<compile_context>
chip_gen: v7x
topology: tpu7x:2x2x1
jax: 0.10.0
libtpu: 0.0.40
codegen_flags: <defaults>
</compile_context>

<pallas_src>
import functools

import jax
import jax.numpy as jnp
from jax.experimental import pallas as pl
from jax.experimental.pallas import tpu as pltpu


# Matmul-operand / stored-activation dtype.  bf16 = MXU-friendly + half the
# HBM traffic; switch to jnp.float32 for exact f32 PyTorch parity.
MXU_DTYPE = jnp.bfloat16

# Explicit scoped-VMEM limit (default is 16 MiB v5e / 32 MiB v6e,v7x).
_VMEM_LIMIT_BYTES = 64 * 1024 * 1024


# ----------------------------- shared math ---------------------------------

def _instance_norm(h, axis=0, eps=1e-5):
    # PyTorch InstanceNorm1d (affine=False): biased variance, eps=1e-5,
    # normalize over the length axis.  All math in f32.
    mean = jnp.mean(h, axis=axis, keepdims=True)
    var = jnp.mean(jnp.square(h - mean), axis=axis, keepdims=True)
    return (h - mean) * jax.lax.rsqrt(var + eps)


def _leaky_relu(h, slope):
    return jnp.where(h >= 0, h, slope * h)


# ----------------------------- Pallas kernels ------------------------------

def encode_stage_kernel(x_ref, wc_ref, bc_ref, w1a_ref, b1a_ref,
                        w1b_ref, b1b_ref, ws_ref, bs_ref, o_ref, *, cin):
    """Fused conv_i (k=1, stride 2) + encode Resnet1DBlock (k=1).

    x_ref: (Lh, 4*cin).  Columns [0:cin] of row g hold the stage input at
    position 4*g -- the only positions this fused stage ever reads (stride-2
    of conv_i composed with stride-2 of conv1a / skip_conv).
    """
    xs = x_ref[:, :cin]                               # (Lh, cin)

    if cin == 1:
        # 1x1 conv with a single input channel is an outer product: do it on
        # the VPU (broadcast multiply) instead of a degenerate K=1 MXU matmul.
        c = xs.astype(jnp.float32) * wc_ref[...] + bc_ref[...]
    else:
        c = (jnp.dot(xs, wc_ref[...], preferred_element_type=jnp.float32)
             + bc_ref[...])                           # conv_i, f32 accum

    # Resnet1DBlock (encode): relu -> conv1a -> IN -> lrelu(0.4) -> conv1b
    # -> IN -> lrelu(0.4) -> + skip_conv(input) -> relu.
    h = jnp.maximum(c, 0.0)                           # F.relu(input)
    h = (jnp.dot(h.astype(w1a_ref.dtype), w1a_ref[...],
                 preferred_element_type=jnp.float32) + b1a_ref[...])
    h = _leaky_relu(_instance_norm(h), 0.4)
    h = (jnp.dot(h.astype(w1b_ref.dtype), w1b_ref[...],
                 preferred_element_type=jnp.float32) + b1b_ref[...])
    h = _leaky_relu(_instance_norm(h), 0.4)

    res = (jnp.dot(c.astype(ws_ref.dtype), ws_ref[...],
                   preferred_element_type=jnp.float32) + bs_ref[...])
    o_ref[...] = jnp.maximum(h + res, 0.0).astype(o_ref.dtype)


def fc_kernel(x_ref, w_ref, b_ref, o_ref, acc_ref):
    # K-tiled Linear: accumulate partial products in f32 scratch.
    @pl.when(pl.program_id(0) == 0)
    def _():
        acc_ref[...] = jnp.zeros_like(acc_ref)

    acc_ref[...] += jnp.dot(x_ref[...], w_ref[...],
                            preferred_element_type=jnp.float32)

    @pl.when(pl.program_id(0) == pl.num_programs(0) - 1)
    def _():
        o_ref[...] = acc_ref[...] + b_ref[...]


# ------------------------------ pallas wrappers ----------------------------

def encode_stage(a, conv_p, res_p):
    """Fused conv_i + Resnet1DBlock stage.  a: (B, M, Cin) -> (B, ceil(M/4), Cout)."""
    B, M, cin = a.shape
    mh = -(-M // 4)                                   # ceil(M / 4)
    if M != 4 * mh:
        # Rarely hit (only if a stage length is not a multiple of 4); padded
        # rows are never read because 4*(mh-1) < M.
        a = jnp.pad(a, ((0, 0), (0, 4 * mh - M), (0, 0)))
    # Contiguity-preserving view: row g, columns [0:cin] == a[:, 4g, :].
    a4 = a.reshape(B, mh, 4 * cin)

    wc, bc = conv_p
    w1a, b1a = res_p["conv1a"]
    w1b, b1b = res_p["conv1b"]
    ws, bs = res_p["skip"]
    cout = w1a.shape[1]

    def const_spec(arr):
        return pl.BlockSpec(arr.shape, lambda b: (0, 0))

    kern = functools.partial(encode_stage_kernel, cin=cin)
    return pl.pallas_call(
        kern,
        out_shape=jax.ShapeDtypeStruct((B, mh, cout), MXU_DTYPE),
        grid=(B,),
        in_specs=[
            pl.BlockSpec((None, mh, 4 * cin), lambda b: (b, 0, 0)),
            const_spec(wc), const_spec(bc),
            const_spec(w1a), const_spec(b1a),
            const_spec(w1b), const_spec(b1b),
            const_spec(ws), const_spec(bs),
        ],
        out_specs=pl.BlockSpec((None, mh, cout), lambda b: (b, 0, 0)),
        compiler_params=pltpu.CompilerParams(
            dimension_semantics=("parallel",),
            vmem_limit_bytes=_VMEM_LIMIT_BYTES),
    )(a4, wc, bc, w1a, b1a, w1b, b1b, ws, bs)


def _pick_k_tile(d):
    for cand in (8192, 4096, 2048, 1024, 512, 256, 128):
        if d % cand == 0 and d // cand >= 2:
            return cand
    return d


def fc_forward(x, w, b):
    """Final Linear, K-tiled over the (potentially large) feature dim."""
    B, D = x.shape
    O = w.shape[1]
    dk = _pick_k_tile(D)
    kt = D // dk
    return pl.pallas_call(
        fc_kernel,
        out_shape=jax.ShapeDtypeStruct((B, O), jnp.float32),
        grid=(kt,),
        in_specs=[
            pl.BlockSpec((B, dk), lambda k: (0, k)),
            pl.BlockSpec((dk, O), lambda k: (k, 0)),
            pl.BlockSpec((1, O), lambda k: (0, 0)),
        ],
        out_specs=pl.BlockSpec((B, O), lambda k: (0, 0)),
        scratch_shapes=[pltpu.VMEM((B, O), jnp.float32)],
        compiler_params=pltpu.CompilerParams(
            dimension_semantics=("arbitrary",),
            vmem_limit_bytes=_VMEM_LIMIT_BYTES),
    )(x, w, b)


# ------------------------------ encoder forward ----------------------------

def encoder_forward(params, x, key):
    """x: (B, 1, L) float32 (PyTorch NCW).  Returns (mu, logvar, z)."""
    B, _, L = x.shape
    a = x.reshape(B, L, 1)                            # C=1: free channel-last view

    a = encode_stage(a, params["conv1"], params["res1"])   # 1   -> 64,  L/4
    a = encode_stage(a, params["conv2"], params["res2"])   # 64  -> 128, L/16
    a = encode_stage(a, params["conv3"], params["res3"])   # 128 -> 128, L/64
    a = encode_stage(a, params["conv4"], params["res4"])   # 128 -> 256, L/256

    Bo, Lf, C = a.shape
    # fc weight rows are stored in (l*C + c) order (offline permutation of
    # PyTorch's (c*Lf + l) flatten order) => plain reshape, no transpose pass.
    flat = a.reshape(Bo, Lf * C)
    out = fc_forward(flat, *params["fc"])             # (B, 2*latent), f32

    mu, logvar = jnp.split(out, 2, axis=1)
    eps = jax.random.normal(key, mu.shape, dtype=mu.dtype)   # torch.randn_like
    z = mu + eps * jnp.exp(0.5 * logvar)                     # reparameterize
    return mu, logvar, z


# ------------------------------ params -------------------------------------

def init_params(key, latent_dim, input_length):
    # final_length mirrors the module probe: length after 8 stride-2, k=1 convs.
    final_length = input_length
    for _ in range(8):
        final_length = (final_length - 1) // 2 + 1

    keys = iter(jax.random.split(key, 40))

    def conv_p(cin, cout, w_dtype=MXU_DTYPE):
        # Stored as (Cin, Cout) / (1, Cout): transposed (and, for fc,
        # row-permuted) relative to PyTorch storage -- a pure offline
        # reparameterization for checkpoint loading.
        w = (jax.random.normal(next(keys), (cin, cout), jnp.float32)
             * (1.0 / jnp.sqrt(jnp.float32(cin)))).astype(w_dtype)
        b = jax.random.normal(next(keys), (1, cout), jnp.float32) * 0.01
        return (w, b)

    def res_p(c):
        return {"conv1a": conv_p(c, c), "conv1b": conv_p(c, c),
                "skip": conv_p(c, c)}

    D = 256 * final_length
    params = {
        "conv1": conv_p(1, 64, w_dtype=jnp.float32),  # VPU broadcast path: f32
        "res1": res_p(64),
        "conv2": conv_p(64, 128), "res2": res_p(128),
        "conv3": conv_p(128, 128), "res3": res_p(128),
        "conv4": conv_p(128, 256), "res4": res_p(256),
        "fc": conv_p(D, 2 * latent_dim),
    }
    return params, final_length


# ------------------------------ reference ----------------------------------

def _ref_forward(params, x, key):
    """Unfused full-length plain-jnp reference with identical math and
    identical low-precision cast points (k=1 convs == per-position matmuls)."""
    f32 = jnp.float32

    def pw(h, w, b):
        return jnp.dot(h.astype(w.dtype), w, preferred_element_type=f32) + b

    def res(c, p):
        cs = c[:, ::2, :]                             # conv1a & skip, stride 2
        h = jnp.maximum(cs, 0.0)
        h = pw(h, *p["conv1a"])
        h = _leaky_relu(_instance_norm(h, axis=1), 0.4)
        h = pw(h, *p["conv1b"])
        h = _leaky_relu(_instance_norm(h, axis=1), 0.4)
        r = pw(cs, *p["skip"])
        return jnp.maximum(h + r, 0.0)

    B, _, L = x.shape
    a = x.reshape(B, L, 1).astype(f32)

    w1, b1 = params["conv1"]
    c = a[:, ::2, :] * w1 + b1                        # conv1 (Cin=1), f32
    a = res(c, params["res1"]).astype(MXU_DTYPE)
    c = pw(a[:, ::2, :], *params["conv2"]); a = res(c, params["res2"]).astype(MXU_DTYPE)
    c = pw(a[:, ::2, :], *params["conv3"]); a = res(c, params["res3"]).astype(MXU_DTYPE)
    c = pw(a[:, ::2, :], *params["conv4"]); a = res(c, params["res4"]).astype(MXU_DTYPE)

    flat = a.reshape(B, -1)
    wf, bf = params["fc"]
    out = jnp.dot(flat.astype(wf.dtype), wf, preferred_element_type=f32) + bf
    mu, logvar = jnp.split(out, 2, axis=1)
    eps = jax.random.normal(key, mu.shape, dtype=mu.dtype)
    return mu, logvar, mu + eps * jnp.exp(0.5 * logvar)


# ----------------------------------- main -----------------------------------

if __name__ == "__main__":
    B = 2
    LATENT_DIM = 32
    INPUT_LENGTH = 1024        # small stand-in for 90000; final_length = 4

    root = jax.random.PRNGKey(0)
    k_param, k_data, k_eps = jax.random.split(root, 3)

    params, final_length = init_params(k_param, LATENT_DIM, INPUT_LENGTH)
    x = jax.random.normal(k_data, (B, 1, INPUT_LENGTH), jnp.float32)

    fwd = jax.jit(encoder_forward)
    mu, logvar, z = fwd(params, x, k_eps)
    jax.block_until_ready((mu, logvar, z))

    # sanity: shapes + agreement with the plain-jnp reference of the same math
    assert mu.shape == (B, LATENT_DIM)
    assert logvar.shape == (B, LATENT_DIM)
    assert z.shape == (B, LATENT_DIM)
    rmu, rlv, rz = _ref_forward(params, x, k_eps)
    assert jnp.allclose(mu, rmu, atol=1e-3, rtol=1e-3)
    assert jnp.allclose(logvar, rlv, atol=1e-3, rtol=1e-3)
    assert jnp.allclose(z, rz, atol=1e-3, rtol=1e-3)

    print("KERNEL_OK")
</pallas_src>

<mosaic_0001>
module attributes {stable_mosaic.version = 11 : i64} {
  func.func @encode_stage_kernel(%arg0: i32, %arg1: memref<1x256x4xf32, #tpu.memory_space<vmem>>, %arg2: memref<1x64xf32, #tpu.memory_space<vmem>>, %arg3: memref<1x64xf32, #tpu.memory_space<vmem>>, %arg4: memref<64x64xbf16, #tpu.memory_space<vmem>>, %arg5: memref<1x64xf32, #tpu.memory_space<vmem>>, %arg6: memref<64x64xbf16, #tpu.memory_space<vmem>>, %arg7: memref<1x64xf32, #tpu.memory_space<vmem>>, %arg8: memref<64x64xbf16, #tpu.memory_space<vmem>>, %arg9: memref<1x64xf32, #tpu.memory_space<vmem>>, %arg10: memref<1x256x64xbf16, #tpu.memory_space<vmem>>) attributes {dimension_semantics = [#tpu.dimension_semantics<parallel>], iteration_bounds = array<i64: 2>, scalar_prefetch = 0 : i64, scratch_operands = 0 : i64, tpu.core_type = #tpu.core_type<tc>, window_params = [{transform_indices = @transform_0, window_bounds = array<i64: 1, 256, 4>}, {pipeline_mode = #tpu.pipeline_mode<synchronous>, transform_indices = @transform_1, window_bounds = array<i64: 1, 64>}, {pipeline_mode = #tpu.pipeline_mode<synchronous>, transform_indices = @transform_2, window_bounds = array<i64: 1, 64>}, {pipeline_mode = #tpu.pipeline_mode<synchronous>, transform_indices = @transform_3, window_bounds = array<i64: 64, 64>}, {pipeline_mode = #tpu.pipeline_mode<synchronous>, transform_indices = @transform_4, window_bounds = array<i64: 1, 64>}, {pipeline_mode = #tpu.pipeline_mode<synchronous>, transform_indices = @transform_5, window_bounds = array<i64: 64, 64>}, {pipeline_mode = #tpu.pipeline_mode<synchronous>, transform_indices = @transform_6, window_bounds = array<i64: 1, 64>}, {pipeline_mode = #tpu.pipeline_mode<synchronous>, transform_indices = @transform_7, window_bounds = array<i64: 64, 64>}, {pipeline_mode = #tpu.pipeline_mode<synchronous>, transform_indices = @transform_8, window_bounds = array<i64: 1, 64>}, {transform_indices = @transform_9, window_bounds = array<i64: 1, 256, 64>}]} {
    %c0 = arith.constant 0 : index
    %c0_0 = arith.constant 0 : index
    %c0_1 = arith.constant 0 : index
    %0 = vector.load %arg1[%c0, %c0_0, %c0_1] : memref<1x256x4xf32, #tpu.memory_space<vmem>>, vector<1x256x1xf32>
    %1 = vector.shape_cast %0 : vector<1x256x1xf32> to vector<256x1xf32>
    %c0_2 = arith.constant 0 : index
    %c0_3 = arith.constant 0 : index
    %2 = vector.load %arg2[%c0_2, %c0_3] : memref<1x64xf32, #tpu.memory_space<vmem>>, vector<1x64xf32>
    %3 = vector.broadcast %1 : vector<256x1xf32> to vector<256x64xf32>
    %4 = vector.broadcast %2 : vector<1x64xf32> to vector<256x64xf32>
    %5 = arith.mulf %3, %4 : vector<256x64xf32>
    %c0_4 = arith.constant 0 : index
    %c0_5 = arith.constant 0 : index
    %6 = vector.load %arg3[%c0_4, %c0_5] : memref<1x64xf32, #tpu.memory_space<vmem>>, vector<1x64xf32>
    %7 = vector.broadcast %6 : vector<1x64xf32> to vector<256x64xf32>
    %8 = arith.addf %5, %7 : vector<256x64xf32>
    %cst = arith.constant 0.000000e+00 : f32
    %9 = vector.broadcast %cst : f32 to vector<256x64xf32>
    %10 = arith.maximumf %8, %9 : vector<256x64xf32>
    %11 = arith.truncf %10 : vector<256x64xf32> to vector<256x64xbf16>
    %c0_6 = arith.constant 0 : index
    %c0_7 = arith.constant 0 : index
    %12 = vector.load %arg4[%c0_6, %c0_7] : memref<64x64xbf16, #tpu.memory_space<vmem>>, vector<64x64xbf16>
    %cst_8 = arith.constant dense<0.000000e+00> : vector<256x64xf32>
    %13 = tpu.matmul %11, %12, %cst_8 {dimension_numbers = #tpu.dot_dimension_numbers<[1], [0], [0], [1], [0, 0, 1, 1], [], []>} : vector<256x64xbf16>, vector<64x64xbf16>, vector<256x64xf32> -> vector<256x64xf32>
    %c0_9 = arith.constant 0 : index
    %c0_10 = arith.constant 0 : index
    %14 = vector.load %arg5[%c0_9, %c0_10] : memref<1x64xf32, #tpu.memory_space<vmem>>, vector<1x64xf32>
    %15 = vector.broadcast %14 : vector<1x64xf32> to vector<256x64xf32>
    %16 = arith.addf %13, %15 : vector<256x64xf32>
    %cst_11 = arith.constant dense<0.000000e+00> : vector<64xf32>
    %17 = vector.multi_reduction <add>, %16, %cst_11 [0] : vector<256x64xf32> to vector<64xf32>
    %18 = vector.shape_cast %17 : vector<64xf32> to vector<1x64xf32>
    %cst_12 = arith.constant 2.560000e+02 : f32
    %19 = vector.broadcast %cst_12 : f32 to vector<1x64xf32>
    %20 = arith.divf %18, %19 : vector<1x64xf32>
    %21 = vector.broadcast %20 : vector<1x64xf32> to vector<256x64xf32>
    %22 = arith.subf %16, %21 : vector<256x64xf32>
    %23 = arith.mulf %22, %22 : vector<256x64xf32>
    %cst_13 = arith.constant dense<0.000000e+00> : vector<64xf32>
    %24 = vector.multi_reduction <add>, %23, %cst_13 [0] : vector<256x64xf32> to vector<64xf32>
    %25 = vector.shape_cast %24 : vector<64xf32> to vector<1x64xf32>
    %cst_14 = arith.constant 2.560000e+02 : f32
    %26 = vector.broadcast %cst_14 : f32 to vector<1x64xf32>
    %27 = arith.divf %25, %26 : vector<1x64xf32>
    %28 = vector.broadcast %20 : vector<1x64xf32> to vector<256x64xf32>
    %29 = arith.subf %16, %28 : vector<256x64xf32>
    %cst_15 = arith.constant 9.99999974E-6 : f32
    %30 = vector.broadcast %cst_15 : f32 to vector<1x64xf32>
    %31 = arith.addf %27, %30 : vector<1x64xf32>
    %32 = math.rsqrt %31 : vector<1x64xf32>
    %33 = vector.broadcast %32 : vector<1x64xf32> to vector<256x64xf32>
    %34 = arith.mulf %29, %33 : vector<256x64xf32>
    %cst_16 = arith.constant 0.000000e+00 : f32
    %35 = vector.broadcast %cst_16 : f32 to vector<256x64xf32>
    %36 = arith.cmpf oge, %34, %35 : vector<256x64xf32>
    %cst_17 = arith.constant 4.000000e-01 : f32
    %37 = vector.broadcast %cst_17 : f32 to vector<256x64xf32>
    %38 = arith.mulf %37, %34 : vector<256x64xf32>
    %39 = arith.select %36, %34, %38 : vector<256x64xi1>, vector<256x64xf32>
    %40 = arith.truncf %39 : vector<256x64xf32> to vector<256x64xbf16>
    %c0_18 = arith.constant 0 : index
    %c0_19 = arith.constant 0 : index
    %41 = vector.load %arg6[%c0_18, %c0_19] : memref<64x64xbf16, #tpu.memory_space<vmem>>, vector<64x64xbf16>
    %cst_20 = arith.constant dense<0.000000e+00> : vector<256x64xf32>
    %42 = tpu.matmul %40, %41, %cst_20 {dimension_numbers = #tpu.dot_dimension_numbers<[1], [0], [0], [1], [0, 0, 1, 1], [], []>} : vector<256x64xbf16>, vector<64x64xbf16>, vector<256x64xf32> -> vector<256x64xf32>
    %c0_21 = arith.constant 0 : index
    %c0_22 = arith.constant 0 : index
    %43 = vector.load %arg7[%c0_21, %c0_22] : memref<1x64xf32, #tpu.memory_space<vmem>>, vector<1x64xf32>
    %44 = vector.broadcast %43 : vector<1x64xf32> to vector<256x64xf32>
    %45 = arith.addf %42, %44 : vector<256x64xf32>
    %cst_23 = arith.constant dense<0.000000e+00> : vector<64xf32>
    %46 = vector.multi_reduction <add>, %45, %cst_23 [0] : vector<256x64xf32> to vector<64xf32>
    %47 = vector.shape_cast %46 : vector<64xf32> to vector<1x64xf32>
    %cst_24 = arith.constant 2.560000e+02 : f32
    %48 = vector.broadcast %cst_24 : f32 to vector<1x64xf32>
    %49 = arith.divf %47, %48 : vector<1x64xf32>
    %50 = vector.broadcast %49 : vector<1x64xf32> to vector<256x64xf32>
    %51 = arith.subf %45, %50 : vector<256x64xf32>
    %52 = arith.mulf %51, %51 : vector<256x64xf32>
    %cst_25 = arith.constant dense<0.000000e+00> : vector<64xf32>
    %53 = vector.multi_reduction <add>, %52, %cst_25 [0] : vector<256x64xf32> to vector<64xf32>
    %54 = vector.shape_cast %53 : vector<64xf32> to vector<1x64xf32>
    %cst_26 = arith.constant 2.560000e+02 : f32
    %55 = vector.broadcast %cst_26 : f32 to vector<1x64xf32>
    %56 = arith.divf %54, %55 : vector<1x64xf32>
    %57 = vector.broadcast %49 : vector<1x64xf32> to vector<256x64xf32>
    %58 = arith.subf %45, %57 : vector<256x64xf32>
    %cst_27 = arith.constant 9.99999974E-6 : f32
    %59 = vector.broadcast %cst_27 : f32 to vector<1x64xf32>
    %60 = arith.addf %56, %59 : vector<1x64xf32>
    %61 = math.rsqrt %60 : vector<1x64xf32>
    %62 = vector.broadcast %61 : vector<1x64xf32> to vector<256x64xf32>
    %63 = arith.mulf %58, %62 : vector<256x64xf32>
    %cst_28 = arith.constant 0.000000e+00 : f32
    %64 = vector.broadcast %cst_28 : f32 to vector<256x64xf32>
    %65 = arith.cmpf oge, %63, %64 : vector<256x64xf32>
    %cst_29 = arith.constant 4.000000e-01 : f32
    %66 = vector.broadcast %cst_29 : f32 to vector<256x64xf32>
    %67 = arith.mulf %66, %63 : vector<256x64xf32>
    %68 = arith.select %65, %63, %67 : vector<256x64xi1>, vector<256x64xf32>
    %69 = arith.truncf %8 : vector<256x64xf32> to vector<256x64xbf16>
    %c0_30 = arith.constant 0 : index
    %c0_31 = arith.constant 0 : index
    %70 = vector.load %arg8[%c0_30, %c0_31] : memref<64x64xbf16, #tpu.memory_space<vmem>>, vector<64x64xbf16>
    %cst_32 = arith.constant dense<0.000000e+00> : vector<256x64xf32>
    %71 = tpu.matmul %69, %70, %cst_32 {dimension_numbers = #tpu.dot_dimension_numbers<[1], [0], [0], [1], [0, 0, 1, 1], [], []>} : vector<256x64xbf16>, vector<64x64xbf16>, vector<256x64xf32> -> vector<256x64xf32>
    %c0_33 = arith.constant 0 : index
    %c0_34 = arith.constant 0 : index
    %72 = vector.load %arg9[%c0_33, %c0_34] : memref<1x64xf32, #tpu.memory_space<vmem>>, vector<1x64xf32>
    %73 = vector.broadcast %72 : vector<1x64xf32> to vector<256x64xf32>
    %74 = arith.addf %71, %73 : vector<256x64xf32>
    %75 = arith.addf %68, %74 : vector<256x64xf32>
    %cst_35 = arith.constant 0.000000e+00 : f32
    %76 = vector.broadcast %cst_35 : f32 to vector<256x64xf32>
    %77 = arith.maximumf %75, %76 : vector<256x64xf32>
    %78 = arith.truncf %77 : vector<256x64xf32> to vector<256x64xbf16>
    %c0_36 = arith.constant 0 : index
    %c0_37 = arith.constant 0 : index
    %c0_38 = arith.constant 0 : index
    %79 = vector.load %arg10[%c0_36, %c0_37, %c0_38] : memref<1x256x64xbf16, #tpu.memory_space<vmem>>, vector<1x256x64xbf16>
    %80 = vector.shape_cast %79 : vector<1x256x64xbf16> to vector<256x64xbf16>
    %81 = vector.shape_cast %78 : vector<256x64xbf16> to vector<1x256x64xbf16>
    tpu.vector_store %arg10[%c0_36, %c0_37, %c0_38], %81 {strides = array<i32>} : memref<1x256x64xbf16, #tpu.memory_space<vmem>>, vector<1x256x64xbf16>,
    return
  }
  func.func @transform_0(%arg0: i32) -> (i32, i32, i32) {
    %c0_i32 = arith.constant 0 : i32
    %c0_i32_0 = arith.constant 0 : i32
    %c0_i32_1 = arith.constant 0 : i32
    return %arg0, %c0_i32, %c0_i32_0 : i32, i32, i32
  }
  func.func @transform_1(%arg0: i32) -> (i32, i32) {
    %c0_i32 = arith.constant 0 : i32
    %c0_i32_0 = arith.constant 0 : i32
    %c0_i32_1 = arith.constant 0 : i32
    return %c0_i32, %c0_i32_0 : i32, i32
  }
  func.func @transform_2(%arg0: i32) -> (i32, i32) {
    %c0_i32 = arith.constant 0 : i32
    %c0_i32_0 = arith.constant 0 : i32
    %c0_i32_1 = arith.constant 0 : i32
    return %c0_i32, %c0_i32_0 : i32, i32
  }
  func.func @transform_3(%arg0: i32) -> (i32, i32) {
    %c0_i32 = arith.constant 0 : i32
    %c0_i32_0 = arith.constant 0 : i32
    %c0_i32_1 = arith.constant 0 : i32
    return %c0_i32, %c0_i32_0 : i32, i32
  }
  func.func @transform_4(%arg0: i32) -> (i32, i32) {
    %c0_i32 = arith.constant 0 : i32
    %c0_i32_0 = arith.constant 0 : i32
    %c0_i32_1 = arith.constant 0 : i32
    return %c0_i32, %c0_i32_0 : i32, i32
  }
  func.func @transform_5(%arg0: i32) -> (i32, i32) {
    %c0_i32 = arith.constant 0 : i32
    %c0_i32_0 = arith.constant 0 : i32
    %c0_i32_1 = arith.constant 0 : i32
    return %c0_i32, %c0_i32_0 : i32, i32
  }
  func.func @transform_6(%arg0: i32) -> (i32, i32) {
    %c0_i32 = arith.constant 0 : i32
    %c0_i32_0 = arith.constant 0 : i32
    %c0_i32_1 = arith.constant 0 : i32
    return %c0_i32, %c0_i32_0 : i32, i32
  }
  func.func @transform_7(%arg0: i32) -> (i32, i32) {
    %c0_i32 = arith.constant 0 : i32
    %c0_i32_0 = arith.constant 0 : i32
    %c0_i32_1 = arith.constant 0 : i32
    return %c0_i32, %c0_i32_0 : i32, i32
  }
  func.func @transform_8(%arg0: i32) -> (i32, i32) {
    %c0_i32 = arith.constant 0 : i32
    %c0_i32_0 = arith.constant 0 : i32
    %c0_i32_1 = arith.constant 0 : i32
    return %c0_i32, %c0_i32_0 : i32, i32
  }
  func.func @transform_9(%arg0: i32) -> (i32, i32, i32) {
    %c0_i32 = arith.constant 0 : i32
    %c0_i32_0 = arith.constant 0 : i32
    %c0_i32_1 = arith.constant 0 : i32
    return %arg0, %c0_i32, %c0_i32_0 : i32, i32, i32
  }
}

module attributes {stable_mosaic.version = 11 : i64} {
  func.func @encode_stage_kernel(%arg0: i32, %arg1: memref<1x16x512xbf16, #tpu.memory_space<vmem>>, %arg2: memref<128x128xbf16, #tpu.memory_space<vmem>>, %arg3: memref<1x128xf32, #tpu.memory_space<vmem>>, %arg4: memref<128x128xbf16, #tpu.memory_space<vmem>>, %arg5: memref<1x128xf32, #tpu.memory_space<vmem>>, %arg6: memref<128x128xbf16, #tpu.memory_space<vmem>>, %arg7: memref<1x128xf32, #tpu.memory_space<vmem>>, %arg8: memref<128x128xbf16, #tpu.memory_space<vmem>>, %arg9: memref<1x128xf32, #tpu.memory_space<vmem>>, %arg10: memref<1x16x128xbf16, #tpu.memory_space<vmem>>) attributes {dimension_semantics = [#tpu.dimension_semantics<parallel>], iteration_bounds = array<i64: 2>, scalar_prefetch = 0 : i64, scratch_operands = 0 : i64, tpu.core_type = #tpu.core_type<tc>, window_params = [{transform_indices = @transform_0, window_bounds = array<i64: 1, 16, 512>}, {pipeline_mode = #tpu.pipeline_mode<synchronous>, transform_indices = @transform_1, window_bounds = array<i64: 128, 128>}, {pipeline_mode = #tpu.pipeline_mode<synchronous>, transform_indices = @transform_2, window_bounds = array<i64: 1, 128>}, {pipeline_mode = #tpu.pipeline_mode<synchronous>, transform_indices = @transform_3, window_bounds = array<i64: 128, 128>}, {pipeline_mode = #tpu.pipeline_mode<synchronous>, transform_indices = @transform_4, window_bounds = array<i64: 1, 128>}, {pipeline_mode = #tpu.pipeline_mode<synchronous>, transform_indices = @transform_5, window_bounds = array<i64: 128, 128>}, {pipeline_mode = #tpu.pipeline_mode<synchronous>, transform_indices = @transform_6, window_bounds = array<i64: 1, 128>}, {pipeline_mode = #tpu.pipeline_mode<synchronous>, transform_indices = @transform_7, window_bounds = array<i64: 128, 128>}, {pipeline_mode = #tpu.pipeline_mode<synchronous>, transform_indices = @transform_8, window_bounds = array<i64: 1, 128>}, {transform_indices = @transform_9, window_bounds = array<i64: 1, 16, 128>}]} {
    %c0 = arith.constant 0 : index
    %c0_0 = arith.constant 0 : index
    %c0_1 = arith.constant 0 : index
    %0 = vector.load %arg1[%c0, %c0_0, %c0_1] : memref<1x16x512xbf16, #tpu.memory_space<vmem>>, vector<1x16x128xbf16>
    %1 = vector.shape_cast %0 : vector<1x16x128xbf16> to vector<16x128xbf16>
    %c0_2 = arith.constant 0 : index
    %c0_3 = arith.constant 0 : index
    %2 = vector.load %arg2[%c0_2, %c0_3] : memref<128x128xbf16, #tpu.memory_space<vmem>>, vector<128x128xbf16>
    %cst = arith.constant dense<0.000000e+00> : vector<16x128xf32>
    %3 = tpu.matmul %1, %2, %cst {dimension_numbers = #tpu.dot_dimension_numbers<[1], [0], [0], [1], [0, 0, 1, 1], [], []>} : vector<16x128xbf16>, vector<128x128xbf16>, vector<16x128xf32> -> vector<16x128xf32>
    %c0_4 = arith.constant 0 : index
    %c0_5 = arith.constant 0 : index
    %4 = vector.load %arg3[%c0_4, %c0_5] : memref<1x128xf32, #tpu.memory_space<vmem>>, vector<1x128xf32>
    %5 = vector.broadcast %4 : vector<1x128xf32> to vector<16x128xf32>
    %6 = arith.addf %3, %5 : vector<16x128xf32>
    %cst_6 = arith.constant 0.000000e+00 : f32
    %7 = vector.broadcast %cst_6 : f32 to vector<16x128xf32>
    %8 = arith.maximumf %6, %7 : vector<16x128xf32>
    %9 = arith.truncf %8 : vector<16x128xf32> to vector<16x128xbf16>
    %c0_7 = arith.constant 0 : index
    %c0_8 = arith.constant 0 : index
    %10 = vector.load %arg4[%c0_7, %c0_8] : memref<128x128xbf16, #tpu.memory_space<vmem>>, vector<128x128xbf16>
    %cst_9 = arith.constant dense<0.000000e+00> : vector<16x128xf32>
    %11 = tpu.matmul %9, %10, %cst_9 {dimension_numbers = #tpu.dot_dimension_numbers<[1], [0], [0], [1], [0, 0, 1, 1], [], []>} : vector<16x128xbf16>, vector<128x128xbf16>, vector<16x128xf32> -> vector<16x128xf32>
    %c0_10 = arith.constant 0 : index
    %c0_11 = arith.constant 0 : index
    %12 = vector.load %arg5[%c0_10, %c0_11] : memref<1x128xf32, #tpu.memory_space<vmem>>, vector<1x128xf32>
    %13 = vector.broadcast %12 : vector<1x128xf32> to vector<16x128xf32>
    %14 = arith.addf %11, %13 : vector<16x128xf32>
    %cst_12 = arith.constant dense<0.000000e+00> : vector<128xf32>
    %15 = vector.multi_reduction <add>, %14, %cst_12 [0] : vector<16x128xf32> to vector<128xf32>
    %16 = vector.shape_cast %15 : vector<128xf32> to vector<1x128xf32>
    %cst_13 = arith.constant 1.600000e+01 : f32
    %17 = vector.broadcast %cst_13 : f32 to vector<1x128xf32>
    %18 = arith.divf %16, %17 : vector<1x128xf32>
    %19 = vector.broadcast %18 : vector<1x128xf32> to vector<16x128xf32>
    %20 = arith.subf %14, %19 : vector<16x128xf32>
    %21 = arith.mulf %20, %20 : vector<16x128xf32>
    %cst_14 = arith.constant dense<0.000000e+00> : vector<128xf32>
    %22 = vector.multi_reduction <add>, %21, %cst_14 [0] : vector<16x128xf32> to vector<128xf32>
    %23 = vector.shape_cast %22 : vector<128xf32> to vector<1x128xf32>
    %cst_15 = arith.constant 1.600000e+01 : f32
    %24 = vector.broadcast %cst_15 : f32 to vector<1x128xf32>
    %25 = arith.divf %23, %24 : vector<1x128xf32>
    %26 = vector.broadcast %18 : vector<1x128xf32> to vector<16x128xf32>
    %27 = arith.subf %14, %26 : vector<16x128xf32>
    %cst_16 = arith.constant 9.99999974E-6 : f32
    %28 = vector.broadcast %cst_16 : f32 to vector<1x128xf32>
    %29 = arith.addf %25, %28 : vector<1x128xf32>
    %30 = math.rsqrt %29 : vector<1x128xf32>
    %31 = vector.broadcast %30 : vector<1x128xf32> to vector<16x128xf32>
    %32 = arith.mulf %27, %31 : vector<16x128xf32>
    %cst_17 = arith.constant 0.000000e+00 : f32
    %33 = vector.broadcast %cst_17 : f32 to vector<16x128xf32>
    %34 = arith.cmpf oge, %32, %33 : vector<16x128xf32>
    %cst_18 = arith.constant 4.000000e-01 : f32
    %35 = vector.broadcast %cst_18 : f32 to vector<16x128xf32>
    %36 = arith.mulf %35, %32 : vector<16x128xf32>
    %37 = arith.select %34, %32, %36 : vector<16x128xi1>, vector<16x128xf32>
    %38 = arith.truncf %37 : vector<16x128xf32> to vector<16x128xbf16>
    %c0_19 = arith.constant 0 : index
    %c0_20 = arith.constant 0 : index
    %39 = vector.load %arg6[%c0_19, %c0_20] : memref<128x128xbf16, #tpu.memory_space<vmem>>, vector<128x128xbf16>
    %cst_21 = arith.constant dense<0.000000e+00> : vector<16x128xf32>
    %40 = tpu.matmul %38, %39, %cst_21 {dimension_numbers = #tpu.dot_dimension_numbers<[1], [0], [0], [1], [0, 0, 1, 1], [], []>} : vector<16x128xbf16>, vector<128x128xbf16>, vector<16x128xf32> -> vector<16x128xf32>
    %c0_22 = arith.constant 0 : index
    %c0_23 = arith.constant 0 : index
    %41 = vector.load %arg7[%c0_22, %c0_23] : memref<1x128xf32, #tpu.memory_space<vmem>>, vector<1x128xf32>
    %42 = vector.broadcast %41 : vector<1x128xf32> to vector<16x128xf32>
    %43 = arith.addf %40, %42 : vector<16x128xf32>
    %cst_24 = arith.constant dense<0.000000e+00> : vector<128xf32>
    %44 = vector.multi_reduction <add>, %43, %cst_24 [0] : vector<16x128xf32> to vector<128xf32>
    %45 = vector.shape_cast %44 : vector<128xf32> to vector<1x128xf32>
    %cst_25 = arith.constant 1.600000e+01 : f32
    %46 = vector.broadcast %cst_25 : f32 to vector<1x128xf32>
    %47 = arith.divf %45, %46 : vector<1x128xf32>
    %48 = vector.broadcast %47 : vector<1x128xf32> to vector<16x128xf32>
    %49 = arith.subf %43, %48 : vector<16x128xf32>
    %50 = arith.mulf %49, %49 : vector<16x128xf32>
    %cst_26 = arith.constant dense<0.000000e+00> : vector<128xf32>
    %51 = vector.multi_reduction <add>, %50, %cst_26 [0] : vector<16x128xf32> to vector<128xf32>
    %52 = vector.shape_cast %51 : vector<128xf32> to vector<1x128xf32>
    %cst_27 = arith.constant 1.600000e+01 : f32
    %53 = vector.broadcast %cst_27 : f32 to vector<1x128xf32>
    %54 = arith.divf %52, %53 : vector<1x128xf32>
    %55 = vector.broadcast %47 : vector<1x128xf32> to vector<16x128xf32>
    %56 = arith.subf %43, %55 : vector<16x128xf32>
    %cst_28 = arith.constant 9.99999974E-6 : f32
    %57 = vector.broadcast %cst_28 : f32 to vector<1x128xf32>
    %58 = arith.addf %54, %57 : vector<1x128xf32>
    %59 = math.rsqrt %58 : vector<1x128xf32>
    %60 = vector.broadcast %59 : vector<1x128xf32> to vector<16x128xf32>
    %61 = arith.mulf %56, %60 : vector<16x128xf32>
    %cst_29 = arith.constant 0.000000e+00 : f32
    %62 = vector.broadcast %cst_29 : f32 to vector<16x128xf32>
    %63 = arith.cmpf oge, %61, %62 : vector<16x128xf32>
    %cst_30 = arith.constant 4.000000e-01 : f32
    %64 = vector.broadcast %cst_30 : f32 to vector<16x128xf32>
    %65 = arith.mulf %64, %61 : vector<16x128xf32>
    %66 = arith.select %63, %61, %65 : vector<16x128xi1>, vector<16x128xf32>
    %67 = arith.truncf %6 : vector<16x128xf32> to vector<16x128xbf16>
    %c0_31 = arith.constant 0 : index
    %c0_32 = arith.constant 0 : index
    %68 = vector.load %arg8[%c0_31, %c0_32] : memref<128x128xbf16, #tpu.memory_space<vmem>>, vector<128x128xbf16>
    %cst_33 = arith.constant dense<0.000000e+00> : vector<16x128xf32>
    %69 = tpu.matmul %67, %68, %cst_33 {dimension_numbers = #tpu.dot_dimension_numbers<[1], [0], [0], [1], [0, 0, 1, 1], [], []>} : vector<16x128xbf16>, vector<128x128xbf16>, vector<16x128xf32> -> vector<16x128xf32>
    %c0_34 = arith.constant 0 : index
    %c0_35 = arith.constant 0 : index
    %70 = vector.load %arg9[%c0_34, %c0_35] : memref<1x128xf32, #tpu.memory_space<vmem>>, vector<1x128xf32>
    %71 = vector.broadcast %70 : vector<1x128xf32> to vector<16x128xf32>
    %72 = arith.addf %69, %71 : vector<16x128xf32>
    %73 = arith.addf %66, %72 : vector<16x128xf32>
    %cst_36 = arith.constant 0.000000e+00 : f32
    %74 = vector.broadcast %cst_36 : f32 to vector<16x128xf32>
    %75 = arith.maximumf %73, %74 : vector<16x128xf32>
    %76 = arith.truncf %75 : vector<16x128xf32> to vector<16x128xbf16>
    %c0_37 = arith.constant 0 : index
    %c0_38 = arith.constant 0 : index
    %c0_39 = arith.constant 0 : index
    %77 = vector.load %arg10[%c0_37, %c0_38, %c0_39] : memref<1x16x128xbf16, #tpu.memory_space<vmem>>, vector<1x16x128xbf16>
    %78 = vector.shape_cast %77 : vector<1x16x128xbf16> to vector<16x128xbf16>
    %79 = vector.shape_cast %76 : vector<16x128xbf16> to vector<1x16x128xbf16>
    tpu.vector_store %arg10[%c0_37, %c0_38, %c0_39], %79 {strides = array<i32>} : memref<1x16x128xbf16, #tpu.memory_space<vmem>>, vector<1x16x128xbf16>,
    return
  }
  func.func @transform_0(%arg0: i32) -> (i32, i32, i32) {
    %c0_i32 = arith.constant 0 : i32
    %c0_i32_0 = arith.constant 0 : i32
    %c0_i32_1 = arith.constant 0 : i32
    return %arg0, %c0_i32, %c0_i32_0 : i32, i32, i32
  }
  func.func @transform_1(%arg0: i32) -> (i32, i32) {
    %c0_i32 = arith.constant 0 : i32
    %c0_i32_0 = arith.constant 0 : i32
    %c0_i32_1 = arith.constant 0 : i32
    return %c0_i32, %c0_i32_0 : i32, i32
  }
  func.func @transform_2(%arg0: i32) -> (i32, i32) {
    %c0_i32 = arith.constant 0 : i32
    %c0_i32_0 = arith.constant 0 : i32
    %c0_i32_1 = arith.constant 0 : i32
    return %c0_i32, %c0_i32_0 : i32, i32
  }
  func.func @transform_3(%arg0: i32) -> (i32, i32) {
    %c0_i32 = arith.constant 0 : i32
    %c0_i32_0 = arith.constant 0 : i32
    %c0_i32_1 = arith.constant 0 : i32
    return %c0_i32, %c0_i32_0 : i32, i32
  }
  func.func @transform_4(%arg0: i32) -> (i32, i32) {
    %c0_i32 = arith.constant 0 : i32
    %c0_i32_0 = arith.constant 0 : i32
    %c0_i32_1 = arith.constant 0 : i32
    return %c0_i32, %c0_i32_0 : i32, i32
  }
  func.func @transform_5(%arg0: i32) -> (i32, i32) {
    %c0_i32 = arith.constant 0 : i32
    %c0_i32_0 = arith.constant 0 : i32
    %c0_i32_1 = arith.constant 0 : i32
    return %c0_i32, %c0_i32_0 : i32, i32
  }
  func.func @transform_6(%arg0: i32) -> (i32, i32) {
    %c0_i32 = arith.constant 0 : i32
    %c0_i32_0 = arith.constant 0 : i32
    %c0_i32_1 = arith.constant 0 : i32
    return %c0_i32, %c0_i32_0 : i32, i32
  }
  func.func @transform_7(%arg0: i32) -> (i32, i32) {
    %c0_i32 = arith.constant 0 : i32
    %c0_i32_0 = arith.constant 0 : i32
    %c0_i32_1 = arith.constant 0 : i32
    return %c0_i32, %c0_i32_0 : i32, i32
  }
  func.func @transform_8(%arg0: i32) -> (i32, i32) {
    %c0_i32 = arith.constant 0 : i32
    %c0_i32_0 = arith.constant 0 : i32
    %c0_i32_1 = arith.constant 0 : i32
    return %c0_i32, %c0_i32_0 : i32, i32
  }
  func.func @transform_9(%arg0: i32) -> (i32, i32, i32) {
    %c0_i32 = arith.constant 0 : i32
    %c0_i32_0 = arith.constant 0 : i32
    %c0_i32_1 = arith.constant 0 : i32
    return %arg0, %c0_i32, %c0_i32_0 : i32, i32, i32
  }
}

module attributes {stable_mosaic.version = 11 : i64} {
  func.func @encode_stage_kernel(%arg0: i32, %arg1: memref<1x64x256xbf16, #tpu.memory_space<vmem>>, %arg2: memref<64x128xbf16, #tpu.memory_space<vmem>>, %arg3: memref<1x128xf32, #tpu.memory_space<vmem>>, %arg4: memref<128x128xbf16, #tpu.memory_space<vmem>>, %arg5: memref<1x128xf32, #tpu.memory_space<vmem>>, %arg6: memref<128x128xbf16, #tpu.memory_space<vmem>>, %arg7: memref<1x128xf32, #tpu.memory_space<vmem>>, %arg8: memref<128x128xbf16, #tpu.memory_space<vmem>>, %arg9: memref<1x128xf32, #tpu.memory_space<vmem>>, %arg10: memref<1x64x128xbf16, #tpu.memory_space<vmem>>) attributes {dimension_semantics = [#tpu.dimension_semantics<parallel>], iteration_bounds = array<i64: 2>, scalar_prefetch = 0 : i64, scratch_operands = 0 : i64, tpu.core_type = #tpu.core_type<tc>, window_params = [{transform_indices = @transform_0, window_bounds = array<i64: 1, 64, 256>}, {pipeline_mode = #tpu.pipeline_mode<synchronous>, transform_indices = @transform_1, window_bounds = array<i64: 64, 128>}, {pipeline_mode = #tpu.pipeline_mode<synchronous>, transform_indices = @transform_2, window_bounds = array<i64: 1, 128>}, {pipeline_mode = #tpu.pipeline_mode<synchronous>, transform_indices = @transform_3, window_bounds = array<i64: 128, 128>}, {pipeline_mode = #tpu.pipeline_mode<synchronous>, transform_indices = @transform_4, window_bounds = array<i64: 1, 128>}, {pipeline_mode = #tpu.pipeline_mode<synchronous>, transform_indices = @transform_5, window_bounds = array<i64: 128, 128>}, {pipeline_mode = #tpu.pipeline_mode<synchronous>, transform_indices = @transform_6, window_bounds = array<i64: 1, 128>}, {pipeline_mode = #tpu.pipeline_mode<synchronous>, transform_indices = @transform_7, window_bounds = array<i64: 128, 128>}, {pipeline_mode = #tpu.pipeline_mode<synchronous>, transform_indices = @transform_8, window_bounds = array<i64: 1, 128>}, {transform_indices = @transform_9, window_bounds = array<i64: 1, 64, 128>}]} {
    %c0 = arith.constant 0 : index
    %c0_0 = arith.constant 0 : index
    %c0_1 = arith.constant 0 : index
    %0 = vector.load %arg1[%c0, %c0_0, %c0_1] : memref<1x64x256xbf16, #tpu.memory_space<vmem>>, vector<1x64x64xbf16>
    %1 = vector.shape_cast %0 : vector<1x64x64xbf16> to vector<64x64xbf16>
    %c0_2 = arith.constant 0 : index
    %c0_3 = arith.constant 0 : index
    %2 = vector.load %arg2[%c0_2, %c0_3] : memref<64x128xbf16, #tpu.memory_space<vmem>>, vector<64x128xbf16>
    %cst = arith.constant dense<0.000000e+00> : vector<64x128xf32>
    %3 = tpu.matmul %1, %2, %cst {dimension_numbers = #tpu.dot_dimension_numbers<[1], [0], [0], [1], [0, 0, 1, 1], [], []>} : vector<64x64xbf16>, vector<64x128xbf16>, vector<64x128xf32> -> vector<64x128xf32>
    %c0_4 = arith.constant 0 : index
    %c0_5 = arith.constant 0 : index
    %4 = vector.load %arg3[%c0_4, %c0_5] : memref<1x128xf32, #tpu.memory_space<vmem>>, vector<1x128xf32>
    %5 = vector.broadcast %4 : vector<1x128xf32> to vector<64x128xf32>
    %6 = arith.addf %3, %5 : vector<64x128xf32>
    %cst_6 = arith.constant 0.000000e+00 : f32
    %7 = vector.broadcast %cst_6 : f32 to vector<64x128xf32>
    %8 = arith.maximumf %6, %7 : vector<64x128xf32>
    %9 = arith.truncf %8 : vector<64x128xf32> to vector<64x128xbf16>
    %c0_7 = arith.constant 0 : index
    %c0_8 = arith.constant 0 : index
    %10 = vector.load %arg4[%c0_7, %c0_8] : memref<128x128xbf16, #tpu.memory_space<vmem>>, vector<128x128xbf16>
    %cst_9 = arith.constant dense<0.000000e+00> : vector<64x128xf32>
    %11 = tpu.matmul %9, %10, %cst_9 {dimension_numbers = #tpu.dot_dimension_numbers<[1], [0], [0], [1], [0, 0, 1, 1], [], []>} : vector<64x128xbf16>, vector<128x128xbf16>, vector<64x128xf32> -> vector<64x128xf32>
    %c0_10 = arith.constant 0 : index
    %c0_11 = arith.constant 0 : index
    %12 = vector.load %arg5[%c0_10, %c0_11] : memref<1x128xf32, #tpu.memory_space<vmem>>, vector<1x128xf32>
    %13 = vector.broadcast %12 : vector<1x128xf32> to vector<64x128xf32>
    %14 = arith.addf %11, %13 : vector<64x128xf32>
    %cst_12 = arith.constant dense<0.000000e+00> : vector<128xf32>
    %15 = vector.multi_reduction <add>, %14, %cst_12 [0] : vector<64x128xf32> to vector<128xf32>
    %16 = vector.shape_cast %15 : vector<128xf32> to vector<1x128xf32>
    %cst_13 = arith.constant 6.400000e+01 : f32
    %17 = vector.broadcast %cst_13 : f32 to vector<1x128xf32>
    %18 = arith.divf %16, %17 : vector<1x128xf32>
    %19 = vector.broadcast %18 : vector<1x128xf32> to vector<64x128xf32>
    %20 = arith.subf %14, %19 : vector<64x128xf32>
    %21 = arith.mulf %20, %20 : vector<64x128xf32>
    %cst_14 = arith.constant dense<0.000000e+00> : vector<128xf32>
    %22 = vector.multi_reduction <add>, %21, %cst_14 [0] : vector<64x128xf32> to vector<128xf32>
    %23 = vector.shape_cast %22 : vector<128xf32> to vector<1x128xf32>
    %cst_15 = arith.constant 6.400000e+01 : f32
    %24 = vector.broadcast %cst_15 : f32 to vector<1x128xf32>
    %25 = arith.divf %23, %24 : vector<1x128xf32>
    %26 = vector.broadcast %18 : vector<1x128xf32> to vector<64x128xf32>
    %27 = arith.subf %14, %26 : vector<64x128xf32>
    %cst_16 = arith.constant 9.99999974E-6 : f32
    %28 = vector.broadcast %cst_16 : f32 to vector<1x128xf32>
    %29 = arith.addf %25, %28 : vector<1x128xf32>
    %30 = math.rsqrt %29 : vector<1x128xf32>
    %31 = vector.broadcast %30 : vector<1x128xf32> to vector<64x128xf32>
    %32 = arith.mulf %27, %31 : vector<64x128xf32>
    %cst_17 = arith.constant 0.000000e+00 : f32
    %33 = vector.broadcast %cst_17 : f32 to vector<64x128xf32>
    %34 = arith.cmpf oge, %32, %33 : vector<64x128xf32>
    %cst_18 = arith.constant 4.000000e-01 : f32
    %35 = vector.broadcast %cst_18 : f32 to vector<64x128xf32>
    %36 = arith.mulf %35, %32 : vector<64x128xf32>
    %37 = arith.select %34, %32, %36 : vector<64x128xi1>, vector<64x128xf32>
    %38 = arith.truncf %37 : vector<64x128xf32> to vector<64x128xbf16>
    %c0_19 = arith.constant 0 : index
    %c0_20 = arith.constant 0 : index
    %39 = vector.load %arg6[%c0_19, %c0_20] : memref<128x128xbf16, #tpu.memory_space<vmem>>, vector<128x128xbf16>
    %cst_21 = arith.constant dense<0.000000e+00> : vector<64x128xf32>
    %40 = tpu.matmul %38, %39, %cst_21 {dimension_numbers = #tpu.dot_dimension_numbers<[1], [0], [0], [1], [0, 0, 1, 1], [], []>} : vector<64x128xbf16>, vector<128x128xbf16>, vector<64x128xf32> -> vector<64x128xf32>
    %c0_22 = arith.constant 0 : index
    %c0_23 = arith.constant 0 : index
    %41 = vector.load %arg7[%c0_22, %c0_23] : memref<1x128xf32, #tpu.memory_space<vmem>>, vector<1x128xf32>
    %42 = vector.broadcast %41 : vector<1x128xf32> to vector<64x128xf32>
    %43 = arith.addf %40, %42 : vector<64x128xf32>
    %cst_24 = arith.constant dense<0.000000e+00> : vector<128xf32>
    %44 = vector.multi_reduction <add>, %43, %cst_24 [0] : vector<64x128xf32> to vector<128xf32>
    %45 = vector.shape_cast %44 : vector<128xf32> to vector<1x128xf32>
    %cst_25 = arith.constant 6.400000e+01 : f32
    %46 = vector.broadcast %cst_25 : f32 to vector<1x128xf32>
    %47 = arith.divf %45, %46 : vector<1x128xf32>
    %48 = vector.broadcast %47 : vector<1x128xf32> to vector<64x128xf32>
    %49 = arith.subf %43, %48 : vector<64x128xf32>
    %50 = arith.mulf %49, %49 : vector<64x128xf32>
    %cst_26 = arith.constant dense<0.000000e+00> : vector<128xf32>
    %51 = vector.multi_reduction <add>, %50, %cst_26 [0] : vector<64x128xf32> to vector<128xf32>
    %52 = vector.shape_cast %51 : vector<128xf32> to vector<1x128xf32>
    %cst_27 = arith.constant 6.400000e+01 : f32
    %53 = vector.broadcast %cst_27 : f32 to vector<1x128xf32>
    %54 = arith.divf %52, %53 : vector<1x128xf32>
    %55 = vector.broadcast %47 : vector<1x128xf32> to vector<64x128xf32>
    %56 = arith.subf %43, %55 : vector<64x128xf32>
    %cst_28 = arith.constant 9.99999974E-6 : f32
    %57 = vector.broadcast %cst_28 : f32 to vector<1x128xf32>
    %58 = arith.addf %54, %57 : vector<1x128xf32>
    %59 = math.rsqrt %58 : vector<1x128xf32>
    %60 = vector.broadcast %59 : vector<1x128xf32> to vector<64x128xf32>
    %61 = arith.mulf %56, %60 : vector<64x128xf32>
    %cst_29 = arith.constant 0.000000e+00 : f32
    %62 = vector.broadcast %cst_29 : f32 to vector<64x128xf32>
    %63 = arith.cmpf oge, %61, %62 : vector<64x128xf32>
    %cst_30 = arith.constant 4.000000e-01 : f32
    %64 = vector.broadcast %cst_30 : f32 to vector<64x128xf32>
    %65 = arith.mulf %64, %61 : vector<64x128xf32>
    %66 = arith.select %63, %61, %65 : vector<64x128xi1>, vector<64x128xf32>
    %67 = arith.truncf %6 : vector<64x128xf32> to vector<64x128xbf16>
    %c0_31 = arith.constant 0 : index
    %c0_32 = arith.constant 0 : index
    %68 = vector.load %arg8[%c0_31, %c0_32] : memref<128x128xbf16, #tpu.memory_space<vmem>>, vector<128x128xbf16>
    %cst_33 = arith.constant dense<0.000000e+00> : vector<64x128xf32>
    %69 = tpu.matmul %67, %68, %cst_33 {dimension_numbers = #tpu.dot_dimension_numbers<[1], [0], [0], [1], [0, 0, 1, 1], [], []>} : vector<64x128xbf16>, vector<128x128xbf16>, vector<64x128xf32> -> vector<64x128xf32>
    %c0_34 = arith.constant 0 : index
    %c0_35 = arith.constant 0 : index
    %70 = vector.load %arg9[%c0_34, %c0_35] : memref<1x128xf32, #tpu.memory_space<vmem>>, vector<1x128xf32>
    %71 = vector.broadcast %70 : vector<1x128xf32> to vector<64x128xf32>
    %72 = arith.addf %69, %71 : vector<64x128xf32>
    %73 = arith.addf %66, %72 : vector<64x128xf32>
    %cst_36 = arith.constant 0.000000e+00 : f32
    %74 = vector.broadcast %cst_36 : f32 to vector<64x128xf32>
    %75 = arith.maximumf %73, %74 : vector<64x128xf32>
    %76 = arith.truncf %75 : vector<64x128xf32> to vector<64x128xbf16>
    %c0_37 = arith.constant 0 : index
    %c0_38 = arith.constant 0 : index
    %c0_39 = arith.constant 0 : index
    %77 = vector.load %arg10[%c0_37, %c0_38, %c0_39] : memref<1x64x128xbf16, #tpu.memory_space<vmem>>, vector<1x64x128xbf16>
    %78 = vector.shape_cast %77 : vector<1x64x128xbf16> to vector<64x128xbf16>
    %79 = vector.shape_cast %76 : vector<64x128xbf16> to vector<1x64x128xbf16>
    tpu.vector_store %arg10[%c0_37, %c0_38, %c0_39], %79 {strides = array<i32>} : memref<1x64x128xbf16, #tpu.memory_space<vmem>>, vector<1x64x128xbf16>,
    return
  }
  func.func @transform_0(%arg0: i32) -> (i32, i32, i32) {
    %c0_i32 = arith.constant 0 : i32
    %c0_i32_0 = arith.constant 0 : i32
    %c0_i32_1 = arith.constant 0 : i32
    return %arg0, %c0_i32, %c0_i32_0 : i32, i32, i32
  }
  func.func @transform_1(%arg0: i32) -> (i32, i32) {
    %c0_i32 = arith.constant 0 : i32
    %c0_i32_0 = arith.constant 0 : i32
    %c0_i32_1 = arith.constant 0 : i32
    return %c0_i32, %c0_i32_0 : i32, i32
  }
  func.func @transform_2(%arg0: i32) -> (i32, i32) {
    %c0_i32 = arith.constant 0 : i32
    %c0_i32_0 = arith.constant 0 : i32
    %c0_i32_1 = arith.constant 0 : i32
    return %c0_i32, %c0_i32_0 : i32, i32
  }
  func.func @transform_3(%arg0: i32) -> (i32, i32) {
    %c0_i32 = arith.constant 0 : i32
    %c0_i32_0 = arith.constant 0 : i32
    %c0_i32_1 = arith.constant 0 : i32
    return %c0_i32, %c0_i32_0 : i32, i32
  }
  func.func @transform_4(%arg0: i32) -> (i32, i32) {
    %c0_i32 = arith.constant 0 : i32
    %c0_i32_0 = arith.constant 0 : i32
    %c0_i32_1 = arith.constant 0 : i32
    return %c0_i32, %c0_i32_0 : i32, i32
  }
  func.func @transform_5(%arg0: i32) -> (i32, i32) {
    %c0_i32 = arith.constant 0 : i32
    %c0_i32_0 = arith.constant 0 : i32
    %c0_i32_1 = arith.constant 0 : i32
    return %c0_i32, %c0_i32_0 : i32, i32
  }
  func.func @transform_6(%arg0: i32) -> (i32, i32) {
    %c0_i32 = arith.constant 0 : i32
    %c0_i32_0 = arith.constant 0 : i32
    %c0_i32_1 = arith.constant 0 : i32
    return %c0_i32, %c0_i32_0 : i32, i32
  }
  func.func @transform_7(%arg0: i32) -> (i32, i32) {
    %c0_i32 = arith.constant 0 : i32
    %c0_i32_0 = arith.constant 0 : i32
    %c0_i32_1 = arith.constant 0 : i32
    return %c0_i32, %c0_i32_0 : i32, i32
  }
  func.func @transform_8(%arg0: i32) -> (i32, i32) {
    %c0_i32 = arith.constant 0 : i32
    %c0_i32_0 = arith.constant 0 : i32
    %c0_i32_1 = arith.constant 0 : i32
    return %c0_i32, %c0_i32_0 : i32, i32
  }
  func.func @transform_9(%arg0: i32) -> (i32, i32, i32) {
    %c0_i32 = arith.constant 0 : i32
    %c0_i32_0 = arith.constant 0 : i32
    %c0_i32_1 = arith.constant 0 : i32
    return %arg0, %c0_i32, %c0_i32_0 : i32, i32, i32
  }
}

module attributes {stable_mosaic.version = 11 : i64} {
  func.func @encode_stage_kernel(%arg0: i32, %arg1: memref<1x4x512xbf16, #tpu.memory_space<vmem>>, %arg2: memref<128x256xbf16, #tpu.memory_space<vmem>>, %arg3: memref<1x256xf32, #tpu.memory_space<vmem>>, %arg4: memref<256x256xbf16, #tpu.memory_space<vmem>>, %arg5: memref<1x256xf32, #tpu.memory_space<vmem>>, %arg6: memref<256x256xbf16, #tpu.memory_space<vmem>>, %arg7: memref<1x256xf32, #tpu.memory_space<vmem>>, %arg8: memref<256x256xbf16, #tpu.memory_space<vmem>>, %arg9: memref<1x256xf32, #tpu.memory_space<vmem>>, %arg10: memref<1x4x256xbf16, #tpu.memory_space<vmem>>) attributes {dimension_semantics = [#tpu.dimension_semantics<parallel>], iteration_bounds = array<i64: 2>, scalar_prefetch = 0 : i64, scratch_operands = 0 : i64, tpu.core_type = #tpu.core_type<tc>, window_params = [{transform_indices = @transform_0, window_bounds = array<i64: 1, 4, 512>}, {pipeline_mode = #tpu.pipeline_mode<synchronous>, transform_indices = @transform_1, window_bounds = array<i64: 128, 256>}, {pipeline_mode = #tpu.pipeline_mode<synchronous>, transform_indices = @transform_2, window_bounds = array<i64: 1, 256>}, {pipeline_mode = #tpu.pipeline_mode<synchronous>, transform_indices = @transform_3, window_bounds = array<i64: 256, 256>}, {pipeline_mode = #tpu.pipeline_mode<synchronous>, transform_indices = @transform_4, window_bounds = array<i64: 1, 256>}, {pipeline_mode = #tpu.pipeline_mode<synchronous>, transform_indices = @transform_5, window_bounds = array<i64: 256, 256>}, {pipeline_mode = #tpu.pipeline_mode<synchronous>, transform_indices = @transform_6, window_bounds = array<i64: 1, 256>}, {pipeline_mode = #tpu.pipeline_mode<synchronous>, transform_indices = @transform_7, window_bounds = array<i64: 256, 256>}, {pipeline_mode = #tpu.pipeline_mode<synchronous>, transform_indices = @transform_8, window_bounds = array<i64: 1, 256>}, {transform_indices = @transform_9, window_bounds = array<i64: 1, 4, 256>}]} {
    %c0 = arith.constant 0 : index
    %c0_0 = arith.constant 0 : index
    %c0_1 = arith.constant 0 : index
    %0 = vector.load %arg1[%c0, %c0_0, %c0_1] : memref<1x4x512xbf16, #tpu.memory_space<vmem>>, vector<1x4x128xbf16>
    %1 = vector.shape_cast %0 : vector<1x4x128xbf16> to vector<4x128xbf16>
    %c0_2 = arith.constant 0 : index
    %c0_3 = arith.constant 0 : index
    %2 = vector.load %arg2[%c0_2, %c0_3] : memref<128x256xbf16, #tpu.memory_space<vmem>>, vector<128x256xbf16>
    %cst = arith.constant dense<0.000000e+00> : vector<4x256xf32>
    %3 = tpu.matmul %1, %2, %cst {dimension_numbers = #tpu.dot_dimension_numbers<[1], [0], [0], [1], [0, 0, 1, 1], [], []>} : vector<4x128xbf16>, vector<128x256xbf16>, vector<4x256xf32> -> vector<4x256xf32>
    %c0_4 = arith.constant 0 : index
    %c0_5 = arith.constant 0 : index
    %4 = vector.load %arg3[%c0_4, %c0_5] : memref<1x256xf32, #tpu.memory_space<vmem>>, vector<1x256xf32>
    %5 = vector.broadcast %4 : vector<1x256xf32> to vector<4x256xf32>
    %6 = arith.addf %3, %5 : vector<4x256xf32>
    %cst_6 = arith.constant 0.000000e+00 : f32
    %7 = vector.broadcast %cst_6 : f32 to vector<4x256xf32>
    %8 = arith.maximumf %6, %7 : vector<4x256xf32>
    %9 = arith.truncf %8 : vector<4x256xf32> to vector<4x256xbf16>
    %c0_7 = arith.constant 0 : index
    %c0_8 = arith.constant 0 : index
    %10 = vector.load %arg4[%c0_7, %c0_8] : memref<256x256xbf16, #tpu.memory_space<vmem>>, vector<256x256xbf16>
    %cst_9 = arith.constant dense<0.000000e+00> : vector<4x256xf32>
    %11 = tpu.matmul %9, %10, %cst_9 {dimension_numbers = #tpu.dot_dimension_numbers<[1], [0], [0], [1], [0, 0, 1, 1], [], []>} : vector<4x256xbf16>, vector<256x256xbf16>, vector<4x256xf32> -> vector<4x256xf32>
    %c0_10 = arith.constant 0 : index
    %c0_11 = arith.constant 0 : index
    %12 = vector.load %arg5[%c0_10, %c0_11] : memref<1x256xf32, #tpu.memory_space<vmem>>, vector<1x256xf32>
    %13 = vector.broadcast %12 : vector<1x256xf32> to vector<4x256xf32>
    %14 = arith.addf %11, %13 : vector<4x256xf32>
    %cst_12 = arith.constant dense<0.000000e+00> : vector<256xf32>
    %15 = vector.multi_reduction <add>, %14, %cst_12 [0] : vector<4x256xf32> to vector<256xf32>
    %16 = vector.shape_cast %15 : vector<256xf32> to vector<1x256xf32>
    %cst_13 = arith.constant 4.000000e+00 : f32
    %17 = vector.broadcast %cst_13 : f32 to vector<1x256xf32>
    %18 = arith.divf %16, %17 : vector<1x256xf32>
    %19 = vector.broadcast %18 : vector<1x256xf32> to vector<4x256xf32>
    %20 = arith.subf %14, %19 : vector<4x256xf32>
    %21 = arith.mulf %20, %20 : vector<4x256xf32>
    %cst_14 = arith.constant dense<0.000000e+00> : vector<256xf32>
    %22 = vector.multi_reduction <add>, %21, %cst_14 [0] : vector<4x256xf32> to vector<256xf32>
    %23 = vector.shape_cast %22 : vector<256xf32> to vector<1x256xf32>
    %cst_15 = arith.constant 4.000000e+00 : f32
    %24 = vector.broadcast %cst_15 : f32 to vector<1x256xf32>
    %25 = arith.divf %23, %24 : vector<1x256xf32>
    %26 = vector.broadcast %18 : vector<1x256xf32> to vector<4x256xf32>
    %27 = arith.subf %14, %26 : vector<4x256xf32>
    %cst_16 = arith.constant 9.99999974E-6 : f32
    %28 = vector.broadcast %cst_16 : f32 to vector<1x256xf32>
    %29 = arith.addf %25, %28 : vector<1x256xf32>
    %30 = math.rsqrt %29 : vector<1x256xf32>
    %31 = vector.broadcast %30 : vector<1x256xf32> to vector<4x256xf32>
    %32 = arith.mulf %27, %31 : vector<4x256xf32>
    %cst_17 = arith.constant 0.000000e+00 : f32
    %33 = vector.broadcast %cst_17 : f32 to vector<4x256xf32>
    %34 = arith.cmpf oge, %32, %33 : vector<4x256xf32>
    %cst_18 = arith.constant 4.000000e-01 : f32
    %35 = vector.broadcast %cst_18 : f32 to vector<4x256xf32>
    %36 = arith.mulf %35, %32 : vector<4x256xf32>
    %37 = arith.select %34, %32, %36 : vector<4x256xi1>, vector<4x256xf32>
    %38 = arith.truncf %37 : vector<4x256xf32> to vector<4x256xbf16>
    %c0_19 = arith.constant 0 : index
    %c0_20 = arith.constant 0 : index
    %39 = vector.load %arg6[%c0_19, %c0_20] : memref<256x256xbf16, #tpu.memory_space<vmem>>, vector<256x256xbf16>
    %cst_21 = arith.constant dense<0.000000e+00> : vector<4x256xf32>
    %40 = tpu.matmul %38, %39, %cst_21 {dimension_numbers = #tpu.dot_dimension_numbers<[1], [0], [0], [1], [0, 0, 1, 1], [], []>} : vector<4x256xbf16>, vector<256x256xbf16>, vector<4x256xf32> -> vector<4x256xf32>
    %c0_22 = arith.constant 0 : index
    %c0_23 = arith.constant 0 : index
    %41 = vector.load %arg7[%c0_22, %c0_23] : memref<1x256xf32, #tpu.memory_space<vmem>>, vector<1x256xf32>
    %42 = vector.broadcast %41 : vector<1x256xf32> to vector<4x256xf32>
    %43 = arith.addf %40, %42 : vector<4x256xf32>
    %cst_24 = arith.constant dense<0.000000e+00> : vector<256xf32>
    %44 = vector.multi_reduction <add>, %43, %cst_24 [0] : vector<4x256xf32> to vector<256xf32>
    %45 = vector.shape_cast %44 : vector<256xf32> to vector<1x256xf32>
    %cst_25 = arith.constant 4.000000e+00 : f32
    %46 = vector.broadcast %cst_25 : f32 to vector<1x256xf32>
    %47 = arith.divf %45, %46 : vector<1x256xf32>
    %48 = vector.broadcast %47 : vector<1x256xf32> to vector<4x256xf32>
    %49 = arith.subf %43, %48 : vector<4x256xf32>
    %50 = arith.mulf %49, %49 : vector<4x256xf32>
    %cst_26 = arith.constant dense<0.000000e+00> : vector<256xf32>
    %51 = vector.multi_reduction <add>, %50, %cst_26 [0] : vector<4x256xf32> to vector<256xf32>
    %52 = vector.shape_cast %51 : vector<256xf32> to vector<1x256xf32>
    %cst_27 = arith.constant 4.000000e+00 : f32
    %53 = vector.broadcast %cst_27 : f32 to vector<1x256xf32>
    %54 = arith.divf %52, %53 : vector<1x256xf32>
    %55 = vector.broadcast %47 : vector<1x256xf32> to vector<4x256xf32>
    %56 = arith.subf %43, %55 : vector<4x256xf32>
    %cst_28 = arith.constant 9.99999974E-6 : f32
    %57 = vector.broadcast %cst_28 : f32 to vector<1x256xf32>
    %58 = arith.addf %54, %57 : vector<1x256xf32>
    %59 = math.rsqrt %58 : vector<1x256xf32>
    %60 = vector.broadcast %59 : vector<1x256xf32> to vector<4x256xf32>
    %61 = arith.mulf %56, %60 : vector<4x256xf32>
    %cst_29 = arith.constant 0.000000e+00 : f32
    %62 = vector.broadcast %cst_29 : f32 to vector<4x256xf32>
    %63 = arith.cmpf oge, %61, %62 : vector<4x256xf32>
    %cst_30 = arith.constant 4.000000e-01 : f32
    %64 = vector.broadcast %cst_30 : f32 to vector<4x256xf32>
    %65 = arith.mulf %64, %61 : vector<4x256xf32>
    %66 = arith.select %63, %61, %65 : vector<4x256xi1>, vector<4x256xf32>
    %67 = arith.truncf %6 : vector<4x256xf32> to vector<4x256xbf16>
    %c0_31 = arith.constant 0 : index
    %c0_32 = arith.constant 0 : index
    %68 = vector.load %arg8[%c0_31, %c0_32] : memref<256x256xbf16, #tpu.memory_space<vmem>>, vector<256x256xbf16>
    %cst_33 = arith.constant dense<0.000000e+00> : vector<4x256xf32>
    %69 = tpu.matmul %67, %68, %cst_33 {dimension_numbers = #tpu.dot_dimension_numbers<[1], [0], [0], [1], [0, 0, 1, 1], [], []>} : vector<4x256xbf16>, vector<256x256xbf16>, vector<4x256xf32> -> vector<4x256xf32>
    %c0_34 = arith.constant 0 : index
    %c0_35 = arith.constant 0 : index
    %70 = vector.load %arg9[%c0_34, %c0_35] : memref<1x256xf32, #tpu.memory_space<vmem>>, vector<1x256xf32>
    %71 = vector.broadcast %70 : vector<1x256xf32> to vector<4x256xf32>
    %72 = arith.addf %69, %71 : vector<4x256xf32>
    %73 = arith.addf %66, %72 : vector<4x256xf32>
    %cst_36 = arith.constant 0.000000e+00 : f32
    %74 = vector.broadcast %cst_36 : f32 to vector<4x256xf32>
    %75 = arith.maximumf %73, %74 : vector<4x256xf32>
    %76 = arith.truncf %75 : vector<4x256xf32> to vector<4x256xbf16>
    %c0_37 = arith.constant 0 : index
    %c0_38 = arith.constant 0 : index
    %c0_39 = arith.constant 0 : index
    %77 = vector.load %arg10[%c0_37, %c0_38, %c0_39] : memref<1x4x256xbf16, #tpu.memory_space<vmem>>, vector<1x4x256xbf16>
    %78 = vector.shape_cast %77 : vector<1x4x256xbf16> to vector<4x256xbf16>
    %79 = vector.shape_cast %76 : vector<4x256xbf16> to vector<1x4x256xbf16>
    tpu.vector_store %arg10[%c0_37, %c0_38, %c0_39], %79 {strides = array<i32>} : memref<1x4x256xbf16, #tpu.memory_space<vmem>>, vector<1x4x256xbf16>,
    return
  }
  func.func @transform_0(%arg0: i32) -> (i32, i32, i32) {
    %c0_i32 = arith.constant 0 : i32
    %c0_i32_0 = arith.constant 0 : i32
    %c0_i32_1 = arith.constant 0 : i32
    return %arg0, %c0_i32, %c0_i32_0 : i32, i32, i32
  }
  func.func @transform_1(%arg0: i32) -> (i32, i32) {
    %c0_i32 = arith.constant 0 : i32
    %c0_i32_0 = arith.constant 0 : i32
    %c0_i32_1 = arith.constant 0 : i32
    return %c0_i32, %c0_i32_0 : i32, i32
  }
  func.func @transform_2(%arg0: i32) -> (i32, i32) {
    %c0_i32 = arith.constant 0 : i32
    %c0_i32_0 = arith.constant 0 : i32
    %c0_i32_1 = arith.constant 0 : i32
    return %c0_i32, %c0_i32_0 : i32, i32
  }
  func.func @transform_3(%arg0: i32) -> (i32, i32) {
    %c0_i32 = arith.constant 0 : i32
    %c0_i32_0 = arith.constant 0 : i32
    %c0_i32_1 = arith.constant 0 : i32
    return %c0_i32, %c0_i32_0 : i32, i32
  }
  func.func @transform_4(%arg0: i32) -> (i32, i32) {
    %c0_i32 = arith.constant 0 : i32
    %c0_i32_0 = arith.constant 0 : i32
    %c0_i32_1 = arith.constant 0 : i32
    return %c0_i32, %c0_i32_0 : i32, i32
  }
  func.func @transform_5(%arg0: i32) -> (i32, i32) {
    %c0_i32 = arith.constant 0 : i32
    %c0_i32_0 = arith.constant 0 : i32
    %c0_i32_1 = arith.constant 0 : i32
    return %c0_i32, %c0_i32_0 : i32, i32
  }
  func.func @transform_6(%arg0: i32) -> (i32, i32) {
    %c0_i32 = arith.constant 0 : i32
    %c0_i32_0 = arith.constant 0 : i32
    %c0_i32_1 = arith.constant 0 : i32
    return %c0_i32, %c0_i32_0 : i32, i32
  }
  func.func @transform_7(%arg0: i32) -> (i32, i32) {
    %c0_i32 = arith.constant 0 : i32
    %c0_i32_0 = arith.constant 0 : i32
    %c0_i32_1 = arith.constant 0 : i32
    return %c0_i32, %c0_i32_0 : i32, i32
  }
  func.func @transform_8(%arg0: i32) -> (i32, i32) {
    %c0_i32 = arith.constant 0 : i32
    %c0_i32_0 = arith.constant 0 : i32
    %c0_i32_1 = arith.constant 0 : i32
    return %c0_i32, %c0_i32_0 : i32, i32
  }
  func.func @transform_9(%arg0: i32) -> (i32, i32, i32) {
    %c0_i32 = arith.constant 0 : i32
    %c0_i32_0 = arith.constant 0 : i32
    %c0_i32_1 = arith.constant 0 : i32
    return %arg0, %c0_i32, %c0_i32_0 : i32, i32, i32
  }
}

module attributes {stable_mosaic.version = 11 : i64} {
  func.func @fc_kernel(%arg0: i32, %arg1: memref<2x512xbf16, #tpu.memory_space<vmem>>, %arg2: memref<512x64xbf16, #tpu.memory_space<vmem>>, %arg3: memref<1x64xf32, #tpu.memory_space<vmem>>, %arg4: memref<2x64xf32, #tpu.memory_space<vmem>>, %arg5: memref<2x64xf32, #tpu.memory_space<vmem>>) attributes {dimension_semantics = [#tpu.dimension_semantics<arbitrary>], iteration_bounds = array<i64: 2>, scalar_prefetch = 0 : i64, scratch_operands = 1 : i64, tpu.core_type = #tpu.core_type<tc>, window_params = [{transform_indices = @transform_0, window_bounds = array<i64: 2, 512>}, {transform_indices = @transform_1, window_bounds = array<i64: 512, 64>}, {pipeline_mode = #tpu.pipeline_mode<synchronous>, transform_indices = @transform_2, window_bounds = array<i64: 1, 64>}, {pipeline_mode = #tpu.pipeline_mode<synchronous>, transform_indices = @transform_3, window_bounds = array<i64: 2, 64>}]} {
    %c0_i32 = arith.constant 0 : i32
    %0 = arith.cmpi eq, %arg0, %c0_i32 : i32
    %1 = arith.extui %0 : i1 to i32
    %c0_i32_0 = arith.constant 0 : i32
    %2 = arith.cmpi ne, %1, %c0_i32_0 : i32
    scf.if %2 {
      %cst_9 = arith.constant 0.000000e+00 : f32
      %12 = vector.broadcast %cst_9 : f32 to vector<2x64xf32>
      %c0_10 = arith.constant 0 : index
      %c0_11 = arith.constant 0 : index
      %13 = vector.load %arg5[%c0_10, %c0_11] : memref<2x64xf32, #tpu.memory_space<vmem>>, vector<2x64xf32>
      tpu.vector_store %arg5[%c0_10, %c0_11], %12 {strides = array<i32>} : memref<2x64xf32, #tpu.memory_space<vmem>>, vector<2x64xf32>,
    } else {
    }
    %c0 = arith.constant 0 : index
    %c0_1 = arith.constant 0 : index
    %3 = vector.load %arg5[%c0, %c0_1] : memref<2x64xf32, #tpu.memory_space<vmem>>, vector<2x64xf32>
    %c0_2 = arith.constant 0 : index
    %c0_3 = arith.constant 0 : index
    %4 = vector.load %arg1[%c0_2, %c0_3] : memref<2x512xbf16, #tpu.memory_space<vmem>>, vector<2x512xbf16>
    %c0_4 = arith.constant 0 : index
    %c0_5 = arith.constant 0 : index
    %5 = vector.load %arg2[%c0_4, %c0_5] : memref<512x64xbf16, #tpu.memory_space<vmem>>, vector<512x64xbf16>
    %cst = arith.constant dense<0.000000e+00> : vector<2x64xf32>
    %6 = tpu.matmul %4, %5, %cst {dimension_numbers = #tpu.dot_dimension_numbers<[1], [0], [0], [1], [0, 0, 1, 1], [], []>} : vector<2x512xbf16>, vector<512x64xbf16>, vector<2x64xf32> -> vector<2x64xf32>
    %7 = arith.addf %3, %6 : vector<2x64xf32>
    %c0_6 = arith.constant 0 : index
    %c0_7 = arith.constant 0 : index
    %8 = vector.load %arg5[%c0_6, %c0_7] : memref<2x64xf32, #tpu.memory_space<vmem>>, vector<2x64xf32>
    tpu.vector_store %arg5[%c0_6, %c0_7], %7 {strides = array<i32>} : memref<2x64xf32, #tpu.memory_space<vmem>>, vector<2x64xf32>,
    %c1_i32 = arith.constant 1 : i32
    %9 = arith.cmpi eq, %arg0, %c1_i32 : i32
    %10 = arith.extui %9 : i1 to i32
    %c0_i32_8 = arith.constant 0 : i32
    %11 = arith.cmpi ne, %10, %c0_i32_8 : i32
    scf.if %11 {
      %c0_9 = arith.constant 0 : index
      %c0_10 = arith.constant 0 : index
      %12 = vector.load %arg5[%c0_9, %c0_10] : memref<2x64xf32, #tpu.memory_space<vmem>>, vector<2x64xf32>
      %c0_11 = arith.constant 0 : index
      %c0_12 = arith.constant 0 : index
      %13 = vector.load %arg3[%c0_11, %c0_12] : memref<1x64xf32, #tpu.memory_space<vmem>>, vector<1x64xf32>
      %14 = vector.broadcast %13 : vector<1x64xf32> to vector<2x64xf32>
      %15 = arith.addf %12, %14 : vector<2x64xf32>
      %c0_13 = arith.constant 0 : index
      %c0_14 = arith.constant 0 : index
      %16 = vector.load %arg4[%c0_13, %c0_14] : memref<2x64xf32, #tpu.memory_space<vmem>>, vector<2x64xf32>
      tpu.vector_store %arg4[%c0_13, %c0_14], %15 {strides = array<i32>} : memref<2x64xf32, #tpu.memory_space<vmem>>, vector<2x64xf32>,
    } else {
    }
    return
  }
  func.func @transform_0(%arg0: i32) -> (i32, i32) {
    %c0_i32 = arith.constant 0 : i32
    %c0_i32_0 = arith.constant 0 : i32
    return %c0_i32, %arg0 : i32, i32
  }
  func.func @transform_1(%arg0: i32) -> (i32, i32) {
    %c0_i32 = arith.constant 0 : i32
    %c0_i32_0 = arith.constant 0 : i32
    return %arg0, %c0_i32 : i32, i32
  }
  func.func @transform_2(%arg0: i32) -> (i32, i32) {
    %c0_i32 = arith.constant 0 : i32
    %c0_i32_0 = arith.constant 0 : i32
    %c0_i32_1 = arith.constant 0 : i32
    return %c0_i32, %c0_i32_0 : i32, i32
  }
  func.func @transform_3(%arg0: i32) -> (i32, i32) {
    %c0_i32 = arith.constant 0 : i32
    %c0_i32_0 = arith.constant 0 : i32
    %c0_i32_1 = arith.constant 0 : i32
    return %c0_i32, %c0_i32_0 : i32, i32
  }
}

</mosaic_0001>

<bundles_post_ra>
// kernel: encoder_forward.7
= control target key start
LH: loop header
LB: loop body
LE: loop exit
PB: predicated region body
PF: predicated region fallthrough
CT: control target
= control target key end

     0   :  { %s2352_s0 = inlined_call_operand.hbm [shape: bf16[2,16,512], index: 0, kind: input, shape index: {}]   ;;  %s2353_s1 = inlined_call_operand.hbm [shape: bf16[128,128], index: 1, kind: input, shape index: {}]   ;;  %s2354_s2 = inlined_call_operand.hbm [shape: f32[1,128], index: 2, kind: input, shape index: {}]   ;;  %s2355_s3 = inlined_call_operand.hbm [shape: bf16[128,128], index: 3, kind: input, shape index: {}]   ;;  %s2356_s4 = inlined_call_operand.hbm [shape: f32[1,128], index: 4, kind: input, shape index: {}]   ;;  %s2357_s5 = inlined_call_operand.hbm [shape: bf16[128,128], index: 5, kind: input, shape index: {}]   ;;  %s2358_s6 = inlined_call_operand.hbm [shape: f32[1,128], index: 6, kind: input, shape index: {}]   ;;  %s2359_s7 = inlined_call_operand.hbm [shape: bf16[128,128], index: 7, kind: input, shape index: {}]   ;;  %s2360_s8 = inlined_call_operand.hbm [shape: f32[1,128], index: 8, kind: input, shape index: {}]   ;;  %s2361_s9 = inlined_call_operand.hbm [shape: bf16[2,16,128], index: 9, kind: output, shape index: {}]  }
   0x1   :  { %2366 = sst [smem:[#allocation24_spill]] %s2353_s1 }
   0x2   :  { %2367 = sst [smem:[#allocation25_spill]] %s2361_s9 }
   0x3   :  { %14 = vsyncpa [#allocation3], 0 }
   0x4   :  { %16 = vsyncpa [#allocation3 + $0x1], 0 }
   0x5   :  { %17 = vsyncpa [#allocation6], 0 }
   0x6   :  { %18 = vsyncpa [#allocation9], 0 }
   0x7   :  { %19 = vsyncpa [#allocation12], 0 }
   0x8   :  { %20 = vsyncpa [#allocation15], 0 }
   0x9   :  { %21 = vsyncpa [#allocation4], 0 }
   0xa   :  { %23 = vsyncpa [#allocation4 + $0x1], 0  ;;  %s1931_s30 = smov 0   ;;  %s1933_s10 = smov 0  }
   0xb   :  { %s1935_s11 = smov 0   ;;  %s1937_s12 = smov 0  }
   0xc LB: > { %s1863_s13 = smov [#allocation5]   ;;  %s1952_s15 = sadd.s32 4294967295, %s1861_s12   ;;  %s1861_s12 = sphi %s1937_s12, %s2394_s12   ;;  %s1857_s11 = sphi %s1935_s11, %s2393_s11   ;;  %s1853_s10 = sphi %s1933_s10, %s2392_s10   ;;  %s1849_s30 = sphi %s1931_s30, %s2391_s30  }
   0xd   : > { %s266_s14 = sshll.u32 %s1863_s13, 4  ;;  %p1160_p0 = scmp.ge.s32.totalorder %s1861_s12, 1  ;;  %s1957_s14 = int_to_ptr.vmem [resolvable:$true] %s266_s14 }
   0xe   : > { %p2363_p1 = scmp.eq.s32.totalorder %s1952_s15, 0  ;;  %p254_p2 = scmp.lt.s32.totalorder %s1861_s12, 3 }
   0xf   : > { %s1864_s17 = smov [#allocation8]   ;;  %s1865_s20 = smov [#allocation11]  }
  0x10   : > { %p1959_p3 = pnand %p1160_p0, %p254_p2  ;;  %s290_s18 = sshll.u32 %s1864_s17, 4  ;;  %s1972_s18 = int_to_ptr.vmem [resolvable:$true] %s290_s18 }
  0x11   : > { %s314_s21 = sshll.u32 %s1865_s20, 4  ;;  %s2370_s1 = sld [smem:[#allocation24_spill]]  ;;  %s1974_s21 = int_to_ptr.vmem [resolvable:$true] %s314_s21 }
  0x12   : > { %s2368_s16 = scalar_select %p1959_p3, 1, 0 }
  0x13   : > { %p1389_p5 = pneg %p1959_p3 }
  0x15   : > { %p1968_p6 = pnand %p1389_p5, %p2363_p1 }
  0x17   : > { %s1525_s24 = scalar_lea.hbm %s2370_s1, 1024  ;;  %p1984_p8 = pneg %p1968_p6 }
  0x18   : > { %p1526_p7 = scmp.ne.s32.totalorder %s2370_s1, %s1525_s24  ;;  %p1532_p11 = scmp.lt.u32.totalorder %s1525_s24, %s2370_s1 }
  0x1a   : > { %p1528_p9 = pnand %p1984_p8, %p1526_p7 }
  0x1c   : > { %p1529_p10 = pneg %p1528_p9 }
  0x1e   : > { %p1534_p12 = pnand %p1532_p11, %p1529_p10 }
  0x20   : > { %1537 = shalt.err (!%p1534_p12)
}
  0x21   : > { %s1538_s13 = scalar_lea.vmem %s1957_s14, 1024  ;;  %p1546_p5 = scmp.lt.s32.totalorder %s1957_s14, %s1957_s14 }
  0x22   : > { %p1539_p13 = scmp.ne.s32.totalorder %s1957_s14, %s1538_s13  ;;  %p1547_p4 = scmp.lt.s32.totalorder %s1538_s13, %s1538_s13 }
  0x24   : > { %p1541_p0 = pnand %p1539_p13, %p1984_p8  ;;  %p1548_p7 = por %p1547_p4, %p1546_p5 }
  0x26   : > { %p1542_p2 = pneg %p1541_p0 }
  0x28   : > { %p1549_p9 = pnand %p1548_p7, %p1542_p2 }
  0x2a   : > { %1552 = shalt.err (!%p1549_p9)
}
  0x2b   : > { %s1866_s17 = smov 64   ;;  %s1867_s20 = smov 4  }
  0x2c   : > { %1392 = dma.hbm_to_vmem [thread:$0]  (!%p1968_p6), %s2370_s1, 1024, %s1957_s14, [#allocation6], %s1866_s17, %s1866_s17, %s1867_s20  }
  0x2d   : > { %s1553_s26 = scalar_lea.hbm %s2355_s3, 1024 }
  0x2e   : > { %p1554_p4 = scmp.ne.s32.totalorder %s2355_s3, %s1553_s26  ;;  %p1560_p12 = scmp.lt.u32.totalorder %s1553_s26, %s2355_s3 }
  0x30   : > { %p1556_p10 = pnand %p1554_p4, %p1984_p8 }
  0x32   : > { %p1557_p11 = pneg %p1556_p10 }
  0x34   : > { %p1562_p13 = pnand %p1560_p12, %p1557_p11 }
  0x36   : > { %1565 = shalt.err (!%p1562_p13)
}
  0x37   : > { %s1566_s14 = scalar_lea.vmem %s1972_s18, 1024  ;;  %p1574_p7 = scmp.lt.s32.totalorder %s1972_s18, %s1972_s18 }
  0x38   : > { %p1567_p0 = scmp.ne.s32.totalorder %s1972_s18, %s1566_s14  ;;  %p1575_p9 = scmp.lt.s32.totalorder %s1566_s14, %s1566_s14 }
  0x3a   : > { %p1569_p2 = pnand %p1567_p0, %p1984_p8  ;;  %p1576_p4 = por %p1575_p9, %p1574_p7 }
  0x3c   : > { %p1570_p5 = pneg %p1569_p2 }
  0x3e   : > { %p1577_p10 = pnand %p1576_p4, %p1570_p5 }
  0x40   : > { %1580 = shalt.err (!%p1577_p10)
}
  0x41   : > { %1398 = dma.hbm_to_vmem [thread:$0]  (!%p1968_p6), %s2355_s3, 1024, %s1972_s18, [#allocation9], %s1866_s17, %s1866_s17, %s1867_s20  }
  0x42   : > { %s1581_s25 = scalar_lea.hbm %s2357_s5, 1024 }
  0x43   : > { %p1582_p11 = scmp.ne.s32.totalorder %s2357_s5, %s1581_s25  ;;  %p1588_p0 = scmp.lt.u32.totalorder %s1581_s25, %s2357_s5 }
  0x45   : > { %p1584_p12 = pnand %p1582_p11, %p1984_p8 }
  0x47   : > { %p1585_p13 = pneg %p1584_p12 }
  0x49   : > { %p1590_p2 = pnand %p1588_p0, %p1585_p13 }
  0x4b   : > { %1593 = shalt.err (!%p1590_p2)
}
  0x4c   : > { %s1594_s18 = scalar_lea.vmem %s1974_s21, 1024  ;;  %p1602_p4 = scmp.lt.s32.totalorder %s1974_s21, %s1974_s21 }
  0x4d   : > { %p1595_p5 = scmp.ne.s32.totalorder %s1974_s21, %s1594_s18  ;;  %p1603_p10 = scmp.lt.s32.totalorder %s1594_s18, %s1594_s18 }
  0x4f   : > { %p1597_p7 = pnand %p1595_p5, %p1984_p8  ;;  %p1604_p11 = por %p1603_p10, %p1602_p4 }
  0x51   : > { %p1598_p9 = pneg %p1597_p7 }
  0x53   : > { %p1605_p12 = pnand %p1604_p11, %p1598_p9 }
  0x55   : > { %1608 = shalt.err (!%p1605_p12)
}
  0x56   : > { %1404 = dma.hbm_to_vmem [thread:$0]  (!%p1968_p6), %s2357_s5, 1024, %s1974_s21, [#allocation12], %s1866_s17, %s1866_s17, %s1867_s20  }
  0x57   : > { %s1868_s22 = smov [#allocation14]   ;;  %s1869_s24 = smov [#allocation7]  }
  0x58   : > { %s338_s23 = sshll.u32 %s1868_s22, 4  ;;  %s280_s25 = sshll.u32 %s1869_s24, 4  ;;  %s339_s23 = int_to_ptr.vmem [resolvable:$true] %s338_s23  ;;  %s281_s25 = int_to_ptr.vmem [resolvable:$true] %s280_s25 }
  0x59   : > { %s1609_s29 = scalar_lea.hbm %s2359_s7, 1024 }
  0x5a   : > { %p1610_p13 = scmp.ne.s32.totalorder %s2359_s7, %s1609_s29  ;;  %p1616_p5 = scmp.lt.u32.totalorder %s1609_s29, %s2359_s7 }
  0x5c   : > { %p1612_p0 = pnand %p1610_p13, %p1984_p8 }
  0x5e   : > { %p1613_p2 = pneg %p1612_p0 }
  0x60   : > { %p1618_p7 = pnand %p1616_p5, %p1613_p2 }
  0x62   : > { %1621 = shalt.err (!%p1618_p7)
}
  0x63   : > { %s1622_s21 = scalar_lea.vmem %s339_s23, 1024  ;;  %p1630_p11 = scmp.lt.s32.totalorder %s339_s23, %s339_s23 }
  0x64   : > { %p1623_p9 = scmp.ne.s32.totalorder %s339_s23, %s1622_s21  ;;  %p1631_p12 = scmp.lt.s32.totalorder %s1622_s21, %s1622_s21 }
  0x66   : > { %p1625_p4 = pnand %p1623_p9, %p1984_p8  ;;  %p1632_p1 = por %p1631_p12, %p1630_p11 }
  0x68   : > { %p1626_p10 = pneg %p1625_p4 }
  0x6a   : > { %p1633_p3 = pnand %p1632_p1, %p1626_p10 }
  0x6c   : > { %1636 = shalt.err (!%p1633_p3)
}
  0x6d   : > { %1410 = dma.hbm_to_vmem [thread:$0]  (!%p1968_p6), %s2359_s7, 1024, %s339_s23, [#allocation15], %s1866_s17, %s1866_s17, %s1867_s20  }
  0x6e   : > { %s1637_s26 = scalar_lea.hbm %s2354_s2, 16 }
  0x6f   : > { %p1638_p1 = scmp.ne.s32.totalorder %s2354_s2, %s1637_s26  ;;  %p1644_p0 = scmp.lt.u32.totalorder %s1637_s26, %s2354_s2 }
  0x71   : > { %p1640_p3 = pnand %p1638_p1, %p1984_p8 }
  0x73   : > { %p1641_p13 = pneg %p1640_p3 }
  0x75   : > { %p1646_p2 = pnand %p1644_p0, %p1641_p13 }
  0x77   : > { %1649 = shalt.err (!%p1646_p2)
}
  0x78   : > { %s1650_s14 = scalar_lea.vmem %s281_s25, 16  ;;  %s1657_s17 = scalar_lea.vmem %s281_s25, 32 }
  0x79   : > { %p1651_p5 = scmp.ne.s32.totalorder %s281_s25, %s1650_s14  ;;  %p1658_p4 = scmp.lt.s32.totalorder %s281_s25, %s281_s25 }
  0x7a   : > { %p1659_p10 = scmp.lt.s32.totalorder %s1657_s17, %s1650_s14 }
  0x7b   : > { %p1653_p7 = pnand %p1651_p5, %p1984_p8 }
  0x7c   : > { %p1660_p11 = por %p1659_p10, %p1658_p4 }
  0x7d   : > { %p1654_p9 = pneg %p1653_p7 }
  0x7f   : > { %p1661_p12 = pnand %p1660_p11, %p1654_p9 }
  0x81   : > { %1664 = shalt.err (!%p1661_p12)
}
  0x82   : > { %1395 = dma.hbm_to_vmem [thread:$0]  (!%p1968_p6), %s2354_s2, 16, %s281_s25, [#allocation6]  }
  0x83   : > { %s1870_s21 = smov [#allocation10]   ;;  %s1871_s9 = smov [#allocation13]  }
  0x84   : > { %s304_s1 = sshll.u32 %s1870_s21, 4  ;;  %s328_s22 = sshll.u32 %s1871_s9, 4  ;;  %s305_s1 = int_to_ptr.vmem [resolvable:$true] %s304_s1  ;;  %s329_s22 = int_to_ptr.vmem [resolvable:$true] %s328_s22 }
  0x85   : > { %s1665_s28 = scalar_lea.hbm %s2356_s4, 16 }
  0x86   : > { %p1666_p1 = scmp.ne.s32.totalorder %s2356_s4, %s1665_s28  ;;  %p1672_p0 = scmp.lt.u32.totalorder %s1665_s28, %s2356_s4 }
  0x88   : > { %p1668_p3 = pnand %p1666_p1, %p1984_p8 }
  0x8a   : > { %p1669_p13 = pneg %p1668_p3 }
  0x8c   : > { %p1674_p2 = pnand %p1672_p0, %p1669_p13 }
  0x8e   : > { %1677 = shalt.err (!%p1674_p2)
}
  0x8f   : > { %s1678_s25 = scalar_lea.vmem %s305_s1, 16  ;;  %s1685_s17 = scalar_lea.vmem %s305_s1, 32 }
  0x90   : > { %p1679_p5 = scmp.ne.s32.totalorder %s305_s1, %s1678_s25  ;;  %p1686_p4 = scmp.lt.s32.totalorder %s305_s1, %s305_s1 }
  0x91   : > { %p1687_p10 = scmp.lt.s32.totalorder %s1685_s17, %s1678_s25 }
  0x92   : > { %p1681_p7 = pnand %p1679_p5, %p1984_p8 }
  0x93   : > { %p1688_p11 = por %p1687_p10, %p1686_p4 }
  0x94   : > { %p1682_p9 = pneg %p1681_p7 }
  0x96   : > { %p1689_p12 = pnand %p1688_p11, %p1682_p9 }
  0x98   : > { %1692 = shalt.err (!%p1689_p12)
}
  0x99   : > { %1401 = dma.hbm_to_vmem [thread:$0]  (!%p1968_p6), %s2356_s4, 16, %s305_s1, [#allocation9]  }
  0x9a   : > { %s1693_s24 = scalar_lea.hbm %s2358_s6, 16 }
  0x9b   : > { %p1694_p1 = scmp.ne.s32.totalorder %s2358_s6, %s1693_s24  ;;  %p1700_p0 = scmp.lt.u32.totalorder %s1693_s24, %s2358_s6 }
  0x9d   : > { %p1696_p3 = pnand %p1694_p1, %p1984_p8 }
  0x9f   : > { %p1697_p13 = pneg %p1696_p3 }
  0xa1   : > { %p1702_p2 = pnand %p1700_p0, %p1697_p13 }
  0xa3   : > { %1705 = shalt.err (!%p1702_p2)
}
  0xa4   : > { %s1706_s18 = scalar_lea.vmem %s329_s22, 16  ;;  %s1713_s1 = scalar_lea.vmem %s329_s22, 32 }
  0xa5   : > { %p1707_p5 = scmp.ne.s32.totalorder %s329_s22, %s1706_s18  ;;  %p1714_p4 = scmp.lt.s32.totalorder %s329_s22, %s329_s22 }
  0xa6   : > { %p1715_p10 = scmp.lt.s32.totalorder %s1713_s1, %s1706_s18 }
  0xa7   : > { %p1709_p7 = pnand %p1707_p5, %p1984_p8 }
  0xa8   : > { %p1716_p11 = por %p1715_p10, %p1714_p4 }
  0xa9   : > { %p1710_p9 = pneg %p1709_p7 }
  0xab   : > { %p1717_p12 = pnand %p1716_p11, %p1710_p9 }
  0xad   : > { %1720 = shalt.err (!%p1717_p12)
}
  0xae   : > { %1407 = dma.hbm_to_vmem [thread:$0]  (!%p1968_p6), %s2358_s6, 16, %s329_s22, [#allocation12]  }
  0xaf   : > { %s1872_s17 = smov [#allocation16]   ;;  %s1721_s9 = scalar_lea.hbm %s2360_s8, 16 }
  0xb0   : > { %s352_s20 = sshll.u32 %s1872_s17, 4  ;;  %p1722_p1 = scmp.ne.s32.totalorder %s2360_s8, %s1721_s9  ;;  %s353_s20 = int_to_ptr.vmem [resolvable:$true] %s352_s20 }
  0xb1   : > { %p1728_p0 = scmp.lt.u32.totalorder %s1721_s9, %s2360_s8 }
  0xb2   : > { %p1724_p3 = pnand %p1722_p1, %p1984_p8 }
  0xb4   : > { %p1725_p13 = pneg %p1724_p3 }
  0xb6   : > { %p1730_p2 = pnand %p1728_p0, %p1725_p13 }
  0xb8   : > { %1733 = shalt.err (!%p1730_p2)
}
  0xb9   : > { %s1734_s22 = scalar_lea.vmem %s353_s20, 16  ;;  %s1741_s13 = scalar_lea.vmem %s353_s20, 32 }
  0xba   : > { %p1735_p5 = scmp.ne.s32.totalorder %s353_s20, %s1734_s22  ;;  %p1742_p4 = scmp.lt.s32.totalorder %s353_s20, %s353_s20 }
  0xbb   : > { %p1743_p10 = scmp.lt.s32.totalorder %s1741_s13, %s1734_s22 }
  0xbc   : > { %p1737_p7 = pnand %p1735_p5, %p1984_p8 }
  0xbd   : > { %p1744_p11 = por %p1743_p10, %p1742_p4 }
  0xbe   : > { %p1738_p9 = pneg %p1737_p7 }
  0xc0   : > { %p1745_p12 = pnand %p1744_p11, %p1738_p9 }
  0xc2   : > { %1748 = shalt.err (!%p1745_p12)
}
  0xc3   : > { %1413 = dma.hbm_to_vmem [thread:$0]  (!%p1968_p6), %s2360_s8, 16, %s353_s20, [#allocation15]  }
  0xc4   : > { %s1159_s27 = sadd.s32 4294967294, %s1861_s12   ;;  %s2155_s19 = sadd.s32 1, %s1861_s12  }
  0xc5   : > { %s33_s14 = ssub.s32 %s1861_s12, %s2155_s19  ;;  %s36_s25 = sadd.s32 1, %s1857_s11 }
  0xc6   : > { %p34_p8 = scmp.eq.s32.totalorder %s33_s14, 0  ;;  %p43_p1 = scmp.ne.s32.totalorder %s1857_s11, %s1853_s10 }
  0xc7   : > { %p44_p3 = scmp.eq.s32.totalorder %s1861_s12, 0  ;;  %p49_p13 = scmp.ne.s32.totalorder %s1853_s10, %s1849_s30 }
  0xc8   : > { %s2166_s17 = scalar_select %p34_p8, %s1857_s11, %s36_s25  }
  0xc9   : > { %p2168_p0 = por %p44_p3, %p43_p1  ;;  %p2373_p2 = scmp.eq.s32.totalorder %s1952_s15, 0 }
  0xca   : > { %p241_p5 = scmp.eq.s32.totalorder %s1952_s15, 1  ;;  %p247_p7 = scmp.eq.s32.totalorder %s1159_s27, 1 }
  0xcb   : > { %p2174_p6 = por %p2373_p2, %p49_p13  ;;  %p1430_p9 = scmp.lt.s32.totalorder %s1861_s12, 2 }
  0xcc   : > { %s363_s21 = sand.u32 1, %s1857_s11   ;;  %p2181_p4 = por %p241_p5, %p43_p1 }
  0xcd   : > { %p2185_p10 = por %p247_p7, %p49_p13  ;;  %s1170_s26 = sshll.u32 %s363_s21, 5 }
  0xce   : > { %s2375_s9 = scalar_select %p2181_p4, 1, 0 }
  0xcf   : > { %s2376_s24 = scalar_select %p2185_p10, 1, 0 }
  0xd0   : > { %s1228_s28 = sshll.u32 %s1861_s12, 9  ;;  %s367_s18 = scalar_lea.vmem [#allocation2], %s1170_s26 }
  0xd1   : > { %s2193_s13 = scalar_lea.hbm %s2352_s0, %s1228_s28  ;;  %s374_s1 = sshll.u32 %s367_s18, 4  ;;  %s2195_s1 = int_to_ptr.vmem [resolvable:$true] %s374_s1 }
  0xd2   : > { %p2199_p11 = pnand %p1430_p9, %p2168_p0  ;;  %s2203_s14 = scalar_lea.sflag [#allocation3], %s363_s21 }
  0xd3   : > { %s1749_s25 = scalar_lea.hbm %s2193_s13, 512  ;;  %s1754_s23 = scalar_lea.hbm %s2352_s0, 1024 }
  0xd4   : > { %p1750_p12 = scmp.ne.s32.totalorder %s2193_s13, %s1749_s25  ;;  %p1751_p8 = pneg %p2199_p11 }
  0xd5   : > { %p1755_p13 = scmp.lt.u32.totalorder %s2193_s13, %s2352_s0  ;;  %p1756_p0 = scmp.lt.u32.totalorder %s1754_s23, %s1749_s25 }
  0xd6   : > { %p1752_p1 = pnand %p1751_p8, %p1750_p12  ;;  %p1758_p5 = scmp.lt.u32.totalorder %s1749_s25, %s2193_s13 }
  0xd7   : > { %p1757_p2 = por %p1756_p0, %p1755_p13 }
  0xd8   : > { %p1753_p3 = pneg %p1752_p1 }
  0xd9   : > { %p1759_p7 = por %p1758_p5, %p1757_p2 }
  0xdb   : > { %p1760_p9 = pnand %p1759_p7, %p1753_p3 }
  0xdd   : > { %1763 = shalt.err (!%p1760_p9)
}
  0xde   : > { %s1764_s21 = scalar_lea.vmem %s2195_s1, 512  ;;  %s1873_s18 = smov [#allocation2]  }
  0xdf   : > { %p1765_p12 = scmp.ne.s32.totalorder %s2195_s1, %s1764_s21  ;;  %s1769_s26 = sshll.u32 %s1873_s18, 4  ;;  %s1770_s26 = int_to_ptr.vmem [resolvable:$false] %s1769_s26 }
  0xe0   : > { %s1771_s28 = scalar_lea.vmem %s1770_s26, 1024  ;;  %p1772_p4 = scmp.lt.s32.totalorder %s2195_s1, %s1770_s26 }
  0xe1   : > { %p1767_p1 = pnand %p1765_p12, %p1751_p8  ;;  %p1773_p13 = scmp.lt.s32.totalorder %s1771_s28, %s1764_s21 }
  0xe3   : > { %p1768_p10 = pneg %p1767_p1  ;;  %p1774_p0 = por %p1773_p13, %p1772_p4 }
  0xe5   : > { %p1775_p2 = pnand %p1774_p0, %p1768_p10 }
  0xe7   : > { %1778 = shalt.err (!%p1775_p2)
}
  0xe8   : > { %s1874_s25 = smov 256   ;;  %s1875_s23 = smov 16  }
  0xe9   : > { %1417 = dma.hbm_to_vmem [thread:$0]  (!%p2199_p11), %s2193_s13, 512, %s2195_s1, %s2203_s14, %s1874_s25, %s1874_s25, %s1875_s23  }
  0xea   : > { %p2378_p8 = scmp.ne.s32.totalorder %s2368_s16, 0 }
  0xeb   : > { %s2234_s29 = sand.u32 (!%p2378_p8), 1, %s1853_s10  }
  0xec   : > { %386 = sbr.rel (%p2378_p8) target bundleno = 1074 (0x432), region = 56  ;;  %s1174_s22 = sshll.u32 (!%p2378_p8), %s2234_s29, 5 }
  0xed   : > { %s389_s21 = scalar_lea.sflag (!%p2378_p8), [#allocation3], %s2234_s29  ;;  %s2238_s18 = scalar_lea.vmem (!%p2378_p8), [#allocation2], %s1174_s22 }
  0xf3   : > { %1824 = dma.done.wait (%p2174_p6), %s389_s21, 512  }
  0xf4   : > { %1826 = vsyncadd (%p2174_p6), %s389_s21, 4294966784  ;;  %p2379_p4 = scmp.eq.s32.totalorder %s1952_s15, 0 }
  0xf6   : > { %1828 = dma.done.wait (%p2379_p4), [#allocation6], 1040   ;;  %p2380_p10 = pmov %p2379_p4 }
  0xf7   : > { %p2381_p11 = pmov %p2379_p4 }
  0xf8   : > { %1830 = vsyncadd (%p2380_p10), [#allocation6], 4294966256 }
  0xf9   : > { %1832 = dma.done.wait (%p2381_p11), [#allocation9], 1040   ;;  %p2382_p3 = pmov %p2379_p4 }
  0xfb   : > { %1834 = vsyncadd (%p2382_p3), [#allocation9], 4294966256  ;;  %p2383_p5 = pmov %p2382_p3 }
  0xfc   : > { %p2384_p7 = pmov %p2382_p3 }
  0xfd   : > { %1836 = dma.done.wait (%p2383_p5), [#allocation12], 1040  }
  0xfe   : > { %1838 = vsyncadd (%p2384_p7), [#allocation12], 4294966256  ;;  %p2385_p6 = pmov %p2382_p3 }
  0xff   : > { %p2386_p9 = pmov %p2382_p3 }
 0x100   : > { %1840 = dma.done.wait (%p2385_p6), [#allocation15], 1040  }
 0x101   : > { %1842 = vsyncadd (%p2386_p9), [#allocation15], 4294966256  ;;  %v1876_v0 = vmov 0.0   ;;  %vm1877_vm0 = vmmov 0   ;;  %v1488_v1 = vld [vmem:[#allocation5] sm:$0xff]   ;;  %v1489_v2 = vld [vmem:[#allocation5 + $0x8] sm:$0xff]  }
 0x102   : > { %1273 = vmatprep.subr.bf16.mxu0 %v1876_v0  ;;  %1289 = vmatprep.mubr.msk.bf16.mxu0 %vm1877_vm0, %v1876_v0  ;;  %v1490_v3 = vld [vmem:[#allocation5 + $0x10] sm:$0xff]   ;;  %v1497_v4 = vld [vmem:[#allocation8] sm:$0xff]   ;;  %v1491_v5 = vld [vmem:[#allocation5 + $0x18] sm:$0xff]   ;;  %s1183_s16 = sshll.u32 %s2234_s29, 3  ;;  %s1231_s20 = sshll.u32 %s1952_s15, 7 }
 0x103   : > { %1293 = vmatprep.subr.bf16.mxu1 %v1876_v0  ;;  %1309 = vmatprep.mubr.msk.bf16.mxu1 %vm1877_vm0, %v1876_v0  ;;  %v1498_v6 = vld [vmem:[#allocation8 + $0x8] sm:$0xff]   ;;  %v1492_v7 = vld [vmem:[#allocation5 + $0x20] sm:$0xff]   ;;  %v1499_v8 = vld [vmem:[#allocation8 + $0x10] sm:$0xff]   ;;  %s458_s13 = scalar_lea.vmem [#allocation17], %s1183_s16  ;;  %s2387_s26 = sld [smem:[#allocation25_spill]] }
 0x104   : > { %1274 = vmatpush3.bf16.msra.mxu0 %v1488_v1  ;;  %1294 = vmatpush3.bf16.msra.mxu1 %v1497_v4  ;;  %v1493_v9 = vld [vmem:[#allocation5 + $0x28] sm:$0xff]   ;;  %v1500_v10 = vld [vmem:[#allocation8 + $0x18] sm:$0xff]   ;;  %v1494_v11 = vld [vmem:[#allocation5 + $0x30] sm:$0xff]   ;;  %s1010_s1 = sshll.u32 %s458_s13, 4  ;;  %s997_s25 = scalar_lea.sflag [#allocation4], %s2234_s29  ;;  %s2308_s1 = int_to_ptr.vmem [resolvable:$true] %s1010_s1 }
 0x105   : > { %1275 = vmatprep.subr.bf16.mxu0 %v1876_v0  ;;  %1295 = vmatprep.subr.bf16.mxu1 %v1876_v0  ;;  %v1501_v12 = vld [vmem:[#allocation8 + $0x20] sm:$0xff]   ;;  %v1495_v13 = vld [vmem:[#allocation5 + $0x38] sm:$0xff]   ;;  %v1502_v14 = vld [vmem:[#allocation8 + $0x28] sm:$0xff]   ;;  %s1779_s23 = scalar_lea.vmem %s2308_s1, 128  ;;  %p2388_p1 = scmp.ne.s32.totalorder %s2375_s9, 0 }
 0x106   : > { %v1496_v15 = vld [vmem:[%s2238_s18] ss:$16 sps:$4 sm:$0xff]   ;;  %v1505_v28 = vld [vmem:[#allocation14] sm:$0xff]   ;;  %v1507_v31 = vld [vmem:[#allocation14 + $0x10] sm:$0xff]   ;;  %p1780_p12 = scmp.ne.s32.totalorder %s2308_s1, %s1779_s23  ;;  %s1878_s15 = smov [#allocation17]  }
 0x107   : > { %v1503_v16 = vld [vmem:[#allocation8 + $0x30] sm:$0xff]   ;;  %v1504_v17 = vld [vmem:[#allocation8 + $0x38] sm:$0xff]   ;;  %v1509_v33 = vld [vmem:[#allocation14 + $0x20] sm:$0xff]   ;;  %s1783_s22 = sshll.u32 %s1878_s15, 4  ;;  %s1784_s22 = int_to_ptr.vmem [resolvable:$false] %s1783_s22 }
 0x108   : > { %1276 = vmatpush3.bf16.msra.mxu0 %v1489_v2  ;;  %1296 = vmatpush3.bf16.msra.mxu1 %v1498_v6  ;;  %v1184_v18 = vld [vmem:[#allocation7] ss:$0 sm:$0xff]  ;;  %v1506_v30 = vld [vmem:[#allocation14 + $0x8] sm:$0xff]   ;;  %v1511_v35 = vld [vmem:[#allocation14 + $0x30] sm:$0xff]   ;;  %p1781_p13 = pnand %p1780_p12, %p2388_p1  ;;  %s1785_s21 = scalar_lea.vmem %s1784_s22, 256 }
 0x109   : > { %1277 = vmatprep.subr.bf16.mxu0 %v1876_v0  ;;  %1297 = vmatprep.subr.bf16.mxu1 %v1876_v0  ;;  %v1508_v32 = vld [vmem:[#allocation14 + $0x18] sm:$0xff]   ;;  %v1510_v34 = vld [vmem:[#allocation14 + $0x28] sm:$0xff]   ;;  %s2306_s28 = scalar_lea.hbm %s2387_s26, %s1231_s20  ;;  %p1786_p2 = scmp.lt.s32.totalorder %s2308_s1, %s1784_s22 }
 0x10a   : > { %v1512_v36 = vld [vmem:[#allocation14 + $0x38] sm:$0xff]   ;;  %v1514_v38 = vld [vmem:[#allocation11 + $0x8] sm:$0xff]   ;;  %v1515_v39 = vld [vmem:[#allocation11 + $0x10] sm:$0xff]   ;;  %p1782_p0 = pneg %p1781_p13  ;;  %p1787_p8 = scmp.lt.s32.totalorder %s1785_s21, %s1779_s23 }
 0x10b   : > { %v1513_v37 = vld [vmem:[#allocation11] sm:$0xff]   ;;  %v1516_v40 = vld [vmem:[#allocation11 + $0x18] sm:$0xff]   ;;  %v1518_v42 = vld [vmem:[#allocation11 + $0x28] sm:$0xff]  }
 0x10c   : > { %1278 = vmatpush3.bf16.msra.mxu0 %v1490_v3  ;;  %1298 = vmatpush3.bf16.msra.mxu1 %v1499_v8  ;;  %v1517_v41 = vld [vmem:[#allocation11 + $0x20] sm:$0xff]   ;;  %v1519_v43 = vld [vmem:[#allocation11 + $0x30] sm:$0xff]   ;;  %v1520_v44 = vld [vmem:[#allocation11 + $0x38] sm:$0xff]   ;;  %p1788_p4 = por %p1787_p8, %p1786_p2 }
 0x10d   : > { %1279 = vmatprep.subr.bf16.mxu0 %v1876_v0  ;;  %1299 = vmatprep.subr.bf16.mxu1 %v1876_v0  ;;  %v1194_v45 = vld [vmem:[#allocation10] ss:$0 sm:$0xff] }
 0x10e   : > { %p1789_p10 = pnand %p1788_p4, %p1782_p0 }
 0x110   : > { %1280 = vmatpush3.bf16.msra.mxu0 %v1491_v5  ;;  %1300 = vmatpush3.bf16.msra.mxu1 %v1500_v10 }
 0x111   : > { %1281 = vmatprep.subr.bf16.mxu0 %v1876_v0  ;;  %1301 = vmatprep.subr.bf16.mxu1 %v1876_v0 }
 0x114   : > { %1282 = vmatpush3.bf16.msra.mxu0 %v1492_v7  ;;  %1302 = vmatpush3.bf16.msra.mxu1 %v1501_v12 }
 0x115   : > { %1283 = vmatprep.subr.bf16.mxu0 %v1876_v0  ;;  %1303 = vmatprep.subr.bf16.mxu1 %v1876_v0 }
 0x118   : > { %1284 = vmatpush3.bf16.msra.mxu0 %v1493_v9  ;;  %1304 = vmatpush3.bf16.msra.mxu1 %v1502_v14 }
 0x119   : > { %1285 = vmatprep.subr.bf16.mxu0 %v1876_v0  ;;  %1305 = vmatprep.subr.bf16.mxu1 %v1876_v0 }
 0x11c   : > { %1286 = vmatpush3.bf16.msra.mxu0 %v1494_v11  ;;  %1306 = vmatpush3.bf16.msra.mxu1 %v1503_v16 }
 0x11d   : > { %1287 = vmatprep.subr.bf16.mxu0 %v1876_v0  ;;  %1307 = vmatprep.subr.bf16.mxu1 %v1876_v0 }
 0x120   : > { %1288 = vmatpush3.bf16.msra.mxu0 %v1495_v13  ;;  %1308 = vmatpush3.bf16.msra.mxu1 %v1504_v17 }
 0x121   : > { %1313 = vmatprep.subr.bf16.mxu0 %v1876_v0  ;;  %1333 = vmatprep.subr.bf16.mxu1 %v1876_v0 }
 0x123   : > { %1290 = vmatmul.mubr.bf16.vlgmr.msra.gmra.mrb[0].mxu0 %v1496_v15 }
 0x124   : > { %1329 = vmatprep.mubr.msk.bf16.mxu0 %vm1877_vm0, %v1876_v0  ;;  %1314 = vmatpush3.bf16.msra.mxu0 %v1513_v37 }
 0x125   : > { %1315 = vmatprep.subr.bf16.mxu0 %v1876_v0 }
 0x128   : > { %1316 = vmatpush3.bf16.msra.mxu0 %v1514_v38 }
 0x129   : > { %1317 = vmatprep.subr.bf16.mxu0 %v1876_v0 }
 0x12c   : > { %1318 = vmatpush3.bf16.msra.mxu0 %v1515_v39 }
 0x12d   : > { %1319 = vmatprep.subr.bf16.mxu0 %v1876_v0 }
 0x130   : > { %1320 = vmatpush3.bf16.msra.mxu0 %v1516_v40 }
 0x131   : > { %1321 = vmatprep.subr.bf16.mxu0 %v1876_v0 }
 0x134   : > { %1322 = vmatpush3.bf16.msra.mxu0 %v1517_v41 }
 0x135   : > { %1323 = vmatprep.subr.bf16.mxu0 %v1876_v0 }
 0x138   : > { %1324 = vmatpush3.bf16.msra.mxu0 %v1518_v42 }
 0x139   : > { %1325 = vmatprep.subr.bf16.mxu0 %v1876_v0 }
 0x13c   : > { %1326 = vmatpush3.bf16.msra.mxu0 %v1519_v43 }
 0x13d   : > { %1327 = vmatprep.subr.bf16.mxu0 %v1876_v0 }
 0x140   : > { %1328 = vmatpush3.bf16.msra.mxu0 %v1520_v44 }
 0x1f6   : > { %v573_v19 = vpop.f32.mrb[0].mxu0 }
 0x1f7   : > { %v574_v20 = vadd.f32 %v1184_v18, %v573_v19  ;;  %v1291_v21 = vpop.f32.mrb[1].mxu0 }
 0x1f8   : > { %v576_v22 = vpop.f32.mrb[2].mxu0  ;;  %v1203_v21 = vld [vmem:[#allocation13] ss:$0 sm:$0xff] }
 0x1f9   : > { %v577_v23 = vadd.f32 %v1184_v18, %v576_v22  ;;  %v1292_v24 = vpop.f32.mrb[3].mxu0  ;;  %v580_v25 = vmax.f32 %v574_v20, 0.0 }
 0x1fb   : > { %v581_v26 = vmax.f32 %v577_v23, 0.0  ;;  %v869_v27 = vpack.c.bf16 %v577_v23, %v574_v20 }
 0x1fd   : > { %v582_v29 = vpack.c.bf16 %v581_v26, %v580_v25 }
 0x1ff   : > { %1310 = vmatmul.mubr.bf16.vlgmr.msra.gmra.mrb[0].mxu1 %v582_v29 }
 0x200   : > { %1334 = vmatpush3.bf16.msra.mxu1 %v1505_v28  ;;  %1349 = vmatprep.mubr.msk.bf16.mxu1 %vm1877_vm0, %v1876_v0 }
 0x201   : > { %1335 = vmatprep.subr.bf16.mxu1 %v1876_v0 }
 0x204   : > { %1336 = vmatpush3.bf16.msra.mxu1 %v1506_v30 }
 0x205   : > { %1337 = vmatprep.subr.bf16.mxu1 %v1876_v0 }
 0x208   : > { %1338 = vmatpush3.bf16.msra.mxu1 %v1507_v31 }
 0x209   : > { %1339 = vmatprep.subr.bf16.mxu1 %v1876_v0 }
 0x20c   : > { %1340 = vmatpush3.bf16.msra.mxu1 %v1508_v32 }
 0x20d   : > { %1341 = vmatprep.subr.bf16.mxu1 %v1876_v0 }
 0x210   : > { %1342 = vmatpush3.bf16.msra.mxu1 %v1509_v33 }
 0x211   : > { %1343 = vmatprep.subr.bf16.mxu1 %v1876_v0 }
 0x214   : > { %1344 = vmatpush3.bf16.msra.mxu1 %v1510_v34 }
 0x215   : > { %1345 = vmatprep.subr.bf16.mxu1 %v1876_v0 }
 0x218   : > { %1346 = vmatpush3.bf16.msra.mxu1 %v1511_v35 }
 0x219   : > { %1347 = vmatprep.subr.bf16.mxu1 %v1876_v0 }
 0x21c   : > { %1348 = vmatpush3.bf16.msra.mxu1 %v1512_v36 }
 0x21f   : > { %1350 = vmatmul.mubr.bf16.vlgmr.msra.gmra.mrb[4].mxu1 %v869_v27 }
 0x2d2   : > { %v688_v46 = vpop.f32.mrb[0].mxu1 }
 0x2d3   : > { %v1311_v47 = vpop.f32.mrb[1].mxu1  ;;  %v689_v49 = vadd.f32 %v1194_v45, %v688_v46 }
 0x2d4   : > { %v691_v48 = vpop.f32.mrb[2].mxu1 }
 0x2d5   : > { %v692_v50 = vadd.f32 %v1194_v45, %v691_v48  ;;  %v1312_v51 = vpop.f32.mrb[3].mxu1 }
 0x2d7   : > { %v695_v52 = vadd.f32 %v692_v50, %v689_v49 }
 0x2d9   : > { %v696_v53 = vrot.slane %v695_v52, 4 }
 0x2db   : > { %v697_v54 = vadd.f32 %v696_v53, %v695_v52 }
 0x2dd   : > { %v698_v55 = vrot.slane %v697_v54, 2 }
 0x2df   : > { %v699_v56 = vadd.f32 %v698_v55, %v697_v54 }
 0x2e1   : > { %v700_v57 = vrot.slane %v699_v56, 1 }
 0x2e3   : > { %v701_v58 = vadd.f32 %v700_v57, %v699_v56 }
 0x2e5   : > { %v703_v59 = vmul.f32 0.0625, %v701_v58 }
 0x2e7   : > { %v704_v60 = vsub.f32 %v689_v49, %v703_v59  ;;  %v705_v61 = vsub.f32 %v692_v50, %v703_v59  ;;  %v1212_v50 = vld [vmem:[#allocation16] ss:$0 sm:$0xff] }
 0x2e9   : > { %v706_v62 = vmul.f32 %v704_v60, %v704_v60  ;;  %v707_v63 = vmul.f32 %v705_v61, %v705_v61 }
 0x2eb   : > { %v708_v0 = vadd.f32 %v707_v63, %v706_v62 }
 0x2ed   : > { %v709_v1 = vrot.slane %v708_v0, 4 }
 0x2ef   : > { %v710_v2 = vadd.f32 %v709_v1, %v708_v0 }
 0x2f1   : > { %v711_v3 = vrot.slane %v710_v2, 2 }
 0x2f2   : > { %v975_v4 = vpop.f32.mrb[4].mxu1 }
 0x2f3   : > { %v712_v5 = vadd.f32 %v711_v3, %v710_v2  ;;  %v1351_v6 = vpop.f32.mrb[5].mxu1  ;;  %v976_v55 = vadd.f32 %v1212_v50, %v975_v4 }
 0x2f4   : > { %v978_v7 = vpop.f32.mrb[6].mxu1 }
 0x2f5   : > { %v713_v8 = vrot.slane %v712_v5, 1  ;;  %v1352_v9 = vpop.f32.mrb[7].mxu1  ;;  %v979_v56 = vadd.f32 %v1212_v50, %v978_v7 }
 0x2f7   : > { %v714_v10 = vadd.f32 %v713_v8, %v712_v5 }
 0x2f9   : > { %v715_v11 = vmul.f32 0.0625, %v714_v10 }
 0x2fb   : > { %v716_v12 = vadd.f32 1e-05, %v715_v11 }
 0x2fd   : > { %1521 = vrsqrt.f32 %v716_v12 }
 0x307   : > { %v1522_v13 = vpop.eup %1521 }
 0x308   : > { %v718_v14 = vmul.f32 %v1522_v13, %v704_v60  ;;  %v719_v15 = vmul.f32 %v1522_v13, %v705_v61 }
 0x30a   : > { %vm721_vm1 = vcmp.ge.f32.partialorder %v719_v15, 0.0  ;;  %v723_v16 = vmul.f32 0.4, %v719_v15  ;;  %vm720_vm2 = vcmp.ge.f32.partialorder %v718_v14, 0.0  ;;  %v722_v17 = vmul.f32 0.4, %v718_v14 }
 0x30c   : > { %v724_v18 = vsel %vm720_vm2, %v718_v14, %v722_v17  ;;  %v725_v19 = vsel %vm721_vm1, %v719_v15, %v723_v16 }
 0x30d   : > { %v726_v20 = vpack.c.bf16 %v725_v19, %v724_v18 }
 0x30f   : > { %1330 = vmatmul.mubr.bf16.vlgmr.msra.gmra.mrb[4].mxu0 %v726_v20 }
 0x3e2   : > { %v832_v22 = vpop.f32.mrb[4].mxu0 }
 0x3e3   : > { %v1331_v23 = vpop.f32.mrb[5].mxu0  ;;  %v833_v25 = vadd.f32 %v1203_v21, %v832_v22 }
 0x3e4   : > { %v835_v24 = vpop.f32.mrb[6].mxu0 }
 0x3e5   : > { %v836_v26 = vadd.f32 %v1203_v21, %v835_v24  ;;  %v1332_v27 = vpop.f32.mrb[7].mxu0 }
 0x3e7   : > { %v839_v28 = vadd.f32 %v836_v26, %v833_v25 }
 0x3e9   : > { %v840_v29 = vrot.slane %v839_v28, 4 }
 0x3eb   : > { %v841_v30 = vadd.f32 %v840_v29, %v839_v28 }
 0x3ed   : > { %v842_v31 = vrot.slane %v841_v30, 2 }
 0x3ef   : > { %v843_v32 = vadd.f32 %v842_v31, %v841_v30 }
 0x3f1   : > { %v844_v33 = vrot.slane %v843_v32, 1 }
 0x3f3   : > { %v845_v34 = vadd.f32 %v844_v33, %v843_v32 }
 0x3f5   : > { %v846_v35 = vmul.f32 0.0625, %v845_v34 }
 0x3f7   : > { %v847_v36 = vsub.f32 %v833_v25, %v846_v35  ;;  %v848_v37 = vsub.f32 %v836_v26, %v846_v35 }
 0x3f9   : > { %v849_v38 = vmul.f32 %v847_v36, %v847_v36  ;;  %v850_v39 = vmul.f32 %v848_v37, %v848_v37 }
 0x3fb   : > { %v851_v40 = vadd.f32 %v850_v39, %v849_v38 }
 0x3fd   : > { %v852_v41 = vrot.slane %v851_v40, 4 }
 0x3ff   : > { %v853_v42 = vadd.f32 %v852_v41, %v851_v40 }
 0x401   : > { %v854_v43 = vrot.slane %v853_v42, 2 }
 0x403   : > { %v855_v44 = vadd.f32 %v854_v43, %v853_v42 }
 0x405   : > { %v856_v45 = vrot.slane %v855_v44, 1 }
 0x407   : > { %v857_v46 = vadd.f32 %v856_v45, %v855_v44 }
 0x409   : > { %v858_v47 = vmul.f32 0.0625, %v857_v46 }
 0x40b   : > { %v859_v48 = vadd.f32 1e-05, %v858_v47 }
 0x40d   : > { %1523 = vrsqrt.f32 %v859_v48 }
 0x417   : > { %v1524_v49 = vpop.eup %1523 }
 0x418   : > { %v861_v51 = vmul.f32 %v1524_v49, %v847_v36  ;;  %v862_v52 = vmul.f32 %v1524_v49, %v848_v37 }
 0x41a   : > { %vm863_vm3 = vcmp.ge.f32.partialorder %v861_v51, 0.0  ;;  %vm864_vm4 = vcmp.ge.f32.partialorder %v862_v52, 0.0  ;;  %v865_v53 = vmul.f32 0.4, %v861_v51  ;;  %v866_v54 = vmul.f32 0.4, %v862_v52 }
 0x41c   : > { %v867_v57 = vsel %vm863_vm3, %v861_v51, %v865_v53  ;;  %v868_v58 = vsel %vm864_vm4, %v862_v52, %v866_v54 }
 0x41d   : > { %v982_v59 = vadd.f32 %v976_v55, %v867_v57  ;;  %v983_v60 = vadd.f32 %v979_v56, %v868_v58 }
 0x41f   : > { %v984_v61 = vmax.f32 %v982_v59, 0.0  ;;  %v985_v62 = vmax.f32 %v983_v60, 0.0 }
 0x421   : > { %v1235_v63 = vpack.c.bf16 %v985_v62, %v984_v61 }
 0x423   : > { %1236 = vst [vmem:[%s458_s13] sm:$0xff] %v1235_v63  }
 0x424   : > { %1792 = shalt.err (!%p1789_p10)
}
 0x425   : > { %s1793_s18 = scalar_lea.hbm %s2306_s28, 128  ;;  %s1797_s13 = scalar_lea.hbm %s2387_s26, 256 }
 0x426   : > { %p1794_p11 = scmp.ne.s32.totalorder %s2306_s28, %s1793_s18  ;;  %p1798_p7 = scmp.lt.u32.totalorder %s2306_s28, %s2387_s26 }
 0x427   : > { %p1799_p6 = scmp.lt.u32.totalorder %s1797_s13, %s1793_s18  ;;  %p1801_p12 = scmp.lt.u32.totalorder %s1793_s18, %s2306_s28 }
 0x428   : > { %p1795_p3 = pnand %p1794_p11, %p2388_p1 }
 0x429   : > { %p1800_p9 = por %p1799_p6, %p1798_p7 }
 0x42a   : > { %p1796_p5 = pneg %p1795_p3 }
 0x42b   : > { %p1802_p13 = por %p1801_p12, %p1800_p9 }
 0x42d   : > { %p1803_p0 = pnand %p1802_p13, %p1796_p5 }
 0x42f   : > { %1806 = shalt.err (!%p1803_p0)
}
 0x430   : > { %s1879_s23 = smov 64   ;;  %s1880_s15 = smov 4  }
 0x431   : > { %1387 = dma.vmem_to_hbm [thread:$0]  (%p2388_p1), %s2308_s1, 128, %s2306_s28, %s997_s25, %s1879_s23, %s1879_s23, %s1880_s15  }
 0x432 PF: > { %s1025_s22 = sand.u32 1, %s1849_s30   ;;  %p2389_p2 = scmp.ne.s32.totalorder %s2376_s24, 0 }
 0x433   : > { %p2390_p8 = scmp.ge.s32.totalorder %s1861_s12, 2  ;;  %s1026_s21 = scalar_lea.sflag [#allocation4], %s1025_s22 }
 0x435   : > { %p1419_p4 = pnand %p2390_p8, %p2389_p2 }
 0x437   : > { %1844 = dma.done.wait (!%p1419_p4), %s1026_s21, 128  }
 0x438   : > { %1846 = vsyncadd (!%p1419_p4), %s1026_s21, 4294967168  ;;  %p26_p10 = scmp.ge.s32.totalorder %s2155_s19, 4   ;;  %s2391_s30 = smov %s1853_s10 }
 0x439   : > { %s2392_s10 = smov %s1857_s11  ;;  %s2393_s11 = smov %s2166_s17 }
 0x43a   : > { %s2394_s12 = smov %s2155_s19  ;;  %28 = sbr.rel (!%p26_p10) target bundleno = 12 (0xc), region = 133 }
 0x441   :  { %1031 = vsyncpa [#allocation3], 1 }
 0x442   :  { %1033 = vsyncpa [#allocation3 + $0x1], 1 }
 0x443   :  { %1034 = vsyncpa [#allocation6], 1 }
 0x444   :  { %1035 = vsyncpa [#allocation9], 1 }
 0x445   :  { %1036 = vsyncpa [#allocation12], 1 }
 0x446   :  { %1037 = vsyncpa [#allocation15], 1 }
 0x447   :  { %1038 = vsyncpa [#allocation4], 1 }
 0x448   :  { %1040 = vsyncpa [#allocation4 + $0x1], 1 }

// kernel: encoder_forward.6
= control target key start
LH: loop header
LB: loop body
LE: loop exit
PB: predicated region body
PF: predicated region fallthrough
CT: control target
= control target key end

     0   :  { %s2647_s0 = inlined_call_operand.hbm [shape: bf16[2,64,256], index: 0, kind: input, shape index: {}]   ;;  %s2648_s1 = inlined_call_operand.hbm [shape: bf16[64,128], index: 1, kind: input, shape index: {}]   ;;  %s2649_s2 = inlined_call_operand.hbm [shape: f32[1,128], index: 2, kind: input, shape index: {}]   ;;  %s2650_s3 = inlined_call_operand.hbm [shape: bf16[128,128], index: 3, kind: input, shape index: {}]   ;;  %s2651_s4 = inlined_call_operand.hbm [shape: f32[1,128], index: 4, kind: input, shape index: {}]   ;;  %s2652_s5 = inlined_call_operand.hbm [shape: bf16[128,128], index: 5, kind: input, shape index: {}]   ;;  %s2653_s6 = inlined_call_operand.hbm [shape: f32[1,128], index: 6, kind: input, shape index: {}]   ;;  %s2654_s7 = inlined_call_operand.hbm [shape: bf16[128,128], index: 7, kind: input, shape index: {}]   ;;  %s2655_s8 = inlined_call_operand.hbm [shape: f32[1,128], index: 8, kind: input, shape index: {}]   ;;  %s2656_s9 = inlined_call_operand.hbm [shape: bf16[2,64,128], index: 9, kind: output, shape index: {}]  }
   0x1   :  { %2661 = sst [smem:[#allocation24_spill]] %s2648_s1 }
   0x2   :  { %2662 = sst [smem:[#allocation25_spill]] %s2656_s9 }
   0x3   :  { %14 = vsyncpa [#allocation3], 0 }
   0x4   :  { %16 = vsyncpa [#allocation3 + $0x1], 0 }
   0x5   :  { %17 = vsyncpa [#allocation6], 0 }
   0x6   :  { %18 = vsyncpa [#allocation9], 0 }
   0x7   :  { %19 = vsyncpa [#allocation12], 0 }
   0x8   :  { %20 = vsyncpa [#allocation15], 0 }
   0x9   :  { %21 = vsyncpa [#allocation4], 0 }
   0xa   :  { %23 = vsyncpa [#allocation4 + $0x1], 0  ;;  %s2225_s30 = smov 0   ;;  %s2227_s10 = smov 0  }
   0xb   :  { %s2229_s11 = smov 0   ;;  %s2231_s12 = smov 0  }
   0xc LB: > { %s2159_s13 = smov [#allocation5]   ;;  %s2246_s15 = sadd.s32 4294967295, %s2157_s12   ;;  %s2157_s12 = sphi %s2231_s12, %s2689_s12   ;;  %s2153_s11 = sphi %s2229_s11, %s2688_s11   ;;  %s2149_s10 = sphi %s2227_s10, %s2687_s10   ;;  %s2145_s30 = sphi %s2225_s30, %s2686_s30  }
   0xd   : > { %s266_s14 = sshll.u32 %s2159_s13, 4  ;;  %p1410_p0 = scmp.ge.s32.totalorder %s2157_s12, 1  ;;  %s2251_s14 = int_to_ptr.vmem [resolvable:$true] %s266_s14 }
   0xe   : > { %p2658_p1 = scmp.eq.s32.totalorder %s2246_s15, 0  ;;  %p254_p2 = scmp.lt.s32.totalorder %s2157_s12, 3 }
   0xf   : > { %s2160_s17 = smov [#allocation8]   ;;  %s2161_s20 = smov [#allocation11]  }
  0x10   : > { %p2253_p3 = pnand %p1410_p0, %p254_p2  ;;  %s290_s18 = sshll.u32 %s2160_s17, 4  ;;  %s2266_s18 = int_to_ptr.vmem [resolvable:$true] %s290_s18 }
  0x11   : > { %s314_s21 = sshll.u32 %s2161_s20, 4  ;;  %s2665_s1 = sld [smem:[#allocation24_spill]]  ;;  %s2268_s21 = int_to_ptr.vmem [resolvable:$true] %s314_s21 }
  0x12   : > { %s2663_s16 = scalar_select %p2253_p3, 1, 0 }
  0x13   : > { %p1688_p5 = pneg %p2253_p3 }
  0x15   : > { %p2262_p6 = pnand %p1688_p5, %p2658_p1 }
  0x17   : > { %s1821_s24 = scalar_lea.hbm %s2665_s1, 512  ;;  %p2278_p8 = pneg %p2262_p6 }
  0x18   : > { %p1822_p7 = scmp.ne.s32.totalorder %s2665_s1, %s1821_s24  ;;  %p1828_p11 = scmp.lt.u32.totalorder %s1821_s24, %s2665_s1 }
  0x1a   : > { %p1824_p9 = pnand %p2278_p8, %p1822_p7 }
  0x1c   : > { %p1825_p10 = pneg %p1824_p9 }
  0x1e   : > { %p1830_p12 = pnand %p1828_p11, %p1825_p10 }
  0x20   : > { %1833 = shalt.err (!%p1830_p12)
}
  0x21   : > { %s1834_s13 = scalar_lea.vmem %s2251_s14, 512  ;;  %p1842_p5 = scmp.lt.s32.totalorder %s2251_s14, %s2251_s14 }
  0x22   : > { %p1835_p13 = scmp.ne.s32.totalorder %s2251_s14, %s1834_s13  ;;  %p1843_p4 = scmp.lt.s32.totalorder %s1834_s13, %s1834_s13 }
  0x24   : > { %p1837_p0 = pnand %p1835_p13, %p2278_p8  ;;  %p1844_p7 = por %p1843_p4, %p1842_p5 }
  0x26   : > { %p1838_p2 = pneg %p1837_p0 }
  0x28   : > { %p1845_p9 = pnand %p1844_p7, %p1838_p2 }
  0x2a   : > { %1848 = shalt.err (!%p1845_p9)
}
  0x2b   : > { %s2162_s17 = smov 64   ;;  %s2163_s20 = smov 4  }
  0x2c   : > { %1691 = dma.hbm_to_vmem [thread:$0]  (!%p2262_p6), %s2665_s1, 512, %s2251_s14, [#allocation6], %s2162_s17, %s2162_s17, %s2163_s20  }
  0x2d   : > { %s1849_s26 = scalar_lea.hbm %s2650_s3, 1024 }
  0x2e   : > { %p1850_p4 = scmp.ne.s32.totalorder %s2650_s3, %s1849_s26  ;;  %p1856_p12 = scmp.lt.u32.totalorder %s1849_s26, %s2650_s3 }
  0x30   : > { %p1852_p10 = pnand %p1850_p4, %p2278_p8 }
  0x32   : > { %p1853_p11 = pneg %p1852_p10 }
  0x34   : > { %p1858_p13 = pnand %p1856_p12, %p1853_p11 }
  0x36   : > { %1861 = shalt.err (!%p1858_p13)
}
  0x37   : > { %s1862_s14 = scalar_lea.vmem %s2266_s18, 1024  ;;  %p1870_p7 = scmp.lt.s32.totalorder %s2266_s18, %s2266_s18 }
  0x38   : > { %p1863_p0 = scmp.ne.s32.totalorder %s2266_s18, %s1862_s14  ;;  %p1871_p9 = scmp.lt.s32.totalorder %s1862_s14, %s1862_s14 }
  0x3a   : > { %p1865_p2 = pnand %p1863_p0, %p2278_p8  ;;  %p1872_p4 = por %p1871_p9, %p1870_p7 }
  0x3c   : > { %p1866_p5 = pneg %p1865_p2 }
  0x3e   : > { %p1873_p10 = pnand %p1872_p4, %p1866_p5 }
  0x40   : > { %1876 = shalt.err (!%p1873_p10)
}
  0x41   : > { %1697 = dma.hbm_to_vmem [thread:$0]  (!%p2262_p6), %s2650_s3, 1024, %s2266_s18, [#allocation9], %s2162_s17, %s2162_s17, %s2163_s20  }
  0x42   : > { %s1877_s25 = scalar_lea.hbm %s2652_s5, 1024 }
  0x43   : > { %p1878_p11 = scmp.ne.s32.totalorder %s2652_s5, %s1877_s25  ;;  %p1884_p0 = scmp.lt.u32.totalorder %s1877_s25, %s2652_s5 }
  0x45   : > { %p1880_p12 = pnand %p1878_p11, %p2278_p8 }
  0x47   : > { %p1881_p13 = pneg %p1880_p12 }
  0x49   : > { %p1886_p2 = pnand %p1884_p0, %p1881_p13 }
  0x4b   : > { %1889 = shalt.err (!%p1886_p2)
}
  0x4c   : > { %s1890_s18 = scalar_lea.vmem %s2268_s21, 1024  ;;  %p1898_p4 = scmp.lt.s32.totalorder %s2268_s21, %s2268_s21 }
  0x4d   : > { %p1891_p5 = scmp.ne.s32.totalorder %s2268_s21, %s1890_s18  ;;  %p1899_p10 = scmp.lt.s32.totalorder %s1890_s18, %s1890_s18 }
  0x4f   : > { %p1893_p7 = pnand %p1891_p5, %p2278_p8  ;;  %p1900_p11 = por %p1899_p10, %p1898_p4 }
  0x51   : > { %p1894_p9 = pneg %p1893_p7 }
  0x53   : > { %p1901_p12 = pnand %p1900_p11, %p1894_p9 }
  0x55   : > { %1904 = shalt.err (!%p1901_p12)
}
  0x56   : > { %1703 = dma.hbm_to_vmem [thread:$0]  (!%p2262_p6), %s2652_s5, 1024, %s2268_s21, [#allocation12], %s2162_s17, %s2162_s17, %s2163_s20  }
  0x57   : > { %s2164_s22 = smov [#allocation14]   ;;  %s2165_s24 = smov [#allocation7]  }
  0x58   : > { %s338_s23 = sshll.u32 %s2164_s22, 4  ;;  %s280_s25 = sshll.u32 %s2165_s24, 4  ;;  %s339_s23 = int_to_ptr.vmem [resolvable:$true] %s338_s23  ;;  %s281_s25 = int_to_ptr.vmem [resolvable:$true] %s280_s25 }
  0x59   : > { %s1905_s29 = scalar_lea.hbm %s2654_s7, 1024 }
  0x5a   : > { %p1906_p13 = scmp.ne.s32.totalorder %s2654_s7, %s1905_s29  ;;  %p1912_p5 = scmp.lt.u32.totalorder %s1905_s29, %s2654_s7 }
  0x5c   : > { %p1908_p0 = pnand %p1906_p13, %p2278_p8 }
  0x5e   : > { %p1909_p2 = pneg %p1908_p0 }
  0x60   : > { %p1914_p7 = pnand %p1912_p5, %p1909_p2 }
  0x62   : > { %1917 = shalt.err (!%p1914_p7)
}
  0x63   : > { %s1918_s21 = scalar_lea.vmem %s339_s23, 1024  ;;  %p1926_p11 = scmp.lt.s32.totalorder %s339_s23, %s339_s23 }
  0x64   : > { %p1919_p9 = scmp.ne.s32.totalorder %s339_s23, %s1918_s21  ;;  %p1927_p12 = scmp.lt.s32.totalorder %s1918_s21, %s1918_s21 }
  0x66   : > { %p1921_p4 = pnand %p1919_p9, %p2278_p8  ;;  %p1928_p1 = por %p1927_p12, %p1926_p11 }
  0x68   : > { %p1922_p10 = pneg %p1921_p4 }
  0x6a   : > { %p1929_p3 = pnand %p1928_p1, %p1922_p10 }
  0x6c   : > { %1932 = shalt.err (!%p1929_p3)
}
  0x6d   : > { %1709 = dma.hbm_to_vmem [thread:$0]  (!%p2262_p6), %s2654_s7, 1024, %s339_s23, [#allocation15], %s2162_s17, %s2162_s17, %s2163_s20  }
  0x6e   : > { %s1933_s26 = scalar_lea.hbm %s2649_s2, 16 }
  0x6f   : > { %p1934_p1 = scmp.ne.s32.totalorder %s2649_s2, %s1933_s26  ;;  %p1940_p0 = scmp.lt.u32.totalorder %s1933_s26, %s2649_s2 }
  0x71   : > { %p1936_p3 = pnand %p1934_p1, %p2278_p8 }
  0x73   : > { %p1937_p13 = pneg %p1936_p3 }
  0x75   : > { %p1942_p2 = pnand %p1940_p0, %p1937_p13 }
  0x77   : > { %1945 = shalt.err (!%p1942_p2)
}
  0x78   : > { %s1946_s14 = scalar_lea.vmem %s281_s25, 16  ;;  %s1953_s17 = scalar_lea.vmem %s281_s25, 32 }
  0x79   : > { %p1947_p5 = scmp.ne.s32.totalorder %s281_s25, %s1946_s14  ;;  %p1954_p4 = scmp.lt.s32.totalorder %s281_s25, %s281_s25 }
  0x7a   : > { %p1955_p10 = scmp.lt.s32.totalorder %s1953_s17, %s1946_s14 }
  0x7b   : > { %p1949_p7 = pnand %p1947_p5, %p2278_p8 }
  0x7c   : > { %p1956_p11 = por %p1955_p10, %p1954_p4 }
  0x7d   : > { %p1950_p9 = pneg %p1949_p7 }
  0x7f   : > { %p1957_p12 = pnand %p1956_p11, %p1950_p9 }
  0x81   : > { %1960 = shalt.err (!%p1957_p12)
}
  0x82   : > { %1694 = dma.hbm_to_vmem [thread:$0]  (!%p2262_p6), %s2649_s2, 16, %s281_s25, [#allocation6]  }
  0x83   : > { %s2166_s21 = smov [#allocation10]   ;;  %s2167_s9 = smov [#allocation13]  }
  0x84   : > { %s304_s1 = sshll.u32 %s2166_s21, 4  ;;  %s328_s22 = sshll.u32 %s2167_s9, 4  ;;  %s305_s1 = int_to_ptr.vmem [resolvable:$true] %s304_s1  ;;  %s329_s22 = int_to_ptr.vmem [resolvable:$true] %s328_s22 }
  0x85   : > { %s1961_s28 = scalar_lea.hbm %s2651_s4, 16 }
  0x86   : > { %p1962_p1 = scmp.ne.s32.totalorder %s2651_s4, %s1961_s28  ;;  %p1968_p0 = scmp.lt.u32.totalorder %s1961_s28, %s2651_s4 }
  0x88   : > { %p1964_p3 = pnand %p1962_p1, %p2278_p8 }
  0x8a   : > { %p1965_p13 = pneg %p1964_p3 }
  0x8c   : > { %p1970_p2 = pnand %p1968_p0, %p1965_p13 }
  0x8e   : > { %1973 = shalt.err (!%p1970_p2)
}
  0x8f   : > { %s1974_s25 = scalar_lea.vmem %s305_s1, 16  ;;  %s1981_s17 = scalar_lea.vmem %s305_s1, 32 }
  0x90   : > { %p1975_p5 = scmp.ne.s32.totalorder %s305_s1, %s1974_s25  ;;  %p1982_p4 = scmp.lt.s32.totalorder %s305_s1, %s305_s1 }
  0x91   : > { %p1983_p10 = scmp.lt.s32.totalorder %s1981_s17, %s1974_s25 }
  0x92   : > { %p1977_p7 = pnand %p1975_p5, %p2278_p8 }
  0x93   : > { %p1984_p11 = por %p1983_p10, %p1982_p4 }
  0x94   : > { %p1978_p9 = pneg %p1977_p7 }
  0x96   : > { %p1985_p12 = pnand %p1984_p11, %p1978_p9 }
  0x98   : > { %1988 = shalt.err (!%p1985_p12)
}
  0x99   : > { %1700 = dma.hbm_to_vmem [thread:$0]  (!%p2262_p6), %s2651_s4, 16, %s305_s1, [#allocation9]  }
  0x9a   : > { %s1989_s24 = scalar_lea.hbm %s2653_s6, 16 }
  0x9b   : > { %p1990_p1 = scmp.ne.s32.totalorder %s2653_s6, %s1989_s24  ;;  %p1996_p0 = scmp.lt.u32.totalorder %s1989_s24, %s2653_s6 }
  0x9d   : > { %p1992_p3 = pnand %p1990_p1, %p2278_p8 }
  0x9f   : > { %p1993_p13 = pneg %p1992_p3 }
  0xa1   : > { %p1998_p2 = pnand %p1996_p0, %p1993_p13 }
  0xa3   : > { %2001 = shalt.err (!%p1998_p2)
}
  0xa4   : > { %s2002_s18 = scalar_lea.vmem %s329_s22, 16  ;;  %s2009_s1 = scalar_lea.vmem %s329_s22, 32 }
  0xa5   : > { %p2003_p5 = scmp.ne.s32.totalorder %s329_s22, %s2002_s18  ;;  %p2010_p4 = scmp.lt.s32.totalorder %s329_s22, %s329_s22 }
  0xa6   : > { %p2011_p10 = scmp.lt.s32.totalorder %s2009_s1, %s2002_s18 }
  0xa7   : > { %p2005_p7 = pnand %p2003_p5, %p2278_p8 }
  0xa8   : > { %p2012_p11 = por %p2011_p10, %p2010_p4 }
  0xa9   : > { %p2006_p9 = pneg %p2005_p7 }
  0xab   : > { %p2013_p12 = pnand %p2012_p11, %p2006_p9 }
  0xad   : > { %2016 = shalt.err (!%p2013_p12)
}
  0xae   : > { %1706 = dma.hbm_to_vmem [thread:$0]  (!%p2262_p6), %s2653_s6, 16, %s329_s22, [#allocation12]  }
  0xaf   : > { %s2168_s17 = smov [#allocation16]   ;;  %s2017_s9 = scalar_lea.hbm %s2655_s8, 16 }
  0xb0   : > { %s352_s20 = sshll.u32 %s2168_s17, 4  ;;  %p2018_p1 = scmp.ne.s32.totalorder %s2655_s8, %s2017_s9  ;;  %s353_s20 = int_to_ptr.vmem [resolvable:$true] %s352_s20 }
  0xb1   : > { %p2024_p0 = scmp.lt.u32.totalorder %s2017_s9, %s2655_s8 }
  0xb2   : > { %p2020_p3 = pnand %p2018_p1, %p2278_p8 }
  0xb4   : > { %p2021_p13 = pneg %p2020_p3 }
  0xb6   : > { %p2026_p2 = pnand %p2024_p0, %p2021_p13 }
  0xb8   : > { %2029 = shalt.err (!%p2026_p2)
}
  0xb9   : > { %s2030_s22 = scalar_lea.vmem %s353_s20, 16  ;;  %s2037_s13 = scalar_lea.vmem %s353_s20, 32 }
  0xba   : > { %p2031_p5 = scmp.ne.s32.totalorder %s353_s20, %s2030_s22  ;;  %p2038_p4 = scmp.lt.s32.totalorder %s353_s20, %s353_s20 }
  0xbb   : > { %p2039_p10 = scmp.lt.s32.totalorder %s2037_s13, %s2030_s22 }
  0xbc   : > { %p2033_p7 = pnand %p2031_p5, %p2278_p8 }
  0xbd   : > { %p2040_p11 = por %p2039_p10, %p2038_p4 }
  0xbe   : > { %p2034_p9 = pneg %p2033_p7 }
  0xc0   : > { %p2041_p12 = pnand %p2040_p11, %p2034_p9 }
  0xc2   : > { %2044 = shalt.err (!%p2041_p12)
}
  0xc3   : > { %1712 = dma.hbm_to_vmem [thread:$0]  (!%p2262_p6), %s2655_s8, 16, %s353_s20, [#allocation15]  }
  0xc4   : > { %s1409_s27 = sadd.s32 4294967294, %s2157_s12   ;;  %s2449_s19 = sadd.s32 1, %s2157_s12  }
  0xc5   : > { %s33_s14 = ssub.s32 %s2157_s12, %s2449_s19  ;;  %s36_s25 = sadd.s32 1, %s2153_s11 }
  0xc6   : > { %p34_p8 = scmp.eq.s32.totalorder %s33_s14, 0  ;;  %p43_p1 = scmp.ne.s32.totalorder %s2153_s11, %s2149_s10 }
  0xc7   : > { %p44_p3 = scmp.eq.s32.totalorder %s2157_s12, 0  ;;  %p49_p13 = scmp.ne.s32.totalorder %s2149_s10, %s2145_s30 }
  0xc8   : > { %s2460_s17 = scalar_select %p34_p8, %s2153_s11, %s36_s25  }
  0xc9   : > { %p2462_p0 = por %p44_p3, %p43_p1  ;;  %p2668_p2 = scmp.eq.s32.totalorder %s2246_s15, 0 }
  0xca   : > { %p241_p5 = scmp.eq.s32.totalorder %s2246_s15, 1  ;;  %p247_p7 = scmp.eq.s32.totalorder %s1409_s27, 1 }
  0xcb   : > { %p2468_p6 = por %p2668_p2, %p49_p13  ;;  %p1729_p9 = scmp.lt.s32.totalorder %s2157_s12, 2 }
  0xcc   : > { %s363_s21 = sand.u32 1, %s2153_s11   ;;  %p2475_p4 = por %p241_p5, %p43_p1 }
  0xcd   : > { %p2479_p10 = por %p247_p7, %p49_p13  ;;  %s1420_s26 = sshll.u32 %s363_s21, 6 }
  0xce   : > { %s2670_s9 = scalar_select %p2475_p4, 1, 0 }
  0xcf   : > { %s2671_s24 = scalar_select %p2479_p10, 1, 0 }
  0xd0   : > { %s1487_s28 = sshll.u32 %s2157_s12, 10  ;;  %s367_s18 = scalar_lea.vmem [#allocation2], %s1420_s26 }
  0xd1   : > { %s2487_s13 = scalar_lea.hbm %s2647_s0, %s1487_s28  ;;  %s374_s1 = sshll.u32 %s367_s18, 4  ;;  %s2489_s1 = int_to_ptr.vmem [resolvable:$true] %s374_s1 }
  0xd2   : > { %p2493_p11 = pnand %p1729_p9, %p2462_p0  ;;  %s2497_s14 = scalar_lea.sflag [#allocation3], %s363_s21 }
  0xd3   : > { %s2045_s25 = scalar_lea.hbm %s2487_s13, 1024  ;;  %s2050_s23 = scalar_lea.hbm %s2647_s0, 2048 }
  0xd4   : > { %p2046_p12 = scmp.ne.s32.totalorder %s2487_s13, %s2045_s25  ;;  %p2047_p8 = pneg %p2493_p11 }
  0xd5   : > { %p2051_p13 = scmp.lt.u32.totalorder %s2487_s13, %s2647_s0  ;;  %p2052_p0 = scmp.lt.u32.totalorder %s2050_s23, %s2045_s25 }
  0xd6   : > { %p2048_p1 = pnand %p2047_p8, %p2046_p12  ;;  %p2054_p5 = scmp.lt.u32.totalorder %s2045_s25, %s2487_s13 }
  0xd7   : > { %p2053_p2 = por %p2052_p0, %p2051_p13 }
  0xd8   : > { %p2049_p3 = pneg %p2048_p1 }
  0xd9   : > { %p2055_p7 = por %p2054_p5, %p2053_p2 }
  0xdb   : > { %p2056_p9 = pnand %p2055_p7, %p2049_p3 }
  0xdd   : > { %2059 = shalt.err (!%p2056_p9)
}
  0xde   : > { %s2060_s21 = scalar_lea.vmem %s2489_s1, 1024  ;;  %s2169_s18 = smov [#allocation2]  }
  0xdf   : > { %p2061_p12 = scmp.ne.s32.totalorder %s2489_s1, %s2060_s21  ;;  %s2065_s26 = sshll.u32 %s2169_s18, 4  ;;  %s2066_s26 = int_to_ptr.vmem [resolvable:$false] %s2065_s26 }
  0xe0   : > { %s2067_s28 = scalar_lea.vmem %s2066_s26, 2048  ;;  %p2068_p4 = scmp.lt.s32.totalorder %s2489_s1, %s2066_s26 }
  0xe1   : > { %p2063_p1 = pnand %p2061_p12, %p2047_p8  ;;  %p2069_p13 = scmp.lt.s32.totalorder %s2067_s28, %s2060_s21 }
  0xe3   : > { %p2064_p10 = pneg %p2063_p1  ;;  %p2070_p0 = por %p2069_p13, %p2068_p4 }
  0xe5   : > { %p2071_p2 = pnand %p2070_p0, %p2064_p10 }
  0xe7   : > { %2074 = shalt.err (!%p2071_p2)
}
  0xe8   : > { %s2170_s25 = smov 128   ;;  %s2171_s23 = smov 8  }
  0xe9   : > { %1716 = dma.hbm_to_vmem [thread:$0]  (!%p2493_p11), %s2487_s13, 1024, %s2489_s1, %s2497_s14, %s2170_s25, %s2170_s25, %s2171_s23  }
  0xea   : > { %p2673_p8 = scmp.ne.s32.totalorder %s2663_s16, 0 }
  0xeb   : > { %s2528_s29 = sand.u32 (!%p2673_p8), 1, %s2149_s10  }
  0xec   : > { %386 = sbr.rel (%p2673_p8) target bundleno = 1116 (0x45c), region = 56  ;;  %s1424_s22 = sshll.u32 (!%p2673_p8), %s2528_s29, 6 }
  0xed   : > { %s389_s21 = scalar_lea.sflag (!%p2673_p8), [#allocation3], %s2528_s29  ;;  %s2532_s18 = scalar_lea.vmem (!%p2673_p8), [#allocation2], %s1424_s22 }
  0xf3   : > { %2120 = dma.done.wait (%p2468_p6), %s389_s21, 1024  }
  0xf4   : > { %2122 = vsyncadd (%p2468_p6), %s389_s21, 4294966272  ;;  %p2674_p4 = scmp.eq.s32.totalorder %s2246_s15, 0 }
  0xf6   : > { %2124 = dma.done.wait (%p2674_p4), [#allocation6], 528   ;;  %p2675_p10 = pmov %p2674_p4 }
  0xf7   : > { %p2676_p11 = pmov %p2674_p4 }
  0xf8   : > { %2126 = vsyncadd (%p2675_p10), [#allocation6], 4294966768 }
  0xf9   : > { %2128 = dma.done.wait (%p2676_p11), [#allocation9], 1040   ;;  %p2677_p3 = pmov %p2674_p4 }
  0xfb   : > { %2130 = vsyncadd (%p2677_p3), [#allocation9], 4294966256  ;;  %p2678_p5 = pmov %p2677_p3 }
  0xfc   : > { %p2679_p7 = pmov %p2677_p3 }
  0xfd   : > { %2132 = dma.done.wait (%p2678_p5), [#allocation12], 1040  }
  0xfe   : > { %2134 = vsyncadd (%p2679_p7), [#allocation12], 4294966256  ;;  %p2680_p6 = pmov %p2677_p3 }
  0xff   : > { %p2681_p9 = pmov %p2677_p3 }
 0x100   : > { %2136 = dma.done.wait (%p2680_p6), [#allocation15], 1040  }
 0x101   : > { %2138 = vsyncadd (%p2681_p9), [#allocation15], 4294966256  ;;  %v1785_v0 = vld [vmem:[#allocation5] sm:$0xff]   ;;  %v1786_v1 = vld [vmem:[#allocation5 + $0x8] sm:$0xff]   ;;  %vm527_vm0 = vcmask 523264   ;;  %s1433_s16 = sshll.u32 %s2528_s29, 5 }
 0x102   : > { %1564 = vmatprep.subr.bf16.mxu0 %v1785_v0  ;;  %v1787_v2 = vld [vmem:[#allocation5 + $0x10] sm:$0xff]   ;;  %v1789_v3 = vld [vmem:[%s2532_s18] ss:$8 sps:$4 sm:$0xff]   ;;  %v1788_v4 = vld [vmem:[#allocation5 + $0x18] sm:$0xff]   ;;  %s1496_s20 = sshll.u32 %s2246_s15, 9  ;;  %s458_s13 = scalar_lea.vmem [#allocation17], %s1433_s16 }
 0x103   : > { %1565 = vmatpush3.bf16.msra.mxu0 %v1785_v0  ;;  %1572 = vmatprep.mubr.msk.bf16.mxu0 %vm527_vm0, %v1789_v3  ;;  %v1793_v5 = vld [vmem:[#allocation8] sm:$0xff]   ;;  %v1794_v6 = vld [vmem:[#allocation8 + $0x8] sm:$0xff]   ;;  %v1795_v8 = vld [vmem:[#allocation8 + $0x10] sm:$0xff]   ;;  %s1260_s1 = sshll.u32 %s458_s13, 4  ;;  %s2682_s26 = sld [smem:[#allocation25_spill]]  ;;  %s2603_s1 = int_to_ptr.vmem [resolvable:$true] %s1260_s1 }
 0x104   : > { %1566 = vmatprep.subr.bf16.mxu0 %v1786_v1  ;;  %1580 = vmatprep.subr.bf16.mxu1 %v1793_v5  ;;  %v1790_v7 = vld [vmem:[%s2532_s18 + $0x10] ss:$8 sps:$4 sm:$0xff]   ;;  %v1791_v9 = vld [vmem:[%s2532_s18 + $0x20] ss:$8 sps:$4 sm:$0xff]   ;;  %s1247_s15 = scalar_lea.sflag [#allocation4], %s2528_s29  ;;  %s2075_s25 = scalar_lea.vmem %s2603_s1, 512 }
 0x105   : > { %1581 = vmatpush3.bf16.msra.mxu1 %v1793_v5  ;;  %v1796_v10 = vld [vmem:[#allocation8 + $0x18] sm:$0xff]   ;;  %v1797_v11 = vld [vmem:[#allocation8 + $0x20] sm:$0xff]   ;;  %v1798_v13 = vld [vmem:[#allocation8 + $0x28] sm:$0xff]   ;;  %p2076_p12 = scmp.ne.s32.totalorder %s2603_s1, %s2075_s25  ;;  %p2683_p1 = scmp.ne.s32.totalorder %s2670_s9, 0 }
 0x106   : > { %1582 = vmatprep.subr.bf16.mxu1 %v1794_v6  ;;  %v1792_v12 = vld [vmem:[%s2532_s18 + $0x30] ss:$8 sps:$4 sm:$0xff]   ;;  %v1801_v16 = vld [vmem:[#allocation14] sm:$0xff]   ;;  %v1434_v17 = vld [vmem:[#allocation7] ss:$0 sm:$0xff]  ;;  %s2172_s23 = smov [#allocation17]  }
 0x107   : > { %1567 = vmatpush3.bf16.msra.mxu0 %v1786_v1  ;;  %v1799_v14 = vld [vmem:[#allocation8 + $0x30] sm:$0xff]   ;;  %v1800_v15 = vld [vmem:[#allocation8 + $0x38] sm:$0xff]   ;;  %v1805_v53 = vld [vmem:[#allocation14 + $0x20] sm:$0xff]   ;;  %p2077_p13 = pnand %p2076_p12, %p2683_p1  ;;  %s2079_s22 = sshll.u32 %s2172_s23, 4  ;;  %s2080_s22 = int_to_ptr.vmem [resolvable:$false] %s2079_s22 }
 0x108   : > { %1568 = vmatprep.subr.bf16.mxu0 %v1787_v2  ;;  %v1802_v37 = vld [vmem:[#allocation14 + $0x8] sm:$0xff]   ;;  %v1803_v46 = vld [vmem:[#allocation14 + $0x10] sm:$0xff]   ;;  %v1804_v52 = vld [vmem:[#allocation14 + $0x18] sm:$0xff]   ;;  %s2081_s21 = scalar_lea.vmem %s2080_s22, 1024  ;;  %p2082_p2 = scmp.lt.s32.totalorder %s2603_s1, %s2080_s22 }
 0x109   : > { %1583 = vmatpush3.bf16.msra.mxu1 %v1794_v6  ;;  %v1806_v54 = vld [vmem:[#allocation14 + $0x28] sm:$0xff]   ;;  %v1807_v55 = vld [vmem:[#allocation14 + $0x30] sm:$0xff]   ;;  %v1808_v56 = vld [vmem:[#allocation14 + $0x38] sm:$0xff]   ;;  %s2601_s28 = scalar_lea.hbm %s2682_s26, %s1496_s20  ;;  %p2078_p0 = pneg %p2077_p13 }
 0x10a   : > { %1584 = vmatprep.subr.bf16.mxu1 %v1795_v8  ;;  %v1809_v57 = vld [vmem:[#allocation11] sm:$0xff]   ;;  %v1810_v58 = vld [vmem:[#allocation11 + $0x8] sm:$0xff]   ;;  %v1811_v59 = vld [vmem:[#allocation11 + $0x10] sm:$0xff]   ;;  %p2083_p8 = scmp.lt.s32.totalorder %s2081_s21, %s2075_s25 }
 0x10b   : > { %1569 = vmatpush3.bf16.msra.mxu0 %v1787_v2  ;;  %v1812_v60 = vld [vmem:[#allocation11 + $0x18] sm:$0xff]   ;;  %v1813_v61 = vld [vmem:[#allocation11 + $0x20] sm:$0xff]   ;;  %v1814_v62 = vld [vmem:[#allocation11 + $0x28] sm:$0xff]  }
 0x10c   : > { %1570 = vmatprep.subr.bf16.mxu0 %v1788_v4  ;;  %v1815_v63 = vld [vmem:[#allocation11 + $0x30] sm:$0xff]   ;;  %v1816_v0 = vld [vmem:[#allocation11 + $0x38] sm:$0xff]   ;;  %p2084_p4 = por %p2083_p8, %p2082_p2 }
 0x10d   : > { %1585 = vmatpush3.bf16.msra.mxu1 %v1795_v8  ;;  %v1447_v2 = vld [vmem:[#allocation10] ss:$0 sm:$0xff] }
 0x10e   : > { %1586 = vmatprep.subr.bf16.mxu1 %v1796_v10  ;;  %p2085_p10 = pnand %p2084_p4, %p2078_p0 }
 0x10f   : > { %1571 = vmatpush3.bf16.msra.mxu0 %v1788_v4 }
 0x110   : > { %1604 = vmatprep.subr.bf16.mxu0 %v1809_v57 }
 0x111   : > { %1587 = vmatpush3.bf16.msra.mxu1 %v1796_v10 }
 0x112   : > { %1573 = vmatmul.mubr.msk.bf16.vlgmr.msra.gmra.mrb[0].mxu0 %vm527_vm0, %v1790_v7  ;;  %1588 = vmatprep.subr.bf16.mxu1 %v1797_v11 }
 0x113   : > { %1576 = vmatprep.mubr.msk.bf16.mxu0 %vm527_vm0, %v1791_v9  ;;  %1605 = vmatpush3.bf16.msra.mxu0 %v1809_v57 }
 0x114   : > { %1606 = vmatprep.subr.bf16.mxu0 %v1810_v58 }
 0x115   : > { %1589 = vmatpush3.bf16.msra.mxu1 %v1797_v11 }
 0x116   : > { %1590 = vmatprep.subr.bf16.mxu1 %v1798_v13 }
 0x117   : > { %1607 = vmatpush3.bf16.msra.mxu0 %v1810_v58 }
 0x118   : > { %1608 = vmatprep.subr.bf16.mxu0 %v1811_v59 }
 0x119   : > { %1591 = vmatpush3.bf16.msra.mxu1 %v1798_v13 }
 0x11a   : > { %1577 = vmatmul.mubr.msk.bf16.gmra.mrb[4].mxu0 %vm527_vm0, %v1792_v12  ;;  %1592 = vmatprep.subr.bf16.mxu1 %v1799_v14 }
 0x11b   : > { %1609 = vmatpush3.bf16.msra.mxu0 %v1811_v59 }
 0x11c   : > { %1610 = vmatprep.subr.bf16.mxu0 %v1812_v60 }
 0x11d   : > { %1593 = vmatpush3.bf16.msra.mxu1 %v1799_v14 }
 0x11e   : > { %1594 = vmatprep.subr.bf16.mxu1 %v1800_v15 }
 0x11f   : > { %1611 = vmatpush3.bf16.msra.mxu0 %v1812_v60 }
 0x120   : > { %1612 = vmatprep.subr.bf16.mxu0 %v1813_v61 }
 0x121   : > { %1595 = vmatpush3.bf16.msra.mxu1 %v1800_v15 }
 0x122   : > { %1628 = vmatprep.subr.bf16.mxu1 %v1801_v16 }
 0x123   : > { %1613 = vmatpush3.bf16.msra.mxu0 %v1813_v61 }
 0x124   : > { %1614 = vmatprep.subr.bf16.mxu0 %v1814_v62 }
 0x127   : > { %1615 = vmatpush3.bf16.msra.mxu0 %v1814_v62 }
 0x128   : > { %1616 = vmatprep.subr.bf16.mxu0 %v1815_v63 }
 0x12b   : > { %1617 = vmatpush3.bf16.msra.mxu0 %v1815_v63 }
 0x12c   : > { %1618 = vmatprep.subr.bf16.mxu0 %v1816_v0 }
 0x12f   : > { %1619 = vmatpush3.bf16.msra.mxu0 %v1816_v0 }
 0x1e5   : > { %v1574_v18 = vpop.f32.mrb[0].mxu0 }
 0x1e6   : > { %v583_v19 = vadd.f32 %v1574_v18, %v1434_v17  ;;  %v574_v20 = vpop.f32.mrb[1].mxu0 }
 0x1e7   : > { %v575_v21 = vadd.f32 %v1434_v17, %v574_v20  ;;  %v1575_v22 = vpop.f32.mrb[2].mxu0 }
 0x1e8   : > { %v586_v23 = vadd.f32 %v1575_v22, %v1434_v17  ;;  %v577_v24 = vpop.f32.mrb[3].mxu0  ;;  %v607_v26 = vmax.f32 %v583_v19, 0.0 }
 0x1e9   : > { %v578_v25 = vadd.f32 %v1434_v17, %v577_v24  ;;  %v605_v30 = vmax.f32 %v575_v21, 0.0 }
 0x1ea   : > { %v608_v27 = vmax.f32 %v586_v23, 0.0  ;;  %v1051_v28 = vpack.c.bf16 %v586_v23, %v583_v19 }
 0x1eb   : > { %v1050_v29 = vpack.c.bf16 %v578_v25, %v575_v21  ;;  %v606_v31 = vmax.f32 %v578_v25, 0.0 }
 0x1ec   : > { %v614_v32 = vpack.c.bf16 %v608_v27, %v607_v26 }
 0x1ed   : > { %v1578_v33 = vpop.f32.mrb[4].mxu0  ;;  %v613_v34 = vpack.c.bf16 %v606_v31, %v605_v30 }
 0x1ee   : > { %v599_v35 = vadd.f32 %v1578_v33, %v1434_v17  ;;  %v590_v36 = vpop.f32.mrb[5].mxu0 }
 0x1ef   : > { %v591_v38 = vadd.f32 %v1434_v17, %v590_v36  ;;  %v1579_v39 = vpop.f32.mrb[6].mxu0  ;;  %1596 = vmatprep.mubr.bf16.mxu1 %v613_v34 }
 0x1f0   : > { %v602_v40 = vadd.f32 %v1579_v39, %v1434_v17  ;;  %v593_v41 = vpop.f32.mrb[7].mxu0  ;;  %1597 = vmatmul.mubr.bf16.vlgmr.msra.gmra.mrb[0].mxu1 %v614_v32  ;;  %v611_v43 = vmax.f32 %v599_v35, 0.0 }
 0x1f1   : > { %v594_v42 = vadd.f32 %v1434_v17, %v593_v41  ;;  %1629 = vmatpush3.bf16.msra.mxu1 %v1801_v16  ;;  %v609_v47 = vmax.f32 %v591_v38, 0.0 }
 0x1f2   : > { %v612_v44 = vmax.f32 %v602_v40, 0.0  ;;  %v1053_v45 = vpack.c.bf16 %v602_v40, %v599_v35  ;;  %1630 = vmatprep.subr.bf16.mxu1 %v1802_v37 }
 0x1f3   : > { %v610_v48 = vmax.f32 %v594_v42, 0.0  ;;  %v1052_v49 = vpack.c.bf16 %v594_v42, %v591_v38 }
 0x1f4   : > { %v616_v50 = vpack.c.bf16 %v612_v44, %v611_v43 }
 0x1f5   : > { %1631 = vmatpush3.bf16.msra.mxu1 %v1802_v37  ;;  %v615_v51 = vpack.c.bf16 %v610_v48, %v609_v47 }
 0x1f6   : > { %1632 = vmatprep.subr.bf16.mxu1 %v1803_v46 }
 0x1f7   : > { %1600 = vmatprep.mubr.bf16.mxu1 %v615_v51 }
 0x1f8   : > { %1601 = vmatmul.mubr.bf16.gmra.mrb[4].mxu1 %v616_v50 }
 0x1f9   : > { %1633 = vmatpush3.bf16.msra.mxu1 %v1803_v46  ;;  %1644 = vmatprep.mubr.bf16.mxu1 %v1050_v29 }
 0x1fa   : > { %1634 = vmatprep.subr.bf16.mxu1 %v1804_v52 }
 0x1fd   : > { %1635 = vmatpush3.bf16.msra.mxu1 %v1804_v52 }
 0x1fe   : > { %1636 = vmatprep.subr.bf16.mxu1 %v1805_v53 }
 0x201   : > { %1637 = vmatpush3.bf16.msra.mxu1 %v1805_v53 }
 0x202   : > { %1638 = vmatprep.subr.bf16.mxu1 %v1806_v54 }
 0x205   : > { %1639 = vmatpush3.bf16.msra.mxu1 %v1806_v54 }
 0x206   : > { %1640 = vmatprep.subr.bf16.mxu1 %v1807_v55 }
 0x209   : > { %1641 = vmatpush3.bf16.msra.mxu1 %v1807_v55 }
 0x20a   : > { %1642 = vmatprep.subr.bf16.mxu1 %v1808_v56 }
 0x20d   : > { %1643 = vmatpush3.bf16.msra.mxu1 %v1808_v56 }
 0x210   : > { %1645 = vmatmul.mubr.bf16.vlgmr.msra.gmra.mrb[8].mxu1 %v1051_v28 }
 0x211   : > { %1648 = vmatprep.mubr.bf16.mxu1 %v1052_v49 }
 0x218   : > { %1649 = vmatmul.mubr.bf16.gmra.mrb[12].mxu1 %v1053_v45 }
 0x2c3   : > { %v1598_v1 = vpop.f32.mrb[0].mxu1 }
 0x2c4   : > { %v722_v3 = vpop.f32.mrb[1].mxu1  ;;  %v731_v8 = vadd.f32 %v1598_v1, %v1447_v2 }
 0x2c5   : > { %v1599_v4 = vpop.f32.mrb[2].mxu1  ;;  %v723_v6 = vadd.f32 %v1447_v2, %v722_v3 }
 0x2c6   : > { %v725_v5 = vpop.f32.mrb[3].mxu1  ;;  %v734_v10 = vadd.f32 %v1599_v4, %v1447_v2 }
 0x2c7   : > { %v726_v7 = vadd.f32 %v1447_v2, %v725_v5 }
 0x2c9   : > { %v753_v9 = vadd.f32 %v726_v7, %v723_v6 }
 0x2cb   : > { %v754_v11 = vadd.f32 %v753_v9, %v731_v8  ;;  %v1602_v12 = vpop.f32.mrb[4].mxu1 }
 0x2cc   : > { %v738_v13 = vpop.f32.mrb[5].mxu1  ;;  %v747_v20 = vadd.f32 %v1602_v12, %v1447_v2 }
 0x2cd   : > { %v739_v14 = vadd.f32 %v1447_v2, %v738_v13  ;;  %v755_v15 = vadd.f32 %v754_v11, %v734_v10  ;;  %v1603_v16 = vpop.f32.mrb[6].mxu1 }
 0x2ce   : > { %v741_v17 = vpop.f32.mrb[7].mxu1  ;;  %v750_v22 = vadd.f32 %v1603_v16, %v1447_v2 }
 0x2cf   : > { %v756_v18 = vadd.f32 %v755_v15, %v739_v14  ;;  %v742_v19 = vadd.f32 %v1447_v2, %v741_v17 }
 0x2d1   : > { %v757_v21 = vadd.f32 %v756_v18, %v742_v19 }
 0x2d3   : > { %v758_v23 = vadd.f32 %v757_v21, %v747_v20 }
 0x2d5   : > { %v759_v24 = vadd.f32 %v758_v23, %v750_v22 }
 0x2d7   : > { %v760_v25 = vrot.slane %v759_v24, 4 }
 0x2d9   : > { %v761_v26 = vadd.f32 %v760_v25, %v759_v24 }
 0x2db   : > { %v762_v27 = vrot.slane %v761_v26, 2 }
 0x2dd   : > { %v763_v28 = vadd.f32 %v762_v27, %v761_v26 }
 0x2df   : > { %v764_v29 = vrot.slane %v763_v28, 1 }
 0x2e1   : > { %v765_v30 = vadd.f32 %v764_v29, %v763_v28 }
 0x2e3   : > { %v767_v31 = vmul.f32 0.015625, %v765_v30  ;;  %v2562_v32 = vpop.f32.mrb[8].mxu1 }
 0x2e4   : > { %v2564_v33 = vpop.f32.mrb[9].mxu1 }
 0x2e5   : > { %v768_v34 = vsub.f32 %v723_v6, %v767_v31  ;;  %v769_v35 = vsub.f32 %v726_v7, %v767_v31  ;;  %v770_v36 = vsub.f32 %v731_v8, %v767_v31  ;;  %v771_v37 = vsub.f32 %v734_v10, %v767_v31  ;;  %v2566_v38 = vpop.f32.mrb[10].mxu1 }
 0x2e6   : > { %v772_v39 = vsub.f32 %v739_v14, %v767_v31  ;;  %v773_v40 = vsub.f32 %v742_v19, %v767_v31  ;;  %v774_v41 = vsub.f32 %v747_v20, %v767_v31  ;;  %v775_v42 = vsub.f32 %v750_v22, %v767_v31  ;;  %v2568_v43 = vpop.f32.mrb[11].mxu1 }
 0x2e7   : > { %v776_v44 = vmul.f32 %v768_v34, %v768_v34  ;;  %v777_v45 = vmul.f32 %v769_v35, %v769_v35  ;;  %v778_v46 = vmul.f32 %v770_v36, %v770_v36  ;;  %v779_v48 = vmul.f32 %v771_v37, %v771_v37 }
 0x2e8   : > { %v780_v52 = vmul.f32 %v772_v39, %v772_v39  ;;  %v781_v56 = vmul.f32 %v773_v40, %v773_v40  ;;  %v782_v58 = vmul.f32 %v774_v41, %v774_v41  ;;  %v783_v60 = vmul.f32 %v775_v42, %v775_v42 }
 0x2e9   : > { %v784_v47 = vadd.f32 %v777_v45, %v776_v44 }
 0x2eb   : > { %v785_v49 = vadd.f32 %v784_v47, %v778_v46  ;;  %v2570_v50 = vpop.f32.mrb[12].mxu1 }
 0x2ec   : > { %v2572_v51 = vpop.f32.mrb[13].mxu1 }
 0x2ed   : > { %v786_v53 = vadd.f32 %v785_v49, %v779_v48  ;;  %v2574_v54 = vpop.f32.mrb[14].mxu1 }
 0x2ee   : > { %v2576_v55 = vpop.f32.mrb[15].mxu1 }
 0x2ef   : > { %v787_v57 = vadd.f32 %v786_v53, %v780_v52 }
 0x2f1   : > { %v788_v59 = vadd.f32 %v787_v57, %v781_v56 }
 0x2f3   : > { %v789_v61 = vadd.f32 %v788_v59, %v782_v58 }
 0x2f5   : > { %v790_v62 = vadd.f32 %v789_v61, %v783_v60 }
 0x2f7   : > { %v791_v63 = vrot.slane %v790_v62, 4 }
 0x2f9   : > { %v792_v0 = vadd.f32 %v791_v63, %v790_v62 }
 0x2fb   : > { %v793_v1 = vrot.slane %v792_v0, 2 }
 0x2fd   : > { %v794_v2 = vadd.f32 %v793_v1, %v792_v0 }
 0x2ff   : > { %v795_v3 = vrot.slane %v794_v2, 1 }
 0x301   : > { %v796_v4 = vadd.f32 %v795_v3, %v794_v2 }
 0x303   : > { %v797_v5 = vmul.f32 0.015625, %v796_v4 }
 0x305   : > { %v798_v6 = vadd.f32 1e-05, %v797_v5 }
 0x307   : > { %1817 = vrsqrt.f32 %v798_v6 }
 0x311   : > { %v1818_v7 = vpop.eup %1817 }
 0x312   : > { %v803_v8 = vmul.f32 %v1818_v7, %v771_v37  ;;  %v805_v9 = vmul.f32 %v1818_v7, %v773_v40  ;;  %v800_v10 = vmul.f32 %v1818_v7, %v768_v34  ;;  %v801_v11 = vmul.f32 %v1818_v7, %v769_v35  ;;  %v1456_v40 = vld [vmem:[#allocation13] ss:$0 sm:$0xff] }
 0x313   : > { %v802_v12 = vmul.f32 %v1818_v7, %v770_v36  ;;  %v804_v13 = vmul.f32 %v1818_v7, %v772_v39  ;;  %v806_v14 = vmul.f32 %v1818_v7, %v774_v41  ;;  %v807_v15 = vmul.f32 %v1818_v7, %v775_v42 }
 0x314   : > { %v821_v16 = vmul.f32 0.4, %v805_v9  ;;  %vm808_vm1 = vcmp.ge.f32.partialorder %v800_v10, 0.0  ;;  %vm809_vm2 = vcmp.ge.f32.partialorder %v801_v11, 0.0  ;;  %v816_v17 = vmul.f32 0.4, %v800_v10 }
 0x315   : > { %v817_v18 = vmul.f32 0.4, %v801_v11  ;;  %vm810_vm3 = vcmp.ge.f32.partialorder %v802_v12, 0.0  ;;  %vm811_vm4 = vcmp.ge.f32.partialorder %v803_v8, 0.0  ;;  %v818_v19 = vmul.f32 0.4, %v802_v12 }
 0x316   : > { %v824_v20 = vsel %vm808_vm1, %v800_v10, %v816_v17  ;;  %v819_v21 = vmul.f32 0.4, %v803_v8  ;;  %vm812_vm5 = vcmp.ge.f32.partialorder %v804_v13, 0.0  ;;  %vm813_vm6 = vcmp.ge.f32.partialorder %v805_v9, 0.0 }
 0x317   : > { %v825_v22 = vsel %vm809_vm2, %v801_v11, %v817_v18  ;;  %v826_v23 = vsel %vm810_vm3, %v802_v12, %v818_v19  ;;  %v820_v24 = vmul.f32 0.4, %v804_v13  ;;  %v829_v25 = vsel %vm813_vm6, %v805_v9, %v821_v16 }
 0x318   : > { %v832_v26 = vpack.c.bf16 %v825_v22, %v824_v20  ;;  %v827_v27 = vsel %vm811_vm4, %v803_v8, %v819_v21  ;;  %vm814_vm7 = vcmp.ge.f32.partialorder %v806_v14, 0.0  ;;  %vm815_vm8 = vcmp.ge.f32.partialorder %v807_v15, 0.0 }
 0x319   : > { %v833_v28 = vpack.c.bf16 %v827_v27, %v826_v23  ;;  %v828_v29 = vsel %vm812_vm5, %v804_v13, %v820_v24  ;;  %v822_v30 = vmul.f32 0.4, %v806_v14  ;;  %v823_v31 = vmul.f32 0.4, %v807_v15 }
 0x31a   : > { %1620 = vmatprep.mubr.bf16.mxu0 %v832_v26  ;;  %v834_v34 = vpack.c.bf16 %v829_v25, %v828_v29 }
 0x31b   : > { %1621 = vmatmul.mubr.bf16.vlgmr.msra.gmra.mrb[8].mxu0 %v833_v28  ;;  %v830_v35 = vsel %vm814_vm7, %v806_v14, %v822_v30  ;;  %v831_v36 = vsel %vm815_vm8, %v807_v15, %v823_v31 }
 0x31c   : > { %1624 = vmatprep.mubr.bf16.mxu0 %v834_v34  ;;  %v835_v37 = vpack.c.bf16 %v831_v36, %v830_v35 }
 0x323   : > { %1625 = vmatmul.mubr.bf16.gmra.mrb[12].mxu0 %v835_v37 }
 0x3ee   : > { %v1622_v39 = vpop.f32.mrb[8].mxu0 }
 0x3ef   : > { %v941_v41 = vpop.f32.mrb[9].mxu0  ;;  %v950_v47 = vadd.f32 %v1622_v39, %v1456_v40 }
 0x3f0   : > { %v1623_v42 = vpop.f32.mrb[10].mxu0  ;;  %v942_v45 = vadd.f32 %v1456_v40, %v941_v41 }
 0x3f1   : > { %v944_v44 = vpop.f32.mrb[11].mxu0  ;;  %v953_v49 = vadd.f32 %v1623_v42, %v1456_v40 }
 0x3f2   : > { %v945_v46 = vadd.f32 %v1456_v40, %v944_v44 }
 0x3f4   : > { %v972_v48 = vadd.f32 %v945_v46, %v942_v45 }
 0x3f6   : > { %v973_v52 = vadd.f32 %v972_v48, %v950_v47  ;;  %v1626_v53 = vpop.f32.mrb[12].mxu0 }
 0x3f7   : > { %v957_v56 = vpop.f32.mrb[13].mxu0  ;;  %v966_v63 = vadd.f32 %v1626_v53, %v1456_v40 }
 0x3f8   : > { %v958_v57 = vadd.f32 %v1456_v40, %v957_v56  ;;  %v974_v58 = vadd.f32 %v973_v52, %v953_v49  ;;  %v1627_v59 = vpop.f32.mrb[14].mxu0 }
 0x3f9   : > { %v960_v60 = vpop.f32.mrb[15].mxu0  ;;  %v969_v1 = vadd.f32 %v1627_v59, %v1456_v40 }
 0x3fa   : > { %v975_v61 = vadd.f32 %v974_v58, %v958_v57  ;;  %v961_v62 = vadd.f32 %v1456_v40, %v960_v60 }
 0x3fc   : > { %v976_v0 = vadd.f32 %v975_v61, %v961_v62 }
 0x3fe   : > { %v977_v2 = vadd.f32 %v976_v0, %v966_v63 }
 0x400   : > { %v978_v3 = vadd.f32 %v977_v2, %v969_v1 }
 0x402   : > { %v979_v4 = vrot.slane %v978_v3, 4 }
 0x404   : > { %v980_v5 = vadd.f32 %v979_v4, %v978_v3 }
 0x406   : > { %v981_v6 = vrot.slane %v980_v5, 2 }
 0x408   : > { %v982_v7 = vadd.f32 %v981_v6, %v980_v5 }
 0x40a   : > { %v983_v8 = vrot.slane %v982_v7, 1 }
 0x40c   : > { %v984_v9 = vadd.f32 %v983_v8, %v982_v7 }
 0x40e   : > { %v985_v10 = vmul.f32 0.015625, %v984_v9 }
 0x410   : > { %v986_v11 = vsub.f32 %v942_v45, %v985_v10  ;;  %v987_v12 = vsub.f32 %v945_v46, %v985_v10  ;;  %v988_v13 = vsub.f32 %v950_v47, %v985_v10  ;;  %v989_v14 = vsub.f32 %v953_v49, %v985_v10  ;;  %v1465_v46 = vld [vmem:[#allocation16] ss:$0 sm:$0xff] }
 0x411   : > { %v990_v15 = vsub.f32 %v958_v57, %v985_v10  ;;  %v991_v16 = vsub.f32 %v961_v62, %v985_v10  ;;  %v992_v17 = vsub.f32 %v966_v63, %v985_v10  ;;  %v993_v18 = vsub.f32 %v969_v1, %v985_v10 }
 0x412   : > { %v994_v19 = vmul.f32 %v986_v11, %v986_v11  ;;  %v995_v20 = vmul.f32 %v987_v12, %v987_v12  ;;  %v996_v21 = vmul.f32 %v988_v13, %v988_v13  ;;  %v997_v23 = vmul.f32 %v989_v14, %v989_v14 }
 0x413   : > { %v998_v25 = vmul.f32 %v990_v15, %v990_v15  ;;  %v999_v27 = vmul.f32 %v991_v16, %v991_v16  ;;  %v1000_v29 = vmul.f32 %v992_v17, %v992_v17  ;;  %v1001_v31 = vmul.f32 %v993_v18, %v993_v18 }
 0x414   : > { %v1002_v22 = vadd.f32 %v995_v20, %v994_v19  ;;  %v1168_v47 = vadd.f32 %v2562_v32, %v1465_v46  ;;  %v1160_v48 = vadd.f32 %v1465_v46, %v2564_v33  ;;  %v1171_v52 = vadd.f32 %v2566_v38, %v1465_v46 }
 0x415   : > { %v1163_v53 = vadd.f32 %v1465_v46, %v2568_v43  ;;  %v1184_v56 = vadd.f32 %v2570_v50, %v1465_v46  ;;  %v1176_v57 = vadd.f32 %v1465_v46, %v2572_v51  ;;  %v1187_v33 = vadd.f32 %v2574_v54, %v1465_v46 }
 0x416   : > { %v1003_v24 = vadd.f32 %v1002_v22, %v996_v21  ;;  %v1179_v51 = vadd.f32 %v1465_v46, %v2576_v55 }
 0x418   : > { %v1004_v26 = vadd.f32 %v1003_v24, %v997_v23 }
 0x41a   : > { %v1005_v28 = vadd.f32 %v1004_v26, %v998_v25 }
 0x41c   : > { %v1006_v30 = vadd.f32 %v1005_v28, %v999_v27 }
 0x41e   : > { %v1007_v34 = vadd.f32 %v1006_v30, %v1000_v29 }
 0x420   : > { %v1008_v35 = vadd.f32 %v1007_v34, %v1001_v31 }
 0x422   : > { %v1009_v36 = vrot.slane %v1008_v35, 4 }
 0x424   : > { %v1010_v37 = vadd.f32 %v1009_v36, %v1008_v35 }
 0x426   : > { %v1011_v39 = vrot.slane %v1010_v37, 2 }
 0x428   : > { %v1012_v40 = vadd.f32 %v1011_v39, %v1010_v37 }
 0x42a   : > { %v1013_v41 = vrot.slane %v1012_v40, 1 }
 0x42c   : > { %v1014_v42 = vadd.f32 %v1013_v41, %v1012_v40 }
 0x42e   : > { %v1015_v44 = vmul.f32 0.015625, %v1014_v42 }
 0x430   : > { %v1016_v45 = vadd.f32 1e-05, %v1015_v44 }
 0x432   : > { %1819 = vrsqrt.f32 %v1016_v45 }
 0x43c   : > { %v1820_v49 = vpop.eup %1819 }
 0x43d   : > { %v1018_v58 = vmul.f32 %v1820_v49, %v986_v11  ;;  %v1019_v59 = vmul.f32 %v1820_v49, %v987_v12  ;;  %v1020_v60 = vmul.f32 %v1820_v49, %v988_v13  ;;  %v1021_v61 = vmul.f32 %v1820_v49, %v989_v14 }
 0x43e   : > { %v1022_v62 = vmul.f32 %v1820_v49, %v990_v15  ;;  %v1023_v63 = vmul.f32 %v1820_v49, %v991_v16  ;;  %v1024_v0 = vmul.f32 %v1820_v49, %v992_v17  ;;  %v1025_v32 = vmul.f32 %v1820_v49, %v993_v18 }
 0x43f   : > { %vm1026_vm9 = vcmp.ge.f32.partialorder %v1018_v58, 0.0  ;;  %vm1027_vm10 = vcmp.ge.f32.partialorder %v1019_v59, 0.0  ;;  %vm1028_vm11 = vcmp.ge.f32.partialorder %v1020_v60, 0.0  ;;  %vm1029_vm12 = vcmp.ge.f32.partialorder %v1021_v61, 0.0 }
 0x440   : > { %vm1030_vm13 = vcmp.ge.f32.partialorder %v1022_v62, 0.0  ;;  %vm1031_vm14 = vcmp.ge.f32.partialorder %v1023_v63, 0.0  ;;  %vm1032_vm15 = vcmp.ge.f32.partialorder %v1024_v0, 0.0  ;;  %vm1033_vm0 = vcmp.ge.f32.partialorder %v1025_v32, 0.0 }
 0x441   : > { %v1034_v38 = vmul.f32 0.4, %v1018_v58  ;;  %v1035_v43 = vmul.f32 0.4, %v1019_v59  ;;  %v1036_v50 = vmul.f32 0.4, %v1020_v60 }
 0x442   : > { %v1037_v1 = vmul.f32 0.4, %v1021_v61  ;;  %v1038_v2 = vmul.f32 0.4, %v1022_v62  ;;  %v1039_v3 = vmul.f32 0.4, %v1023_v63 }
 0x443   : > { %v1040_v4 = vmul.f32 0.4, %v1024_v0  ;;  %v1041_v5 = vmul.f32 0.4, %v1025_v32  ;;  %v1042_v6 = vsel %vm1026_vm9, %v1018_v58, %v1034_v38  ;;  %v1043_v7 = vsel %vm1027_vm10, %v1019_v59, %v1035_v43 }
 0x444   : > { %v1044_v8 = vsel %vm1028_vm11, %v1020_v60, %v1036_v50  ;;  %v1045_v9 = vsel %vm1029_vm12, %v1021_v61, %v1037_v1  ;;  %v1046_v54 = vsel %vm1030_vm13, %v1022_v62, %v1038_v2  ;;  %v1047_v10 = vsel %vm1031_vm14, %v1023_v63, %v1039_v3 }
 0x445   : > { %v1048_v55 = vsel %vm1032_vm15, %v1024_v0, %v1040_v4  ;;  %v1049_v11 = vsel %vm1033_vm0, %v1025_v32, %v1041_v5  ;;  %v1190_v12 = vadd.f32 %v1160_v48, %v1042_v6  ;;  %v1191_v13 = vadd.f32 %v1163_v53, %v1043_v7 }
 0x446   : > { %v1192_v14 = vadd.f32 %v1168_v47, %v1044_v8  ;;  %v1193_v15 = vadd.f32 %v1171_v52, %v1045_v9  ;;  %v1194_v16 = vadd.f32 %v1176_v57, %v1046_v54  ;;  %v1195_v17 = vadd.f32 %v1179_v51, %v1047_v10 }
 0x447   : > { %v1196_v18 = vadd.f32 %v1184_v56, %v1048_v55  ;;  %v1197_v19 = vadd.f32 %v1187_v33, %v1049_v11  ;;  %v1198_v20 = vmax.f32 %v1190_v12, 0.0  ;;  %v1199_v21 = vmax.f32 %v1191_v13, 0.0 }
 0x448   : > { %v1200_v22 = vmax.f32 %v1192_v14, 0.0  ;;  %v1201_v23 = vmax.f32 %v1193_v15, 0.0  ;;  %v1202_v24 = vmax.f32 %v1194_v16, 0.0  ;;  %v1203_v25 = vmax.f32 %v1195_v17, 0.0 }
 0x449   : > { %v1204_v26 = vmax.f32 %v1196_v18, 0.0  ;;  %v1205_v27 = vmax.f32 %v1197_v19, 0.0  ;;  %v1500_v28 = vpack.c.bf16 %v1199_v21, %v1198_v20 }
 0x44a   : > { %v1505_v29 = vpack.c.bf16 %v1201_v23, %v1200_v22  ;;  %v1510_v30 = vpack.c.bf16 %v1203_v25, %v1202_v24 }
 0x44b   : > { %v1515_v31 = vpack.c.bf16 %v1205_v27, %v1204_v26  ;;  %1501 = vst [vmem:[%s458_s13] sm:$0xff] %v1500_v28  }
 0x44c   : > { %1518 = vst [vmem:[%s458_s13 + $0x10] sm:$0xff] %v1510_v30   ;;  %1517 = vst [vmem:[%s458_s13 + $0x8] sm:$0xff] %v1505_v29  }
 0x44d   : > { %1519 = vst [vmem:[%s458_s13 + $0x18] sm:$0xff] %v1515_v31  }
 0x44e   : > { %2088 = shalt.err (!%p2085_p10)
}
 0x44f   : > { %s2089_s18 = scalar_lea.hbm %s2601_s28, 512  ;;  %s2093_s13 = scalar_lea.hbm %s2682_s26, 1024 }
 0x450   : > { %p2090_p11 = scmp.ne.s32.totalorder %s2601_s28, %s2089_s18  ;;  %p2094_p7 = scmp.lt.u32.totalorder %s2601_s28, %s2682_s26 }
 0x451   : > { %p2095_p6 = scmp.lt.u32.totalorder %s2093_s13, %s2089_s18  ;;  %p2097_p12 = scmp.lt.u32.totalorder %s2089_s18, %s2601_s28 }
 0x452   : > { %p2091_p3 = pnand %p2090_p11, %p2683_p1 }
 0x453   : > { %p2096_p9 = por %p2095_p6, %p2094_p7 }
 0x454   : > { %p2092_p5 = pneg %p2091_p3 }
 0x455   : > { %p2098_p13 = por %p2097_p12, %p2096_p9 }
 0x457   : > { %p2099_p0 = pnand %p2098_p13, %p2092_p5 }
 0x459   : > { %2102 = shalt.err (!%p2099_p0)
}
 0x45a   : > { %s2173_s25 = smov 64   ;;  %s2174_s23 = smov 4  }
 0x45b   : > { %1686 = dma.vmem_to_hbm [thread:$0]  (%p2683_p1), %s2603_s1, 512, %s2601_s28, %s1247_s15, %s2173_s25, %s2173_s25, %s2174_s23  }
 0x45c PF: > { %s1275_s22 = sand.u32 1, %s2145_s30   ;;  %p2684_p2 = scmp.ne.s32.totalorder %s2671_s24, 0 }
 0x45d   : > { %p2685_p8 = scmp.ge.s32.totalorder %s2157_s12, 2  ;;  %s1276_s21 = scalar_lea.sflag [#allocation4], %s1275_s22 }
 0x45f   : > { %p1718_p4 = pnand %p2685_p8, %p2684_p2 }
 0x461   : > { %2140 = dma.done.wait (!%p1718_p4), %s1276_s21, 512  }
 0x462   : > { %2142 = vsyncadd (!%p1718_p4), %s1276_s21, 4294966784  ;;  %p26_p10 = scmp.ge.s32.totalorder %s2449_s19, 4   ;;  %s2686_s30 = smov %s2149_s10 }
 0x463   : > { %s2687_s10 = smov %s2153_s11  ;;  %s2688_s11 = smov %s2460_s17 }
 0x464   : > { %s2689_s12 = smov %s2449_s19  ;;  %28 = sbr.rel (!%p26_p10) target bundleno = 12 (0xc), region = 133 }
 0x46b   :  { %1281 = vsyncpa [#allocation3], 1 }
 0x46c   :  { %1283 = vsyncpa [#allocation3 + $0x1], 1 }
 0x46d   :  { %1284 = vsyncpa [#allocation6], 1 }
 0x46e   :  { %1285 = vsyncpa [#allocation9], 1 }
 0x46f   :  { %1286 = vsyncpa [#allocation12], 1 }
 0x470   :  { %1287 = vsyncpa [#allocation15], 1 }
 0x471   :  { %1288 = vsyncpa [#allocation4], 1 }
 0x472   :  { %1290 = vsyncpa [#allocation4 + $0x1], 1 }

// kernel: encoder_forward.5
= control target key start
LH: loop header
LB: loop body
LE: loop exit
PB: predicated region body
PF: predicated region fallthrough
CT: control target
= control target key end

     0   :  { %s5533_s0 = inlined_call_operand.hbm [shape: f32[2,256,4], index: 0, kind: input, shape index: {}]   ;;  %s5534_s1 = inlined_call_operand.hbm [shape: f32[1,64], index: 1, kind: input, shape index: {}]   ;;  %s5535_s2 = inlined_call_operand.hbm [shape: f32[1,64], index: 2, kind: input, shape index: {}]   ;;  %s5536_s3 = inlined_call_operand.hbm [shape: bf16[64,64], index: 3, kind: input, shape index: {}]   ;;  %s5537_s4 = inlined_call_operand.hbm [shape: f32[1,64], index: 4, kind: input, shape index: {}]   ;;  %s5538_s5 = inlined_call_operand.hbm [shape: bf16[64,64], index: 5, kind: input, shape index: {}]   ;;  %s5539_s6 = inlined_call_operand.hbm [shape: f32[1,64], index: 6, kind: input, shape index: {}]   ;;  %s5540_s7 = inlined_call_operand.hbm [shape: bf16[64,64], index: 7, kind: input, shape index: {}]   ;;  %s5541_s8 = inlined_call_operand.hbm [shape: f32[1,64], index: 8, kind: input, shape index: {}]   ;;  %s5542_s9 = inlined_call_operand.hbm [shape: bf16[2,256,64], index: 9, kind: output, shape index: {}]  }
   0x1   :  { %5548 = sst [smem:[#allocation52_spill]] %s5534_s1 }
   0x2   :  { %5549 = sst [smem:[#allocation53_spill]] %s5536_s3 }
   0x3   :  { %14 = vsyncpa [#allocation3], 0 }
   0x4   :  { %16 = vsyncpa [#allocation3 + $0x1], 0 }
   0x5   :  { %17 = vsyncpa [#allocation6], 0 }
   0x6   :  { %18 = vsyncpa [#allocation9], 0 }
   0x7   :  { %19 = vsyncpa [#allocation12], 0 }
   0x8   :  { %20 = vsyncpa [#allocation15], 0 }
   0x9   :  { %21 = vsyncpa [#allocation4], 0 }
   0xa   :  { %23 = vsyncpa [#allocation4 + $0x1], 0  ;;  %s3516_s30 = smov 0   ;;  %s3518_s10 = smov 0  }
   0xb   :  { %s3520_s11 = smov 0   ;;  %s3522_s12 = smov 0  }
   0xc LB: > { %s3449_s13 = smov [#allocation5]   ;;  %s3537_s15 = sadd.s32 4294967295, %s3447_s12   ;;  %s3447_s12 = sphi %s3522_s12, %s5711_s12   ;;  %s3443_s11 = sphi %s3520_s11, %s5710_s11   ;;  %s3439_s10 = sphi %s3518_s10, %s5709_s10   ;;  %s3435_s30 = sphi %s3516_s30, %s5708_s30  }
   0xd   : > { %s267_s14 = sshll.u32 %s3449_s13, 4  ;;  %p2611_p0 = scmp.ge.s32.totalorder %s3447_s12, 1  ;;  %s3542_s14 = int_to_ptr.vmem [resolvable:$true] %s267_s14 }
   0xe   : > { %p5543_p1 = scmp.eq.s32.totalorder %s3537_s15, 0  ;;  %p254_p2 = scmp.lt.s32.totalorder %s3447_s12, 3 }
   0xf   : > { %s3450_s17 = smov [#allocation8]   ;;  %s3451_s20 = smov [#allocation11]  }
  0x10   : > { %p3544_p3 = pnand %p2611_p0, %p254_p2  ;;  %s288_s18 = sshll.u32 %s3450_s17, 4  ;;  %s3551_s18 = int_to_ptr.vmem [resolvable:$true] %s288_s18 }
  0x11   : > { %s312_s21 = sshll.u32 %s3451_s20, 4  ;;  %s5552_s1 = sld [smem:[#allocation52_spill]]  ;;  %s3559_s21 = int_to_ptr.vmem [resolvable:$true] %s312_s21 }
  0x12   : > { %s5550_s16 = scalar_select %p3544_p3, 1, 0 }
  0x13   : > { %p2995_p5 = pneg %p3544_p3 }
  0x15   : > { %p3555_p6 = pnand %p2995_p5, %p5543_p1 }
  0x17   : > { %s3111_s24 = scalar_lea.hbm %s5552_s1, 16  ;;  %p3569_p8 = pneg %p3555_p6 }
  0x18   : > { %p3112_p7 = scmp.ne.s32.totalorder %s5552_s1, %s3111_s24  ;;  %p3118_p11 = scmp.lt.u32.totalorder %s3111_s24, %s5552_s1 }
  0x1a   : > { %p3114_p9 = pnand %p3569_p8, %p3112_p7 }
  0x1c   : > { %p3115_p10 = pneg %p3114_p9 }
  0x1e   : > { %p3120_p12 = pnand %p3118_p11, %p3115_p10 }
  0x20   : > { %3123 = shalt.err (!%p3120_p12)
}
  0x21   : > { %s3124_s13 = scalar_lea.vmem %s3542_s14, 16  ;;  %s3131_s17 = scalar_lea.vmem %s3542_s14, 32 }
  0x22   : > { %p3125_p13 = scmp.ne.s32.totalorder %s3542_s14, %s3124_s13  ;;  %p3132_p5 = scmp.lt.s32.totalorder %s3542_s14, %s3542_s14 }
  0x23   : > { %p3133_p7 = scmp.lt.s32.totalorder %s3131_s17, %s3124_s13 }
  0x24   : > { %p3127_p0 = pnand %p3125_p13, %p3569_p8 }
  0x25   : > { %p3134_p9 = por %p3133_p7, %p3132_p5 }
  0x26   : > { %p3128_p2 = pneg %p3127_p0 }
  0x28   : > { %p3135_p4 = pnand %p3134_p9, %p3128_p2 }
  0x2a   : > { %3138 = shalt.err (!%p3135_p4)
}
  0x2b   : > { %2998 = dma.hbm_to_vmem [thread:$0]  (!%p3555_p6), %s5552_s1, 16, %s3542_s14, [#allocation6]  }
  0x2c   : > { %s5554_s3 = sld [smem:[#allocation53_spill]] }
  0x32   : > { %s3139_s25 = scalar_lea.hbm %s5554_s3, 512 }
  0x33   : > { %p3140_p10 = scmp.ne.s32.totalorder %s5554_s3, %s3139_s25  ;;  %p3146_p4 = scmp.lt.u32.totalorder %s3139_s25, %s5554_s3 }
  0x35   : > { %p3142_p11 = pnand %p3140_p10, %p3569_p8 }
  0x37   : > { %p3143_p12 = pneg %p3142_p11 }
  0x39   : > { %p3148_p13 = pnand %p3146_p4, %p3143_p12 }
  0x3b   : > { %3151 = shalt.err (!%p3148_p13)
}
  0x3c   : > { %s3152_s14 = scalar_lea.vmem %s3551_s18, 512  ;;  %p3160_p7 = scmp.lt.s32.totalorder %s3551_s18, %s3551_s18 }
  0x3d   : > { %p3153_p0 = scmp.ne.s32.totalorder %s3551_s18, %s3152_s14  ;;  %p3161_p9 = scmp.lt.s32.totalorder %s3152_s14, %s3152_s14 }
  0x3f   : > { %p3155_p2 = pnand %p3153_p0, %p3569_p8  ;;  %p3162_p10 = por %p3161_p9, %p3160_p7 }
  0x41   : > { %p3156_p5 = pneg %p3155_p2 }
  0x43   : > { %p3163_p11 = pnand %p3162_p10, %p3156_p5 }
  0x45   : > { %3166 = shalt.err (!%p3163_p11)
}
  0x46   : > { %s3452_s17 = smov 64   ;;  %s3453_s20 = smov 4  }
  0x47   : > { %3004 = dma.hbm_to_vmem [thread:$0]  (!%p3555_p6), %s5554_s3, 512, %s3551_s18, [#allocation9], %s3452_s17, %s3452_s17, %s3453_s20  }
  0x48   : > { %s3167_s26 = scalar_lea.hbm %s5538_s5, 512 }
  0x49   : > { %p3168_p12 = scmp.ne.s32.totalorder %s5538_s5, %s3167_s26  ;;  %p3174_p0 = scmp.lt.u32.totalorder %s3167_s26, %s5538_s5 }
  0x4b   : > { %p3170_p4 = pnand %p3168_p12, %p3569_p8 }
  0x4d   : > { %p3171_p13 = pneg %p3170_p4 }
  0x4f   : > { %p3176_p2 = pnand %p3174_p0, %p3171_p13 }
  0x51   : > { %3179 = shalt.err (!%p3176_p2)
}
  0x52   : > { %s3180_s18 = scalar_lea.vmem %s3559_s21, 512  ;;  %p3188_p10 = scmp.lt.s32.totalorder %s3559_s21, %s3559_s21 }
  0x53   : > { %p3181_p5 = scmp.ne.s32.totalorder %s3559_s21, %s3180_s18  ;;  %p3189_p11 = scmp.lt.s32.totalorder %s3180_s18, %s3180_s18 }
  0x55   : > { %p3183_p7 = pnand %p3181_p5, %p3569_p8  ;;  %p3190_p12 = por %p3189_p11, %p3188_p10 }
  0x57   : > { %p3184_p9 = pneg %p3183_p7 }
  0x59   : > { %p3191_p4 = pnand %p3190_p12, %p3184_p9 }
  0x5b   : > { %3194 = shalt.err (!%p3191_p4)
}
  0x5c   : > { %3010 = dma.hbm_to_vmem [thread:$0]  (!%p3555_p6), %s5538_s5, 512, %s3559_s21, [#allocation12], %s3452_s17, %s3452_s17, %s3453_s20  }
  0x5d   : > { %s3454_s24 = smov [#allocation14]   ;;  %s3455_s26 = smov [#allocation7]  }
  0x5e   : > { %s336_s25 = sshll.u32 %s3454_s24, 4  ;;  %s278_s28 = sshll.u32 %s3455_s26, 4  ;;  %s337_s25 = int_to_ptr.vmem [resolvable:$true] %s336_s25  ;;  %s279_s28 = int_to_ptr.vmem [resolvable:$true] %s278_s28 }
  0x5f   : > { %s3195_s14 = scalar_lea.hbm %s5540_s7, 512 }
  0x60   : > { %p3196_p13 = scmp.ne.s32.totalorder %s5540_s7, %s3195_s14  ;;  %p3202_p5 = scmp.lt.u32.totalorder %s3195_s14, %s5540_s7 }
  0x62   : > { %p3198_p0 = pnand %p3196_p13, %p3569_p8 }
  0x64   : > { %p3199_p2 = pneg %p3198_p0 }
  0x66   : > { %p3204_p7 = pnand %p3202_p5, %p3199_p2 }
  0x68   : > { %3207 = shalt.err (!%p3204_p7)
}
  0x69   : > { %s3208_s21 = scalar_lea.vmem %s337_s25, 512  ;;  %p3216_p12 = scmp.lt.s32.totalorder %s337_s25, %s337_s25 }
  0x6a   : > { %p3209_p9 = scmp.ne.s32.totalorder %s337_s25, %s3208_s21  ;;  %p3217_p4 = scmp.lt.s32.totalorder %s3208_s21, %s3208_s21 }
  0x6c   : > { %p3211_p10 = pnand %p3209_p9, %p3569_p8  ;;  %p3218_p1 = por %p3217_p4, %p3216_p12 }
  0x6e   : > { %p3212_p11 = pneg %p3211_p10 }
  0x70   : > { %p3219_p3 = pnand %p3218_p1, %p3212_p11 }
  0x72   : > { %3222 = shalt.err (!%p3219_p3)
}
  0x73   : > { %3016 = dma.hbm_to_vmem [thread:$0]  (!%p3555_p6), %s5540_s7, 512, %s337_s25, [#allocation15], %s3452_s17, %s3452_s17, %s3453_s20  }
  0x74   : > { %s3223_s26 = scalar_lea.hbm %s5535_s2, 16 }
  0x75   : > { %p3224_p1 = scmp.ne.s32.totalorder %s5535_s2, %s3223_s26  ;;  %p3230_p0 = scmp.lt.u32.totalorder %s3223_s26, %s5535_s2 }
  0x77   : > { %p3226_p3 = pnand %p3224_p1, %p3569_p8 }
  0x79   : > { %p3227_p13 = pneg %p3226_p3 }
  0x7b   : > { %p3232_p2 = pnand %p3230_p0, %p3227_p13 }
  0x7d   : > { %3235 = shalt.err (!%p3232_p2)
}
  0x7e   : > { %s3236_s22 = scalar_lea.vmem %s279_s28, 16  ;;  %s3243_s17 = scalar_lea.vmem %s279_s28, 32 }
  0x7f   : > { %p3237_p5 = scmp.ne.s32.totalorder %s279_s28, %s3236_s22  ;;  %p3244_p10 = scmp.lt.s32.totalorder %s279_s28, %s279_s28 }
  0x80   : > { %p3245_p11 = scmp.lt.s32.totalorder %s3243_s17, %s3236_s22 }
  0x81   : > { %p3239_p7 = pnand %p3237_p5, %p3569_p8 }
  0x82   : > { %p3246_p12 = por %p3245_p11, %p3244_p10 }
  0x83   : > { %p3240_p9 = pneg %p3239_p7 }
  0x85   : > { %p3247_p4 = pnand %p3246_p12, %p3240_p9 }
  0x87   : > { %3250 = shalt.err (!%p3247_p4)
}
  0x88   : > { %3001 = dma.hbm_to_vmem [thread:$0]  (!%p3555_p6), %s5535_s2, 16, %s279_s28, [#allocation6]  }
  0x89   : > { %s3456_s21 = smov [#allocation10]   ;;  %s3457_s3 = smov [#allocation13]  }
  0x8a   : > { %s302_s1 = sshll.u32 %s3456_s21, 4  ;;  %s326_s23 = sshll.u32 %s3457_s3, 4  ;;  %s303_s1 = int_to_ptr.vmem [resolvable:$true] %s302_s1  ;;  %s327_s23 = int_to_ptr.vmem [resolvable:$true] %s326_s23 }
  0x8b   : > { %s3251_s29 = scalar_lea.hbm %s5537_s4, 16 }
  0x8c   : > { %p3252_p1 = scmp.ne.s32.totalorder %s5537_s4, %s3251_s29  ;;  %p3258_p0 = scmp.lt.u32.totalorder %s3251_s29, %s5537_s4 }
  0x8e   : > { %p3254_p3 = pnand %p3252_p1, %p3569_p8 }
  0x90   : > { %p3255_p13 = pneg %p3254_p3 }
  0x92   : > { %p3260_p2 = pnand %p3258_p0, %p3255_p13 }
  0x94   : > { %3263 = shalt.err (!%p3260_p2)
}
  0x95   : > { %s3264_s28 = scalar_lea.vmem %s303_s1, 16  ;;  %s3271_s17 = scalar_lea.vmem %s303_s1, 32 }
  0x96   : > { %p3265_p5 = scmp.ne.s32.totalorder %s303_s1, %s3264_s28  ;;  %p3272_p10 = scmp.lt.s32.totalorder %s303_s1, %s303_s1 }
  0x97   : > { %p3273_p11 = scmp.lt.s32.totalorder %s3271_s17, %s3264_s28 }
  0x98   : > { %p3267_p7 = pnand %p3265_p5, %p3569_p8 }
  0x99   : > { %p3274_p12 = por %p3273_p11, %p3272_p10 }
  0x9a   : > { %p3268_p9 = pneg %p3267_p7 }
  0x9c   : > { %p3275_p4 = pnand %p3274_p12, %p3268_p9 }
  0x9e   : > { %3278 = shalt.err (!%p3275_p4)
}
  0x9f   : > { %3007 = dma.hbm_to_vmem [thread:$0]  (!%p3555_p6), %s5537_s4, 16, %s303_s1, [#allocation9]  }
  0xa0   : > { %s3279_s24 = scalar_lea.hbm %s5539_s6, 16 }
  0xa1   : > { %p3280_p1 = scmp.ne.s32.totalorder %s5539_s6, %s3279_s24  ;;  %p3286_p0 = scmp.lt.u32.totalorder %s3279_s24, %s5539_s6 }
  0xa3   : > { %p3282_p3 = pnand %p3280_p1, %p3569_p8 }
  0xa5   : > { %p3283_p13 = pneg %p3282_p3 }
  0xa7   : > { %p3288_p2 = pnand %p3286_p0, %p3283_p13 }
  0xa9   : > { %3291 = shalt.err (!%p3288_p2)
}
  0xaa   : > { %s3292_s18 = scalar_lea.vmem %s327_s23, 16  ;;  %s3299_s1 = scalar_lea.vmem %s327_s23, 32 }
  0xab   : > { %p3293_p5 = scmp.ne.s32.totalorder %s327_s23, %s3292_s18  ;;  %p3300_p10 = scmp.lt.s32.totalorder %s327_s23, %s327_s23 }
  0xac   : > { %p3301_p11 = scmp.lt.s32.totalorder %s3299_s1, %s3292_s18 }
  0xad   : > { %p3295_p7 = pnand %p3293_p5, %p3569_p8 }
  0xae   : > { %p3302_p12 = por %p3301_p11, %p3300_p10 }
  0xaf   : > { %p3296_p9 = pneg %p3295_p7 }
  0xb1   : > { %p3303_p4 = pnand %p3302_p12, %p3296_p9 }
  0xb3   : > { %3306 = shalt.err (!%p3303_p4)
}
  0xb4   : > { %3013 = dma.hbm_to_vmem [thread:$0]  (!%p3555_p6), %s5539_s6, 16, %s327_s23, [#allocation12]  }
  0xb5   : > { %s3458_s17 = smov [#allocation16]   ;;  %s3307_s3 = scalar_lea.hbm %s5541_s8, 16 }
  0xb6   : > { %s350_s20 = sshll.u32 %s3458_s17, 4  ;;  %p3308_p1 = scmp.ne.s32.totalorder %s5541_s8, %s3307_s3  ;;  %s351_s20 = int_to_ptr.vmem [resolvable:$true] %s350_s20 }
  0xb7   : > { %p3314_p0 = scmp.lt.u32.totalorder %s3307_s3, %s5541_s8 }
  0xb8   : > { %p3310_p3 = pnand %p3308_p1, %p3569_p8 }
  0xba   : > { %p3311_p13 = pneg %p3310_p3 }
  0xbc   : > { %p3316_p2 = pnand %p3314_p0, %p3311_p13 }
  0xbe   : > { %3319 = shalt.err (!%p3316_p2)
}
  0xbf   : > { %s3320_s23 = scalar_lea.vmem %s351_s20, 16  ;;  %s3327_s14 = scalar_lea.vmem %s351_s20, 32 }
  0xc0   : > { %p3321_p5 = scmp.ne.s32.totalorder %s351_s20, %s3320_s23  ;;  %p3328_p10 = scmp.lt.s32.totalorder %s351_s20, %s351_s20 }
  0xc1   : > { %p3329_p11 = scmp.lt.s32.totalorder %s3327_s14, %s3320_s23 }
  0xc2   : > { %p3323_p7 = pnand %p3321_p5, %p3569_p8 }
  0xc3   : > { %p3330_p12 = por %p3329_p11, %p3328_p10 }
  0xc4   : > { %p3324_p9 = pneg %p3323_p7 }
  0xc6   : > { %p3331_p4 = pnand %p3330_p12, %p3324_p9 }
  0xc8   : > { %3334 = shalt.err (!%p3331_p4)
}
  0xc9   : > { %3019 = dma.hbm_to_vmem [thread:$0]  (!%p3555_p6), %s5541_s8, 16, %s351_s20, [#allocation15]  }
  0xca   : > { %s2610_s27 = sadd.s32 4294967294, %s3447_s12   ;;  %s3738_s19 = sadd.s32 1, %s3447_s12  }
  0xcb   : > { %s33_s22 = ssub.s32 %s3447_s12, %s3738_s19  ;;  %s36_s28 = sadd.s32 1, %s3443_s11 }
  0xcc   : > { %p34_p8 = scmp.eq.s32.totalorder %s33_s22, 0  ;;  %p43_p1 = scmp.ne.s32.totalorder %s3443_s11, %s3439_s10 }
  0xcd   : > { %p44_p3 = scmp.eq.s32.totalorder %s3447_s12, 0  ;;  %p49_p13 = scmp.ne.s32.totalorder %s3439_s10, %s3435_s30 }
  0xce   : > { %s3749_s17 = scalar_select %p34_p8, %s3443_s11, %s36_s28  }
  0xcf   : > { %p3751_p0 = por %p44_p3, %p43_p1  ;;  %p5556_p2 = scmp.eq.s32.totalorder %s3537_s15, 0 }
  0xd0   : > { %p241_p5 = scmp.eq.s32.totalorder %s3537_s15, 1  ;;  %p247_p7 = scmp.eq.s32.totalorder %s2610_s27, 1 }
  0xd1   : > { %p3757_p6 = por %p5556_p2, %p49_p13  ;;  %p3036_p9 = scmp.lt.s32.totalorder %s3447_s12, 2 }
  0xd2   : > { %s361_s21 = sand.u32 1, %s3443_s11   ;;  %p3764_p10 = por %p241_p5, %p43_p1 }
  0xd3   : > { %p3768_p11 = por %p247_p7, %p49_p13  ;;  %s2621_s26 = sshll.u32 %s361_s21, 8 }
  0xd4   : > { %s5558_s3 = scalar_select %p3764_p10, 1, 0 }
  0xd5   : > { %s5559_s24 = scalar_select %p3768_p11, 1, 0 }
  0xd6   : > { %s2737_s29 = sshll.u32 %s3447_s12, 12  ;;  %s365_s18 = scalar_lea.vmem [#allocation2], %s2621_s26 }
  0xd7   : > { %s3776_s14 = scalar_lea.hbm %s5533_s0, %s2737_s29  ;;  %s372_s1 = sshll.u32 %s365_s18, 4  ;;  %s3778_s1 = int_to_ptr.vmem [resolvable:$true] %s372_s1 }
  0xd8   : > { %p3782_p12 = pnand %p3036_p9, %p3751_p0  ;;  %s3786_s22 = scalar_lea.sflag [#allocation3], %s361_s21 }
  0xd9   : > { %s3335_s28 = scalar_lea.hbm %s3776_s14, 4096  ;;  %s3340_s25 = scalar_lea.hbm %s5533_s0, 8192 }
  0xda   : > { %p3336_p4 = scmp.ne.s32.totalorder %s3776_s14, %s3335_s28  ;;  %p3337_p8 = pneg %p3782_p12 }
  0xdb   : > { %p3341_p13 = scmp.lt.u32.totalorder %s3776_s14, %s5533_s0  ;;  %p3342_p0 = scmp.lt.u32.totalorder %s3340_s25, %s3335_s28 }
  0xdc   : > { %p3338_p1 = pnand %p3337_p8, %p3336_p4  ;;  %p3344_p5 = scmp.lt.u32.totalorder %s3335_s28, %s3776_s14 }
  0xdd   : > { %p3343_p2 = por %p3342_p0, %p3341_p13 }
  0xde   : > { %p3339_p3 = pneg %p3338_p1 }
  0xdf   : > { %p3345_p7 = por %p3344_p5, %p3343_p2 }
  0xe1   : > { %p3346_p9 = pnand %p3345_p7, %p3339_p3 }
  0xe3   : > { %3349 = shalt.err (!%p3346_p9)
}
  0xe4   : > { %s3350_s21 = scalar_lea.vmem %s3778_s1, 4096  ;;  %s3459_s18 = smov [#allocation2]  }
  0xe5   : > { %p3351_p4 = scmp.ne.s32.totalorder %s3778_s1, %s3350_s21  ;;  %s3355_s26 = sshll.u32 %s3459_s18, 4  ;;  %s3356_s26 = int_to_ptr.vmem [resolvable:$false] %s3355_s26 }
  0xe6   : > { %s3357_s29 = scalar_lea.vmem %s3356_s26, 8192  ;;  %p3358_p10 = scmp.lt.s32.totalorder %s3778_s1, %s3356_s26 }
  0xe7   : > { %p3353_p1 = pnand %p3351_p4, %p3337_p8  ;;  %p3359_p13 = scmp.lt.s32.totalorder %s3357_s29, %s3350_s21 }
  0xe9   : > { %p3354_p11 = pneg %p3353_p1  ;;  %p3360_p0 = por %p3359_p13, %p3358_p10 }
  0xeb   : > { %p3361_p2 = pnand %p3360_p0, %p3354_p11 }
  0xed   : > { %3364 = shalt.err (!%p3361_p2)
}
  0xee   : > { %s3460_s28 = smov 128   ;;  %s3461_s25 = smov 8  }
  0xef   : > { %3023 = dma.hbm_to_vmem [thread:$0]  (!%p3782_p12), %s3776_s14, 4096, %s3778_s1, %s3786_s22, %s3460_s28, %s3460_s28, %s3461_s25  }
  0xf0   : > { %p5561_p8 = scmp.ne.s32.totalorder %s5550_s16, 0 }
  0xf2   : > { %384 = sbr.rel (%p5561_p8) target bundleno = 1302 (0x516), region = 56 }
  0xf9   : > { %s3817_s13 = sand.u32 1, %s3439_s10  }
  0xfa   : > { %s2625_s23 = sshll.u32 %s3817_s13, 8  ;;  %s387_s21 = scalar_lea.sflag [#allocation3], %s3817_s13 }
  0xfb   : > { %s3821_s18 = scalar_lea.vmem [#allocation2], %s2625_s23 }
  0xfc   : > { %3410 = dma.done.wait (%p3757_p6), %s387_s21, 4096  }
  0xfd   : > { %3412 = vsyncadd (%p3757_p6), %s387_s21, 4294963200  ;;  %p5562_p10 = scmp.eq.s32.totalorder %s3537_s15, 0 }
  0xff   : > { %3414 = dma.done.wait (%p5562_p10), [#allocation6], 32   ;;  %p5563_p11 = pmov %p5562_p10 }
 0x100   : > { %p5564_p12 = pmov %p5562_p10 }
 0x101   : > { %3416 = vsyncadd (%p5563_p11), [#allocation6], 4294967264 }
 0x102   : > { %3418 = dma.done.wait (%p5564_p12), [#allocation9], 528   ;;  %p5565_p3 = pmov %p5562_p10 }
 0x104   : > { %3420 = vsyncadd (%p5565_p3), [#allocation9], 4294966768  ;;  %p5566_p5 = pmov %p5565_p3 }
 0x105   : > { %p5567_p7 = pmov %p5565_p3 }
 0x106   : > { %3422 = dma.done.wait (%p5566_p5), [#allocation12], 528  }
 0x107   : > { %3424 = vsyncadd (%p5567_p7), [#allocation12], 4294966768  ;;  %p5568_p6 = pmov %p5565_p3 }
 0x108   : > { %p5569_p9 = pmov %p5565_p3 }
 0x109   : > { %3426 = dma.done.wait (%p5568_p6), [#allocation15], 528  }
 0x10a   : > { %3428 = vsyncadd (%p5569_p9), [#allocation15], 4294966768  ;;  %v3462_v0 = vmov 0   ;;  %v460_v1 = vld [vmem:[%s3821_s18 + $0x10] sm:$0xff]  ;;  %v458_v2 = vld [vmem:[%s3821_s18] sm:$0xff]  ;;  %vm815_vm0 = vcmask 523264  }
 0x10b   : > { %3094 = vset.pattern.permute.xlu1 %v3462_v0  ;;  %3093 = vset.pattern.permute.xlu0 %v3462_v0  ;;  %v461_v3 = vld [vmem:[%s3821_s18 + $0x18] sm:$0xff]  ;;  %v459_v4 = vld [vmem:[%s3821_s18 + $0x8] sm:$0xff]  ;;  %v462_v6 = vld [vmem:[%s3821_s18 + $0x20] sm:$0xff]  ;;  %s2634_s16 = sshll.u32 %s3817_s13, 7  ;;  %s2770_s14 = sshll.u32 %s3537_s15, 11 }
 0x10c   : > { %503 = vperm.xlu1 %3094, %v460_v1   ;;  %493 = vperm.xlu0 %3093, %v458_v2   ;;  %v463_v5 = vld [vmem:[%s3821_s18 + $0x28] sm:$0xff]  ;;  %v465_v7 = vld [vmem:[%s3821_s18 + $0x38] sm:$0xff]  ;;  %v464_v8 = vld [vmem:[%s3821_s18 + $0x30] sm:$0xff]  ;;  %s5074_s20 = scalar_lea.vmem [#allocation17], %s2634_s16  ;;  %s5467_s22 = scalar_lea.hbm %s5542_s9, %s2770_s14 }
 0x10d   : > { %v3095_v9 = vld [vmem:[#allocation8] sm:$0xff]   ;;  %v3096_v11 = vld [vmem:[#allocation8 + $0x8] sm:$0xff]   ;;  %v3097_v13 = vld [vmem:[#allocation8 + $0x10] sm:$0xff]   ;;  %s2461_s1 = sshll.u32 %s5074_s20, 4  ;;  %s2448_s26 = scalar_lea.sflag [#allocation4], %s3817_s13  ;;  %s5469_s1 = int_to_ptr.vmem [resolvable:$true] %s2461_s1 }
 0x10e   : > { %v467_v10 = vld [vmem:[%s3821_s18 + $0x48] sm:$0xff]  ;;  %v466_v12 = vld [vmem:[%s3821_s18 + $0x40] sm:$0xff]  ;;  %2831 = vmatprep.subr.bf16.mxu0 %v3095_v9  ;;  %2951 = vmatprep.subr.bf16.mxu1 %v3095_v9  ;;  %v469_v14 = vld [vmem:[%s3821_s18 + $0x58] sm:$0xff]  ;;  %s3365_s29 = scalar_lea.vmem %s5469_s1, 2048  ;;  %p5705_p1 = scmp.ne.s32.totalorder %s5558_s3, 0 }
 0x10f   : > { %2832 = vmatpush3.bf16.msra.mxu0 %v3095_v9  ;;  %2955 = vmatpush3.bf16.msra.mxu1 %v3095_v9  ;;  %v468_v15 = vld [vmem:[%s3821_s18 + $0x50] sm:$0xff]  ;;  %v3098_v16 = vld [vmem:[#allocation8 + $0x18] sm:$0xff]   ;;  %v471_v17 = vld [vmem:[%s3821_s18 + $0x68] sm:$0xff]  ;;  %p3366_p4 = scmp.ne.s32.totalorder %s5469_s1, %s3365_s29  ;;  %s3463_s28 = smov [#allocation17]  }
 0x110   : > { %508 = vperm.xlu1 %3094, %v461_v3   ;;  %498 = vperm.xlu0 %3093, %v459_v4   ;;  %v470_v18 = vld [vmem:[%s3821_s18 + $0x60] sm:$0xff]  ;;  %v473_v19 = vld [vmem:[%s3821_s18 + $0x78] sm:$0xff]  ;;  %v472_v20 = vld [vmem:[%s3821_s18 + $0x70] sm:$0xff]  ;;  %s3369_s25 = sshll.u32 %s3463_s28, 4  ;;  %s3370_s25 = int_to_ptr.vmem [resolvable:$false] %s3369_s25 }
 0x111   : > { %2833 = vmatprep.subr.bf16.mxu0 %v3096_v11  ;;  %2952 = vmatprep.subr.bf16.mxu1 %v3096_v11  ;;  %v3859_v21 = vld [vmem:[#allocation14] sm:$0xff]   ;;  %v474_v23 = vld [vmem:[%s3821_s18 + $0x80] sm:$0xff]  ;;  %v477_v24 = vld [vmem:[%s3821_s18 + $0x98] sm:$0xff]  ;;  %p3367_p13 = pnand %p3366_p4, %p5705_p1  ;;  %s3371_s23 = scalar_lea.vmem %s3370_s25, 4096 }
 0x112   : > { %v475_v22 = vld [vmem:[%s3821_s18 + $0x88] sm:$0xff]  ;;  %v476_v25 = vld [vmem:[%s3821_s18 + $0x90] sm:$0xff]  ;;  %v478_v27 = vld [vmem:[%s3821_s18 + $0xa0] sm:$0xff]  ;;  %p3372_p2 = scmp.lt.s32.totalorder %s5469_s1, %s3370_s25  ;;  %p3373_p8 = scmp.lt.s32.totalorder %s3371_s23, %s3365_s29 }
 0x113   : > { %2834 = vmatpush3.bf16.msra.mxu0 %v3096_v11  ;;  %2956 = vmatpush3.bf16.msra.mxu1 %v3096_v11  ;;  %v479_v26 = vld [vmem:[%s3821_s18 + $0xa8] sm:$0xff]  ;;  %v481_v28 = vld [vmem:[%s3821_s18 + $0xb8] sm:$0xff]  ;;  %v480_v29 = vld [vmem:[%s3821_s18 + $0xb0] sm:$0xff]  ;;  %p3368_p0 = pneg %p3367_p13 }
 0x114   : > { %518 = vperm.xlu1 %3094, %v463_v5   ;;  %513 = vperm.xlu0 %3093, %v462_v6   ;;  %v483_v30 = vld [vmem:[%s3821_s18 + $0xc8] sm:$0xff]  ;;  %v482_v31 = vld [vmem:[%s3821_s18 + $0xc0] sm:$0xff]  ;;  %v485_v32 = vld [vmem:[%s3821_s18 + $0xd8] sm:$0xff]  ;;  %p3374_p10 = por %p3373_p8, %p3372_p2 }
 0x115   : > { %2835 = vmatprep.subr.bf16.mxu0 %v3097_v13  ;;  %2953 = vmatprep.subr.bf16.mxu1 %v3097_v13  ;;  %v484_v33 = vld [vmem:[%s3821_s18 + $0xd0] sm:$0xff]  ;;  %v487_v34 = vld [vmem:[%s3821_s18 + $0xe8] sm:$0xff]  ;;  %v486_v35 = vld [vmem:[%s3821_s18 + $0xe0] sm:$0xff] }
 0x116   : > { %v489_v36 = vld [vmem:[%s3821_s18 + $0xf8] sm:$0xff]  ;;  %v488_v37 = vld [vmem:[%s3821_s18 + $0xf0] sm:$0xff]  ;;  %v3878_v38 = vld [vmem:[#allocation5] ss:$0 sm:$0xff]  ;;  %p3375_p11 = pnand %p3374_p10, %p3368_p0 }
 0x117   : > { %2836 = vmatpush3.bf16.msra.mxu0 %v3097_v13  ;;  %2957 = vmatpush3.bf16.msra.mxu1 %v3097_v13  ;;  %v3881_v42 = vld [vmem:[#allocation7] ss:$0 sm:$0xff]  ;;  %v3100_v5 = vld [vmem:[#allocation14 + $0x8] sm:$0xff]  }
 0x118   : > { %528 = vperm.xlu1 %3094, %v465_v7   ;;  %523 = vperm.xlu0 %3093, %v464_v8  }
 0x119   : > { %2837 = vmatprep.subr.bf16.mxu0 %v3098_v16  ;;  %2954 = vmatprep.subr.bf16.mxu1 %v3098_v16 }
 0x11b   : > { %2838 = vmatpush3.bf16.msra.mxu0 %v3098_v16  ;;  %2958 = vmatpush3.bf16.msra.mxu1 %v3098_v16 }
 0x11c   : > { %538 = vperm.xlu1 %3094, %v467_v10   ;;  %533 = vperm.xlu0 %3093, %v466_v12  }
 0x11d   : > { %2911 = vmatprep.subr.bf16.mxu0 %v3859_v21 }
 0x120   : > { %548 = vperm.xlu1 %3094, %v469_v14   ;;  %543 = vperm.xlu0 %3093, %v468_v15   ;;  %v3101_v15 = vld [vmem:[#allocation14 + $0x10] sm:$0xff]  }
 0x124   : > { %558 = vperm.xlu1 %3094, %v471_v17   ;;  %553 = vperm.xlu0 %3093, %v470_v18  }
 0x128   : > { %568 = vperm.xlu1 %3094, %v473_v19   ;;  %563 = vperm.xlu0 %3093, %v472_v20  }
 0x12c   : > { %578 = vperm.xlu1 %3094, %v475_v22   ;;  %573 = vperm.xlu0 %3093, %v474_v23  }
 0x130   : > { %588 = vperm.xlu1 %3094, %v477_v24   ;;  %583 = vperm.xlu0 %3093, %v476_v25   ;;  %v3102_v25 = vld [vmem:[#allocation14 + $0x18] sm:$0xff]  }
 0x134   : > { %598 = vperm.xlu1 %3094, %v479_v26   ;;  %593 = vperm.xlu0 %3093, %v478_v27  }
 0x138   : > { %608 = vperm.xlu1 %3094, %v481_v28   ;;  %603 = vperm.xlu0 %3093, %v480_v29  }
 0x13c   : > { %618 = vperm.xlu1 %3094, %v483_v30   ;;  %613 = vperm.xlu0 %3093, %v482_v31  }
 0x140   : > { %628 = vperm.xlu1 %3094, %v485_v32   ;;  %623 = vperm.xlu0 %3093, %v484_v33  }
 0x144   : > { %638 = vperm.xlu1 %3094, %v487_v34   ;;  %633 = vperm.xlu0 %3093, %v486_v35  }
 0x148   : > { %648 = vperm.xlu1 %3094, %v489_v36   ;;  %643 = vperm.xlu0 %3093, %v488_v37  }
 0x18b   : > { %v504_v39 = vpop.permute.xlu1 %503  ;;  %v494_v40 = vpop.permute.xlu0 %493 }
 0x18c   : > { %v659_v41 = vmul.f32 %v3878_v38, %v504_v39  ;;  %v657_v43 = vmul.f32 %v3878_v38, %v494_v40 }
 0x18e   : > { %v3885_v46 = vadd.f32 %v3881_v42, %v659_v41  ;;  %v3890_v49 = vadd.f32 %v3881_v42, %v657_v43 }
 0x18f   : > { %v509_v44 = vpop.permute.xlu1 %508  ;;  %v499_v45 = vpop.permute.xlu0 %498 }
 0x190   : > { %v660_v47 = vmul.f32 %v3878_v38, %v509_v44  ;;  %v658_v48 = vmul.f32 %v3878_v38, %v499_v45  ;;  %v730_v54 = vmax.f32 %v3885_v46, 0.0  ;;  %v728_v58 = vmax.f32 %v3890_v49, 0.0 }
 0x192   : > { %v3893_v50 = vadd.f32 %v3881_v42, %v660_v47  ;;  %v3896_v51 = vadd.f32 %v3881_v42, %v658_v48 }
 0x193   : > { %v519_v52 = vpop.permute.xlu1 %518  ;;  %v514_v53 = vpop.permute.xlu0 %513 }
 0x194   : > { %v731_v55 = vmax.f32 %v3893_v50, 0.0  ;;  %v662_v56 = vmul.f32 %v3878_v38, %v519_v52  ;;  %v661_v57 = vmul.f32 %v3878_v38, %v514_v53  ;;  %v729_v59 = vmax.f32 %v3896_v51, 0.0 }
 0x196   : > { %v761_v60 = vpack.c.bf16 %v731_v55, %v730_v54  ;;  %v3905_v61 = vadd.f32 %v3881_v42, %v662_v56  ;;  %v3908_v62 = vadd.f32 %v3881_v42, %v661_v57  ;;  %v760_v1 = vpack.c.bf16 %v729_v59, %v728_v58 }
 0x197   : > { %v529_v63 = vpop.permute.xlu1 %528  ;;  %v524_v0 = vpop.permute.xlu0 %523 }
 0x198   : > { %v733_v2 = vmax.f32 %v3905_v61, 0.0  ;;  %v664_v3 = vmul.f32 %v3878_v38, %v529_v63  ;;  %v663_v4 = vmul.f32 %v3878_v38, %v524_v0  ;;  %v732_v6 = vmax.f32 %v3908_v62, 0.0  ;;  %2839 = vmatprep.mubr.msk.bf16.mxu0 %vm815_vm0, %v760_v1 }
 0x199   : > { %2840 = vmatmul.mubr.msk.bf16.vlgmr.msra.gmra.mrb[0].mxu0 %vm815_vm0, %v761_v60 }
 0x19a   : > { %v3916_v7 = vadd.f32 %v3881_v42, %v664_v3  ;;  %v3919_v8 = vadd.f32 %v3881_v42, %v663_v4  ;;  %v762_v9 = vpack.c.bf16 %v733_v2, %v732_v6  ;;  %2912 = vmatpush3.bf16.msra.mxu0 %v3859_v21  ;;  %v1958_v6 = vpack.c.bf16 %v3896_v51, %v3890_v49 }
 0x19b   : > { %v539_v10 = vpop.permute.xlu1 %538  ;;  %v534_v11 = vpop.permute.xlu0 %533  ;;  %2913 = vmatprep.subr.bf16.mxu0 %v3100_v5 }
 0x19c   : > { %v735_v12 = vmax.f32 %v3916_v7, 0.0  ;;  %v734_v13 = vmax.f32 %v3919_v8, 0.0  ;;  %v666_v14 = vmul.f32 %v3878_v38, %v539_v10  ;;  %v665_v16 = vmul.f32 %v3878_v38, %v534_v11  ;;  %2843 = vmatprep.mubr.msk.bf16.mxu0 %vm815_vm0, %v762_v9 }
 0x19e   : > { %v763_v17 = vpack.c.bf16 %v735_v12, %v734_v13  ;;  %v3929_v18 = vadd.f32 %v3881_v42, %v666_v14  ;;  %v3932_v19 = vadd.f32 %v3881_v42, %v665_v16  ;;  %2914 = vmatpush3.bf16.msra.mxu0 %v3100_v5 }
 0x19f   : > { %v549_v20 = vpop.permute.xlu1 %548  ;;  %v544_v21 = vpop.permute.xlu0 %543  ;;  %2915 = vmatprep.subr.bf16.mxu0 %v3101_v15 }
 0x1a0   : > { %v737_v22 = vmax.f32 %v3929_v18, 0.0  ;;  %v668_v23 = vmul.f32 %v3878_v38, %v549_v20  ;;  %v667_v24 = vmul.f32 %v3878_v38, %v544_v21  ;;  %v736_v26 = vmax.f32 %v3932_v19, 0.0 }
 0x1a1   : > { %2844 = vmatmul.mubr.msk.bf16.gmra.mrb[4].mxu0 %vm815_vm0, %v763_v17 }
 0x1a2   : > { %v3939_v27 = vadd.f32 %v3881_v42, %v668_v23  ;;  %v3942_v28 = vadd.f32 %v3881_v42, %v667_v24  ;;  %v764_v29 = vpack.c.bf16 %v737_v22, %v736_v26  ;;  %2916 = vmatpush3.bf16.msra.mxu0 %v3101_v15  ;;  %v1959_v24 = vpack.c.bf16 %v3893_v50, %v3885_v46 }
 0x1a3   : > { %v559_v30 = vpop.permute.xlu1 %558  ;;  %v554_v31 = vpop.permute.xlu0 %553  ;;  %2917 = vmatprep.subr.bf16.mxu0 %v3102_v25 }
 0x1a4   : > { %v739_v32 = vmax.f32 %v3939_v27, 0.0  ;;  %v738_v33 = vmax.f32 %v3942_v28, 0.0  ;;  %v670_v34 = vmul.f32 %v3878_v38, %v559_v30  ;;  %v669_v35 = vmul.f32 %v3878_v38, %v554_v31  ;;  %2847 = vmatprep.mubr.msk.bf16.mxu0 %vm815_vm0, %v764_v29 }
 0x1a5   : > { %v1960_v30 = vpack.c.bf16 %v3905_v61, %v3908_v62 }
 0x1a6   : > { %v765_v36 = vpack.c.bf16 %v739_v32, %v738_v33  ;;  %v3951_v37 = vadd.f32 %v3881_v42, %v670_v34  ;;  %v3954_v39 = vadd.f32 %v3881_v42, %v669_v35  ;;  %2918 = vmatpush3.bf16.msra.mxu0 %v3102_v25 }
 0x1a7   : > { %v569_v40 = vpop.permute.xlu1 %568  ;;  %v564_v41 = vpop.permute.xlu0 %563 }
 0x1a8   : > { %v741_v43 = vmax.f32 %v3951_v37, 0.0  ;;  %v672_v44 = vmul.f32 %v3878_v38, %v569_v40  ;;  %v671_v45 = vmul.f32 %v3878_v38, %v564_v41  ;;  %v740_v47 = vmax.f32 %v3954_v39, 0.0 }
 0x1a9   : > { %2848 = vmatmul.mubr.msk.bf16.gmra.mrb[8].mxu0 %vm815_vm0, %v765_v36 }
 0x1aa   : > { %v3961_v48 = vadd.f32 %v3881_v42, %v672_v44  ;;  %v3964_v52 = vadd.f32 %v3881_v42, %v671_v45  ;;  %v766_v53 = vpack.c.bf16 %v741_v43, %v740_v47  ;;  %v1961_v47 = vpack.c.bf16 %v3916_v7, %v3919_v8 }
 0x1ab   : > { %v579_v54 = vpop.permute.xlu1 %578  ;;  %v574_v55 = vpop.permute.xlu0 %573 }
 0x1ac   : > { %v743_v56 = vmax.f32 %v3961_v48, 0.0  ;;  %v742_v57 = vmax.f32 %v3964_v52, 0.0  ;;  %v674_v58 = vmul.f32 %v3878_v38, %v579_v54  ;;  %v673_v59 = vmul.f32 %v3878_v38, %v574_v55  ;;  %2851 = vmatprep.mubr.msk.bf16.mxu0 %vm815_vm0, %v766_v53 }
 0x1ae   : > { %v767_v60 = vpack.c.bf16 %v743_v56, %v742_v57  ;;  %v3973_v63 = vadd.f32 %v3881_v42, %v674_v58  ;;  %v3976_v0 = vadd.f32 %v3881_v42, %v673_v59  ;;  %v1962_v56 = vpack.c.bf16 %v3929_v18, %v3932_v19 }
 0x1af   : > { %v589_v1 = vpop.permute.xlu1 %588  ;;  %v584_v2 = vpop.permute.xlu0 %583 }
 0x1b0   : > { %v676_v3 = vmul.f32 %v3878_v38, %v589_v1  ;;  %v675_v4 = vmul.f32 %v3878_v38, %v584_v2  ;;  %v745_v5 = vmax.f32 %v3973_v63, 0.0  ;;  %v744_v9 = vmax.f32 %v3976_v0, 0.0 }
 0x1b1   : > { %2852 = vmatmul.mubr.msk.bf16.gmra.mrb[12].mxu0 %vm815_vm0, %v767_v60 }
 0x1b2   : > { %v3985_v10 = vadd.f32 %v3881_v42, %v676_v3  ;;  %v3988_v11 = vadd.f32 %v3881_v42, %v675_v4  ;;  %2919 = vmatprep.mubr.msk.bf16.mxu0 %vm815_vm0, %v1958_v6  ;;  %v768_v14 = vpack.c.bf16 %v745_v5, %v744_v9 }
 0x1b3   : > { %v599_v12 = vpop.permute.xlu1 %598  ;;  %v594_v13 = vpop.permute.xlu0 %593 }
 0x1b4   : > { %v747_v15 = vmax.f32 %v3985_v10, 0.0  ;;  %v746_v16 = vmax.f32 %v3988_v11, 0.0  ;;  %v678_v49 = vmul.f32 %v3878_v38, %v599_v12  ;;  %v677_v51 = vmul.f32 %v3878_v38, %v594_v13  ;;  %2855 = vmatprep.mubr.msk.bf16.mxu1 %vm815_vm0, %v768_v14 }
 0x1b5   : > { %v1963_v12 = vpack.c.bf16 %v3939_v27, %v3942_v28 }
 0x1b6   : > { %v769_v17 = vpack.c.bf16 %v747_v15, %v746_v16  ;;  %v3998_v20 = vadd.f32 %v3881_v42, %v678_v49  ;;  %v4001_v21 = vadd.f32 %v3881_v42, %v677_v51  ;;  %v1964_v16 = vpack.c.bf16 %v3951_v37, %v3954_v39 }
 0x1b7   : > { %v609_v22 = vpop.permute.xlu1 %608  ;;  %v604_v23 = vpop.permute.xlu0 %603  ;;  %v1966_v37 = vpack.c.bf16 %v3973_v63, %v3976_v0 }
 0x1b8   : > { %v749_v25 = vmax.f32 %v3998_v20, 0.0  ;;  %v680_v26 = vmul.f32 %v3878_v38, %v609_v22  ;;  %v679_v29 = vmul.f32 %v3878_v38, %v604_v23  ;;  %2856 = vmatmul.mubr.msk.bf16.vlgmr.msra.gmra.mrb[0].mxu1 %vm815_vm0, %v769_v17  ;;  %v748_v31 = vmax.f32 %v4001_v21, 0.0 }
 0x1b9   : > { %2920 = vmatmul.mubr.msk.bf16.vlgmr.msra.gmra.mrb[16].mxu0 %vm815_vm0, %v1959_v24  ;;  %v1965_v23 = vpack.c.bf16 %v3961_v48, %v3964_v52  ;;  %v1968_v39 = vpack.c.bf16 %v3998_v20, %v4001_v21 }
 0x1ba   : > { %v4013_v32 = vadd.f32 %v3881_v42, %v680_v26  ;;  %v4016_v33 = vadd.f32 %v3881_v42, %v679_v29  ;;  %v770_v46 = vpack.c.bf16 %v749_v25, %v748_v31  ;;  %2923 = vmatprep.mubr.msk.bf16.mxu0 %vm815_vm0, %v1960_v30 }
 0x1bb   : > { %v619_v50 = vpop.permute.xlu1 %618  ;;  %v614_v34 = vpop.permute.xlu0 %613 }
 0x1bc   : > { %v751_v35 = vmax.f32 %v4013_v32, 0.0  ;;  %v750_v36 = vmax.f32 %v4016_v33, 0.0  ;;  %v682_v61 = vmul.f32 %v3878_v38, %v619_v50  ;;  %v681_v62 = vmul.f32 %v3878_v38, %v614_v34  ;;  %2859 = vmatprep.mubr.msk.bf16.mxu1 %vm815_vm0, %v770_v46 }
 0x1bd   : > { %v1969_v48 = vpack.c.bf16 %v4013_v32, %v4016_v33 }
 0x1be   : > { %v771_v40 = vpack.c.bf16 %v751_v35, %v750_v36  ;;  %v721_v41 = vadd.f32 %v3881_v42, %v682_v61  ;;  %v720_v43 = vadd.f32 %v3881_v42, %v681_v62 }
 0x1bf   : > { %v629_v44 = vpop.permute.xlu1 %628  ;;  %v624_v45 = vpop.permute.xlu0 %623 }
 0x1c0   : > { %v753_v53 = vmax.f32 %v721_v41, 0.0  ;;  %v684_v54 = vmul.f32 %v3878_v38, %v629_v44  ;;  %v683_v55 = vmul.f32 %v3878_v38, %v624_v45  ;;  %2860 = vmatmul.mubr.msk.bf16.gmra.mrb[4].mxu1 %vm815_vm0, %v771_v40  ;;  %v752_v57 = vmax.f32 %v720_v43, 0.0 }
 0x1c1   : > { %2924 = vmatmul.mubr.msk.bf16.gmra.mrb[20].mxu0 %vm815_vm0, %v1961_v47  ;;  %v1970_v52 = vpack.c.bf16 %v721_v41, %v720_v43 }
 0x1c2   : > { %v723_v58 = vadd.f32 %v3881_v42, %v684_v54  ;;  %v722_v59 = vadd.f32 %v3881_v42, %v683_v55  ;;  %v772_v60 = vpack.c.bf16 %v753_v53, %v752_v57  ;;  %2927 = vmatprep.mubr.msk.bf16.mxu0 %vm815_vm0, %v1962_v56 }
 0x1c3   : > { %v639_v7 = vpop.permute.xlu1 %638  ;;  %v634_v8 = vpop.permute.xlu0 %633 }
 0x1c4   : > { %v755_v1 = vmax.f32 %v723_v58, 0.0  ;;  %v754_v2 = vmax.f32 %v722_v59, 0.0  ;;  %v686_v3 = vmul.f32 %v3878_v38, %v639_v7  ;;  %v685_v4 = vmul.f32 %v3878_v38, %v634_v8  ;;  %2863 = vmatprep.mubr.msk.bf16.mxu1 %vm815_vm0, %v772_v60 }
 0x1c5   : > { %v1971_v63 = vpack.c.bf16 %v723_v58, %v722_v59 }
 0x1c6   : > { %v773_v18 = vpack.c.bf16 %v755_v1, %v754_v2  ;;  %v725_v19 = vadd.f32 %v3881_v42, %v686_v3  ;;  %v724_v5 = vadd.f32 %v3881_v42, %v685_v4 }
 0x1c7   : > { %v649_v6 = vpop.permute.xlu1 %648  ;;  %v644_v9 = vpop.permute.xlu0 %643 }
 0x1c8   : > { %v757_v13 = vmax.f32 %v725_v19, 0.0  ;;  %v688_v14 = vmul.f32 %v3878_v38, %v649_v6  ;;  %v687_v15 = vmul.f32 %v3878_v38, %v644_v9  ;;  %2864 = vmatmul.mubr.msk.bf16.gmra.mrb[8].mxu1 %vm815_vm0, %v773_v18  ;;  %v756_v49 = vmax.f32 %v724_v5, 0.0 }
 0x1c9   : > { %2928 = vmatmul.mubr.msk.bf16.gmra.mrb[24].mxu0 %vm815_vm0, %v1963_v12  ;;  %v1972_v0 = vpack.c.bf16 %v725_v19, %v724_v5 }
 0x1ca   : > { %v727_v51 = vadd.f32 %v3881_v42, %v688_v14  ;;  %v726_v17 = vadd.f32 %v3881_v42, %v687_v15  ;;  %v774_v22 = vpack.c.bf16 %v757_v13, %v756_v49  ;;  %2931 = vmatprep.mubr.msk.bf16.mxu0 %vm815_vm0, %v1964_v16  ;;  %v1967_v42 = vpack.c.bf16 %v3985_v10, %v3988_v11  ;;  %v4075_v11 = vld [vmem:[#allocation10] ss:$0 sm:$0xff] }
 0x1cc   : > { %v759_v27 = vmax.f32 %v727_v51, 0.0  ;;  %v758_v28 = vmax.f32 %v726_v17, 0.0  ;;  %2867 = vmatprep.mubr.msk.bf16.mxu1 %vm815_vm0, %v774_v22  ;;  %v1973_v10 = vpack.c.bf16 %v727_v51, %v726_v17 }
 0x1ce   : > { %v775_v38 = vpack.c.bf16 %v759_v27, %v758_v28 }
 0x1d0   : > { %2868 = vmatmul.mubr.msk.bf16.gmra.mrb[12].mxu1 %vm815_vm0, %v775_v38 }
 0x1d1   : > { %2932 = vmatmul.mubr.msk.bf16.gmra.mrb[28].mxu0 %vm815_vm0, %v1965_v23 }
 0x1d2   : > { %2935 = vmatprep.mubr.msk.bf16.mxu0 %vm815_vm0, %v1966_v37 }
 0x1d9   : > { %2936 = vmatmul.mubr.msk.bf16.gmra.mrb[32].mxu0 %vm815_vm0, %v1967_v42 }
 0x1da   : > { %2939 = vmatprep.mubr.msk.bf16.mxu0 %vm815_vm0, %v1968_v39 }
 0x1e1   : > { %2940 = vmatmul.mubr.msk.bf16.gmra.mrb[36].mxu0 %vm815_vm0, %v1969_v48 }
 0x1e2   : > { %2943 = vmatprep.mubr.msk.bf16.mxu0 %vm815_vm0, %v1970_v52 }
 0x1e9   : > { %2944 = vmatmul.mubr.msk.bf16.gmra.mrb[40].mxu0 %vm815_vm0, %v1971_v63 }
 0x1ea   : > { %2947 = vmatprep.mubr.msk.bf16.mxu0 %vm815_vm0, %v1972_v0 }
 0x1f1   : > { %2948 = vmatmul.mubr.msk.bf16.gmra.mrb[44].mxu0 %vm815_vm0, %v1973_v10 }
 0x26c   : > { %v2841_v20 = vpop.f32.mrb[0].mxu0 }
 0x26d   : > { %v898_v21 = vpop.f32.mrb[1].mxu0  ;;  %v4081_v29 = vadd.f32 %v2841_v20, %v4075_v11 }
 0x26e   : > { %v4078_v24 = vadd.f32 %v4075_v11, %v898_v21  ;;  %v2842_v25 = vpop.f32.mrb[2].mxu0 }
 0x26f   : > { %v901_v26 = vpop.f32.mrb[3].mxu0  ;;  %v4089_v32 = vadd.f32 %v2842_v25, %v4075_v11  ;;  %v1028_v50 = vsel %vm815_vm0, %v4081_v29, 0.0 }
 0x270   : > { %v4084_v30 = vadd.f32 %v4075_v11, %v901_v26  ;;  %v1025_v31 = vsel %vm815_vm0, %v4078_v24, 0.0 }
 0x271   : > { %v1030_v61 = vsel %vm815_vm0, %v4089_v32, 0.0 }
 0x272   : > { %v1026_v33 = vsel %vm815_vm0, %v4084_v30, 0.0 }
 0x273   : > { %v1027_v46 = vadd.f32 %v1026_v33, %v1025_v31 }
 0x274   : > { %v2845_v34 = vpop.f32.mrb[4].mxu0 }
 0x275   : > { %v1029_v35 = vadd.f32 %v1028_v50, %v1027_v46  ;;  %v914_v36 = vpop.f32.mrb[5].mxu0  ;;  %v4101_v44 = vadd.f32 %v2845_v34, %v4075_v11 }
 0x276   : > { %v4098_v62 = vadd.f32 %v4075_v11, %v914_v36  ;;  %v2846_v40 = vpop.f32.mrb[6].mxu0 }
 0x277   : > { %v1031_v41 = vadd.f32 %v1030_v61, %v1029_v35  ;;  %v917_v43 = vpop.f32.mrb[7].mxu0  ;;  %v4109_v54 = vadd.f32 %v2846_v40, %v4075_v11  ;;  %v1036_v57 = vsel %vm815_vm0, %v4101_v44, 0.0 }
 0x278   : > { %v1032_v45 = vsel %vm815_vm0, %v4098_v62, 0.0  ;;  %v4106_v47 = vadd.f32 %v4075_v11, %v917_v43 }
 0x279   : > { %v1033_v53 = vadd.f32 %v1032_v45, %v1031_v41  ;;  %v1038_v7 = vsel %vm815_vm0, %v4109_v54, 0.0 }
 0x27a   : > { %v1034_v55 = vsel %vm815_vm0, %v4106_v47, 0.0 }
 0x27b   : > { %v1035_v56 = vadd.f32 %v1034_v55, %v1033_v53 }
 0x27c   : > { %v2849_v58 = vpop.f32.mrb[8].mxu0 }
 0x27d   : > { %v1037_v59 = vadd.f32 %v1036_v57, %v1035_v56  ;;  %v930_v60 = vpop.f32.mrb[9].mxu0  ;;  %v4121_v4 = vadd.f32 %v2849_v58, %v4075_v11 }
 0x27e   : > { %v4118_v8 = vadd.f32 %v4075_v11, %v930_v60  ;;  %v2850_v1 = vpop.f32.mrb[10].mxu0 }
 0x27f   : > { %v1039_v2 = vadd.f32 %v1038_v7, %v1037_v59  ;;  %v933_v3 = vpop.f32.mrb[11].mxu0  ;;  %v4129_v6 = vadd.f32 %v2850_v1, %v4075_v11  ;;  %v1044_v13 = vsel %vm815_vm0, %v4121_v4, 0.0 }
 0x280   : > { %v1040_v18 = vsel %vm815_vm0, %v4118_v8, 0.0  ;;  %v4126_v19 = vadd.f32 %v4075_v11, %v933_v3 }
 0x281   : > { %v1041_v5 = vadd.f32 %v1040_v18, %v1039_v2  ;;  %v1046_v49 = vsel %vm815_vm0, %v4129_v6, 0.0 }
 0x282   : > { %v1042_v9 = vsel %vm815_vm0, %v4126_v19, 0.0 }
 0x283   : > { %v1043_v12 = vadd.f32 %v1042_v9, %v1041_v5 }
 0x284   : > { %v2853_v14 = vpop.f32.mrb[12].mxu0 }
 0x285   : > { %v1045_v15 = vadd.f32 %v1044_v13, %v1043_v12  ;;  %v946_v16 = vpop.f32.mrb[13].mxu0  ;;  %v4141_v28 = vadd.f32 %v2853_v14, %v4075_v11 }
 0x286   : > { %v4138_v51 = vadd.f32 %v4075_v11, %v946_v16  ;;  %v2854_v17 = vpop.f32.mrb[14].mxu0 }
 0x287   : > { %v1047_v22 = vadd.f32 %v1046_v49, %v1045_v15  ;;  %v949_v27 = vpop.f32.mrb[15].mxu0  ;;  %v4149_v42 = vadd.f32 %v2854_v17, %v4075_v11  ;;  %v1052_v0 = vsel %vm815_vm0, %v4141_v28, 0.0 }
 0x288   : > { %v1048_v38 = vsel %vm815_vm0, %v4138_v51, 0.0  ;;  %v4146_v23 = vadd.f32 %v4075_v11, %v949_v27 }
 0x289   : > { %v1049_v37 = vadd.f32 %v1048_v38, %v1047_v22  ;;  %v1054_v33 = vsel %vm815_vm0, %v4149_v42, 0.0 }
 0x28a   : > { %v1050_v39 = vsel %vm815_vm0, %v4146_v23, 0.0 }
 0x28b   : > { %v2857_v48 = vpop.f32.mrb[0].mxu1  ;;  %v1051_v52 = vadd.f32 %v1050_v39, %v1049_v37 }
 0x28c   : > { %v962_v63 = vpop.f32.mrb[1].mxu1  ;;  %v4158_v20 = vpop.f32.mrb[16].mxu0  ;;  %v4174_v61 = vadd.f32 %v2857_v48, %v4075_v11 }
 0x28d   : > { %v4156_v10 = vadd.f32 %v4075_v11, %v962_v63  ;;  %v2858_v21 = vpop.f32.mrb[2].mxu1  ;;  %v1053_v25 = vadd.f32 %v1052_v0, %v1051_v52  ;;  %v4160_v26 = vpop.f32.mrb[17].mxu0 }
 0x28e   : > { %v965_v31 = vpop.f32.mrb[3].mxu1  ;;  %v4169_v34 = vpop.f32.mrb[18].mxu0  ;;  %v4179_v43 = vadd.f32 %v2858_v21, %v4075_v11  ;;  %v1060_v56 = vsel %vm815_vm0, %v4174_v61, 0.0 }
 0x28f   : > { %v1056_v46 = vsel %vm815_vm0, %v4156_v10, 0.0  ;;  %v4167_v50 = vadd.f32 %v4075_v11, %v965_v31  ;;  %v1055_v35 = vadd.f32 %v1054_v33, %v1053_v25  ;;  %v4171_v36 = vpop.f32.mrb[19].mxu0 }
 0x290   : > { %v1062_v2 = vsel %vm815_vm0, %v4179_v43, 0.0 }
 0x291   : > { %v1058_v40 = vsel %vm815_vm0, %v4167_v50, 0.0  ;;  %v1057_v41 = vadd.f32 %v1056_v46, %v1055_v35 }
 0x293   : > { %v2861_v45 = vpop.f32.mrb[4].mxu1  ;;  %v1059_v53 = vadd.f32 %v1058_v40, %v1057_v41 }
 0x294   : > { %v978_v55 = vpop.f32.mrb[5].mxu1  ;;  %v4186_v58 = vpop.f32.mrb[20].mxu0  ;;  %v4202_v13 = vadd.f32 %v2861_v45, %v4075_v11 }
 0x295   : > { %v4184_v57 = vadd.f32 %v4075_v11, %v978_v55  ;;  %v2862_v59 = vpop.f32.mrb[6].mxu1  ;;  %v1061_v60 = vadd.f32 %v1060_v56, %v1059_v53  ;;  %v4188_v7 = vpop.f32.mrb[21].mxu0 }
 0x296   : > { %v981_v1 = vpop.f32.mrb[7].mxu1  ;;  %v4197_v5 = vpop.f32.mrb[22].mxu0  ;;  %v4207_v16 = vadd.f32 %v2862_v59, %v4075_v11  ;;  %v1068_v27 = vsel %vm815_vm0, %v4202_v13, 0.0 }
 0x297   : > { %v1064_v3 = vsel %vm815_vm0, %v4184_v57, 0.0  ;;  %v4195_v18 = vadd.f32 %v4075_v11, %v981_v1  ;;  %v1063_v9 = vadd.f32 %v1062_v2, %v1061_v60  ;;  %v4199_v12 = vpop.f32.mrb[23].mxu0 }
 0x298   : > { %v1070_v0 = vsel %vm815_vm0, %v4207_v16, 0.0 }
 0x299   : > { %v1066_v14 = vsel %vm815_vm0, %v4195_v18, 0.0  ;;  %v1065_v15 = vadd.f32 %v1064_v3, %v1063_v9 }
 0x29b   : > { %v2865_v49 = vpop.f32.mrb[8].mxu1  ;;  %v1067_v17 = vadd.f32 %v1066_v14, %v1065_v15 }
 0x29c   : > { %v994_v22 = vpop.f32.mrb[9].mxu1  ;;  %v4214_v37 = vpop.f32.mrb[24].mxu0  ;;  %v4230_v35 = vadd.f32 %v2865_v49, %v4075_v11 }
 0x29d   : > { %v4212_v38 = vadd.f32 %v4075_v11, %v994_v22  ;;  %v2866_v39 = vpop.f32.mrb[10].mxu1  ;;  %v1069_v48 = vadd.f32 %v1068_v27, %v1067_v17  ;;  %v4216_v52 = vpop.f32.mrb[25].mxu0 }
 0x29e   : > { %v997_v63 = vpop.f32.mrb[11].mxu1  ;;  %v4225_v31 = vpop.f32.mrb[26].mxu0  ;;  %v4235_v45 = vadd.f32 %v2866_v39, %v4075_v11  ;;  %v1076_v59 = vsel %vm815_vm0, %v4230_v35, 0.0 }
 0x29f   : > { %v1072_v21 = vsel %vm815_vm0, %v4212_v38, 0.0  ;;  %v4223_v25 = vadd.f32 %v4075_v11, %v997_v63  ;;  %v1071_v33 = vadd.f32 %v1070_v0, %v1069_v48  ;;  %v4227_v46 = vpop.f32.mrb[27].mxu0 }
 0x2a0   : > { %v1078_v15 = vsel %vm815_vm0, %v4235_v45, 0.0 }
 0x2a1   : > { %v1074_v40 = vsel %vm815_vm0, %v4223_v25, 0.0  ;;  %v1073_v41 = vadd.f32 %v1072_v21, %v1071_v33 }
 0x2a3   : > { %v2869_v53 = vpop.f32.mrb[12].mxu1  ;;  %v1075_v55 = vadd.f32 %v1074_v40, %v1073_v41 }
 0x2a4   : > { %v1010_v56 = vpop.f32.mrb[13].mxu1  ;;  %v4242_v1 = vpop.f32.mrb[28].mxu0  ;;  %v1019_v48 = vadd.f32 %v2869_v53, %v4075_v11 }
 0x2a5   : > { %v4240_v60 = vadd.f32 %v4075_v11, %v1010_v56  ;;  %v2870_v2 = vpop.f32.mrb[14].mxu1  ;;  %v1077_v3 = vadd.f32 %v1076_v59, %v1075_v55  ;;  %v4244_v9 = vpop.f32.mrb[29].mxu0 }
 0x2a6   : > { %5570 = vst [vmem:[#allocation24_spill] sm:$0xff] %v4244_v9  ;;  %v1013_v14 = vpop.f32.mrb[15].mxu1  ;;  %v4253_v22 = vpop.f32.mrb[30].mxu0  ;;  %v1022_v21 = vadd.f32 %v2870_v2, %v4075_v11  ;;  %v1084_v40 = vsel %vm815_vm0, %v1019_v48, 0.0 }
 0x2a7   : > { %v1080_v49 = vsel %vm815_vm0, %v4240_v60, 0.0  ;;  %v4251_v17 = vadd.f32 %v4075_v11, %v1013_v14  ;;  %5571 = vst [vmem:[#allocation25_spill] sm:$0xff] %v4253_v22  ;;  %v1079_v27 = vadd.f32 %v1078_v15, %v1077_v3  ;;  %v4255_v39 = vpop.f32.mrb[31].mxu0 }
 0x2a8   : > { %5572 = vst [vmem:[#allocation26_spill] sm:$0xff] %v4255_v39  ;;  %v1086_v59 = vsel %vm815_vm0, %v1022_v21, 0.0 }
 0x2a9   : > { %v1082_v63 = vsel %vm815_vm0, %v4251_v17, 0.0  ;;  %v1081_v0 = vadd.f32 %v1080_v49, %v1079_v27 }
 0x2ab   : > { %v1083_v33 = vadd.f32 %v1082_v63, %v1081_v0 }
 0x2ac   : > { %v4262_v41 = vpop.f32.mrb[32].mxu0 }
 0x2ad   : > { %5573 = vst [vmem:[#allocation27_spill] sm:$0xff] %v4262_v41  ;;  %v1085_v55 = vadd.f32 %v1084_v40, %v1083_v33  ;;  %v4264_v56 = vpop.f32.mrb[33].mxu0  ;;  %v3103_v33 = vld [vmem:[#allocation11] sm:$0xff]  }
 0x2ae   : > { %5574 = vst [vmem:[#allocation28_spill] sm:$0xff] %v4264_v56  ;;  %v4267_v3 = vpop.f32.mrb[34].mxu0  ;;  %2871 = vmatprep.subr.bf16.mxu1 %v3103_v33 }
 0x2af   : > { %5575 = vst [vmem:[#allocation29_spill] sm:$0xff] %v4267_v3  ;;  %v1087_v14 = vadd.f32 %v1086_v59, %v1085_v55  ;;  %v4269_v53 = vpop.f32.mrb[35].mxu0  ;;  %2872 = vmatpush3.bf16.msra.mxu1 %v3103_v33  ;;  %v3104_v55 = vld [vmem:[#allocation11 + $0x8] sm:$0xff]  }
 0x2b0   : > { %5576 = vst [vmem:[#allocation30_spill] sm:$0xff] %v4269_v53  ;;  %2873 = vmatprep.subr.bf16.mxu1 %v3104_v55 }
 0x2b1   : > { %v1088_v15 = vrot.slane %v1087_v14, 4 }
 0x2b3   : > { %v1089_v39 = vadd.f32 %v1088_v15, %v1087_v14  ;;  %2874 = vmatpush3.bf16.msra.mxu1 %v3104_v55  ;;  %v3106_v55 = vld [vmem:[#allocation11 + $0x18] sm:$0xff]  }
 0x2b4   : > { %v4271_v49 = vpop.f32.mrb[36].mxu0 }
 0x2b5   : > { %5577 = vst [vmem:[#allocation31_spill] sm:$0xff] %v4271_v49  ;;  %v1090_v11 = vrot.slane %v1089_v39, 2  ;;  %v4273_v2 = vpop.f32.mrb[37].mxu0 }
 0x2b6   : > { %5578 = vst [vmem:[#allocation32_spill] sm:$0xff] %v4273_v2  ;;  %v4275_v27 = vpop.f32.mrb[38].mxu0 }
 0x2b7   : > { %5579 = vst [vmem:[#allocation33_spill] sm:$0xff] %v4275_v27  ;;  %v1091_v63 = vadd.f32 %v1090_v11, %v1089_v39  ;;  %v4277_v0 = vpop.f32.mrb[39].mxu0  ;;  %v3105_v39 = vld [vmem:[#allocation11 + $0x10] sm:$0xff]  }
 0x2b8   : > { %5580 = vst [vmem:[#allocation34_spill] sm:$0xff] %v4277_v0  ;;  %2875 = vmatprep.subr.bf16.mxu1 %v3105_v39 }
 0x2b9   : > { %v1092_v40 = vrot.slane %v1091_v63, 1  ;;  %2876 = vmatpush3.bf16.msra.mxu1 %v3105_v39 }
 0x2ba   : > { %2877 = vmatprep.subr.bf16.mxu1 %v3106_v55 }
 0x2bb   : > { %v1093_v3 = vadd.f32 %v1092_v40, %v1091_v63 }
 0x2bc   : > { %v4279_v59 = vpop.f32.mrb[40].mxu0 }
 0x2bd   : > { %5581 = vst [vmem:[#allocation35_spill] sm:$0xff] %v4279_v59  ;;  %v4281_v53 = vmul.f32 0.00390625, %v1093_v3  ;;  %v4283_v14 = vpop.f32.mrb[41].mxu0  ;;  %2878 = vmatpush3.bf16.msra.mxu1 %v3106_v55 }
 0x2be   : > { %5582 = vst [vmem:[#allocation36_spill] sm:$0xff] %v4283_v14  ;;  %v4285_v15 = vpop.f32.mrb[42].mxu0 }
 0x2bf   : > { %5583 = vst [vmem:[#allocation37_spill] sm:$0xff] %v4285_v15  ;;  %v4287_v27 = vpop.f32.mrb[43].mxu0  ;;  %v4291_v11 = vsub.f32 %v4126_v19, %v4281_v53  ;;  %v4295_v63 = vsub.f32 %v4129_v6, %v4281_v53  ;;  %v4299_v3 = vsub.f32 %v4138_v51, %v4281_v53  ;;  %v4303_v33 = vsub.f32 %v4146_v23, %v4281_v53 }
 0x2c0   : > { %5584 = vst [vmem:[#allocation38_spill] sm:$0xff] %v4287_v27  ;;  %v4307_v40 = vsub.f32 %v4141_v28, %v4281_v53  ;;  %v4311_v19 = vsub.f32 %v4149_v42, %v4281_v53  ;;  %v4315_v6 = vsub.f32 %v4156_v10, %v4281_v53  ;;  %v4319_v51 = vsub.f32 %v4167_v50, %v4281_v53 }
 0x2c1   : > { %v4323_v23 = vsub.f32 %v4174_v61, %v4281_v53  ;;  %v4327_v28 = vsub.f32 %v4179_v43, %v4281_v53  ;;  %v4331_v42 = vsub.f32 %v4184_v57, %v4281_v53  ;;  %v4335_v10 = vsub.f32 %v4195_v18, %v4281_v53 }
 0x2c2   : > { %v4339_v50 = vsub.f32 %v4202_v13, %v4281_v53  ;;  %v4343_v61 = vsub.f32 %v4207_v16, %v4281_v53  ;;  %v4349_v43 = vsub.f32 %v4212_v38, %v4281_v53  ;;  %v4353_v57 = vsub.f32 %v4223_v25, %v4281_v53 }
 0x2c3   : > { %v4357_v18 = vsub.f32 %v4230_v35, %v4281_v53  ;;  %v4361_v13 = vsub.f32 %v4235_v45, %v4281_v53  ;;  %v4371_v38 = vsub.f32 %v4251_v17, %v4281_v53  ;;  %v4374_v25 = vsub.f32 %v1019_v48, %v4281_v53 }
 0x2c4   : > { %v4345_v39 = vpop.f32.mrb[44].mxu0  ;;  %v4377_v35 = vsub.f32 %v1022_v21, %v4281_v53  ;;  %v4383_v45 = vsub.f32 %v4078_v24, %v4281_v53  ;;  %v4393_v17 = vsub.f32 %v4081_v29, %v4281_v53  ;;  %v4397_v48 = vsub.f32 %v4089_v32, %v4281_v53 }
 0x2c5   : > { %5585 = vst [vmem:[#allocation39_spill] sm:$0xff] %v4345_v39  ;;  %v4363_v16 = vpop.f32.mrb[45].mxu0  ;;  %v4367_v39 = vsub.f32 %v4240_v60, %v4281_v53  ;;  %v4387_v60 = vsub.f32 %v4084_v30, %v4281_v53  ;;  %v4405_v30 = vsub.f32 %v4098_v62, %v4281_v53  ;;  %v4411_v29 = vsub.f32 %v4106_v47, %v4281_v53 }
 0x2c6   : > { %5586 = vst [vmem:[#allocation40_spill] sm:$0xff] %v4363_v16  ;;  %v4379_v27 = vpop.f32.mrb[46].mxu0  ;;  %v1128_v21 = vmul.f32 %v4383_v45, %v4383_v45  ;;  %v1130_v55 = vmul.f32 %v4393_v17, %v4393_v17  ;;  %v1131_v32 = vmul.f32 %v4397_v48, %v4397_v48  ;;  %v4419_v59 = vsub.f32 %v4101_v44, %v4281_v53 }
 0x2c7   : > { %5587 = vst [vmem:[#allocation41_spill] sm:$0xff] %v4379_v27  ;;  %v4389_v16 = vpop.f32.mrb[47].mxu0  ;;  %v1129_v24 = vmul.f32 %v4387_v60, %v4387_v60  ;;  %v1132_v62 = vmul.f32 %v4405_v30, %v4405_v30  ;;  %v4426_v47 = vsub.f32 %v4109_v54, %v4281_v53  ;;  %v4433_v44 = vsub.f32 %v4118_v8, %v4281_v53 }
 0x2c8   : > { %5588 = vst [vmem:[#allocation42_spill] sm:$0xff] %v4389_v16  ;;  %v1160_v27 = vsel %vm815_vm0, %v1128_v21, 0.0  ;;  %v1163_v16 = vsel %vm815_vm0, %v1130_v55, 0.0  ;;  %v1133_v21 = vmul.f32 %v4411_v29, %v4411_v29 }
 0x2c9   : > { %v1161_v15 = vsel %vm815_vm0, %v1129_v24, 0.0  ;;  %v1165_v24 = vsel %vm815_vm0, %v1131_v32, 0.0  ;;  %v1167_v55 = vsel %vm815_vm0, %v1132_v62, 0.0  ;;  %v1135_v54 = vmul.f32 %v4426_v47, %v4426_v47 }
 0x2ca   : > { %v1162_v14 = vadd.f32 %v1161_v15, %v1160_v27  ;;  %v1134_v15 = vmul.f32 %v4419_v59, %v4419_v59  ;;  %v4443_v32 = vsub.f32 %v4121_v4, %v4281_v53  ;;  %v1136_v8 = vmul.f32 %v4433_v44, %v4433_v44 }
 0x2cb   : > { %v1137_v62 = vmul.f32 %v4291_v11, %v4291_v11  ;;  %v1139_v4 = vmul.f32 %v4295_v63, %v4295_v63 }
 0x2cc   : > { %v1164_v0 = vadd.f32 %v1163_v16, %v1162_v14  ;;  %v1169_v16 = vsel %vm815_vm0, %v1133_v21, 0.0  ;;  %v1138_v21 = vmul.f32 %v4443_v32, %v4443_v32 }
 0x2cd   : > { %v1177_v53 = vsel %vm815_vm0, %v1137_v62, 0.0  ;;  %v1143_v62 = vmul.f32 %v4311_v19, %v4311_v19 }
 0x2ce   : > { %v1166_v27 = vadd.f32 %v1165_v24, %v1164_v0  ;;  %v1171_v0 = vsel %vm815_vm0, %v1134_v15, 0.0  ;;  %v1179_v15 = vsel %vm815_vm0, %v1138_v21, 0.0 }
 0x2d0   : > { %v1168_v14 = vadd.f32 %v1167_v55, %v1166_v27  ;;  %v1173_v27 = vsel %vm815_vm0, %v1135_v54, 0.0  ;;  %v1141_v54 = vmul.f32 %v4303_v33, %v4303_v33 }
 0x2d2   : > { %v1170_v2 = vadd.f32 %v1169_v16, %v1168_v14  ;;  %v1175_v14 = vsel %vm815_vm0, %v1136_v8, 0.0  ;;  %v1142_v8 = vmul.f32 %v4307_v40, %v4307_v40 }
 0x2d4   : > { %v1172_v24 = vadd.f32 %v1171_v0, %v1170_v2  ;;  %v1140_v2 = vmul.f32 %v4299_v3, %v4299_v3  ;;  %v1187_v21 = vsel %vm815_vm0, %v1142_v8, 0.0  ;;  %v1148_v8 = vmul.f32 %v4331_v42, %v4331_v42 }
 0x2d6   : > { %v1174_v55 = vadd.f32 %v1173_v27, %v1172_v24  ;;  %v1181_v24 = vsel %vm815_vm0, %v1139_v4, 0.0  ;;  %v1145_v4 = vmul.f32 %v4319_v51, %v4319_v51 }
 0x2d8   : > { %v1176_v16 = vadd.f32 %v1175_v14, %v1174_v55  ;;  %v1183_v55 = vsel %vm815_vm0, %v1140_v2, 0.0  ;;  %v1146_v2 = vmul.f32 %v4323_v23, %v4323_v23 }
 0x2da   : > { %v1178_v49 = vadd.f32 %v1177_v53, %v1176_v16  ;;  %v1185_v16 = vsel %vm815_vm0, %v1141_v54, 0.0  ;;  %v1147_v54 = vmul.f32 %v4327_v28, %v4327_v28 }
 0x2dc   : > { %v1180_v0 = vadd.f32 %v1179_v15, %v1178_v49  ;;  %v1144_v49 = vmul.f32 %v4315_v6, %v4315_v6 }
 0x2de   : > { %v1182_v27 = vadd.f32 %v1181_v24, %v1180_v0  ;;  %v1189_v0 = vsel %vm815_vm0, %v1143_v62, 0.0  ;;  %v1149_v62 = vmul.f32 %v4335_v10, %v4335_v10 }
 0x2e0   : > { %v1184_v14 = vadd.f32 %v1183_v55, %v1182_v27  ;;  %v1191_v27 = vsel %vm815_vm0, %v1144_v49, 0.0  ;;  %v1150_v49 = vmul.f32 %v4339_v50, %v4339_v50 }
 0x2e2   : > { %v1186_v53 = vadd.f32 %v1185_v16, %v1184_v14  ;;  %v1193_v14 = vsel %vm815_vm0, %v1145_v4, 0.0  ;;  %v1151_v4 = vmul.f32 %v4343_v61, %v4343_v61 }
 0x2e4   : > { %v1188_v15 = vadd.f32 %v1187_v21, %v1186_v53  ;;  %v1195_v53 = vsel %vm815_vm0, %v1146_v2, 0.0  ;;  %v1152_v2 = vmul.f32 %v4349_v43, %v4349_v43 }
 0x2e6   : > { %v1190_v24 = vadd.f32 %v1189_v0, %v1188_v15  ;;  %v1197_v15 = vsel %vm815_vm0, %v1147_v54, 0.0  ;;  %v1153_v54 = vmul.f32 %v4353_v57, %v4353_v57 }
 0x2e8   : > { %v1192_v55 = vadd.f32 %v1191_v27, %v1190_v24  ;;  %v1199_v24 = vsel %vm815_vm0, %v1148_v8, 0.0  ;;  %v1154_v8 = vmul.f32 %v4357_v18, %v4357_v18 }
 0x2ea   : > { %v1194_v16 = vadd.f32 %v1193_v14, %v1192_v55  ;;  %v1201_v55 = vsel %vm815_vm0, %v1149_v62, 0.0  ;;  %v1155_v62 = vmul.f32 %v4361_v13, %v4361_v13 }
 0x2ec   : > { %v1196_v21 = vadd.f32 %v1195_v53, %v1194_v16  ;;  %v1203_v16 = vsel %vm815_vm0, %v1150_v49, 0.0  ;;  %v1156_v49 = vmul.f32 %v4367_v39, %v4367_v39 }
 0x2ee   : > { %v1198_v0 = vadd.f32 %v1197_v15, %v1196_v21  ;;  %v1205_v21 = vsel %vm815_vm0, %v1151_v4, 0.0  ;;  %v1157_v4 = vmul.f32 %v4371_v38, %v4371_v38 }
 0x2f0   : > { %v1200_v27 = vadd.f32 %v1199_v24, %v1198_v0  ;;  %v1207_v0 = vsel %vm815_vm0, %v1152_v2, 0.0  ;;  %v1158_v2 = vmul.f32 %v4374_v25, %v4374_v25 }
 0x2f2   : > { %v1202_v14 = vadd.f32 %v1201_v55, %v1200_v27  ;;  %v1209_v27 = vsel %vm815_vm0, %v1153_v54, 0.0  ;;  %v1159_v54 = vmul.f32 %v4377_v35, %v4377_v35 }
 0x2f4   : > { %v1204_v53 = vadd.f32 %v1203_v16, %v1202_v14  ;;  %v1211_v14 = vsel %vm815_vm0, %v1154_v8, 0.0  ;;  %v1219_v8 = vsel %vm815_vm0, %v1158_v2, 0.0 }
 0x2f6   : > { %v1206_v15 = vadd.f32 %v1205_v21, %v1204_v53  ;;  %v1213_v53 = vsel %vm815_vm0, %v1155_v62, 0.0 }
 0x2f8   : > { %v1208_v24 = vadd.f32 %v1207_v0, %v1206_v15  ;;  %v1215_v15 = vsel %vm815_vm0, %v1156_v49, 0.0 }
 0x2fa   : > { %v1210_v55 = vadd.f32 %v1209_v27, %v1208_v24  ;;  %v1217_v24 = vsel %vm815_vm0, %v1157_v4, 0.0 }
 0x2fc   : > { %v1212_v16 = vadd.f32 %v1211_v14, %v1210_v55  ;;  %v1221_v14 = vsel %vm815_vm0, %v1159_v54, 0.0 }
 0x2fe   : > { %v1214_v21 = vadd.f32 %v1213_v53, %v1212_v16 }
 0x300   : > { %v1216_v0 = vadd.f32 %v1215_v15, %v1214_v21 }
 0x302   : > { %v1218_v27 = vadd.f32 %v1217_v24, %v1216_v0 }
 0x304   : > { %v1220_v55 = vadd.f32 %v1219_v8, %v1218_v27 }
 0x306   : > { %v1222_v56 = vadd.f32 %v1221_v14, %v1220_v55 }
 0x308   : > { %v1223_v62 = vrot.slane %v1222_v56, 4 }
 0x30a   : > { %v1224_v16 = vadd.f32 %v1223_v62, %v1222_v56 }
 0x30c   : > { %v1225_v53 = vrot.slane %v1224_v16, 2 }
 0x30e   : > { %v1226_v41 = vadd.f32 %v1225_v53, %v1224_v16 }
 0x310   : > { %v1227_v22 = vrot.slane %v1226_v41, 1 }
 0x312   : > { %v1228_v9 = vadd.f32 %v1227_v22, %v1226_v41 }
 0x314   : > { %v1229_v49 = vmul.f32 0.00390625, %v1228_v9 }
 0x316   : > { %v1230_v21 = vadd.f32 1e-05, %v1229_v49 }
 0x318   : > { %3107 = vrsqrt.f32 %v1230_v21 }
 0x322   : > { %v4519_v15 = vpop.eup %3107 }
 0x323   : > { %v1232_v4 = vmul.f32 %v4519_v15, %v4383_v45  ;;  %v1234_v2 = vmul.f32 %v4519_v15, %v4393_v17  ;;  %v1235_v0 = vmul.f32 %v4519_v15, %v4397_v48  ;;  %v1233_v56 = vmul.f32 %v4519_v15, %v4387_v60 }
 0x324   : > { %v1236_v22 = vmul.f32 %v4519_v15, %v4405_v30  ;;  %v1237_v9 = vmul.f32 %v4519_v15, %v4411_v29  ;;  %v1238_v48 = vmul.f32 %v4519_v15, %v4419_v59  ;;  %v1239_v30 = vmul.f32 %v4519_v15, %v4426_v47 }
 0x325   : > { %vm1266_vm1 = vcmp.ge.f32.partialorder %v1234_v2, 0.0  ;;  %v1296_v41 = vmul.f32 0.4, %v1232_v4  ;;  %vm1264_vm2 = vcmp.ge.f32.partialorder %v1232_v4, 0.0  ;;  %vm1267_vm3 = vcmp.ge.f32.partialorder %v1235_v0, 0.0 }
 0x326   : > { %v1298_v45 = vmul.f32 0.4, %v1234_v2  ;;  %v1299_v54 = vmul.f32 0.4, %v1235_v0  ;;  %v1297_v24 = vmul.f32 0.4, %v1233_v56  ;;  %v1240_v29 = vmul.f32 %v4519_v15, %v4433_v44 }
 0x327   : > { %vm1265_vm4 = vcmp.ge.f32.partialorder %v1233_v56, 0.0  ;;  %v1300_v27 = vmul.f32 0.4, %v1236_v22  ;;  %v1328_v8 = vsel %vm1264_vm2, %v1232_v4, %v1296_v41  ;;  %vm1268_vm5 = vcmp.ge.f32.partialorder %v1236_v22, 0.0 }
 0x328   : > { %v1330_v17 = vsel %vm1266_vm1, %v1234_v2, %v1298_v45  ;;  %v1331_v60 = vsel %vm1267_vm3, %v1235_v0, %v1299_v54  ;;  %v1301_v55 = vmul.f32 0.4, %v1237_v9  ;;  %v1241_v14 = vmul.f32 %v4519_v15, %v4291_v11 }
 0x329   : > { %vm1269_vm6 = vcmp.ge.f32.partialorder %v1237_v9, 0.0  ;;  %v1361_v62 = vpack.c.bf16 %v1331_v60, %v1330_v17  ;;  %v1329_v16 = vsel %vm1265_vm4, %v1233_v56, %v1297_v24  ;;  %v1332_v49 = vsel %vm1268_vm5, %v1236_v22, %v1300_v27 }
 0x32a   : > { %v1360_v53 = vpack.c.bf16 %v1329_v16, %v1328_v8  ;;  %vm1270_vm7 = vcmp.ge.f32.partialorder %v1238_v48, 0.0  ;;  %v1302_v59 = vmul.f32 0.4, %v1238_v48  ;;  %v1303_v21 = vmul.f32 0.4, %v1239_v30 }
 0x32b   : > { %v1333_v4 = vsel %vm1269_vm6, %v1237_v9, %v1301_v55  ;;  %vm1271_vm8 = vcmp.ge.f32.partialorder %v1239_v30, 0.0  ;;  %v1304_v47 = vmul.f32 0.4, %v1240_v29  ;;  %v1305_v2 = vmul.f32 0.4, %v1241_v14 }
 0x32c   : > { %2879 = vmatprep.mubr.msk.bf16.mxu1 %vm815_vm0, %v1360_v53  ;;  %v1362_v44 = vpack.c.bf16 %v1333_v4, %v1332_v49  ;;  %vm1272_vm9 = vcmp.ge.f32.partialorder %v1240_v29, 0.0  ;;  %vm1273_vm10 = vcmp.ge.f32.partialorder %v1241_v14, 0.0  ;;  %v1242_v11 = vmul.f32 %v4519_v15, %v4443_v32 }
 0x32d   : > { %2880 = vmatmul.mubr.msk.bf16.vlgmr.msra.gmra.mrb[16].mxu1 %vm815_vm0, %v1361_v62  ;;  %v1243_v0 = vmul.f32 %v4519_v15, %v4295_v63  ;;  %v1334_v56 = vsel %vm1270_vm7, %v1238_v48, %v1302_v59  ;;  %v1335_v22 = vsel %vm1271_vm8, %v1239_v30, %v1303_v21  ;;  %v1244_v9 = vmul.f32 %v4519_v15, %v4299_v3 }
 0x32e   : > { %2883 = vmatprep.mubr.msk.bf16.mxu1 %vm815_vm0, %v1362_v44  ;;  %v1245_v41 = vmul.f32 %v4519_v15, %v4303_v33  ;;  %v1336_v45 = vsel %vm1272_vm9, %v1240_v29, %v1304_v47  ;;  %v1337_v54 = vsel %vm1273_vm10, %v1241_v14, %v1305_v2  ;;  %v1363_v24 = vpack.c.bf16 %v1335_v22, %v1334_v56 }
 0x32f   : > { %v1306_v17 = vmul.f32 0.4, %v1242_v11  ;;  %v1307_v27 = vmul.f32 0.4, %v1243_v0  ;;  %v1364_v60 = vpack.c.bf16 %v1337_v54, %v1336_v45  ;;  %vm1274_vm11 = vcmp.ge.f32.partialorder %v1242_v11, 0.0 }
 0x330   : > { %vm1275_vm12 = vcmp.ge.f32.partialorder %v1243_v0, 0.0  ;;  %v1308_v32 = vmul.f32 0.4, %v1244_v9  ;;  %v1309_v8 = vmul.f32 0.4, %v1245_v41  ;;  %vm1276_vm13 = vcmp.ge.f32.partialorder %v1244_v9, 0.0 }
 0x331   : > { %vm1277_vm14 = vcmp.ge.f32.partialorder %v1245_v41, 0.0  ;;  %v1246_v63 = vmul.f32 %v4519_v15, %v4307_v40  ;;  %v1247_v3 = vmul.f32 %v4519_v15, %v4311_v19  ;;  %v1338_v33 = vsel %vm1274_vm11, %v1242_v11, %v1306_v17 }
 0x332   : > { %v1339_v48 = vsel %vm1275_vm12, %v1243_v0, %v1307_v27  ;;  %v1248_v30 = vmul.f32 %v4519_v15, %v4315_v6  ;;  %v1249_v29 = vmul.f32 %v4519_v15, %v4319_v51  ;;  %v1340_v55 = vsel %vm1276_vm13, %v1244_v9, %v1308_v32 }
 0x333   : > { %v1341_v14 = vsel %vm1277_vm14, %v1245_v41, %v1309_v8  ;;  %v1365_v62 = vpack.c.bf16 %v1339_v48, %v1338_v33  ;;  %v1310_v16 = vmul.f32 0.4, %v1246_v63  ;;  %v1311_v53 = vmul.f32 0.4, %v1247_v3 }
 0x334   : > { %v1366_v49 = vpack.c.bf16 %v1341_v14, %v1340_v55  ;;  %vm1278_vm15 = vcmp.ge.f32.partialorder %v1246_v63, 0.0  ;;  %vm1279_vm1 = vcmp.ge.f32.partialorder %v1247_v3, 0.0  ;;  %v1312_v40 = vmul.f32 0.4, %v1248_v30 }
 0x335   : > { %2884 = vmatmul.mubr.msk.bf16.gmra.mrb[20].mxu1 %vm815_vm0, %v1363_v24  ;;  %v1313_v59 = vmul.f32 0.4, %v1249_v29  ;;  %vm1280_vm2 = vcmp.ge.f32.partialorder %v1248_v30, 0.0  ;;  %vm1281_vm3 = vcmp.ge.f32.partialorder %v1249_v29, 0.0  ;;  %v1250_v19 = vmul.f32 %v4519_v15, %v4323_v23 }
 0x336   : > { %2887 = vmatprep.mubr.msk.bf16.mxu1 %vm815_vm0, %v1364_v60  ;;  %v1251_v6 = vmul.f32 %v4519_v15, %v4327_v28  ;;  %v1342_v51 = vsel %vm1278_vm15, %v1246_v63, %v1310_v16  ;;  %v1343_v21 = vsel %vm1279_vm1, %v1247_v3, %v1311_v53  ;;  %v1252_v4 = vmul.f32 %v4519_v15, %v4331_v42 }
 0x337   : > { %v1253_v47 = vmul.f32 %v4519_v15, %v4335_v10  ;;  %v1344_v2 = vsel %vm1280_vm2, %v1248_v30, %v1312_v40  ;;  %v1345_v44 = vsel %vm1281_vm3, %v1249_v29, %v1313_v59  ;;  %v1367_v11 = vpack.c.bf16 %v1343_v21, %v1342_v51 }
 0x338   : > { %v1314_v0 = vmul.f32 0.4, %v1250_v19  ;;  %v1315_v56 = vmul.f32 0.4, %v1251_v6  ;;  %v1368_v22 = vpack.c.bf16 %v1345_v44, %v1344_v2  ;;  %vm1282_vm4 = vcmp.ge.f32.partialorder %v1250_v19, 0.0 }
 0x339   : > { %vm1283_vm5 = vcmp.ge.f32.partialorder %v1251_v6, 0.0  ;;  %v1316_v23 = vmul.f32 0.4, %v1252_v4  ;;  %v1317_v9 = vmul.f32 0.4, %v1253_v47  ;;  %vm1284_vm6 = vcmp.ge.f32.partialorder %v1252_v4, 0.0 }
 0x33a   : > { %vm1285_vm7 = vcmp.ge.f32.partialorder %v1253_v47, 0.0  ;;  %v1254_v28 = vmul.f32 %v4519_v15, %v4339_v50  ;;  %v1255_v42 = vmul.f32 %v4519_v15, %v4343_v61  ;;  %v1346_v10 = vsel %vm1282_vm4, %v1250_v19, %v1314_v0 }
 0x33b   : > { %v1347_v41 = vsel %vm1283_vm5, %v1251_v6, %v1315_v56  ;;  %v1256_v45 = vmul.f32 %v4519_v15, %v4349_v43  ;;  %v1257_v54 = vmul.f32 %v4519_v15, %v4353_v57  ;;  %v1348_v24 = vsel %vm1284_vm6, %v1252_v4, %v1316_v23 }
 0x33c   : > { %v1349_v17 = vsel %vm1285_vm7, %v1253_v47, %v1317_v9  ;;  %v1369_v27 = vpack.c.bf16 %v1347_v41, %v1346_v10  ;;  %v1318_v60 = vmul.f32 0.4, %v1254_v28  ;;  %v1319_v32 = vmul.f32 0.4, %v1255_v42 }
 0x33d   : > { %2888 = vmatmul.mubr.msk.bf16.gmra.mrb[24].mxu1 %vm815_vm0, %v1365_v62  ;;  %v1370_v8 = vpack.c.bf16 %v1349_v17, %v1348_v24  ;;  %vm1286_vm8 = vcmp.ge.f32.partialorder %v1254_v28, 0.0  ;;  %vm1287_vm9 = vcmp.ge.f32.partialorder %v1255_v42, 0.0  ;;  %v1320_v50 = vmul.f32 0.4, %v1256_v45 }
 0x33e   : > { %2891 = vmatprep.mubr.msk.bf16.mxu1 %vm815_vm0, %v1366_v49  ;;  %v1321_v63 = vmul.f32 0.4, %v1257_v54  ;;  %vm1288_vm10 = vcmp.ge.f32.partialorder %v1256_v45, 0.0  ;;  %vm1289_vm11 = vcmp.ge.f32.partialorder %v1257_v54, 0.0  ;;  %v1258_v61 = vmul.f32 %v4519_v15, %v4357_v18 }
 0x33f   : > { %v1259_v43 = vmul.f32 %v4519_v15, %v4361_v13  ;;  %v1350_v57 = vsel %vm1286_vm8, %v1254_v28, %v1318_v60  ;;  %v1351_v3 = vsel %vm1287_vm9, %v1255_v42, %v1319_v32  ;;  %v1261_v33 = vmul.f32 %v4519_v15, %v4371_v38 }
 0x340   : > { %v1260_v48 = vmul.f32 %v4519_v15, %v4367_v39  ;;  %v1352_v30 = vsel %vm1288_vm10, %v1256_v45, %v1320_v50  ;;  %v1353_v29 = vsel %vm1289_vm11, %v1257_v54, %v1321_v63  ;;  %v1371_v55 = vpack.c.bf16 %v1351_v3, %v1350_v57 }
 0x341   : > { %v1322_v14 = vmul.f32 0.4, %v1258_v61  ;;  %v1323_v62 = vmul.f32 0.4, %v1259_v43  ;;  %v1372_v16 = vpack.c.bf16 %v1353_v29, %v1352_v30  ;;  %v1325_v53 = vmul.f32 0.4, %v1261_v33 }
 0x342   : > { %vm1290_vm12 = vcmp.ge.f32.partialorder %v1258_v61, 0.0  ;;  %vm1291_vm13 = vcmp.ge.f32.partialorder %v1259_v43, 0.0  ;;  %v1324_v18 = vmul.f32 0.4, %v1260_v48  ;;  %vm1293_vm14 = vcmp.ge.f32.partialorder %v1261_v33, 0.0 }
 0x343   : > { %vm1292_vm15 = vcmp.ge.f32.partialorder %v1260_v48, 0.0  ;;  %v1262_v13 = vmul.f32 %v4519_v15, %v4374_v25  ;;  %v1263_v39 = vmul.f32 %v4519_v15, %v4377_v35  ;;  %v1354_v38 = vsel %vm1290_vm12, %v1258_v61, %v1322_v14  ;;  %v4601_v35 = vld [vmem:[#allocation13] ss:$0 sm:$0xff] }
 0x344   : > { %v1355_v49 = vsel %vm1291_vm13, %v1259_v43, %v1323_v62  ;;  %v1356_v40 = vsel %vm1292_vm15, %v1260_v48, %v1324_v18  ;;  %v1357_v59 = vsel %vm1293_vm14, %v1261_v33, %v1325_v53  ;;  %vm5547_vm3 = vcmask 519168  }
 0x345   : > { %2892 = vmatmul.mubr.msk.bf16.gmra.mrb[28].mxu1 %vm815_vm0, %v1367_v11  ;;  %v1373_v19 = vpack.c.bf16 %v1355_v49, %v1354_v38  ;;  %v1326_v6 = vmul.f32 0.4, %v1262_v13  ;;  %v1327_v51 = vmul.f32 0.4, %v1263_v39  ;;  %v1374_v21 = vpack.c.bf16 %v1357_v59, %v1356_v40 }
 0x346   : > { %2895 = vmatprep.mubr.msk.bf16.mxu1 %vm815_vm0, %v1368_v22  ;;  %vm1294_vm1 = vcmp.ge.f32.partialorder %v1262_v13, 0.0  ;;  %vm1295_vm2 = vcmp.ge.f32.partialorder %v1263_v39, 0.0 }
 0x347   : > { %v1358_v4 = vsel %vm1294_vm1, %v1262_v13, %v1326_v6  ;;  %v1359_v47 = vsel %vm1295_vm2, %v1263_v39, %v1327_v51 }
 0x348   : > { %v1375_v25 = vpack.c.bf16 %v1359_v47, %v1358_v4 }
 0x34d   : > { %2896 = vmatmul.mubr.msk.bf16.gmra.mrb[32].mxu1 %vm815_vm0, %v1369_v27 }
 0x34e   : > { %2899 = vmatprep.mubr.msk.bf16.mxu1 %vm815_vm0, %v1370_v8 }
 0x355   : > { %2900 = vmatmul.mubr.msk.bf16.gmra.mrb[36].mxu1 %vm815_vm0, %v1371_v55 }
 0x356   : > { %2903 = vmatprep.mubr.msk.bf16.mxu1 %vm815_vm0, %v1372_v16 }
 0x35d   : > { %2904 = vmatmul.mubr.msk.bf16.gmra.mrb[40].mxu1 %vm815_vm0, %v1373_v19 }
 0x35e   : > { %2907 = vmatprep.mubr.msk.bf16.mxu1 %vm815_vm0, %v1374_v21 }
 0x365   : > { %2908 = vmatmul.mubr.msk.bf16.gmra.mrb[44].mxu1 %vm815_vm0, %v1375_v25 }
 0x400   : > { %v2881_v15 = vpop.f32.mrb[16].mxu1 }
 0x401   : > { %v1497_v2 = vpop.f32.mrb[17].mxu1  ;;  %v4607_v56 = vadd.f32 %v2881_v15, %v4601_v35 }
 0x402   : > { %v4604_v44 = vadd.f32 %v4601_v35, %v1497_v2  ;;  %v2882_v11 = vpop.f32.mrb[18].mxu1 }
 0x403   : > { %v1500_v0 = vpop.f32.mrb[19].mxu1  ;;  %v4615_v9 = vadd.f32 %v2882_v11, %v4601_v35  ;;  %v1627_v10 = vsel %vm815_vm0, %v4607_v56, 0.0 }
 0x404   : > { %v4610_v22 = vadd.f32 %v4601_v35, %v1500_v0  ;;  %v1624_v23 = vsel %vm815_vm0, %v4604_v44, 0.0 }
 0x405   : > { %v1629_v24 = vsel %vm815_vm0, %v4615_v9, 0.0 }
 0x406   : > { %v1625_v28 = vsel %vm815_vm0, %v4610_v22, 0.0 }
 0x407   : > { %v1626_v42 = vadd.f32 %v1625_v28, %v1624_v23 }
 0x408   : > { %v2885_v41 = vpop.f32.mrb[20].mxu1 }
 0x409   : > { %v1628_v45 = vadd.f32 %v1627_v10, %v1626_v42  ;;  %v1513_v54 = vpop.f32.mrb[21].mxu1  ;;  %v4627_v8 = vadd.f32 %v2885_v41, %v4601_v35 }
 0x40a   : > { %v4624_v17 = vadd.f32 %v4601_v35, %v1513_v54  ;;  %v2886_v27 = vpop.f32.mrb[22].mxu1 }
 0x40b   : > { %v1630_v60 = vadd.f32 %v1629_v24, %v1628_v45  ;;  %v1516_v32 = vpop.f32.mrb[23].mxu1  ;;  %v4635_v43 = vadd.f32 %v2886_v27, %v4601_v35  ;;  %v1635_v33 = vsel %vm815_vm0, %v4627_v8, 0.0 }
 0x40c   : > { %v1631_v50 = vsel %vm815_vm0, %v4624_v17, 0.0  ;;  %v4632_v63 = vadd.f32 %v4601_v35, %v1516_v32 }
 0x40d   : > { %v1632_v61 = vadd.f32 %v1631_v50, %v1630_v60  ;;  %v1637_v55 = vsel %vm815_vm0, %v4635_v43, 0.0 }
 0x40e   : > { %v1633_v57 = vsel %vm815_vm0, %v4632_v63, 0.0 }
 0x40f   : > { %v1634_v3 = vadd.f32 %v1633_v57, %v1632_v61 }
 0x410   : > { %v2889_v48 = vpop.f32.mrb[24].mxu1 }
 0x411   : > { %v1636_v30 = vadd.f32 %v1635_v33, %v1634_v3  ;;  %v1529_v29 = vpop.f32.mrb[25].mxu1  ;;  %v4647_v18 = vadd.f32 %v2889_v48, %v4601_v35 }
 0x412   : > { %v4644_v14 = vadd.f32 %v4601_v35, %v1529_v29  ;;  %v2890_v62 = vpop.f32.mrb[26].mxu1 }
 0x413   : > { %v1638_v16 = vadd.f32 %v1637_v55, %v1636_v30  ;;  %v1532_v53 = vpop.f32.mrb[27].mxu1  ;;  %v4655_v49 = vadd.f32 %v2890_v62, %v4601_v35  ;;  %v1643_v19 = vsel %vm815_vm0, %v4647_v18, 0.0 }
 0x414   : > { %v1639_v13 = vsel %vm815_vm0, %v4644_v14, 0.0  ;;  %v4652_v39 = vadd.f32 %v4601_v35, %v1532_v53 }
 0x415   : > { %v1640_v38 = vadd.f32 %v1639_v13, %v1638_v16  ;;  %v1645_v4 = vsel %vm815_vm0, %v4655_v49, 0.0 }
 0x416   : > { %v1641_v40 = vsel %vm815_vm0, %v4652_v39, 0.0 }
 0x417   : > { %v1642_v59 = vadd.f32 %v1641_v40, %v1640_v38 }
 0x418   : > { %v2893_v6 = vpop.f32.mrb[28].mxu1 }
 0x419   : > { %v1644_v51 = vadd.f32 %v1643_v19, %v1642_v59  ;;  %v1545_v21 = vpop.f32.mrb[29].mxu1  ;;  %v4667_v11 = vadd.f32 %v2893_v6, %v4601_v35 }
 0x41a   : > { %v4664_v47 = vadd.f32 %v4601_v35, %v1545_v21  ;;  %v2894_v25 = vpop.f32.mrb[30].mxu1 }
 0x41b   : > { %v1646_v15 = vadd.f32 %v1645_v4, %v1644_v51  ;;  %v1548_v2 = vpop.f32.mrb[31].mxu1  ;;  %v4675_v42 = vadd.f32 %v2894_v25, %v4601_v35  ;;  %v1651_v45 = vsel %vm815_vm0, %v4667_v11, 0.0 }
 0x41c   : > { %v1647_v0 = vsel %vm815_vm0, %v4664_v47, 0.0  ;;  %v4672_v23 = vadd.f32 %v4601_v35, %v1548_v2 }
 0x41d   : > { %v1648_v28 = vadd.f32 %v1647_v0, %v1646_v15  ;;  %v1653_v60 = vsel %vm815_vm0, %v4675_v42, 0.0 }
 0x41e   : > { %v1649_v10 = vsel %vm815_vm0, %v4672_v23, 0.0 }
 0x41f   : > { %v1650_v41 = vadd.f32 %v1649_v10, %v1648_v28 }
 0x420   : > { %v2897_v54 = vpop.f32.mrb[32].mxu1 }
 0x421   : > { %v1652_v24 = vadd.f32 %v1651_v45, %v1650_v41  ;;  %v1561_v27 = vpop.f32.mrb[33].mxu1  ;;  %v4687_v3 = vadd.f32 %v2897_v54, %v4601_v35 }
 0x422   : > { %v4684_v32 = vadd.f32 %v4601_v35, %v1561_v27  ;;  %v2898_v50 = vpop.f32.mrb[34].mxu1 }
 0x423   : > { %v1654_v61 = vadd.f32 %v1653_v60, %v1652_v24  ;;  %v1564_v57 = vpop.f32.mrb[35].mxu1  ;;  %v4695_v29 = vadd.f32 %v2898_v50, %v4601_v35  ;;  %v1659_v16 = vsel %vm815_vm0, %v4687_v3, 0.0 }
 0x424   : > { %v1655_v33 = vsel %vm815_vm0, %v4684_v32, 0.0  ;;  %v4692_v48 = vadd.f32 %v4601_v35, %v1564_v57 }
 0x425   : > { %v1656_v30 = vadd.f32 %v1655_v33, %v1654_v61  ;;  %v1661_v40 = vsel %vm815_vm0, %v4695_v29, 0.0 }
 0x426   : > { %v1657_v55 = vsel %vm815_vm0, %v4692_v48, 0.0 }
 0x427   : > { %v1658_v62 = vadd.f32 %v1657_v55, %v1656_v30 }
 0x428   : > { %v2901_v53 = vpop.f32.mrb[36].mxu1 }
 0x429   : > { %v1660_v13 = vadd.f32 %v1659_v16, %v1658_v62  ;;  %v1577_v38 = vpop.f32.mrb[37].mxu1  ;;  %v1586_v21 = vadd.f32 %v2901_v53, %v4601_v35 }
 0x42a   : > { %v4704_v59 = vadd.f32 %v4601_v35, %v1577_v38  ;;  %v2902_v19 = vpop.f32.mrb[38].mxu1 }
 0x42b   : > { %v1662_v6 = vadd.f32 %v1661_v40, %v1660_v13  ;;  %v1580_v51 = vpop.f32.mrb[39].mxu1  ;;  %v1589_v2 = vadd.f32 %v2902_v19, %v4601_v35  ;;  %v1667_v10 = vsel %vm815_vm0, %v1586_v21, 0.0 }
 0x42c   : > { %v1663_v4 = vsel %vm815_vm0, %v4704_v59, 0.0  ;;  %v1581_v25 = vadd.f32 %v4601_v35, %v1580_v51 }
 0x42d   : > { %v1664_v15 = vadd.f32 %v1663_v4, %v1662_v6  ;;  %v1669_v24 = vsel %vm815_vm0, %v1589_v2, 0.0 }
 0x42e   : > { %v1665_v0 = vsel %vm815_vm0, %v1581_v25, 0.0 }
 0x42f   : > { %v1666_v28 = vadd.f32 %v1665_v0, %v1664_v15 }
 0x430   : > { %v2905_v41 = vpop.f32.mrb[40].mxu1 }
 0x431   : > { %v1668_v45 = vadd.f32 %v1667_v10, %v1666_v28  ;;  %v1593_v54 = vpop.f32.mrb[41].mxu1  ;;  %v1602_v57 = vadd.f32 %v2905_v41, %v4601_v35 }
 0x432   : > { %v1594_v27 = vadd.f32 %v4601_v35, %v1593_v54  ;;  %v2906_v60 = vpop.f32.mrb[42].mxu1 }
 0x433   : > { %v1670_v50 = vadd.f32 %v1669_v24, %v1668_v45  ;;  %v1596_v61 = vpop.f32.mrb[43].mxu1  ;;  %v1605_v62 = vadd.f32 %v2906_v60, %v4601_v35  ;;  %v1675_v13 = vsel %vm815_vm0, %v1602_v57, 0.0 }
 0x434   : > { %v1671_v33 = vsel %vm815_vm0, %v1594_v27, 0.0  ;;  %v1597_v30 = vadd.f32 %v4601_v35, %v1596_v61 }
 0x435   : > { %v1672_v55 = vadd.f32 %v1671_v33, %v1670_v50  ;;  %v1677_v6 = vsel %vm815_vm0, %v1605_v62, 0.0 }
 0x436   : > { %v1673_v16 = vsel %vm815_vm0, %v1597_v30, 0.0 }
 0x437   : > { %v1674_v53 = vadd.f32 %v1673_v16, %v1672_v55 }
 0x438   : > { %v2909_v38 = vpop.f32.mrb[44].mxu1 }
 0x439   : > { %v1676_v40 = vadd.f32 %v1675_v13, %v1674_v53  ;;  %v1609_v19 = vpop.f32.mrb[45].mxu1  ;;  %v1618_v28 = vadd.f32 %v2909_v38, %v4601_v35 }
 0x43a   : > { %v1610_v51 = vadd.f32 %v4601_v35, %v1609_v19  ;;  %v2910_v4 = vpop.f32.mrb[46].mxu1 }
 0x43b   : > { %v1678_v15 = vadd.f32 %v1677_v6, %v1676_v40  ;;  %v1612_v0 = vpop.f32.mrb[47].mxu1  ;;  %v1621_v54 = vadd.f32 %v2910_v4, %v4601_v35  ;;  %v1683_v50 = vsel %vm815_vm0, %v1618_v28, 0.0 }
 0x43c   : > { %v1679_v10 = vsel %vm815_vm0, %v1610_v51, 0.0  ;;  %v1613_v41 = vadd.f32 %v4601_v35, %v1612_v0 }
 0x43d   : > { %v1680_v45 = vadd.f32 %v1679_v10, %v1678_v15  ;;  %v1685_v33 = vsel %vm815_vm0, %v1621_v54, 0.0 }
 0x43e   : > { %v1681_v24 = vsel %vm815_vm0, %v1613_v41, 0.0 }
 0x43f   : > { %v1682_v60 = vadd.f32 %v1681_v24, %v1680_v45 }
 0x441   : > { %v1684_v61 = vadd.f32 %v1683_v50, %v1682_v60 }
 0x443   : > { %v1686_v55 = vadd.f32 %v1685_v33, %v1684_v61 }
 0x445   : > { %v1687_v16 = vrot.slane %v1686_v55, 4 }
 0x447   : > { %v1688_v53 = vadd.f32 %v1687_v16, %v1686_v55 }
 0x449   : > { %v1689_v13 = vrot.slane %v1688_v53, 2 }
 0x44b   : > { %v1690_v38 = vadd.f32 %v1689_v13, %v1688_v53 }
 0x44d   : > { %v1691_v40 = vrot.slane %v1690_v38, 1 }
 0x44f   : > { %v1692_v19 = vadd.f32 %v1691_v40, %v1690_v38 }
 0x451   : > { %v1693_v6 = vmul.f32 0.00390625, %v1692_v19 }
 0x453   : > { %v4731_v15 = vsub.f32 %v4652_v39, %v1693_v6  ;;  %v4734_v35 = vsub.f32 %v4655_v49, %v1693_v6  ;;  %v4737_v4 = vsub.f32 %v4664_v47, %v1693_v6  ;;  %v4740_v0 = vsub.f32 %v4672_v23, %v1693_v6 }
 0x454   : > { %v4743_v10 = vsub.f32 %v4667_v11, %v1693_v6  ;;  %v4746_v45 = vsub.f32 %v4675_v42, %v1693_v6  ;;  %v4749_v24 = vsub.f32 %v4684_v32, %v1693_v6  ;;  %v4752_v39 = vsub.f32 %v4692_v48, %v1693_v6 }
 0x455   : > { %v4755_v49 = vsub.f32 %v4687_v3, %v1693_v6  ;;  %v4758_v47 = vsub.f32 %v4695_v29, %v1693_v6  ;;  %v4761_v23 = vsub.f32 %v4704_v59, %v1693_v6  ;;  %v4763_v11 = vsub.f32 %v1581_v25, %v1693_v6 }
 0x456   : > { %v4765_v60 = vsub.f32 %v1586_v21, %v1693_v6  ;;  %v4767_v42 = vsub.f32 %v1589_v2, %v1693_v6  ;;  %v4769_v32 = vsub.f32 %v1594_v27, %v1693_v6  ;;  %v4771_v50 = vsub.f32 %v1597_v30, %v1693_v6 }
 0x457   : > { %v4773_v48 = vsub.f32 %v1602_v57, %v1693_v6  ;;  %v4775_v3 = vsub.f32 %v1605_v62, %v1693_v6  ;;  %v4777_v61 = vsub.f32 %v1610_v51, %v1693_v6  ;;  %v4779_v29 = vsub.f32 %v1613_v41, %v1693_v6 }
 0x458   : > { %v4781_v59 = vsub.f32 %v1618_v28, %v1693_v6  ;;  %v4783_v25 = vsub.f32 %v1621_v54, %v1693_v6  ;;  %v4786_v21 = vsub.f32 %v4604_v44, %v1693_v6  ;;  %v4789_v2 = vsub.f32 %v4610_v22, %v1693_v6 }
 0x459   : > { %v4792_v27 = vsub.f32 %v4607_v56, %v1693_v6  ;;  %v4795_v57 = vsub.f32 %v4615_v9, %v1693_v6  ;;  %v4802_v51 = vsub.f32 %v4624_v17, %v1693_v6  ;;  %v4807_v22 = vsub.f32 %v4632_v63, %v1693_v6 }
 0x45a   : > { %5589 = vst [vmem:[#allocation43_spill] sm:$0xff] %v4783_v25  ;;  %v1726_v30 = vmul.f32 %v4786_v21, %v4786_v21  ;;  %v1727_v62 = vmul.f32 %v4789_v2, %v4789_v2  ;;  %v4814_v54 = vsub.f32 %v4627_v8, %v1693_v6  ;;  %v4820_v63 = vsub.f32 %v4635_v43, %v1693_v6 }
 0x45b   : > { %v1728_v44 = vmul.f32 %v4792_v27, %v4792_v27  ;;  %v1729_v56 = vmul.f32 %v4795_v57, %v4795_v57  ;;  %v1730_v17 = vmul.f32 %v4802_v51, %v4802_v51  ;;  %v1731_v16 = vmul.f32 %v4807_v22, %v4807_v22 }
 0x45c   : > { %v1758_v9 = vsel %vm815_vm0, %v1726_v30, 0.0  ;;  %v1759_v28 = vsel %vm815_vm0, %v1727_v62, 0.0  ;;  %v4826_v38 = vsub.f32 %v4644_v14, %v1693_v6  ;;  %v1732_v8 = vmul.f32 %v4814_v54, %v4814_v54 }
 0x45d   : > { %v1760_v41 = vadd.f32 %v1759_v28, %v1758_v9  ;;  %v1761_v33 = vsel %vm815_vm0, %v1728_v44, 0.0  ;;  %v1763_v53 = vsel %vm815_vm0, %v1729_v56, 0.0  ;;  %v1765_v40 = vsel %vm815_vm0, %v1730_v17, 0.0 }
 0x45e   : > { %v1733_v30 = vmul.f32 %v4820_v63, %v4820_v63  ;;  %v1767_v43 = vsel %vm815_vm0, %v1731_v16, 0.0  ;;  %v4835_v44 = vsub.f32 %v4647_v18, %v1693_v6  ;;  %v1734_v56 = vmul.f32 %v4826_v38, %v4826_v38 }
 0x45f   : > { %v1762_v55 = vadd.f32 %v1761_v33, %v1760_v41  ;;  %v1769_v14 = vsel %vm815_vm0, %v1732_v8, 0.0  ;;  %v1735_v28 = vmul.f32 %v4731_v15, %v4731_v15  ;;  %v1737_v18 = vmul.f32 %v4734_v35, %v4734_v35 }
 0x460   : > { %v1771_v41 = vsel %vm815_vm0, %v1733_v30, 0.0  ;;  %v1736_v33 = vmul.f32 %v4835_v44, %v4835_v44 }
 0x461   : > { %v1764_v13 = vadd.f32 %v1763_v53, %v1762_v55  ;;  %v1773_v55 = vsel %vm815_vm0, %v1734_v56, 0.0  ;;  %v1775_v6 = vsel %vm815_vm0, %v1735_v28, 0.0  ;;  %v1779_v30 = vsel %vm815_vm0, %v1737_v18, 0.0 }
 0x462   : > { %v1777_v8 = vsel %vm815_vm0, %v1736_v33, 0.0 }
 0x463   : > { %v1766_v19 = vadd.f32 %v1765_v40, %v1764_v13  ;;  %v1738_v13 = vmul.f32 %v4737_v4, %v4737_v4 }
 0x465   : > { %v1768_v62 = vadd.f32 %v1767_v43, %v1766_v19  ;;  %v1739_v19 = vmul.f32 %v4740_v0, %v4740_v0  ;;  %v1781_v56 = vsel %vm815_vm0, %v1738_v13, 0.0 }
 0x467   : > { %v1770_v9 = vadd.f32 %v1769_v14, %v1768_v62  ;;  %v1740_v62 = vmul.f32 %v4743_v10, %v4743_v10  ;;  %v1783_v28 = vsel %vm815_vm0, %v1739_v19, 0.0 }
 0x469   : > { %v1772_v17 = vadd.f32 %v1771_v41, %v1770_v9  ;;  %v1741_v9 = vmul.f32 %v4746_v45, %v4746_v45  ;;  %v1785_v33 = vsel %vm815_vm0, %v1740_v62, 0.0 }
 0x46b   : > { %v1774_v16 = vadd.f32 %v1773_v55, %v1772_v17  ;;  %v1742_v17 = vmul.f32 %v4749_v24, %v4749_v24  ;;  %v1787_v18 = vsel %vm815_vm0, %v1741_v9, 0.0 }
 0x46d   : > { %v1776_v53 = vadd.f32 %v1775_v6, %v1774_v16  ;;  %v1743_v16 = vmul.f32 %v4752_v39, %v4752_v39  ;;  %v1789_v13 = vsel %vm815_vm0, %v1742_v17, 0.0 }
 0x46f   : > { %v1778_v40 = vadd.f32 %v1777_v8, %v1776_v53  ;;  %v1744_v53 = vmul.f32 %v4755_v49, %v4755_v49  ;;  %v1791_v19 = vsel %vm815_vm0, %v1743_v16, 0.0 }
 0x471   : > { %v1780_v43 = vadd.f32 %v1779_v30, %v1778_v40  ;;  %v1745_v40 = vmul.f32 %v4758_v47, %v4758_v47  ;;  %v1793_v62 = vsel %vm815_vm0, %v1744_v53, 0.0 }
 0x473   : > { %v1782_v14 = vadd.f32 %v1781_v56, %v1780_v43  ;;  %v1746_v43 = vmul.f32 %v4761_v23, %v4761_v23  ;;  %v1795_v9 = vsel %vm815_vm0, %v1745_v40, 0.0 }
 0x475   : > { %v1784_v41 = vadd.f32 %v1783_v28, %v1782_v14  ;;  %v1747_v14 = vmul.f32 %v4763_v11, %v4763_v11  ;;  %v1797_v17 = vsel %vm815_vm0, %v1746_v43, 0.0 }
 0x477   : > { %v1786_v55 = vadd.f32 %v1785_v33, %v1784_v41  ;;  %v1748_v41 = vmul.f32 %v4765_v60, %v4765_v60  ;;  %v1799_v16 = vsel %vm815_vm0, %v1747_v14, 0.0 }
 0x479   : > { %v1788_v6 = vadd.f32 %v1787_v18, %v1786_v55  ;;  %v1749_v55 = vmul.f32 %v4767_v42, %v4767_v42  ;;  %v1801_v53 = vsel %vm815_vm0, %v1748_v41, 0.0 }
 0x47b   : > { %v1790_v8 = vadd.f32 %v1789_v13, %v1788_v6  ;;  %v1750_v6 = vmul.f32 %v4769_v32, %v4769_v32  ;;  %v1803_v40 = vsel %vm815_vm0, %v1749_v55, 0.0 }
 0x47d   : > { %v1792_v30 = vadd.f32 %v1791_v19, %v1790_v8  ;;  %v1751_v8 = vmul.f32 %v4771_v50, %v4771_v50  ;;  %v1805_v43 = vsel %vm815_vm0, %v1750_v6, 0.0 }
 0x47f   : > { %v1794_v56 = vadd.f32 %v1793_v62, %v1792_v30  ;;  %v1752_v30 = vmul.f32 %v4773_v48, %v4773_v48  ;;  %v1807_v14 = vsel %vm815_vm0, %v1751_v8, 0.0 }
 0x481   : > { %v1796_v28 = vadd.f32 %v1795_v9, %v1794_v56  ;;  %v1753_v56 = vmul.f32 %v4775_v3, %v4775_v3  ;;  %v1809_v41 = vsel %vm815_vm0, %v1752_v30, 0.0 }
 0x483   : > { %v1798_v33 = vadd.f32 %v1797_v17, %v1796_v28  ;;  %v1754_v28 = vmul.f32 %v4777_v61, %v4777_v61  ;;  %v1811_v55 = vsel %vm815_vm0, %v1753_v56, 0.0 }
 0x485   : > { %v1800_v18 = vadd.f32 %v1799_v16, %v1798_v33  ;;  %v1755_v33 = vmul.f32 %v4779_v29, %v4779_v29  ;;  %v1813_v6 = vsel %vm815_vm0, %v1754_v28, 0.0 }
 0x487   : > { %v1802_v13 = vadd.f32 %v1801_v53, %v1800_v18  ;;  %v1756_v18 = vmul.f32 %v4781_v59, %v4781_v59  ;;  %v1815_v8 = vsel %vm815_vm0, %v1755_v33, 0.0 }
 0x489   : > { %v1804_v19 = vadd.f32 %v1803_v40, %v1802_v13  ;;  %v1757_v13 = vmul.f32 %v4783_v25, %v4783_v25 }
 0x48b   : > { %v1806_v62 = vadd.f32 %v1805_v43, %v1804_v19  ;;  %v1817_v19 = vsel %vm815_vm0, %v1756_v18, 0.0  ;;  %v1819_v43 = vsel %vm815_vm0, %v1757_v13, 0.0 }
 0x48d   : > { %v1808_v9 = vadd.f32 %v1807_v14, %v1806_v62 }
 0x48f   : > { %v1810_v17 = vadd.f32 %v1809_v41, %v1808_v9 }
 0x491   : > { %v1812_v16 = vadd.f32 %v1811_v55, %v1810_v17 }
 0x493   : > { %v1814_v53 = vadd.f32 %v1813_v6, %v1812_v16  ;;  %v2679_v6 = vld [vmem:[#allocation16] ss:$0 sm:$0xff] }
 0x494   : > { %v4912_v25 = vadd.f32 %v4158_v20, %v2679_v6  ;;  %v4915_v33 = vadd.f32 %v2679_v6, %v4160_v26  ;;  %v4918_v18 = vadd.f32 %v4169_v34, %v2679_v6  ;;  %v4924_v13 = vadd.f32 %v4186_v58, %v2679_v6 }
 0x495   : > { %v1816_v40 = vadd.f32 %v1815_v8, %v1814_v53  ;;  %v4921_v53 = vadd.f32 %v2679_v6, %v4171_v36  ;;  %v4927_v8 = vadd.f32 %v2679_v6, %v4188_v7  ;;  %v4933_v20 = vadd.f32 %v2679_v6, %v4199_v12 }
 0x496   : > { %5590 = vst [vmem:[#allocation44_spill] sm:$0xff] %v4924_v13  ;;  %v4938_v34 = vadd.f32 %v4214_v37, %v2679_v6  ;;  %v4941_v36 = vadd.f32 %v2679_v6, %v4216_v52  ;;  %v4944_v58 = vadd.f32 %v4225_v31, %v2679_v6  ;;  %v4947_v7 = vadd.f32 %v2679_v6, %v4227_v46  ;;  %v5602_v52 = vld [vmem:[#allocation26_spill] sm:$0xff]  ;;  %v5604_v31 = vld [vmem:[#allocation27_spill] sm:$0xff]  ;;  %v5606_v46 = vld [vmem:[#allocation28_spill] sm:$0xff] }
 0x497   : > { %v1818_v30 = vadd.f32 %v1817_v19, %v1816_v40  ;;  %v4930_v40 = vadd.f32 %v4197_v5, %v2679_v6  ;;  %5592 = vst [vmem:[#allocation46_spill] sm:$0xff] %v4933_v20  ;;  %v4950_v5 = vadd.f32 %v4242_v1, %v2679_v6  ;;  %v5598_v19 = vld [vmem:[#allocation24_spill] sm:$0xff]  ;;  %v5608_v1 = vld [vmem:[#allocation29_spill] sm:$0xff] }
 0x498   : > { %5593 = vst [vmem:[#allocation47_spill] sm:$0xff] %v4938_v34  ;;  %5594 = vst [vmem:[#allocation48_spill] sm:$0xff] %v4941_v36  ;;  %v4953_v12 = vadd.f32 %v2679_v6, %v5598_v19 }
 0x499   : > { %v1820_v62 = vadd.f32 %v1819_v43, %v1818_v30  ;;  %5591 = vst [vmem:[#allocation45_spill] sm:$0xff] %v4930_v40  ;;  %5595 = vst [vmem:[#allocation49_spill] sm:$0xff] %v4944_v58  ;;  %v5600_v30 = vld [vmem:[#allocation25_spill] sm:$0xff] }
 0x49a   : > { %5596 = vst [vmem:[#allocation50_spill] sm:$0xff] %v4947_v7  ;;  %5597 = vst [vmem:[#allocation51_spill] sm:$0xff] %v4950_v5  ;;  %v4956_v43 = vadd.f32 %v5600_v30, %v2679_v6  ;;  %v5616_v30 = vld [vmem:[#allocation33_spill] sm:$0xff] }
 0x49b   : > { %v1821_v56 = vrot.slane %v1820_v62, 4  ;;  %5599 = vst [vmem:[#allocation24_spill] sm:$0xff] %v4953_v12 }
 0x49c   : > { %5601 = vst [vmem:[#allocation25_spill] sm:$0xff] %v4956_v43 }
 0x49d   : > { %v1822_v14 = vadd.f32 %v1821_v56, %v1820_v62  ;;  %v4961_v62 = vadd.f32 %v2679_v6, %v5602_v52  ;;  %v4964_v56 = vadd.f32 %v5604_v31, %v2679_v6  ;;  %v4982_v52 = vadd.f32 %v5616_v30, %v2679_v6  ;;  %v5618_v31 = vld [vmem:[#allocation34_spill] sm:$0xff]  ;;  %v5629_v30 = vld [vmem:[#allocation39_spill] sm:$0xff] }
 0x49f   : > { %v1823_v9 = vrot.slane %v1822_v14, 2  ;;  %5603 = vst [vmem:[#allocation26_spill] sm:$0xff] %v4961_v62  ;;  %5605 = vst [vmem:[#allocation27_spill] sm:$0xff] %v4964_v56  ;;  %v5621_v56 = vld [vmem:[#allocation35_spill] sm:$0xff] }
 0x4a0   : > { %5617 = vst [vmem:[#allocation33_spill] sm:$0xff] %v4982_v52  ;;  %v5001_v52 = vadd.f32 %v5629_v30, %v2679_v6 }
 0x4a1   : > { %v1824_v41 = vadd.f32 %v1823_v9, %v1822_v14  ;;  %v4967_v14 = vadd.f32 %v2679_v6, %v5606_v46  ;;  %v4970_v9 = vadd.f32 %v5608_v1, %v2679_v6  ;;  %v4985_v46 = vadd.f32 %v2679_v6, %v5618_v31  ;;  %v5620_v1 = vld [vmem:[#allocation42_spill] sm:$0xff]  ;;  %v5631_v31 = vld [vmem:[#allocation40_spill] sm:$0xff] }
 0x4a3   : > { %v1825_v17 = vrot.slane %v1824_v41, 1  ;;  %5607 = vst [vmem:[#allocation28_spill] sm:$0xff] %v4967_v14  ;;  %5609 = vst [vmem:[#allocation29_spill] sm:$0xff] %v4970_v9  ;;  %v2211_v9 = vadd.f32 %v2679_v6, %v5620_v1  ;;  %v4989_v14 = vadd.f32 %v5621_v56, %v2679_v6  ;;  %v5633_v56 = vld [vmem:[#allocation41_spill] sm:$0xff] }
 0x4a4   : > { %5619 = vst [vmem:[#allocation34_spill] sm:$0xff] %v4985_v46  ;;  %v5004_v46 = vadd.f32 %v2679_v6, %v5631_v31 }
 0x4a5   : > { %v1826_v55 = vadd.f32 %v1825_v17, %v1824_v41  ;;  %v5610_v41 = vld [vmem:[#allocation30_spill] sm:$0xff]  ;;  %5622 = vst [vmem:[#allocation42_spill] sm:$0xff] %v4989_v14  ;;  %v5008_v14 = vadd.f32 %v5633_v56, %v2679_v6 }
 0x4a6   : > { %v4973_v17 = vadd.f32 %v2679_v6, %v5610_v41  ;;  %v5623_v41 = vld [vmem:[#allocation36_spill] sm:$0xff]  ;;  %5632 = vst [vmem:[#allocation39_spill] sm:$0xff] %v5004_v46 }
 0x4a7   : > { %v1827_v28 = vmul.f32 0.00390625, %v1826_v55  ;;  %v5612_v55 = vld [vmem:[#allocation31_spill] sm:$0xff]  ;;  %5634 = vst [vmem:[#allocation40_spill] sm:$0xff] %v5008_v14 }
 0x4a8   : > { %5611 = vst [vmem:[#allocation30_spill] sm:$0xff] %v4973_v17  ;;  %v4992_v17 = vadd.f32 %v2679_v6, %v5623_v41 }
 0x4a9   : > { %v1828_v16 = vadd.f32 1e-05, %v1827_v28  ;;  %v4976_v28 = vadd.f32 %v5612_v55, %v2679_v6  ;;  %v5625_v55 = vld [vmem:[#allocation37_spill] sm:$0xff] }
 0x4aa   : > { %5624 = vst [vmem:[#allocation35_spill] sm:$0xff] %v4992_v17 }
 0x4ab   : > { %3109 = vrsqrt.f32 %v1828_v16  ;;  %5613 = vst [vmem:[#allocation31_spill] sm:$0xff] %v4976_v28  ;;  %v5614_v16 = vld [vmem:[#allocation32_spill] sm:$0xff]  ;;  %v4995_v28 = vadd.f32 %v5625_v55, %v2679_v6 }
 0x4ac   : > { %v4979_v19 = vadd.f32 %v2679_v6, %v5614_v16  ;;  %v5627_v16 = vld [vmem:[#allocation38_spill] sm:$0xff] }
 0x4ad   : > { %5626 = vst [vmem:[#allocation36_spill] sm:$0xff] %v4995_v28  ;;  %5630 = vst [vmem:[#allocation38_spill] sm:$0xff] %v5001_v52 }
 0x4ae   : > { %5615 = vst [vmem:[#allocation32_spill] sm:$0xff] %v4979_v19  ;;  %v4998_v19 = vadd.f32 %v2679_v6, %v5627_v16 }
 0x4b0   : > { %5628 = vst [vmem:[#allocation37_spill] sm:$0xff] %v4998_v19 }
 0x4b5   : > { %v4935_v26 = vpop.eup %3109 }
 0x4b6   : > { %v1859_v37 = vmul.f32 %v4935_v26, %v4779_v29  ;;  %v5012_v41 = vmul.f32 %v4935_v26, %v4786_v21  ;;  %v5020_v55 = vmul.f32 %v4935_v26, %v4792_v27  ;;  %v5028_v6 = vmul.f32 %v4935_v26, %v4802_v51 }
 0x4b7   : > { %v5032_v21 = vmul.f32 %v4935_v26, %v4807_v22  ;;  %v5040_v27 = vmul.f32 %v4935_v26, %v4820_v63  ;;  %v5048_v51 = vmul.f32 %v4935_v26, %v4731_v15  ;;  %v5052_v22 = vmul.f32 %v4935_v26, %v4835_v44 }
 0x4b8   : > { %vm1891_vm0 = vcmp.ge.f32.partialorder %v1859_v37, 0.0  ;;  %v1923_v29 = vmul.f32 0.4, %v1859_v37  ;;  %v5060_v63 = vmul.f32 %v4935_v26, %v4737_v4  ;;  %v5068_v15 = vmul.f32 %v4935_v26, %v4743_v10 }
 0x4b9   : > { %v5072_v44 = vmul.f32 %v4935_v26, %v4746_v45  ;;  %v5084_v4 = vmul.f32 %v4935_v26, %v4752_v39  ;;  %v5092_v10 = vmul.f32 %v4935_v26, %v4758_v47  ;;  %v5096_v45 = vmul.f32 %v4935_v26, %v4761_v23 }
 0x4ba   : > { %v1955_v43 = vsel %vm1891_vm0, %v1859_v37, %v1923_v29  ;;  %v5016_v37 = vmul.f32 %v4935_v26, %v4789_v2  ;;  %v5036_v2 = vmul.f32 %v4935_v26, %v4814_v54  ;;  %v5056_v54 = vmul.f32 %v4935_v26, %v4734_v35 }
 0x4bb   : > { %v2251_v1 = vadd.f32 %v2211_v9, %v1955_v43  ;;  %v5024_v43 = vmul.f32 %v4935_v26, %v4795_v57  ;;  %v5044_v57 = vmul.f32 %v4935_v26, %v4826_v38  ;;  %v5064_v38 = vmul.f32 %v4935_v26, %v4740_v0 }
 0x4bc   : > { %v5080_v35 = vmul.f32 %v4935_v26, %v4749_v24  ;;  %v5088_v0 = vmul.f32 %v4935_v26, %v4755_v49  ;;  %v5100_v24 = vmul.f32 %v4935_v26, %v4763_v11  ;;  %v5104_v39 = vmul.f32 %v4935_v26, %v4765_v60 }
 0x4bd   : > { %v2283_v29 = vmax.f32 %v2251_v1, 0.0  ;;  %v5108_v49 = vmul.f32 %v4935_v26, %v4767_v42  ;;  %v5112_v47 = vmul.f32 %v4935_v26, %v4769_v32  ;;  %v5116_v23 = vmul.f32 %v4935_v26, %v4771_v50 }
 0x4be   : > { %v5120_v11 = vmul.f32 %v4935_v26, %v4773_v48  ;;  %v5124_v60 = vmul.f32 %v4935_v26, %v4775_v3  ;;  %v5128_v42 = vmul.f32 %v4935_v26, %v4777_v61  ;;  %v5132_v32 = vmul.f32 %v4935_v26, %v4781_v59  ;;  %v5635_v3 = vld [vmem:[#allocation43_spill] sm:$0xff] }
 0x4bf   : > { %v2767_v9 = vpack.c.bf16 %v2283_v29, %v2283_v29  ;;  %vm1862_vm4 = vcmp.ge.f32.partialorder %v5012_v41, 0.0  ;;  %vm1863_vm5 = vcmp.ge.f32.partialorder %v5016_v37, 0.0  ;;  %vm1864_vm6 = vcmp.ge.f32.partialorder %v5020_v55, 0.0 }
 0x4c0   : > { %vm1865_vm7 = vcmp.ge.f32.partialorder %v5024_v43, 0.0  ;;  %vm1866_vm8 = vcmp.ge.f32.partialorder %v5028_v6, 0.0  ;;  %vm1867_vm9 = vcmp.ge.f32.partialorder %v5032_v21, 0.0  ;;  %vm1868_vm10 = vcmp.ge.f32.partialorder %v5036_v2, 0.0 }
 0x4c1   : > { %2444 = vst.msk [vmem:[%s5074_s20 + $0x74] sm:$0xf] %vm5547_vm3, %v2767_v9  ;;  %vm1869_vm11 = vcmp.ge.f32.partialorder %v5040_v27, 0.0  ;;  %vm1870_vm12 = vcmp.ge.f32.partialorder %v5044_v57, 0.0  ;;  %v1894_v50 = vmul.f32 0.4, %v5012_v41  ;;  %v5152_v61 = vmul.f32 %v4935_v26, %v5635_v3 }
 0x4c2   : > { %v1895_v48 = vmul.f32 0.4, %v5016_v37  ;;  %vm1877_vm3 = vcmp.ge.f32.partialorder %v5072_v44, 0.0  ;;  %vm1878_vm14 = vcmp.ge.f32.partialorder %v5080_v35, 0.0  ;;  %v1896_v59 = vmul.f32 0.4, %v5020_v55 }
 0x4c3   : > { %v1897_v16 = vmul.f32 0.4, %v5024_v43  ;;  %v1898_v30 = vmul.f32 0.4, %v5028_v6  ;;  %vm1883_vm0 = vcmp.ge.f32.partialorder %v5100_v24, 0.0  ;;  %v5171_v56 = vsel %vm1862_vm4, %v5012_v41, %v1894_v50 }
 0x4c4   : > { %v1899_v26 = vmul.f32 0.4, %v5032_v21  ;;  %v1900_v31 = vmul.f32 0.4, %v5036_v2  ;;  %v1901_v1 = vmul.f32 0.4, %v5040_v27  ;;  %v1927_v14 = vsel %vm1863_vm5, %v5016_v37, %v1895_v48 }
 0x4c5   : > { %vm1887_vm13 = vcmp.ge.f32.partialorder %v5116_v23, 0.0  ;;  %v1902_v29 = vmul.f32 0.4, %v5044_v57  ;;  %v1903_v9 = vmul.f32 0.4, %v5048_v51  ;;  %vm1888_vm4 = vcmp.ge.f32.partialorder %v5120_v11, 0.0 }
 0x4c6   : > { %v1904_v3 = vmul.f32 0.4, %v5052_v22  ;;  %vm1889_vm15 = vcmp.ge.f32.partialorder %v5124_v60, 0.0  ;;  %vm1890_vm2 = vcmp.ge.f32.partialorder %v5128_v42, 0.0  ;;  %vm1892_vm1 = vcmp.ge.f32.partialorder %v5132_v32, 0.0 }
 0x4c7   : > { %v1905_v41 = vmul.f32 0.4, %v5056_v54  ;;  %v1906_v50 = vmul.f32 0.4, %v5060_v63  ;;  %v1907_v52 = vmul.f32 0.4, %v5064_v38  ;;  %v1928_v46 = vsel %vm1864_vm6, %v5020_v55, %v1896_v59 }
 0x4c8   : > { %vm1893_vm5 = vcmp.ge.f32.partialorder %v5152_v61, 0.0  ;;  %v1908_v37 = vmul.f32 0.4, %v5068_v15  ;;  %v1909_v48 = vmul.f32 0.4, %v5072_v44  ;;  %v1929_v19 = vsel %vm1865_vm7, %v5024_v43, %v1897_v16 }
 0x4c9   : > { %v1910_v28 = vmul.f32 0.4, %v5080_v35  ;;  %v1911_v17 = vmul.f32 0.4, %v5084_v4  ;;  %v1912_v5 = vmul.f32 0.4, %v5088_v0  ;;  %v1930_v55 = vsel %vm1866_vm8, %v5028_v6, %v1898_v30 }
 0x4ca   : > { %v1913_v62 = vmul.f32 0.4, %v5092_v10  ;;  %v1914_v59 = vmul.f32 0.4, %v5096_v45  ;;  %v1915_v12 = vmul.f32 0.4, %v5100_v24  ;;  %v1931_v43 = vsel %vm1867_vm9, %v5032_v21, %v1899_v26 }
 0x4cb   : > { %v1916_v58 = vmul.f32 0.4, %v5104_v39  ;;  %v1917_v16 = vmul.f32 0.4, %v5108_v49  ;;  %v1918_v34 = vmul.f32 0.4, %v5112_v47  ;;  %v1932_v6 = vsel %vm1868_vm10, %v5036_v2, %v1900_v31 }
 0x4cc   : > { %v1919_v7 = vmul.f32 0.4, %v5116_v23  ;;  %v1920_v30 = vmul.f32 0.4, %v5120_v11  ;;  %v1921_v36 = vmul.f32 0.4, %v5124_v60  ;;  %v1933_v21 = vsel %vm1869_vm11, %v5040_v27, %v1901_v1 }
 0x4cd   : > { %v1922_v40 = vmul.f32 0.4, %v5128_v42  ;;  %v1924_v26 = vmul.f32 0.4, %v5132_v32  ;;  %v1925_v13 = vmul.f32 0.4, %v5152_v61  ;;  %v1934_v20 = vsel %vm1870_vm12, %v5044_v57, %v1902_v29 }
 0x4ce   : > { %vm5636_vm6 = vcmp.ge.f32.partialorder %v5048_v51, 0.0  ;;  %vm5637_vm7 = vcmp.ge.f32.partialorder %v5052_v22, 0.0  ;;  %vm5638_vm8 = vcmp.ge.f32.partialorder %v5056_v54, 0.0  ;;  %vm5639_vm9 = vcmp.ge.f32.partialorder %v5060_v63, 0.0  ;;  %v5660_v29 = vld [vmem:[#allocation28_spill] sm:$0xff] }
 0x4cf   : > { %v1935_v2 = vsel %vm5636_vm6, %v5048_v51, %v1903_v9  ;;  %v1936_v31 = vsel %vm5637_vm7, %v5052_v22, %v1904_v3  ;;  %v1937_v27 = vsel %vm5638_vm8, %v5056_v54, %v1905_v41  ;;  %v1938_v1 = vsel %vm5639_vm9, %v5060_v63, %v1906_v50  ;;  %v5661_v3 = vld [vmem:[#allocation30_spill] sm:$0xff]  ;;  %v5662_v50 = vld [vmem:[#allocation27_spill] sm:$0xff] }
 0x4d0   : > { %vm5640_vm10 = vcmp.ge.f32.partialorder %v5064_v38, 0.0  ;;  %vm5641_vm11 = vcmp.ge.f32.partialorder %v5068_v15, 0.0  ;;  %v1941_v22 = vsel %vm1877_vm3, %v5072_v44, %v1909_v48  ;;  %v1942_v54 = vsel %vm1878_vm14, %v5080_v35, %v1910_v28  ;;  %v5663_v48 = vld [vmem:[#allocation29_spill] sm:$0xff] }
 0x4d1   : > { %v1939_v57 = vsel %vm5640_vm10, %v5064_v38, %v1907_v52  ;;  %v1940_v51 = vsel %vm5641_vm11, %v5068_v15, %v1908_v37  ;;  %vm5642_vm12 = vcmp.ge.f32.partialorder %v5084_v4, 0.0  ;;  %vm5643_vm6 = vcmp.ge.f32.partialorder %v5088_v0, 0.0 }
 0x4d2   : > { %v1943_v63 = vsel %vm5642_vm12, %v5084_v4, %v1911_v17  ;;  %v1944_v52 = vsel %vm5643_vm6, %v5088_v0, %v1912_v5  ;;  %vm5644_vm7 = vcmp.ge.f32.partialorder %v5092_v10, 0.0  ;;  %vm5645_vm8 = vcmp.ge.f32.partialorder %v5096_v45, 0.0 }
 0x4d3   : > { %v1945_v38 = vsel %vm5644_vm7, %v5092_v10, %v1913_v62  ;;  %v1946_v15 = vsel %vm5645_vm8, %v5096_v45, %v1914_v59  ;;  %v1947_v28 = vsel %vm1883_vm0, %v5100_v24, %v1915_v12  ;;  %vm5646_vm3 = vcmp.ge.f32.partialorder %v5104_v39, 0.0  ;;  %v5649_v45 = vld [vmem:[#allocation46_spill] sm:$0xff]  ;;  %v5664_v59 = vld [vmem:[#allocation32_spill] sm:$0xff] }
 0x4d4   : > { %v1948_v17 = vsel %vm5646_vm3, %v5104_v39, %v1916_v58  ;;  %vm5647_vm14 = vcmp.ge.f32.partialorder %v5108_v49, 0.0  ;;  %vm5648_vm9 = vcmp.ge.f32.partialorder %v5112_v47, 0.0  ;;  %v1951_v44 = vsel %vm1887_vm13, %v5116_v23, %v1919_v7  ;;  %v5656_v23 = vld [vmem:[#allocation24_spill] sm:$0xff] }
 0x4d5   : > { %v1949_v5 = vsel %vm5647_vm14, %v5108_v49, %v1917_v16  ;;  %v1950_v62 = vsel %vm5648_vm9, %v5112_v47, %v1918_v34  ;;  %v1952_v12 = vsel %vm1888_vm4, %v5120_v11, %v1920_v30  ;;  %v1953_v58 = vsel %vm1889_vm15, %v5124_v60, %v1921_v36  ;;  %v5657_v60 = vld [vmem:[#allocation26_spill] sm:$0xff]  ;;  %v5666_v30 = vld [vmem:[#allocation31_spill] sm:$0xff] }
 0x4d6   : > { %v1954_v35 = vsel %vm1890_vm2, %v5128_v42, %v1922_v40  ;;  %v1956_v34 = vsel %vm1892_vm1, %v5132_v32, %v1924_v26  ;;  %v1957_v7 = vsel %vm1893_vm5, %v5152_v61, %v1925_v13  ;;  %v5297_v4 = vadd.f32 %v4915_v33, %v5171_v56  ;;  %v5650_v13 = vld [vmem:[#allocation44_spill] sm:$0xff]  ;;  %v5651_v33 = vld [vmem:[#allocation45_spill] sm:$0xff]  ;;  %v5658_v32 = vld [vmem:[#allocation51_spill] sm:$0xff] }
 0x4d7   : > { %v5300_v0 = vadd.f32 %v4921_v53, %v1927_v14  ;;  %v5303_v36 = vadd.f32 %v4912_v25, %v1928_v46  ;;  %v5306_v40 = vadd.f32 %v4918_v18, %v1929_v19  ;;  %v5309_v10 = vadd.f32 %v4927_v8, %v1930_v55  ;;  %v5652_v53 = vld [vmem:[#allocation48_spill] sm:$0xff]  ;;  %v5653_v25 = vld [vmem:[#allocation50_spill] sm:$0xff]  ;;  %v5654_v18 = vld [vmem:[#allocation47_spill] sm:$0xff] }
 0x4d8   : > { %v5312_v24 = vadd.f32 %v5649_v45, %v1931_v43  ;;  %v5315_v39 = vadd.f32 %v5650_v13, %v1932_v6  ;;  %v5318_v49 = vadd.f32 %v5651_v33, %v1933_v21  ;;  %v5321_v14 = vadd.f32 %v5652_v53, %v1934_v20  ;;  %v5655_v8 = vld [vmem:[#allocation49_spill] sm:$0xff]  ;;  %v5665_v16 = vld [vmem:[#allocation34_spill] sm:$0xff] }
 0x4d9   : > { %v5324_v46 = vadd.f32 %v5653_v25, %v1935_v2  ;;  %v5327_v19 = vadd.f32 %v5654_v18, %v1936_v31  ;;  %v5330_v47 = vadd.f32 %v5655_v8, %v1937_v27  ;;  %v5333_v11 = vadd.f32 %v5656_v23, %v1938_v1  ;;  %v5659_v20 = vld [vmem:[#allocation25_spill] sm:$0xff]  ;;  %v5668_v31 = vld [vmem:[#allocation35_spill] sm:$0xff] }
 0x4da   : > { %v5336_v42 = vadd.f32 %v5657_v60, %v1939_v57  ;;  %v5339_v61 = vadd.f32 %v5658_v32, %v1940_v51  ;;  %v5342_v56 = vadd.f32 %v5659_v20, %v1941_v22  ;;  %v5345_v9 = vadd.f32 %v5660_v29, %v1942_v54  ;;  %v5667_v26 = vld [vmem:[#allocation33_spill] sm:$0xff]  ;;  %v5670_v51 = vld [vmem:[#allocation42_spill] sm:$0xff]  ;;  %v5671_v54 = vld [vmem:[#allocation36_spill] sm:$0xff] }
 0x4db   : > { %v5348_v41 = vadd.f32 %v5661_v3, %v1943_v63  ;;  %v5351_v37 = vadd.f32 %v5662_v50, %v1944_v52  ;;  %v5354_v55 = vadd.f32 %v5663_v48, %v1945_v38  ;;  %v5357_v43 = vadd.f32 %v5664_v59, %v1946_v15  ;;  %v5669_v1 = vld [vmem:[#allocation37_spill] sm:$0xff]  ;;  %v5672_v52 = vld [vmem:[#allocation39_spill] sm:$0xff]  ;;  %v5673_v15 = vld [vmem:[#allocation38_spill] sm:$0xff] }
 0x4dc   : > { %v5360_v6 = vadd.f32 %v5665_v16, %v1947_v28  ;;  %v5363_v21 = vadd.f32 %v5666_v30, %v1948_v17  ;;  %v5366_v2 = vadd.f32 %v5667_v26, %v1949_v5  ;;  %v5369_v27 = vadd.f32 %v5668_v31, %v1950_v62  ;;  %v5674_v17 = vld [vmem:[#allocation40_spill] sm:$0xff] }
 0x4dd   : > { %v5372_v57 = vadd.f32 %v5669_v1, %v1951_v44  ;;  %v5375_v22 = vadd.f32 %v5670_v51, %v1952_v12  ;;  %v5378_v63 = vadd.f32 %v5671_v54, %v1953_v58  ;;  %v5381_v38 = vadd.f32 %v5672_v52, %v1954_v35 }
 0x4de   : > { %v5384_v28 = vadd.f32 %v5673_v15, %v1956_v34  ;;  %v5387_v5 = vadd.f32 %v5674_v17, %v1957_v7  ;;  %v2254_v62 = vmax.f32 %v5297_v4, 0.0  ;;  %v2255_v44 = vmax.f32 %v5300_v0, 0.0 }
 0x4df   : > { %v2256_v45 = vmax.f32 %v5303_v36, 0.0  ;;  %v2257_v12 = vmax.f32 %v5306_v40, 0.0  ;;  %v2258_v58 = vmax.f32 %v5309_v10, 0.0  ;;  %v2259_v13 = vmax.f32 %v5312_v24, 0.0 }
 0x4e0   : > { %v2260_v35 = vmax.f32 %v5315_v39, 0.0  ;;  %v2261_v34 = vmax.f32 %v5318_v49, 0.0  ;;  %v2262_v33 = vmax.f32 %v5321_v14, 0.0  ;;  %v2263_v7 = vmax.f32 %v5324_v46, 0.0 }
 0x4e1   : > { %v2264_v4 = vmax.f32 %v5327_v19, 0.0  ;;  %v2265_v0 = vmax.f32 %v5330_v47, 0.0  ;;  %v2266_v36 = vmax.f32 %v5333_v11, 0.0  ;;  %v2267_v40 = vmax.f32 %v5336_v42, 0.0 }
 0x4e2   : > { %v2268_v10 = vmax.f32 %v5339_v61, 0.0  ;;  %v2269_v24 = vmax.f32 %v5342_v56, 0.0  ;;  %v2270_v39 = vmax.f32 %v5345_v9, 0.0  ;;  %v2271_v49 = vmax.f32 %v5348_v41, 0.0 }
 0x4e3   : > { %v2272_v53 = vmax.f32 %v5351_v37, 0.0  ;;  %v2273_v14 = vmax.f32 %v5354_v55, 0.0  ;;  %v2274_v25 = vmax.f32 %v5357_v43, 0.0  ;;  %v2275_v46 = vmax.f32 %v5360_v6, 0.0 }
 0x4e4   : > { %v2276_v18 = vmax.f32 %v5363_v21, 0.0  ;;  %v2277_v19 = vmax.f32 %v5366_v2, 0.0  ;;  %v2278_v8 = vmax.f32 %v5369_v27, 0.0  ;;  %v2279_v47 = vmax.f32 %v5372_v57, 0.0 }
 0x4e5   : > { %v2280_v23 = vmax.f32 %v5375_v22, 0.0  ;;  %v2281_v11 = vmax.f32 %v5378_v63, 0.0  ;;  %v2282_v60 = vmax.f32 %v5381_v38, 0.0  ;;  %v2284_v42 = vmax.f32 %v5384_v28, 0.0 }
 0x4e6   : > { %v2285_v32 = vmax.f32 %v5387_v5, 0.0  ;;  %v2738_v61 = vpack.c.bf16 %v2254_v62, %v2254_v62  ;;  %v2739_v20 = vpack.c.bf16 %v2255_v44, %v2255_v44  ;;  %v2740_v56 = vpack.c.bf16 %v2256_v45, %v2256_v45 }
 0x4e7   : > { %v2741_v29 = vpack.c.bf16 %v2257_v12, %v2257_v12  ;;  %v2742_v9 = vpack.c.bf16 %v2258_v58, %v2258_v58  ;;  %v2743_v3 = vpack.c.bf16 %v2259_v13, %v2259_v13  ;;  %v2744_v41 = vpack.c.bf16 %v2260_v35, %v2260_v35 }
 0x4e8   : > { %v2745_v50 = vpack.c.bf16 %v2261_v34, %v2261_v34  ;;  %v2746_v37 = vpack.c.bf16 %v2262_v33, %v2262_v33  ;;  %vm5675_vm13 = vcmask 519168   ;;  %v2747_v48 = vpack.c.bf16 %v2263_v7, %v2263_v7 }
 0x4e9   : > { %2415 = vst.msk [vmem:[%s5074_s20] sm:$0xf] %vm5675_vm13, %v2738_v61  ;;  %v2748_v55 = vpack.c.bf16 %v2264_v4, %v2264_v4  ;;  %v2749_v59 = vpack.c.bf16 %v2265_v0, %v2265_v0  ;;  %v2750_v43 = vpack.c.bf16 %v2266_v36, %v2266_v36  ;;  %vm5676_vm15 = vmmov %vm5675_vm13  ;;  %v2751_v16 = vpack.c.bf16 %v2267_v40, %v2267_v40 }
 0x4ea   : > { %2416 = vst.msk [vmem:[%s5074_s20 + $0x4] sm:$0xf] %vm5676_vm15, %v2739_v20  ;;  %vm5677_vm1 = vmmov %vm5675_vm13  ;;  %v2752_v6 = vpack.c.bf16 %v2268_v10, %v2268_v10  ;;  %v2753_v30 = vpack.c.bf16 %v2269_v24, %v2269_v24  ;;  %v2754_v21 = vpack.c.bf16 %v2270_v39, %v2270_v39  ;;  %v2755_v26 = vpack.c.bf16 %v2271_v49, %v2271_v49 }
 0x4eb   : > { %2417 = vst.msk [vmem:[%s5074_s20 + $0x8] sm:$0xf] %vm5677_vm1, %v2740_v56  ;;  %vm5678_vm2 = vmmov %vm5677_vm1  ;;  %v2756_v2 = vpack.c.bf16 %v2272_v53, %v2272_v53  ;;  %v2757_v31 = vpack.c.bf16 %v2273_v14, %v2273_v14  ;;  %v2758_v27 = vpack.c.bf16 %v2274_v25, %v2274_v25  ;;  %v2759_v1 = vpack.c.bf16 %v2275_v46, %v2275_v46 }
 0x4ec   : > { %2418 = vst.msk [vmem:[%s5074_s20 + $0xc] sm:$0xf] %vm5678_vm2, %v2741_v29  ;;  %vm5679_vm0 = vmmov %vm5677_vm1  ;;  %v2760_v57 = vpack.c.bf16 %v2276_v18, %v2276_v18  ;;  %v2761_v51 = vpack.c.bf16 %v2277_v19, %v2277_v19  ;;  %v2762_v22 = vpack.c.bf16 %v2278_v8, %v2278_v8  ;;  %v2763_v54 = vpack.c.bf16 %v2279_v47, %v2279_v47 }
 0x4ed   : > { %2419 = vst.msk [vmem:[%s5074_s20 + $0x10] sm:$0xf] %vm5679_vm0, %v2742_v9  ;;  %vm5680_vm4 = vmmov %vm5679_vm0  ;;  %v2764_v63 = vpack.c.bf16 %v2280_v23, %v2280_v23  ;;  %v2765_v52 = vpack.c.bf16 %v2281_v11, %v2281_v11  ;;  %v2766_v38 = vpack.c.bf16 %v2282_v60, %v2282_v60  ;;  %v2768_v15 = vpack.c.bf16 %v2284_v42, %v2284_v42 }
 0x4ee   : > { %2420 = vst.msk [vmem:[%s5074_s20 + $0x14] sm:$0xf] %vm5680_vm4, %v2743_v3  ;;  %vm5681_vm5 = vmmov %vm5679_vm0  ;;  %v2769_v28 = vpack.c.bf16 %v2285_v32, %v2285_v32 }
 0x4ef   : > { %2421 = vst.msk [vmem:[%s5074_s20 + $0x18] sm:$0xf] %vm5681_vm5, %v2744_v41  ;;  %vm5682_vm10 = vmmov %vm5679_vm0 }
 0x4f0   : > { %2422 = vst.msk [vmem:[%s5074_s20 + $0x1c] sm:$0xf] %vm5682_vm10, %v2745_v50  ;;  %vm5683_vm11 = vmmov %vm5679_vm0 }
 0x4f1   : > { %2423 = vst.msk [vmem:[%s5074_s20 + $0x20] sm:$0xf] %vm5683_vm11, %v2746_v37  ;;  %vm5684_vm12 = vmmov %vm5679_vm0 }
 0x4f2   : > { %2424 = vst.msk [vmem:[%s5074_s20 + $0x24] sm:$0xf] %vm5684_vm12, %v2747_v48  ;;  %vm5685_vm6 = vmmov %vm5679_vm0 }
 0x4f3   : > { %2425 = vst.msk [vmem:[%s5074_s20 + $0x28] sm:$0xf] %vm5685_vm6, %v2748_v55  ;;  %vm5686_vm7 = vmmov %vm5679_vm0 }
 0x4f4   : > { %2426 = vst.msk [vmem:[%s5074_s20 + $0x2c] sm:$0xf] %vm5686_vm7, %v2749_v59  ;;  %vm5687_vm8 = vmmov %vm5679_vm0 }
 0x4f5   : > { %2427 = vst.msk [vmem:[%s5074_s20 + $0x30] sm:$0xf] %vm5687_vm8, %v2750_v43  ;;  %vm5688_vm3 = vmmov %vm5679_vm0 }
 0x4f6   : > { %2428 = vst.msk [vmem:[%s5074_s20 + $0x34] sm:$0xf] %vm5688_vm3, %v2751_v16  ;;  %vm5689_vm14 = vmmov %vm5679_vm0 }
 0x4f7   : > { %2429 = vst.msk [vmem:[%s5074_s20 + $0x38] sm:$0xf] %vm5689_vm14, %v2752_v6  ;;  %vm5690_vm9 = vmmov %vm5679_vm0 }
 0x4f8   : > { %2430 = vst.msk [vmem:[%s5074_s20 + $0x3c] sm:$0xf] %vm5690_vm9, %v2753_v30  ;;  %vm5691_vm13 = vmmov %vm5679_vm0 }
 0x4f9   : > { %2431 = vst.msk [vmem:[%s5074_s20 + $0x40] sm:$0xf] %vm5691_vm13, %v2754_v21  ;;  %vm5692_vm15 = vmmov %vm5679_vm0 }
 0x4fa   : > { %2432 = vst.msk [vmem:[%s5074_s20 + $0x44] sm:$0xf] %vm5692_vm15, %v2755_v26  ;;  %vm5693_vm1 = vmmov %vm5679_vm0 }
 0x4fb   : > { %2433 = vst.msk [vmem:[%s5074_s20 + $0x48] sm:$0xf] %vm5693_vm1, %v2756_v2  ;;  %vm5694_vm2 = vmmov %vm5679_vm0 }
 0x4fc   : > { %2434 = vst.msk [vmem:[%s5074_s20 + $0x4c] sm:$0xf] %vm5694_vm2, %v2757_v31  ;;  %vm5695_vm4 = vmmov %vm5679_vm0 }
 0x4fd   : > { %2435 = vst.msk [vmem:[%s5074_s20 + $0x50] sm:$0xf] %vm5679_vm0, %v2758_v27  ;;  %vm5696_vm5 = vmmov %vm5679_vm0 }
 0x4fe   : > { %2436 = vst.msk [vmem:[%s5074_s20 + $0x54] sm:$0xf] %vm5695_vm4, %v2759_v1  ;;  %vm5697_vm10 = vmmov %vm5679_vm0 }
 0x4ff   : > { %2437 = vst.msk [vmem:[%s5074_s20 + $0x58] sm:$0xf] %vm5696_vm5, %v2760_v57  ;;  %vm5698_vm11 = vmmov %vm5679_vm0 }
 0x500   : > { %2438 = vst.msk [vmem:[%s5074_s20 + $0x5c] sm:$0xf] %vm5697_vm10, %v2761_v51  ;;  %vm5699_vm12 = vmmov %vm5679_vm0 }
 0x501   : > { %2439 = vst.msk [vmem:[%s5074_s20 + $0x60] sm:$0xf] %vm5698_vm11, %v2762_v22  ;;  %vm5700_vm6 = vmmov %vm5679_vm0 }
 0x502   : > { %2440 = vst.msk [vmem:[%s5074_s20 + $0x64] sm:$0xf] %vm5699_vm12, %v2763_v54  ;;  %vm5701_vm7 = vmmov %vm5679_vm0 }
 0x503   : > { %2441 = vst.msk [vmem:[%s5074_s20 + $0x68] sm:$0xf] %vm5700_vm6, %v2764_v63  ;;  %vm5702_vm8 = vmmov %vm5679_vm0 }
 0x504   : > { %2442 = vst.msk [vmem:[%s5074_s20 + $0x6c] sm:$0xf] %vm5701_vm7, %v2765_v52  ;;  %vm5703_vm3 = vmmov %vm5679_vm0 }
 0x505   : > { %2443 = vst.msk [vmem:[%s5074_s20 + $0x70] sm:$0xf] %vm5702_vm8, %v2766_v38  ;;  %vm5704_vm14 = vmmov %vm5679_vm0 }
 0x506   : > { %2445 = vst.msk [vmem:[%s5074_s20 + $0x78] sm:$0xf] %vm5703_vm3, %v2768_v15 }
 0x507   : > { %2446 = vst.msk [vmem:[%s5074_s20 + $0x7c] sm:$0xf] %vm5704_vm14, %v2769_v28 }
 0x508   : > { %3378 = shalt.err (!%p3375_p11)
}
 0x509   : > { %s3379_s21 = scalar_lea.hbm %s5467_s22, 2048  ;;  %s3383_s20 = scalar_lea.hbm %s5542_s9, 4096 }
 0x50a   : > { %p3380_p12 = scmp.ne.s32.totalorder %s5467_s22, %s3379_s21  ;;  %p3384_p7 = scmp.lt.u32.totalorder %s5467_s22, %s5542_s9 }
 0x50b   : > { %p3385_p6 = scmp.lt.u32.totalorder %s3383_s20, %s3379_s21  ;;  %p3387_p4 = scmp.lt.u32.totalorder %s3379_s21, %s5467_s22 }
 0x50c   : > { %p3381_p3 = pnand %p3380_p12, %p5705_p1 }
 0x50d   : > { %p3386_p9 = por %p3385_p6, %p3384_p7 }
 0x50e   : > { %p3382_p5 = pneg %p3381_p3 }
 0x50f   : > { %p3388_p13 = por %p3387_p4, %p3386_p9 }
 0x511   : > { %p3389_p0 = pnand %p3388_p13, %p3382_p5 }
 0x513   : > { %3392 = shalt.err (!%p3389_p0)
}
 0x514   : > { %s3464_s27 = smov 64   ;;  %s3465_s29 = smov 4  }
 0x515   : > { %2993 = dma.vmem_to_hbm [thread:$0]  (%p5705_p1), %s5469_s1, 2048, %s5467_s22, %s2448_s26, %s3464_s27, %s3464_s27, %s3465_s29  }
 0x516 PF: > { %s2476_s28 = sand.u32 1, %s3435_s30   ;;  %p5706_p2 = scmp.ne.s32.totalorder %s5559_s24, 0 }
 0x517   : > { %p5707_p8 = scmp.ge.s32.totalorder %s3447_s12, 2  ;;  %s2477_s25 = scalar_lea.sflag [#allocation4], %s2476_s28 }
 0x519   : > { %p3025_p10 = pnand %p5707_p8, %p5706_p2 }
 0x51b   : > { %3430 = dma.done.wait (!%p3025_p10), %s2477_s25, 2048  }
 0x51c   : > { %3432 = vsyncadd (!%p3025_p10), %s2477_s25, 4294965248  ;;  %p26_p11 = scmp.ge.s32.totalorder %s3738_s19, 4   ;;  %s5708_s30 = smov %s3439_s10 }
 0x51d   : > { %s5709_s10 = smov %s3443_s11  ;;  %s5710_s11 = smov %s3749_s17 }
 0x51e   : > { %s5711_s12 = smov %s3738_s19  ;;  %28 = sbr.rel (!%p26_p11) target bundleno = 12 (0xc), region = 133 }
 0x525   :  { %2482 = vsyncpa [#allocation3], 1 }
 0x526   :  { %2484 = vsyncpa [#allocation3 + $0x1], 1 }
 0x527   :  { %2485 = vsyncpa [#allocation6], 1 }
 0x528   :  { %2486 = vsyncpa [#allocation9], 1 }
 0x529   :  { %2487 = vsyncpa [#allocation12], 1 }
 0x52a   :  { %2488 = vsyncpa [#allocation15], 1 }
 0x52b   :  { %2489 = vsyncpa [#allocation4], 1 }
 0x52c   :  { %2491 = vsyncpa [#allocation4 + $0x1], 1 }

// kernel: encoder_forward.8
= control target key start
LH: loop header
LB: loop body
LE: loop exit
PB: predicated region body
PF: predicated region fallthrough
CT: control target
= control target key end

     0   :  { %s2888_s0 = inlined_call_operand.hbm [shape: bf16[2,4,512], index: 0, kind: input, shape index: {}]   ;;  %s2889_s1 = inlined_call_operand.hbm [shape: bf16[128,256], index: 1, kind: input, shape index: {}]   ;;  %s2890_s2 = inlined_call_operand.hbm [shape: f32[1,256], index: 2, kind: input, shape index: {}]   ;;  %s2891_s3 = inlined_call_operand.hbm [shape: bf16[256,256], index: 3, kind: input, shape index: {}]   ;;  %s2892_s4 = inlined_call_operand.hbm [shape: f32[1,256], index: 4, kind: input, shape index: {}]   ;;  %s2893_s5 = inlined_call_operand.hbm [shape: bf16[256,256], index: 5, kind: input, shape index: {}]   ;;  %s2894_s6 = inlined_call_operand.hbm [shape: f32[1,256], index: 6, kind: input, shape index: {}]   ;;  %s2895_s7 = inlined_call_operand.hbm [shape: bf16[256,256], index: 7, kind: input, shape index: {}]   ;;  %s2896_s8 = inlined_call_operand.hbm [shape: f32[1,256], index: 8, kind: input, shape index: {}]   ;;  %s2897_s9 = inlined_call_operand.hbm [shape: bf16[2,4,256], index: 9, kind: output, shape index: {}]  }
   0x1   :  { %2902 = sst [smem:[#allocation24_spill]] %s2889_s1 }
   0x2   :  { %2903 = sst [smem:[#allocation25_spill]] %s2897_s9 }
   0x3   :  { %14 = vsyncpa [#allocation3], 0 }
   0x4   :  { %16 = vsyncpa [#allocation3 + $0x1], 0 }
   0x5   :  { %17 = vsyncpa [#allocation6], 0 }
   0x6   :  { %18 = vsyncpa [#allocation9], 0 }
   0x7   :  { %19 = vsyncpa [#allocation12], 0 }
   0x8   :  { %20 = vsyncpa [#allocation15], 0 }
   0x9   :  { %21 = vsyncpa [#allocation4], 0 }
   0xa   :  { %23 = vsyncpa [#allocation4 + $0x1], 0  ;;  %s2481_s30 = smov 0   ;;  %s2483_s10 = smov 0  }
   0xb   :  { %s2485_s11 = smov 0   ;;  %s2487_s12 = smov 0  }
   0xc LB: > { %s2418_s13 = smov [#allocation5]   ;;  %s2502_s15 = sadd.s32 4294967295, %s2416_s12   ;;  %s2416_s12 = sphi %s2487_s12, %s2930_s12   ;;  %s2412_s11 = sphi %s2485_s11, %s2929_s11   ;;  %s2408_s10 = sphi %s2483_s10, %s2928_s10   ;;  %s2404_s30 = sphi %s2481_s30, %s2927_s30  }
   0xd   : > { %s266_s14 = sshll.u32 %s2418_s13, 4  ;;  %p1629_p0 = scmp.ge.s32.totalorder %s2416_s12, 1  ;;  %s2507_s14 = int_to_ptr.vmem [resolvable:$true] %s266_s14 }
   0xe   : > { %p2899_p1 = scmp.eq.s32.totalorder %s2502_s15, 0  ;;  %p254_p2 = scmp.lt.s32.totalorder %s2416_s12, 3 }
   0xf   : > { %s2419_s17 = smov [#allocation8]   ;;  %s2420_s20 = smov [#allocation11]  }
  0x10   : > { %p2509_p3 = pnand %p1629_p0, %p254_p2  ;;  %s290_s18 = sshll.u32 %s2419_s17, 4  ;;  %s2522_s18 = int_to_ptr.vmem [resolvable:$true] %s290_s18 }
  0x11   : > { %s314_s21 = sshll.u32 %s2420_s20, 4  ;;  %s2906_s1 = sld [smem:[#allocation24_spill]]  ;;  %s2524_s21 = int_to_ptr.vmem [resolvable:$true] %s314_s21 }
  0x12   : > { %s2904_s16 = scalar_select %p2509_p3, 1, 0 }
  0x13   : > { %p1810_p5 = pneg %p2509_p3 }
  0x15   : > { %p2518_p6 = pnand %p1810_p5, %p2899_p1 }
  0x17   : > { %s2080_s24 = scalar_lea.hbm %s2906_s1, 2048  ;;  %p2534_p8 = pneg %p2518_p6 }
  0x18   : > { %p2081_p7 = scmp.ne.s32.totalorder %s2906_s1, %s2080_s24  ;;  %p2087_p11 = scmp.lt.u32.totalorder %s2080_s24, %s2906_s1 }
  0x1a   : > { %p2083_p9 = pnand %p2534_p8, %p2081_p7 }
  0x1c   : > { %p2084_p10 = pneg %p2083_p9 }
  0x1e   : > { %p2089_p12 = pnand %p2087_p11, %p2084_p10 }
  0x20   : > { %2092 = shalt.err (!%p2089_p12)
}
  0x21   : > { %s2093_s13 = scalar_lea.vmem %s2507_s14, 2048  ;;  %p2101_p5 = scmp.lt.s32.totalorder %s2507_s14, %s2507_s14 }
  0x22   : > { %p2094_p13 = scmp.ne.s32.totalorder %s2507_s14, %s2093_s13  ;;  %p2102_p4 = scmp.lt.s32.totalorder %s2093_s13, %s2093_s13 }
  0x24   : > { %p2096_p0 = pnand %p2094_p13, %p2534_p8  ;;  %p2103_p7 = por %p2102_p4, %p2101_p5 }
  0x26   : > { %p2097_p2 = pneg %p2096_p0 }
  0x28   : > { %p2104_p9 = pnand %p2103_p7, %p2097_p2 }
  0x2a   : > { %2107 = shalt.err (!%p2104_p9)
}
  0x2b   : > { %s2421_s17 = smov 128   ;;  %s2422_s20 = smov 8  }
  0x2c   : > { %1813 = dma.hbm_to_vmem [thread:$0]  (!%p2518_p6), %s2906_s1, 2048, %s2507_s14, [#allocation6], %s2421_s17, %s2421_s17, %s2422_s20  }
  0x2d   : > { %s2108_s26 = scalar_lea.hbm %s2891_s3, 4096 }
  0x2e   : > { %p2109_p4 = scmp.ne.s32.totalorder %s2891_s3, %s2108_s26  ;;  %p2115_p12 = scmp.lt.u32.totalorder %s2108_s26, %s2891_s3 }
  0x30   : > { %p2111_p10 = pnand %p2109_p4, %p2534_p8 }
  0x32   : > { %p2112_p11 = pneg %p2111_p10 }
  0x34   : > { %p2117_p13 = pnand %p2115_p12, %p2112_p11 }
  0x36   : > { %2120 = shalt.err (!%p2117_p13)
}
  0x37   : > { %s2121_s14 = scalar_lea.vmem %s2522_s18, 4096  ;;  %p2129_p7 = scmp.lt.s32.totalorder %s2522_s18, %s2522_s18 }
  0x38   : > { %p2122_p0 = scmp.ne.s32.totalorder %s2522_s18, %s2121_s14  ;;  %p2130_p9 = scmp.lt.s32.totalorder %s2121_s14, %s2121_s14 }
  0x3a   : > { %p2124_p2 = pnand %p2122_p0, %p2534_p8  ;;  %p2131_p4 = por %p2130_p9, %p2129_p7 }
  0x3c   : > { %p2125_p5 = pneg %p2124_p2 }
  0x3e   : > { %p2132_p10 = pnand %p2131_p4, %p2125_p5 }
  0x40   : > { %2135 = shalt.err (!%p2132_p10)
}
  0x41   : > { %1819 = dma.hbm_to_vmem [thread:$0]  (!%p2518_p6), %s2891_s3, 4096, %s2522_s18, [#allocation9], %s2421_s17, %s2421_s17, %s2422_s20  }
  0x42   : > { %s2136_s25 = scalar_lea.hbm %s2893_s5, 4096 }
  0x43   : > { %p2137_p11 = scmp.ne.s32.totalorder %s2893_s5, %s2136_s25  ;;  %p2143_p0 = scmp.lt.u32.totalorder %s2136_s25, %s2893_s5 }
  0x45   : > { %p2139_p12 = pnand %p2137_p11, %p2534_p8 }
  0x47   : > { %p2140_p13 = pneg %p2139_p12 }
  0x49   : > { %p2145_p2 = pnand %p2143_p0, %p2140_p13 }
  0x4b   : > { %2148 = shalt.err (!%p2145_p2)
}
  0x4c   : > { %s2149_s18 = scalar_lea.vmem %s2524_s21, 4096  ;;  %p2157_p4 = scmp.lt.s32.totalorder %s2524_s21, %s2524_s21 }
  0x4d   : > { %p2150_p5 = scmp.ne.s32.totalorder %s2524_s21, %s2149_s18  ;;  %p2158_p10 = scmp.lt.s32.totalorder %s2149_s18, %s2149_s18 }
  0x4f   : > { %p2152_p7 = pnand %p2150_p5, %p2534_p8  ;;  %p2159_p11 = por %p2158_p10, %p2157_p4 }
  0x51   : > { %p2153_p9 = pneg %p2152_p7 }
  0x53   : > { %p2160_p12 = pnand %p2159_p11, %p2153_p9 }
  0x55   : > { %2163 = shalt.err (!%p2160_p12)
}
  0x56   : > { %1825 = dma.hbm_to_vmem [thread:$0]  (!%p2518_p6), %s2893_s5, 4096, %s2524_s21, [#allocation12], %s2421_s17, %s2421_s17, %s2422_s20  }
  0x57   : > { %s2423_s22 = smov [#allocation14]   ;;  %s2424_s24 = smov [#allocation7]  }
  0x58   : > { %s338_s23 = sshll.u32 %s2423_s22, 4  ;;  %s280_s25 = sshll.u32 %s2424_s24, 4  ;;  %s339_s23 = int_to_ptr.vmem [resolvable:$true] %s338_s23  ;;  %s281_s25 = int_to_ptr.vmem [resolvable:$true] %s280_s25 }
  0x59   : > { %s2164_s29 = scalar_lea.hbm %s2895_s7, 4096 }
  0x5a   : > { %p2165_p13 = scmp.ne.s32.totalorder %s2895_s7, %s2164_s29  ;;  %p2171_p5 = scmp.lt.u32.totalorder %s2164_s29, %s2895_s7 }
  0x5c   : > { %p2167_p0 = pnand %p2165_p13, %p2534_p8 }
  0x5e   : > { %p2168_p2 = pneg %p2167_p0 }
  0x60   : > { %p2173_p7 = pnand %p2171_p5, %p2168_p2 }
  0x62   : > { %2176 = shalt.err (!%p2173_p7)
}
  0x63   : > { %s2177_s21 = scalar_lea.vmem %s339_s23, 4096  ;;  %p2185_p11 = scmp.lt.s32.totalorder %s339_s23, %s339_s23 }
  0x64   : > { %p2178_p9 = scmp.ne.s32.totalorder %s339_s23, %s2177_s21  ;;  %p2186_p12 = scmp.lt.s32.totalorder %s2177_s21, %s2177_s21 }
  0x66   : > { %p2180_p4 = pnand %p2178_p9, %p2534_p8  ;;  %p2187_p1 = por %p2186_p12, %p2185_p11 }
  0x68   : > { %p2181_p10 = pneg %p2180_p4 }
  0x6a   : > { %p2188_p3 = pnand %p2187_p1, %p2181_p10 }
  0x6c   : > { %2191 = shalt.err (!%p2188_p3)
}
  0x6d   : > { %1831 = dma.hbm_to_vmem [thread:$0]  (!%p2518_p6), %s2895_s7, 4096, %s339_s23, [#allocation15], %s2421_s17, %s2421_s17, %s2422_s20  }
  0x6e   : > { %s2192_s26 = scalar_lea.hbm %s2890_s2, 32 }
  0x6f   : > { %p2193_p1 = scmp.ne.s32.totalorder %s2890_s2, %s2192_s26  ;;  %p2199_p0 = scmp.lt.u32.totalorder %s2192_s26, %s2890_s2 }
  0x71   : > { %p2195_p3 = pnand %p2193_p1, %p2534_p8 }
  0x73   : > { %p2196_p13 = pneg %p2195_p3 }
  0x75   : > { %p2201_p2 = pnand %p2199_p0, %p2196_p13 }
  0x77   : > { %2204 = shalt.err (!%p2201_p2)
}
  0x78   : > { %s2205_s14 = scalar_lea.vmem %s281_s25, 32  ;;  %p2213_p4 = scmp.lt.s32.totalorder %s281_s25, %s281_s25 }
  0x79   : > { %p2206_p5 = scmp.ne.s32.totalorder %s281_s25, %s2205_s14  ;;  %p2214_p10 = scmp.lt.s32.totalorder %s2205_s14, %s2205_s14 }
  0x7b   : > { %p2208_p7 = pnand %p2206_p5, %p2534_p8  ;;  %p2215_p11 = por %p2214_p10, %p2213_p4 }
  0x7d   : > { %p2209_p9 = pneg %p2208_p7 }
  0x7f   : > { %p2216_p12 = pnand %p2215_p11, %p2209_p9 }
  0x81   : > { %2219 = shalt.err (!%p2216_p12)
}
  0x82   : > { %1816 = dma.hbm_to_vmem [thread:$0]  (!%p2518_p6), %s2890_s2, 32, %s281_s25, [#allocation6]  }
  0x83   : > { %s2425_s23 = smov [#allocation10]   ;;  %s2426_s1 = smov [#allocation13]  }
  0x84   : > { %s304_s21 = sshll.u32 %s2425_s23, 4  ;;  %s328_s9 = sshll.u32 %s2426_s1, 4  ;;  %s305_s21 = int_to_ptr.vmem [resolvable:$true] %s304_s21  ;;  %s329_s9 = int_to_ptr.vmem [resolvable:$true] %s328_s9 }
  0x85   : > { %s2220_s26 = scalar_lea.hbm %s2892_s4, 32 }
  0x86   : > { %p2221_p1 = scmp.ne.s32.totalorder %s2892_s4, %s2220_s26  ;;  %p2227_p0 = scmp.lt.u32.totalorder %s2220_s26, %s2892_s4 }
  0x88   : > { %p2223_p3 = pnand %p2221_p1, %p2534_p8 }
  0x8a   : > { %p2224_p13 = pneg %p2223_p3 }
  0x8c   : > { %p2229_p2 = pnand %p2227_p0, %p2224_p13 }
  0x8e   : > { %2232 = shalt.err (!%p2229_p2)
}
  0x8f   : > { %s2233_s25 = scalar_lea.vmem %s305_s21, 32  ;;  %p2241_p4 = scmp.lt.s32.totalorder %s305_s21, %s305_s21 }
  0x90   : > { %p2234_p5 = scmp.ne.s32.totalorder %s305_s21, %s2233_s25  ;;  %p2242_p10 = scmp.lt.s32.totalorder %s2233_s25, %s2233_s25 }
  0x92   : > { %p2236_p7 = pnand %p2234_p5, %p2534_p8  ;;  %p2243_p11 = por %p2242_p10, %p2241_p4 }
  0x94   : > { %p2237_p9 = pneg %p2236_p7 }
  0x96   : > { %p2244_p12 = pnand %p2243_p11, %p2237_p9 }
  0x98   : > { %2247 = shalt.err (!%p2244_p12)
}
  0x99   : > { %1822 = dma.hbm_to_vmem [thread:$0]  (!%p2518_p6), %s2892_s4, 32, %s305_s21, [#allocation9]  }
  0x9a   : > { %s2248_s1 = scalar_lea.hbm %s2894_s6, 32 }
  0x9b   : > { %p2249_p1 = scmp.ne.s32.totalorder %s2894_s6, %s2248_s1  ;;  %p2255_p0 = scmp.lt.u32.totalorder %s2248_s1, %s2894_s6 }
  0x9d   : > { %p2251_p3 = pnand %p2249_p1, %p2534_p8 }
  0x9f   : > { %p2252_p13 = pneg %p2251_p3 }
  0xa1   : > { %p2257_p2 = pnand %p2255_p0, %p2252_p13 }
  0xa3   : > { %2260 = shalt.err (!%p2257_p2)
}
  0xa4   : > { %s2261_s29 = scalar_lea.vmem %s329_s9, 32  ;;  %p2269_p4 = scmp.lt.s32.totalorder %s329_s9, %s329_s9 }
  0xa5   : > { %p2262_p5 = scmp.ne.s32.totalorder %s329_s9, %s2261_s29  ;;  %p2270_p10 = scmp.lt.s32.totalorder %s2261_s29, %s2261_s29 }
  0xa7   : > { %p2264_p7 = pnand %p2262_p5, %p2534_p8  ;;  %p2271_p11 = por %p2270_p10, %p2269_p4 }
  0xa9   : > { %p2265_p9 = pneg %p2264_p7 }
  0xab   : > { %p2272_p12 = pnand %p2271_p11, %p2265_p9 }
  0xad   : > { %2275 = shalt.err (!%p2272_p12)
}
  0xae   : > { %1828 = dma.hbm_to_vmem [thread:$0]  (!%p2518_p6), %s2894_s6, 32, %s329_s9, [#allocation12]  }
  0xaf   : > { %s2427_s18 = smov [#allocation16]   ;;  %s2276_s20 = scalar_lea.hbm %s2896_s8, 32 }
  0xb0   : > { %s352_s25 = sshll.u32 %s2427_s18, 4  ;;  %p2277_p1 = scmp.ne.s32.totalorder %s2896_s8, %s2276_s20  ;;  %s353_s25 = int_to_ptr.vmem [resolvable:$true] %s352_s25 }
  0xb1   : > { %p2283_p0 = scmp.lt.u32.totalorder %s2276_s20, %s2896_s8 }
  0xb2   : > { %p2279_p3 = pnand %p2277_p1, %p2534_p8 }
  0xb4   : > { %p2280_p13 = pneg %p2279_p3 }
  0xb6   : > { %p2285_p2 = pnand %p2283_p0, %p2280_p13 }
  0xb8   : > { %2288 = shalt.err (!%p2285_p2)
}
  0xb9   : > { %s2289_s9 = scalar_lea.vmem %s353_s25, 32  ;;  %p2297_p4 = scmp.lt.s32.totalorder %s353_s25, %s353_s25 }
  0xba   : > { %p2290_p5 = scmp.ne.s32.totalorder %s353_s25, %s2289_s9  ;;  %p2298_p10 = scmp.lt.s32.totalorder %s2289_s9, %s2289_s9 }
  0xbc   : > { %p2292_p7 = pnand %p2290_p5, %p2534_p8  ;;  %p2299_p11 = por %p2298_p10, %p2297_p4 }
  0xbe   : > { %p2293_p9 = pneg %p2292_p7 }
  0xc0   : > { %p2300_p12 = pnand %p2299_p11, %p2293_p9 }
  0xc2   : > { %2303 = shalt.err (!%p2300_p12)
}
  0xc3   : > { %1834 = dma.hbm_to_vmem [thread:$0]  (!%p2518_p6), %s2896_s8, 32, %s353_s25, [#allocation15]  }
  0xc4   : > { %s1628_s27 = sadd.s32 4294967294, %s2416_s12   ;;  %s2705_s19 = sadd.s32 1, %s2416_s12  }
  0xc5   : > { %s33_s29 = ssub.s32 %s2416_s12, %s2705_s19  ;;  %s36_s21 = sadd.s32 1, %s2412_s11 }
  0xc6   : > { %p34_p8 = scmp.eq.s32.totalorder %s33_s29, 0  ;;  %p43_p1 = scmp.ne.s32.totalorder %s2412_s11, %s2408_s10 }
  0xc7   : > { %p44_p3 = scmp.eq.s32.totalorder %s2416_s12, 0  ;;  %p49_p13 = scmp.ne.s32.totalorder %s2408_s10, %s2404_s30 }
  0xc8   : > { %s2716_s13 = scalar_select %p34_p8, %s2412_s11, %s36_s21  }
  0xc9   : > { %p2718_p0 = por %p44_p3, %p43_p1  ;;  %p2909_p2 = scmp.eq.s32.totalorder %s2502_s15, 0 }
  0xca   : > { %p241_p5 = scmp.eq.s32.totalorder %s2502_s15, 1  ;;  %p247_p7 = scmp.eq.s32.totalorder %s1628_s27, 1 }
  0xcb   : > { %p2724_p6 = por %p2909_p2, %p49_p13  ;;  %p1851_p9 = scmp.lt.s32.totalorder %s2416_s12, 2 }
  0xcc   : > { %s363_s14 = sand.u32 1, %s2412_s11   ;;  %p2731_p4 = por %p241_p5, %p43_p1 }
  0xcd   : > { %p2735_p10 = por %p247_p7, %p49_p13  ;;  %s1639_s23 = sshll.u32 %s363_s14, 3 }
  0xce   : > { %s2911_s17 = scalar_select %p2731_p4, 1, 0 }
  0xcf   : > { %s2912_s20 = scalar_select %p2735_p10, 1, 0 }
  0xd0   : > { %s1772_s1 = sshll.u32 %s2416_s12, 7  ;;  %s367_s26 = scalar_lea.vmem [#allocation2], %s1639_s23 }
  0xd1   : > { %s2743_s9 = scalar_lea.hbm %s2888_s0, %s1772_s1  ;;  %s375_s28 = sshll.u32 %s367_s26, 4  ;;  %s2745_s28 = int_to_ptr.vmem [resolvable:$true] %s375_s28 }
  0xd2   : > { %p2749_p11 = pnand %p1851_p9, %p2718_p0  ;;  %s364_s29 = scalar_lea.sflag [#allocation3], %s363_s14 }
  0xd3   : > { %s2304_s21 = scalar_lea.hbm %s2743_s9, 128  ;;  %s2309_s22 = scalar_lea.hbm %s2888_s0, 256 }
  0xd4   : > { %p2305_p12 = scmp.ne.s32.totalorder %s2743_s9, %s2304_s21  ;;  %p2306_p8 = pneg %p2749_p11 }
  0xd5   : > { %p2310_p13 = scmp.lt.u32.totalorder %s2743_s9, %s2888_s0  ;;  %p2311_p0 = scmp.lt.u32.totalorder %s2309_s22, %s2304_s21 }
  0xd6   : > { %p2307_p1 = pnand %p2306_p8, %p2305_p12  ;;  %p2313_p5 = scmp.lt.u32.totalorder %s2304_s21, %s2743_s9 }
  0xd7   : > { %p2312_p2 = por %p2311_p0, %p2310_p13 }
  0xd8   : > { %p2308_p3 = pneg %p2307_p1 }
  0xd9   : > { %p2314_p7 = por %p2313_p5, %p2312_p2 }
  0xdb   : > { %p2315_p9 = pnand %p2314_p7, %p2308_p3 }
  0xdd   : > { %2318 = shalt.err (!%p2315_p9)
}
  0xde   : > { %s2319_s14 = scalar_lea.vmem %s2745_s28, 128  ;;  %s2428_s26 = smov [#allocation2]  }
  0xdf   : > { %p2320_p12 = scmp.ne.s32.totalorder %s2745_s28, %s2319_s14  ;;  %s2324_s23 = sshll.u32 %s2428_s26, 4  ;;  %s2325_s23 = int_to_ptr.vmem [resolvable:$false] %s2324_s23 }
  0xe0   : > { %s2326_s1 = scalar_lea.vmem %s2325_s23, 256  ;;  %p2327_p4 = scmp.lt.s32.totalorder %s2745_s28, %s2325_s23 }
  0xe1   : > { %p2322_p1 = pnand %p2320_p12, %p2306_p8  ;;  %p2328_p13 = scmp.lt.s32.totalorder %s2326_s1, %s2319_s14 }
  0xe3   : > { %p2323_p10 = pneg %p2322_p1  ;;  %p2329_p0 = por %p2328_p13, %p2327_p4 }
  0xe5   : > { %p2330_p2 = pnand %p2329_p0, %p2323_p10 }
  0xe7   : > { %2333 = shalt.err (!%p2330_p2)
}
  0xe8   : > { %1838 = dma.hbm_to_vmem [thread:$0]  (!%p2749_p11), %s2743_s9, 128, %s2745_s28, %s364_s29  }
  0xe9   : > { %p2914_p3 = scmp.ne.s32.totalorder %s2904_s16, 0 }
  0xea   : > { %s2781_s21 = sand.u32 (!%p2914_p3), 1, %s2408_s10  }
  0xeb   : > { %384 = sbr.rel (%p2914_p3) target bundleno = 1065 (0x429), region = 56  ;;  %s1643_s22 = sshll.u32 (!%p2914_p3), %s2781_s21, 3 }
  0xec   : > { %s387_s18 = scalar_lea.sflag (!%p2914_p3), [#allocation3], %s2781_s21  ;;  %s2785_s24 = scalar_lea.vmem (!%p2914_p3), [#allocation2], %s1643_s22 }
  0xf2   : > { %2379 = dma.done.wait (%p2724_p6), %s387_s18, 128  }
  0xf3   : > { %2381 = vsyncadd (%p2724_p6), %s387_s18, 4294967168  ;;  %p2915_p4 = scmp.eq.s32.totalorder %s2502_s15, 0 }
  0xf5   : > { %2383 = dma.done.wait (%p2915_p4), [#allocation6], 2080   ;;  %p2916_p10 = pmov %p2915_p4 }
  0xf6   : > { %p2917_p11 = pmov %p2915_p4 }
  0xf7   : > { %2385 = vsyncadd (%p2916_p10), [#allocation6], 4294965216 }
  0xf8   : > { %2387 = dma.done.wait (%p2917_p11), [#allocation9], 4128   ;;  %p2918_p8 = pmov %p2915_p4 }
  0xf9   : > { %p2919_p5 = pmov %p2915_p4 }
  0xfa   : > { %2389 = vsyncadd (%p2918_p8), [#allocation9], 4294963168 }
  0xfb   : > { %2391 = dma.done.wait (%p2919_p5), [#allocation12], 4128   ;;  %p2920_p7 = pmov %p2915_p4 }
  0xfc   : > { %p2921_p6 = pmov %p2915_p4 }
  0xfd   : > { %2393 = vsyncadd (%p2920_p7), [#allocation12], 4294963168 }
  0xfe   : > { %2395 = dma.done.wait (%p2921_p6), [#allocation15], 4128   ;;  %p2922_p9 = pmov %p2915_p4 }
  0xff   : > { %v2429_v0 = vmov 0   ;;  %v1904_v1 = vld [vmem:[#allocation5 + $0x4] ss:$8 sps:$4 sm:$0xff]   ;;  %v1906_v2 = vld [vmem:[#allocation5] ss:$8 sps:$4 sm:$0xff]   ;;  %v477_v55 = vlaneseq  ;;  %vm857_vm0 = vcmask 1043456  }
 0x100   : > { %2397 = vsyncadd (%p2922_p9), [#allocation15], 4294963168  ;;  %599 = vmatprep.mubr.bf16.mxu0 %v2429_v0  ;;  %567 = vmatprep.subr.bf16.mxu0 %v1904_v1  ;;  %v1907_v3 = vld [vmem:[#allocation5 + $0x14] ss:$8 sps:$4 sm:$0xff]   ;;  %v1909_v4 = vld [vmem:[#allocation5 + $0x10] ss:$8 sps:$4 sm:$0xff]  }
 0x101   : > { %568 = vmatpush1.bf16.msra.mxu0 %v1906_v2  ;;  %v1910_v5 = vld [vmem:[#allocation5 + $0x24] ss:$8 sps:$4 sm:$0xff]   ;;  %v1912_v6 = vld [vmem:[#allocation5 + $0x20] ss:$8 sps:$4 sm:$0xff]   ;;  %v1913_v7 = vld [vmem:[#allocation5 + $0x34] ss:$8 sps:$4 sm:$0xff]  }
 0x102   : > { %569 = vmatprep.subr.bf16.mxu0 %v1907_v3  ;;  %v1915_v8 = vld [vmem:[#allocation5 + $0x30] ss:$8 sps:$4 sm:$0xff]   ;;  %v1916_v9 = vld [vmem:[#allocation5 + $0x44] ss:$8 sps:$4 sm:$0xff]   ;;  %v1918_v13 = vld [vmem:[#allocation5 + $0x40] ss:$8 sps:$4 sm:$0xff]  }
 0x103   : > { %v1928_v10 = vld [vmem:[#allocation8 + $0x4] ss:$8 sps:$4 sm:$0xff]   ;;  %v1930_v11 = vld [vmem:[#allocation8] ss:$8 sps:$4 sm:$0xff]   ;;  %v1931_v12 = vld [vmem:[#allocation8 + $0x14] ss:$8 sps:$4 sm:$0xff]  }
 0x104   : > { %816 = vmatprep.subr.bf16.mxu1 %v1928_v10  ;;  %v1933_v14 = vld [vmem:[#allocation8 + $0x10] ss:$8 sps:$4 sm:$0xff]   ;;  %v1934_v15 = vld [vmem:[#allocation8 + $0x24] ss:$8 sps:$4 sm:$0xff]   ;;  %v1936_v18 = vld [vmem:[#allocation8 + $0x20] ss:$8 sps:$4 sm:$0xff]  }
 0x105   : > { %570 = vmatpush1.bf16.msra.mxu0 %v1909_v4  ;;  %817 = vmatpush1.bf16.msra.mxu1 %v1930_v11  ;;  %v1919_v16 = vld [vmem:[#allocation5 + $0x54] ss:$8 sps:$4 sm:$0xff]   ;;  %v1921_v17 = vld [vmem:[#allocation5 + $0x50] ss:$8 sps:$4 sm:$0xff]   ;;  %v1922_v20 = vld [vmem:[#allocation5 + $0x64] ss:$8 sps:$4 sm:$0xff]  }
 0x106   : > { %571 = vmatprep.subr.bf16.mxu0 %v1910_v5  ;;  %818 = vmatprep.subr.bf16.mxu1 %v1931_v12  ;;  %v1937_v19 = vld [vmem:[#allocation8 + $0x34] ss:$8 sps:$4 sm:$0xff]   ;;  %v1939_v22 = vld [vmem:[#allocation8 + $0x30] ss:$8 sps:$4 sm:$0xff]   ;;  %v1940_v23 = vld [vmem:[#allocation8 + $0x44] ss:$8 sps:$4 sm:$0xff]  }
 0x107   : > { %v1924_v21 = vld [vmem:[#allocation5 + $0x60] ss:$8 sps:$4 sm:$0xff]   ;;  %v1925_v24 = vld [vmem:[#allocation5 + $0x74] ss:$8 sps:$4 sm:$0xff]   ;;  %v1927_v25 = vld [vmem:[#allocation5 + $0x70] ss:$8 sps:$4 sm:$0xff]  }
 0x108   : > { %v1942_v26 = vld [vmem:[#allocation8 + $0x40] ss:$8 sps:$4 sm:$0xff]   ;;  %v1943_v27 = vld [vmem:[#allocation8 + $0x54] ss:$8 sps:$4 sm:$0xff]   ;;  %v1945_v29 = vld [vmem:[#allocation8 + $0x50] ss:$8 sps:$4 sm:$0xff]  }
 0x109   : > { %572 = vmatpush1.bf16.msra.mxu0 %v1912_v6  ;;  %819 = vmatpush1.bf16.msra.mxu1 %v1933_v14  ;;  %v458_v28 = vld [vmem:[%s2785_s24] sm:$0x3]  ;;  %v1948_v31 = vld [vmem:[#allocation8 + $0x60] ss:$8 sps:$4 sm:$0xff]   ;;  %v1951_v33 = vld [vmem:[#allocation8 + $0x70] ss:$8 sps:$4 sm:$0xff]  }
 0x10a   : > { %573 = vmatprep.subr.bf16.mxu0 %v1913_v7  ;;  %820 = vmatprep.subr.bf16.mxu1 %v1934_v15  ;;  %v1946_v30 = vld [vmem:[#allocation8 + $0x64] ss:$8 sps:$4 sm:$0xff]   ;;  %v1949_v32 = vld [vmem:[#allocation8 + $0x74] ss:$8 sps:$4 sm:$0xff]   ;;  %v1954_v35 = vld [vmem:[#allocation8 + $0x80] ss:$8 sps:$4 sm:$0xff]  }
 0x10b   : > { %v1952_v34 = vld [vmem:[#allocation8 + $0x84] ss:$8 sps:$4 sm:$0xff]   ;;  %v1955_v36 = vld [vmem:[#allocation8 + $0x94] ss:$8 sps:$4 sm:$0xff]   ;;  %v1957_v37 = vld [vmem:[#allocation8 + $0x90] ss:$8 sps:$4 sm:$0xff]  }
 0x10c   : > { %v1958_v38 = vld [vmem:[#allocation8 + $0xa4] ss:$8 sps:$4 sm:$0xff]   ;;  %v1960_v39 = vld [vmem:[#allocation8 + $0xa0] ss:$8 sps:$4 sm:$0xff]   ;;  %v1961_v40 = vld [vmem:[#allocation8 + $0xb4] ss:$8 sps:$4 sm:$0xff]  }
 0x10d   : > { %574 = vmatpush1.bf16.msra.mxu0 %v1915_v8  ;;  %821 = vmatpush1.bf16.msra.mxu1 %v1936_v18  ;;  %v1963_v41 = vld [vmem:[#allocation8 + $0xb0] ss:$8 sps:$4 sm:$0xff]   ;;  %v1964_v42 = vld [vmem:[#allocation8 + $0xc4] ss:$8 sps:$4 sm:$0xff]   ;;  %v1966_v43 = vld [vmem:[#allocation8 + $0xc0] ss:$8 sps:$4 sm:$0xff]  }
 0x10e   : > { %575 = vmatprep.subr.bf16.mxu0 %v1916_v9  ;;  %822 = vmatprep.subr.bf16.mxu1 %v1937_v19  ;;  %v1967_v44 = vld [vmem:[#allocation8 + $0xd4] ss:$8 sps:$4 sm:$0xff]   ;;  %v1969_v45 = vld [vmem:[#allocation8 + $0xd0] ss:$8 sps:$4 sm:$0xff]   ;;  %v1970_v46 = vld [vmem:[#allocation8 + $0xe4] ss:$8 sps:$4 sm:$0xff]  }
 0x10f   : > { %v1972_v47 = vld [vmem:[#allocation8 + $0xe0] ss:$8 sps:$4 sm:$0xff]   ;;  %v1973_v48 = vld [vmem:[#allocation8 + $0xf4] ss:$8 sps:$4 sm:$0xff]   ;;  %v1975_v49 = vld [vmem:[#allocation8 + $0xf0] ss:$8 sps:$4 sm:$0xff]  }
 0x110   : > { %v1978_v50 = vld [vmem:[#allocation14 + $0x4] ss:$8 sps:$4 sm:$0xff]   ;;  %v2029_v53 = vld [vmem:[#allocation11 + $0x14] ss:$8 sps:$4 sm:$0xff]   ;;  %v478_v56 = vshrl.u32 %v477_v55, 7  ;;  %s1652_s16 = sshll.u32 %s2781_s21, 2 }
 0x111   : > { %576 = vmatpush1.bf16.msra.mxu0 %v1918_v13  ;;  %823 = vmatpush1.bf16.msra.mxu1 %v1939_v22  ;;  %v2024_v51 = vld [vmem:[#allocation11] ss:$8 sps:$4 sm:$0xff]   ;;  %v2026_v52 = vld [vmem:[#allocation11 + $0x4] ss:$8 sps:$4 sm:$0xff]   ;;  %v2027_v54 = vld [vmem:[#allocation11 + $0x10] ss:$8 sps:$4 sm:$0xff]  }
 0x112   : > { %577 = vmatprep.subr.bf16.mxu0 %v1919_v16  ;;  %824 = vmatprep.subr.bf16.mxu1 %v1940_v23  ;;  %v2808_v57 = vsub.s32 0, %v478_v56  ;;  %v475_v58 = vld [vmem:[#allocation7] sm:$0x3]  ;;  %v2810_v59 = vsub.s32 1, %v478_v56  ;;  %v1976_v7 = vld [vmem:[#allocation14] ss:$8 sps:$4 sm:$0xff]  }
 0x113   : > { %v1981_v9 = vld [vmem:[#allocation14 + $0x14] ss:$8 sps:$4 sm:$0xff]   ;;  %v1979_v11 = vld [vmem:[#allocation14 + $0x10] ss:$8 sps:$4 sm:$0xff]   ;;  %v1984_v12 = vld [vmem:[#allocation14 + $0x24] ss:$8 sps:$4 sm:$0xff]  }
 0x114   : > { %v480_v60 = vrot.slane %v475_v58, %v2808_v57  ;;  %v484_v61 = vrot.slane %v475_v58, %v2810_v59  ;;  %v1982_v13 = vld [vmem:[#allocation14 + $0x20] ss:$8 sps:$4 sm:$0xff]   ;;  %v1987_v14 = vld [vmem:[#allocation14 + $0x34] ss:$8 sps:$4 sm:$0xff]   ;;  %v1985_v15 = vld [vmem:[#allocation14 + $0x30] ss:$8 sps:$4 sm:$0xff]  }
 0x115   : > { %578 = vmatpush1.bf16.msra.mxu0 %v1921_v17  ;;  %825 = vmatpush1.bf16.msra.mxu1 %v1942_v26  ;;  %v1990_v16 = vld [vmem:[#allocation14 + $0x44] ss:$8 sps:$4 sm:$0xff]   ;;  %v1988_v17 = vld [vmem:[#allocation14 + $0x40] ss:$8 sps:$4 sm:$0xff]   ;;  %v1993_v18 = vld [vmem:[#allocation14 + $0x54] ss:$8 sps:$4 sm:$0xff]  }
 0x116   : > { %579 = vmatprep.subr.bf16.mxu0 %v1922_v20  ;;  %826 = vmatprep.subr.bf16.mxu1 %v1943_v27  ;;  %v1991_v19 = vld [vmem:[#allocation14 + $0x50] ss:$8 sps:$4 sm:$0xff]   ;;  %v1996_v20 = vld [vmem:[#allocation14 + $0x64] ss:$8 sps:$4 sm:$0xff]   ;;  %v1999_v22 = vld [vmem:[#allocation14 + $0x74] ss:$8 sps:$4 sm:$0xff]  }
 0x117   : > { %v1997_v23 = vld [vmem:[#allocation14 + $0x70] ss:$8 sps:$4 sm:$0xff]   ;;  %v2005_v26 = vld [vmem:[#allocation14 + $0x94] ss:$8 sps:$4 sm:$0xff]   ;;  %v2056_v58 = vld [vmem:[#allocation11 + $0xa4] ss:$8 sps:$4 sm:$0xff]  }
 0x118   : > { %v2003_v27 = vld [vmem:[#allocation14 + $0x90] ss:$8 sps:$4 sm:$0xff]   ;;  %s1773_s25 = sshll.u32 %s2502_s15, 6  ;;  %s456_s9 = scalar_lea.vmem [#allocation17], %s1652_s16 }
 0x119   : > { %580 = vmatpush1.bf16.msra.mxu0 %v1924_v21  ;;  %827 = vmatpush1.bf16.msra.mxu1 %v1945_v29  ;;  %v1994_v21 = vld [vmem:[#allocation14 + $0x60] ss:$8 sps:$4 sm:$0xff]   ;;  %v2053_v55 = vld [vmem:[#allocation11 + $0x94] ss:$8 sps:$4 sm:$0xff]   ;;  %v2051_v56 = vld [vmem:[#allocation11 + $0x90] ss:$8 sps:$4 sm:$0xff]  }
 0x11a   : > { %581 = vmatprep.subr.bf16.mxu0 %v1925_v24  ;;  %828 = vmatprep.subr.bf16.mxu1 %v1946_v30  ;;  %v2002_v24 = vld [vmem:[#allocation14 + $0x84] ss:$8 sps:$4 sm:$0xff]   ;;  %v2006_v29 = vld [vmem:[#allocation14 + $0xa0] ss:$8 sps:$4 sm:$0xff]   ;;  %v2011_v30 = vld [vmem:[#allocation14 + $0xb4] ss:$8 sps:$4 sm:$0xff]  }
 0x11b   : > { %s1482_s28 = sshll.u32 %s456_s9, 4  ;;  %s2923_s14 = sld [smem:[#allocation25_spill]]  ;;  %s2846_s28 = int_to_ptr.vmem [resolvable:$true] %s1482_s28 }
 0x11c   : > { %s1468_s23 = scalar_lea.sflag [#allocation4], %s2781_s21  ;;  %s2334_s1 = scalar_lea.vmem %s2846_s28, 64 }
 0x11d   : > { %582 = vmatpush1.bf16.msra.mxu0 %v1927_v25  ;;  %829 = vmatpush1.bf16.msra.mxu1 %v1948_v31  ;;  %v2000_v25 = vld [vmem:[#allocation14 + $0x80] ss:$8 sps:$4 sm:$0xff]   ;;  %v2009_v31 = vld [vmem:[#allocation14 + $0xb0] ss:$8 sps:$4 sm:$0xff]   ;;  %p2335_p12 = scmp.ne.s32.totalorder %s2846_s28, %s2334_s1  ;;  %p2924_p1 = scmp.ne.s32.totalorder %s2911_s17, 0 }
 0x11e   : > { %830 = vmatprep.subr.bf16.mxu1 %v1949_v32  ;;  %1113 = vmatprep.subr.bf16.mxu0 %v2026_v52  ;;  %v2014_v32 = vld [vmem:[#allocation14 + $0xc4] ss:$8 sps:$4 sm:$0xff]   ;;  %s2430_s15 = smov [#allocation17]  }
 0x11f   : > { %v2045_v52 = vld [vmem:[#allocation11 + $0x70] ss:$8 sps:$4 sm:$0xff]   ;;  %p2336_p13 = pnand %p2335_p12, %p2924_p1  ;;  %s2338_s22 = sshll.u32 %s2430_s15, 4  ;;  %s2339_s22 = int_to_ptr.vmem [resolvable:$false] %s2338_s22 }
 0x120   : > { %600 = vmatmul.mubr.bf16.vlgmr.msra.gmra.mrb[0].mxu0 %v458_v28  ;;  %v2008_v28 = vld [vmem:[#allocation14 + $0xa4] ss:$8 sps:$4 sm:$0xff]   ;;  %s2340_s18 = scalar_lea.vmem %s2339_s22, 128  ;;  %p2341_p2 = scmp.lt.s32.totalorder %s2846_s28, %s2339_s22 }
 0x121   : > { %831 = vmatpush1.bf16.msra.mxu1 %v1951_v33  ;;  %1114 = vmatpush1.bf16.msra.mxu0 %v2024_v51  ;;  %v2012_v33 = vld [vmem:[#allocation14 + $0xc0] ss:$8 sps:$4 sm:$0xff]   ;;  %v2047_v51 = vld [vmem:[#allocation11 + $0x74] ss:$8 sps:$4 sm:$0xff]   ;;  %s2844_s26 = scalar_lea.hbm %s2923_s14, %s1773_s25  ;;  %p2337_p0 = pneg %p2336_p13 }
 0x122   : > { %832 = vmatprep.subr.bf16.mxu1 %v1952_v34  ;;  %1115 = vmatprep.subr.bf16.mxu0 %v2029_v53  ;;  %v2017_v34 = vld [vmem:[#allocation14 + $0xd4] ss:$8 sps:$4 sm:$0xff]   ;;  %v2050_v53 = vld [vmem:[#allocation11 + $0x84] ss:$8 sps:$4 sm:$0xff]   ;;  %p2342_p3 = scmp.lt.s32.totalorder %s2340_s18, %s2334_s1 }
 0x124   : > { %p2343_p4 = por %p2342_p3, %p2341_p2 }
 0x125   : > { %833 = vmatpush1.bf16.msra.mxu1 %v1954_v35  ;;  %1116 = vmatpush1.bf16.msra.mxu0 %v2027_v54  ;;  %v2015_v35 = vld [vmem:[#allocation14 + $0xd0] ss:$8 sps:$4 sm:$0xff]   ;;  %v2048_v54 = vld [vmem:[#allocation11 + $0x80] ss:$8 sps:$4 sm:$0xff]  }
 0x126   : > { %834 = vmatprep.subr.bf16.mxu1 %v1955_v36  ;;  %v2020_v36 = vld [vmem:[#allocation14 + $0xe4] ss:$8 sps:$4 sm:$0xff]   ;;  %p2344_p10 = pnand %p2343_p4, %p2337_p0 }
 0x129   : > { %835 = vmatpush1.bf16.msra.mxu1 %v1957_v37  ;;  %v2018_v37 = vld [vmem:[#allocation14 + $0xe0] ss:$8 sps:$4 sm:$0xff]  }
 0x12a   : > { %836 = vmatprep.subr.bf16.mxu1 %v1958_v38  ;;  %v2023_v38 = vld [vmem:[#allocation14 + $0xf4] ss:$8 sps:$4 sm:$0xff]  }
 0x12d   : > { %837 = vmatpush1.bf16.msra.mxu1 %v1960_v39  ;;  %v2021_v39 = vld [vmem:[#allocation14 + $0xf0] ss:$8 sps:$4 sm:$0xff]  }
 0x12e   : > { %838 = vmatprep.subr.bf16.mxu1 %v1961_v40 }
 0x131   : > { %839 = vmatpush1.bf16.msra.mxu1 %v1963_v41  ;;  %v2032_v41 = vld [vmem:[#allocation11 + $0x24] ss:$8 sps:$4 sm:$0xff]  }
 0x132   : > { %840 = vmatprep.subr.bf16.mxu1 %v1964_v42  ;;  %v2030_v42 = vld [vmem:[#allocation11 + $0x20] ss:$8 sps:$4 sm:$0xff]   ;;  %1117 = vmatprep.subr.bf16.mxu0 %v2032_v41 }
 0x133   : > { %1118 = vmatpush1.bf16.msra.mxu0 %v2030_v42 }
 0x135   : > { %841 = vmatpush1.bf16.msra.mxu1 %v1966_v43  ;;  %v2035_v43 = vld [vmem:[#allocation11 + $0x34] ss:$8 sps:$4 sm:$0xff]  }
 0x136   : > { %842 = vmatprep.subr.bf16.mxu1 %v1967_v44  ;;  %v2033_v44 = vld [vmem:[#allocation11 + $0x30] ss:$8 sps:$4 sm:$0xff]   ;;  %1119 = vmatprep.subr.bf16.mxu0 %v2035_v43 }
 0x137   : > { %1120 = vmatpush1.bf16.msra.mxu0 %v2033_v44 }
 0x139   : > { %843 = vmatpush1.bf16.msra.mxu1 %v1969_v45  ;;  %v2038_v45 = vld [vmem:[#allocation11 + $0x44] ss:$8 sps:$4 sm:$0xff]  }
 0x13a   : > { %844 = vmatprep.subr.bf16.mxu1 %v1970_v46  ;;  %v2036_v46 = vld [vmem:[#allocation11 + $0x40] ss:$8 sps:$4 sm:$0xff]   ;;  %1121 = vmatprep.subr.bf16.mxu0 %v2038_v45 }
 0x13b   : > { %1122 = vmatpush1.bf16.msra.mxu0 %v2036_v46 }
 0x13d   : > { %845 = vmatpush1.bf16.msra.mxu1 %v1972_v47  ;;  %v2041_v47 = vld [vmem:[#allocation11 + $0x54] ss:$8 sps:$4 sm:$0xff]  }
 0x13e   : > { %846 = vmatprep.subr.bf16.mxu1 %v1973_v48  ;;  %v2039_v48 = vld [vmem:[#allocation11 + $0x50] ss:$8 sps:$4 sm:$0xff]   ;;  %1123 = vmatprep.subr.bf16.mxu0 %v2041_v47 }
 0x13f   : > { %1124 = vmatpush1.bf16.msra.mxu0 %v2039_v48 }
 0x141   : > { %847 = vmatpush1.bf16.msra.mxu1 %v1975_v49  ;;  %v2044_v49 = vld [vmem:[#allocation11 + $0x64] ss:$8 sps:$4 sm:$0xff]  }
 0x142   : > { %1408 = vmatprep.subr.bf16.mxu1 %v1978_v50  ;;  %v2042_v50 = vld [vmem:[#allocation11 + $0x60] ss:$8 sps:$4 sm:$0xff]   ;;  %1125 = vmatprep.subr.bf16.mxu0 %v2044_v49 }
 0x143   : > { %1126 = vmatpush1.bf16.msra.mxu0 %v2042_v50 }
 0x144   : > { %1127 = vmatprep.subr.bf16.mxu0 %v2047_v51 }
 0x147   : > { %1128 = vmatpush1.bf16.msra.mxu0 %v2045_v52 }
 0x148   : > { %1129 = vmatprep.subr.bf16.mxu0 %v2050_v53 }
 0x14b   : > { %1130 = vmatpush1.bf16.msra.mxu0 %v2048_v54 }
 0x14c   : > { %1131 = vmatprep.subr.bf16.mxu0 %v2053_v55 }
 0x14f   : > { %1132 = vmatpush1.bf16.msra.mxu0 %v2051_v56 }
 0x150   : > { %1133 = vmatprep.subr.bf16.mxu0 %v2056_v58 }
 0x1f3   : > { %v601_v62 = vpop.f32.mrb[0].mxu0 }
 0x1f4   : > { %v2814_v63 = vadd.f32 %v601_v62, %v480_v60  ;;  %v603_v0 = vpop.f32.mrb[1].mxu0  ;;  %v2054_v60 = vld [vmem:[#allocation11 + $0xa0] ss:$8 sps:$4 sm:$0xff]   ;;  %v2057_v62 = vld [vmem:[#allocation11 + $0xb0] ss:$8 sps:$4 sm:$0xff]  }
 0x1f5   : > { %v604_v1 = vadd.f32 %v603_v0, %v484_v61  ;;  %v605_v2 = vpop.f32.mrb[2].mxu0  ;;  %1134 = vmatpush1.bf16.msra.mxu0 %v2054_v60  ;;  %v2059_v61 = vld [vmem:[#allocation11 + $0xb4] ss:$8 sps:$4 sm:$0xff]   ;;  %v2060_v0 = vld [vmem:[#allocation11 + $0xc0] ss:$8 sps:$4 sm:$0xff]  }
 0x1f6   : > { %v608_v3 = vmax.f32 %v2814_v63, 0.0  ;;  %v606_v4 = vpop.f32.mrb[3].mxu0  ;;  %v1202_v40 = vpack.c.bf16 %v2814_v63, %v2814_v63  ;;  %1135 = vmatprep.subr.bf16.mxu0 %v2059_v61  ;;  %v2062_v63 = vld [vmem:[#allocation11 + $0xc4] ss:$8 sps:$4 sm:$0xff]   ;;  %v2063_v2 = vld [vmem:[#allocation11 + $0xd0] ss:$8 sps:$4 sm:$0xff]  }
 0x1f7   : > { %v609_v5 = vmax.f32 %v604_v1, 0.0  ;;  %v1203_v10 = vpack.c.bf16 %v604_v1, %v604_v1  ;;  %v2065_v1 = vld [vmem:[#allocation11 + $0xd4] ss:$8 sps:$4 sm:$0xff]   ;;  %v2066_v4 = vld [vmem:[#allocation11 + $0xe0] ss:$8 sps:$4 sm:$0xff]  }
 0x1f8   : > { %v610_v8 = vpack.c.bf16 %v608_v3, %v608_v3  ;;  %v2068_v3 = vld [vmem:[#allocation11 + $0xe4] ss:$8 sps:$4 sm:$0xff]  }
 0x1f9   : > { %v611_v6 = vpack.c.bf16 %v609_v5, %v609_v5  ;;  %1136 = vmatpush1.bf16.msra.mxu0 %v2057_v62  ;;  %v2071_v5 = vld [vmem:[#allocation11 + $0xf4] ss:$8 sps:$4 sm:$0xff]  }
 0x1fa   : > { %1137 = vmatprep.subr.bf16.mxu0 %v2062_v63 }
 0x1fb   : > { %848 = vmatprep.mubr.bf16.mxu1 %v611_v6  ;;  %v2069_v6 = vld [vmem:[#allocation11 + $0xf0] ss:$8 sps:$4 sm:$0xff]  }
 0x1fc   : > { %849 = vmatmul.mubr.bf16.vlgmr.msra.gmra.mrb[0].mxu1 %v610_v8 }
 0x1fd   : > { %1409 = vmatpush1.bf16.msra.mxu1 %v1976_v7  ;;  %1440 = vmatprep.mubr.bf16.mxu1 %v1203_v10  ;;  %v644_v7 = vld [vmem:[#allocation10] sm:$0x3] }
 0x1fe   : > { %1410 = vmatprep.subr.bf16.mxu1 %v1981_v9  ;;  %1138 = vmatpush1.bf16.msra.mxu0 %v2060_v0  ;;  %v649_v8 = vrot.slane %v644_v7, %v2808_v57  ;;  %v653_v9 = vrot.slane %v644_v7, %v2810_v59 }
 0x1ff   : > { %1139 = vmatprep.subr.bf16.mxu0 %v2065_v1 }
 0x201   : > { %1411 = vmatpush1.bf16.msra.mxu1 %v1979_v11 }
 0x202   : > { %1412 = vmatprep.subr.bf16.mxu1 %v1984_v12  ;;  %1140 = vmatpush1.bf16.msra.mxu0 %v2063_v2 }
 0x203   : > { %1141 = vmatprep.subr.bf16.mxu0 %v2068_v3 }
 0x205   : > { %1413 = vmatpush1.bf16.msra.mxu1 %v1982_v13 }
 0x206   : > { %1414 = vmatprep.subr.bf16.mxu1 %v1987_v14  ;;  %1142 = vmatpush1.bf16.msra.mxu0 %v2066_v4 }
 0x207   : > { %1143 = vmatprep.subr.bf16.mxu0 %v2071_v5 }
 0x209   : > { %1415 = vmatpush1.bf16.msra.mxu1 %v1985_v15 }
 0x20a   : > { %1416 = vmatprep.subr.bf16.mxu1 %v1990_v16  ;;  %1144 = vmatpush1.bf16.msra.mxu0 %v2069_v6  ;;  %v941_v6 = vld [vmem:[#allocation13] sm:$0x3] }
 0x20b   : > { %v946_v7 = vrot.slane %v941_v6, %v2808_v57 }
 0x20d   : > { %1417 = vmatpush1.bf16.msra.mxu1 %v1988_v17 }
 0x20e   : > { %1418 = vmatprep.subr.bf16.mxu1 %v1993_v18 }
 0x211   : > { %1419 = vmatpush1.bf16.msra.mxu1 %v1991_v19 }
 0x212   : > { %1420 = vmatprep.subr.bf16.mxu1 %v1996_v20 }
 0x215   : > { %1421 = vmatpush1.bf16.msra.mxu1 %v1994_v21 }
 0x216   : > { %1422 = vmatprep.subr.bf16.mxu1 %v1999_v22 }
 0x219   : > { %1423 = vmatpush1.bf16.msra.mxu1 %v1997_v23 }
 0x21a   : > { %1424 = vmatprep.subr.bf16.mxu1 %v2002_v24 }
 0x21d   : > { %1425 = vmatpush1.bf16.msra.mxu1 %v2000_v25 }
 0x21e   : > { %1426 = vmatprep.subr.bf16.mxu1 %v2005_v26 }
 0x221   : > { %1427 = vmatpush1.bf16.msra.mxu1 %v2003_v27 }
 0x222   : > { %1428 = vmatprep.subr.bf16.mxu1 %v2008_v28 }
 0x225   : > { %1429 = vmatpush1.bf16.msra.mxu1 %v2006_v29 }
 0x226   : > { %1430 = vmatprep.subr.bf16.mxu1 %v2011_v30 }
 0x229   : > { %1431 = vmatpush1.bf16.msra.mxu1 %v2009_v31 }
 0x22a   : > { %1432 = vmatprep.subr.bf16.mxu1 %v2014_v32 }
 0x22d   : > { %1433 = vmatpush1.bf16.msra.mxu1 %v2012_v33 }
 0x22e   : > { %1434 = vmatprep.subr.bf16.mxu1 %v2017_v34 }
 0x231   : > { %1435 = vmatpush1.bf16.msra.mxu1 %v2015_v35 }
 0x232   : > { %1436 = vmatprep.subr.bf16.mxu1 %v2020_v36 }
 0x235   : > { %1437 = vmatpush1.bf16.msra.mxu1 %v2018_v37 }
 0x236   : > { %1438 = vmatprep.subr.bf16.mxu1 %v2023_v38 }
 0x239   : > { %1439 = vmatpush1.bf16.msra.mxu1 %v2021_v39 }
 0x23c   : > { %1441 = vmatmul.mubr.bf16.vlgmr.msra.gmra.mrb[4].mxu1 %v1202_v40 }
 0x2cf   : > { %v850_v10 = vpop.f32.mrb[0].mxu1 }
 0x2d0   : > { %v851_v11 = vadd.f32 %v850_v10, %v649_v8  ;;  %v852_v12 = vpop.f32.mrb[1].mxu1  ;;  %v950_v8 = vrot.slane %v941_v6, %v2810_v59 }
 0x2d1   : > { %v853_v13 = vadd.f32 %v852_v12, %v653_v9  ;;  %v854_v14 = vpop.f32.mrb[2].mxu1 }
 0x2d2   : > { %v858_v15 = vsel %vm857_vm0, %v851_v11, 0.0  ;;  %v855_v16 = vpop.f32.mrb[3].mxu1 }
 0x2d3   : > { %v859_v17 = vrot.slane %v858_v15, 4  ;;  %v865_v18 = vsel %vm857_vm0, %v853_v13, 0.0 }
 0x2d4   : > { %v866_v19 = vrot.slane %v865_v18, 4 }
 0x2d5   : > { %v860_v20 = vadd.f32 %v859_v17, %v858_v15 }
 0x2d6   : > { %v867_v21 = vadd.f32 %v866_v19, %v865_v18 }
 0x2d7   : > { %v861_v22 = vrot.slane %v860_v20, 2 }
 0x2d8   : > { %v868_v23 = vrot.slane %v867_v21, 2 }
 0x2d9   : > { %v862_v24 = vadd.f32 %v861_v22, %v860_v20 }
 0x2da   : > { %v869_v25 = vadd.f32 %v868_v23, %v867_v21 }
 0x2db   : > { %v863_v26 = vrot.slane %v862_v24, 1 }
 0x2dc   : > { %v870_v27 = vrot.slane %v869_v25, 1 }
 0x2dd   : > { %v864_v28 = vadd.f32 %v863_v26, %v862_v24 }
 0x2de   : > { %v871_v29 = vadd.f32 %v870_v27, %v869_v25 }
 0x2df   : > { %v873_v30 = vmul.f32 0.25, %v864_v28 }
 0x2e0   : > { %v874_v31 = vmul.f32 0.25, %v871_v29 }
 0x2e1   : > { %v875_v32 = vsub.f32 %v851_v11, %v873_v30 }
 0x2e2   : > { %v876_v33 = vsub.f32 %v853_v13, %v874_v31 }
 0x2e3   : > { %v877_v34 = vmul.f32 %v875_v32, %v875_v32 }
 0x2e4   : > { %v878_v35 = vmul.f32 %v876_v33, %v876_v33 }
 0x2e5   : > { %v879_v36 = vsel %vm857_vm0, %v877_v34, 0.0 }
 0x2e6   : > { %v880_v37 = vrot.slane %v879_v36, 4  ;;  %v886_v38 = vsel %vm857_vm0, %v878_v35, 0.0 }
 0x2e7   : > { %v887_v39 = vrot.slane %v886_v38, 4 }
 0x2e8   : > { %v881_v40 = vadd.f32 %v880_v37, %v879_v36 }
 0x2e9   : > { %v888_v41 = vadd.f32 %v887_v39, %v886_v38 }
 0x2ea   : > { %v882_v42 = vrot.slane %v881_v40, 2 }
 0x2eb   : > { %v889_v43 = vrot.slane %v888_v41, 2 }
 0x2ec   : > { %v883_v44 = vadd.f32 %v882_v42, %v881_v40 }
 0x2ed   : > { %v890_v45 = vadd.f32 %v889_v43, %v888_v41 }
 0x2ee   : > { %v884_v46 = vrot.slane %v883_v44, 1 }
 0x2ef   : > { %v891_v47 = vrot.slane %v890_v45, 1 }
 0x2f0   : > { %v885_v48 = vadd.f32 %v884_v46, %v883_v44 }
 0x2f1   : > { %v892_v49 = vadd.f32 %v891_v47, %v890_v45 }
 0x2f2   : > { %v893_v50 = vmul.f32 0.25, %v885_v48 }
 0x2f3   : > { %v894_v51 = vmul.f32 0.25, %v892_v49 }
 0x2f4   : > { %v895_v52 = vadd.f32 1e-05, %v893_v50 }
 0x2f5   : > { %v896_v53 = vadd.f32 1e-05, %v894_v51 }
 0x2f6   : > { %2072 = vrsqrt.f32 %v895_v52 }
 0x2f7   : > { %2074 = vrsqrt.f32 %v896_v53  ;;  %v1236_v53 = vld [vmem:[#allocation16] sm:$0x3] }
 0x300   : > { %v2073_v54 = vpop.eup %2072 }
 0x301   : > { %v2075_v55 = vpop.eup %2074  ;;  %v899_v56 = vmul.f32 %v2073_v54, %v875_v32 }
 0x302   : > { %v900_v58 = vmul.f32 %v2075_v55, %v876_v33  ;;  %v1241_v55 = vrot.slane %v1236_v53, %v2808_v57 }
 0x303   : > { %vm901_vm1 = vcmp.ge.f32.partialorder %v899_v56, 0.0  ;;  %v903_v60 = vmul.f32 0.4, %v899_v56 }
 0x304   : > { %vm902_vm2 = vcmp.ge.f32.partialorder %v900_v58, 0.0  ;;  %v904_v61 = vmul.f32 0.4, %v900_v58 }
 0x305   : > { %v905_v62 = vsel %vm901_vm1, %v899_v56, %v903_v60 }
 0x306   : > { %v906_v63 = vsel %vm902_vm2, %v900_v58, %v904_v61  ;;  %v907_v1 = vpack.c.bf16 %v905_v62, %v905_v62  ;;  %v1245_v58 = vrot.slane %v1236_v53, %v2810_v59 }
 0x307   : > { %v908_v0 = vpack.c.bf16 %v906_v63, %v906_v63 }
 0x309   : > { %1145 = vmatprep.mubr.bf16.mxu0 %v908_v0 }
 0x30a   : > { %1146 = vmatmul.mubr.bf16.vlgmr.msra.gmra.mrb[4].mxu0 %v907_v1 }
 0x30f   : > { %v2825_v2 = vpop.f32.mrb[4].mxu1 }
 0x310   : > { %v2827_v3 = vpop.f32.mrb[5].mxu1  ;;  %v1443_v63 = vadd.f32 %v2825_v2, %v1241_v55 }
 0x311   : > { %v1446_v4 = vpop.f32.mrb[6].mxu1  ;;  %v1445_v1 = vadd.f32 %v2827_v3, %v1245_v58 }
 0x312   : > { %v1447_v5 = vpop.f32.mrb[7].mxu1 }
 0x3dd   : > { %v1147_v9 = vpop.f32.mrb[4].mxu0 }
 0x3de   : > { %v1148_v10 = vadd.f32 %v1147_v9, %v946_v7  ;;  %v1149_v11 = vpop.f32.mrb[5].mxu0 }
 0x3df   : > { %v1150_v12 = vadd.f32 %v1149_v11, %v950_v8  ;;  %v1151_v13 = vpop.f32.mrb[6].mxu0 }
 0x3e0   : > { %v1154_v14 = vsel %vm857_vm0, %v1148_v10, 0.0  ;;  %v1152_v15 = vpop.f32.mrb[7].mxu0 }
 0x3e1   : > { %v1155_v16 = vrot.slane %v1154_v14, 4  ;;  %v1161_v17 = vsel %vm857_vm0, %v1150_v12, 0.0 }
 0x3e2   : > { %v1162_v18 = vrot.slane %v1161_v17, 4 }
 0x3e3   : > { %v1156_v19 = vadd.f32 %v1155_v16, %v1154_v14 }
 0x3e4   : > { %v1163_v20 = vadd.f32 %v1162_v18, %v1161_v17 }
 0x3e5   : > { %v1157_v21 = vrot.slane %v1156_v19, 2 }
 0x3e6   : > { %v1164_v22 = vrot.slane %v1163_v20, 2 }
 0x3e7   : > { %v1158_v23 = vadd.f32 %v1157_v21, %v1156_v19 }
 0x3e8   : > { %v1165_v24 = vadd.f32 %v1164_v22, %v1163_v20 }
 0x3e9   : > { %v1159_v25 = vrot.slane %v1158_v23, 1 }
 0x3ea   : > { %v1166_v26 = vrot.slane %v1165_v24, 1 }
 0x3eb   : > { %v1160_v27 = vadd.f32 %v1159_v25, %v1158_v23 }
 0x3ec   : > { %v1167_v28 = vadd.f32 %v1166_v26, %v1165_v24 }
 0x3ed   : > { %v1168_v29 = vmul.f32 0.25, %v1160_v27 }
 0x3ee   : > { %v1169_v30 = vmul.f32 0.25, %v1167_v28 }
 0x3ef   : > { %v1170_v31 = vsub.f32 %v1148_v10, %v1168_v29 }
 0x3f0   : > { %v1171_v32 = vsub.f32 %v1150_v12, %v1169_v30 }
 0x3f1   : > { %v1172_v33 = vmul.f32 %v1170_v31, %v1170_v31 }
 0x3f2   : > { %v1173_v34 = vmul.f32 %v1171_v32, %v1171_v32 }
 0x3f3   : > { %v1174_v35 = vsel %vm857_vm0, %v1172_v33, 0.0 }
 0x3f4   : > { %v1175_v36 = vrot.slane %v1174_v35, 4  ;;  %v1181_v37 = vsel %vm857_vm0, %v1173_v34, 0.0 }
 0x3f5   : > { %v1182_v38 = vrot.slane %v1181_v37, 4 }
 0x3f6   : > { %v1176_v39 = vadd.f32 %v1175_v36, %v1174_v35 }
 0x3f7   : > { %v1183_v40 = vadd.f32 %v1182_v38, %v1181_v37 }
 0x3f8   : > { %v1177_v41 = vrot.slane %v1176_v39, 2 }
 0x3f9   : > { %v1184_v42 = vrot.slane %v1183_v40, 2 }
 0x3fa   : > { %v1178_v43 = vadd.f32 %v1177_v41, %v1176_v39 }
 0x3fb   : > { %v1185_v44 = vadd.f32 %v1184_v42, %v1183_v40 }
 0x3fc   : > { %v1179_v45 = vrot.slane %v1178_v43, 1 }
 0x3fd   : > { %v1186_v46 = vrot.slane %v1185_v44, 1 }
 0x3fe   : > { %v1180_v47 = vadd.f32 %v1179_v45, %v1178_v43 }
 0x3ff   : > { %v1187_v48 = vadd.f32 %v1186_v46, %v1185_v44 }
 0x400   : > { %v1188_v49 = vmul.f32 0.25, %v1180_v47 }
 0x401   : > { %v1189_v50 = vmul.f32 0.25, %v1187_v48 }
 0x402   : > { %v1190_v51 = vadd.f32 1e-05, %v1188_v49 }
 0x403   : > { %v1191_v52 = vadd.f32 1e-05, %v1189_v50 }
 0x404   : > { %2076 = vrsqrt.f32 %v1190_v51 }
 0x405   : > { %2078 = vrsqrt.f32 %v1191_v52 }
 0x40e   : > { %v2077_v54 = vpop.eup %2076 }
 0x40f   : > { %v2079_v56 = vpop.eup %2078  ;;  %v1194_v60 = vmul.f32 %v2077_v54, %v1170_v31 }
 0x410   : > { %v1195_v61 = vmul.f32 %v2079_v56, %v1171_v32 }
 0x411   : > { %vm1196_vm3 = vcmp.ge.f32.partialorder %v1194_v60, 0.0  ;;  %v1198_v62 = vmul.f32 0.4, %v1194_v60 }
 0x412   : > { %vm1197_vm4 = vcmp.ge.f32.partialorder %v1195_v61, 0.0  ;;  %v1199_v0 = vmul.f32 0.4, %v1195_v61 }
 0x413   : > { %v1200_v4 = vsel %vm1196_vm3, %v1194_v60, %v1198_v62 }
 0x414   : > { %v1449_v5 = vadd.f32 %v1443_v63, %v1200_v4  ;;  %v1201_v57 = vsel %vm1197_vm4, %v1195_v61, %v1199_v0 }
 0x415   : > { %v1450_v6 = vadd.f32 %v1445_v1, %v1201_v57 }
 0x416   : > { %v1451_v7 = vmax.f32 %v1449_v5, 0.0 }
 0x417   : > { %v1452_v59 = vmax.f32 %v1450_v6, 0.0 }
 0x419   : > { %v1765_v8 = vpack.c.bf16 %v1452_v59, %v1451_v7 }
 0x41b   : > { %1766 = vst.sshfl [vmem:[%s456_s9] sm:$0x33 pattern:$0x76325410] %v1765_v8 }
 0x41c   : > { %2347 = shalt.err (!%p2344_p10)
}
 0x41d   : > { %s2348_s21 = scalar_lea.hbm %s2844_s26, 64  ;;  %s2352_s25 = scalar_lea.hbm %s2923_s14, 128 }
 0x41e   : > { %p2349_p11 = scmp.ne.s32.totalorder %s2844_s26, %s2348_s21  ;;  %p2353_p7 = scmp.lt.u32.totalorder %s2844_s26, %s2923_s14 }
 0x41f   : > { %p2354_p6 = scmp.lt.u32.totalorder %s2352_s25, %s2348_s21  ;;  %p2356_p12 = scmp.lt.u32.totalorder %s2348_s21, %s2844_s26 }
 0x420   : > { %p2350_p8 = pnand %p2349_p11, %p2924_p1 }
 0x421   : > { %p2355_p9 = por %p2354_p6, %p2353_p7 }
 0x422   : > { %p2351_p5 = pneg %p2350_p8 }
 0x423   : > { %p2357_p13 = por %p2356_p12, %p2355_p9 }
 0x425   : > { %p2358_p0 = pnand %p2357_p13, %p2351_p5 }
 0x427   : > { %2361 = shalt.err (!%p2358_p0)
}
 0x428   : > { %1808 = dma.vmem_to_hbm [thread:$0]  (%p2924_p1), %s2846_s28, 64, %s2844_s26, %s1468_s23  }
 0x429 PF: > { %s1494_s29 = sand.u32 1, %s2404_s30   ;;  %p2925_p2 = scmp.ne.s32.totalorder %s2912_s20, 0 }
 0x42a   : > { %p2926_p3 = scmp.ge.s32.totalorder %s2416_s12, 2  ;;  %s1495_s1 = scalar_lea.sflag [#allocation4], %s1494_s29 }
 0x42c   : > { %p1840_p4 = pnand %p2926_p3, %p2925_p2 }
 0x42e   : > { %2399 = dma.done.wait (!%p1840_p4), %s1495_s1, 64  }
 0x42f   : > { %2401 = vsyncadd (!%p1840_p4), %s1495_s1, 4294967232  ;;  %p26_p10 = scmp.ge.s32.totalorder %s2705_s19, 4   ;;  %s2927_s30 = smov %s2408_s10 }
 0x430   : > { %s2928_s10 = smov %s2412_s11  ;;  %s2929_s11 = smov %s2716_s13 }
 0x431   : > { %s2930_s12 = smov %s2705_s19  ;;  %28 = sbr.rel (!%p26_p10) target bundleno = 12 (0xc), region = 133 }
 0x438   :  { %1500 = vsyncpa [#allocation3], 1 }
 0x439   :  { %1502 = vsyncpa [#allocation3 + $0x1], 1 }
 0x43a   :  { %1503 = vsyncpa [#allocation6], 1 }
 0x43b   :  { %1504 = vsyncpa [#allocation9], 1 }
 0x43c   :  { %1505 = vsyncpa [#allocation12], 1 }
 0x43d   :  { %1506 = vsyncpa [#allocation15], 1 }
 0x43e   :  { %1507 = vsyncpa [#allocation4], 1 }
 0x43f   :  { %1509 = vsyncpa [#allocation4 + $0x1], 1 }

// kernel: encoder_forward.9
= control target key start
LH: loop header
LB: loop body
LE: loop exit
PB: predicated region body
PF: predicated region fallthrough
CT: control target
= control target key end

     0   :  { %8 = vsyncpa [#allocation4], 0  ;;  %s1355_s0 = inlined_call_operand.hbm [shape: bf16[2,1024], index: 0, kind: input, shape index: {}]   ;;  %s1356_s1 = inlined_call_operand.hbm [shape: bf16[1024,64], index: 1, kind: input, shape index: {}]   ;;  %s1357_s2 = inlined_call_operand.hbm [shape: f32[1,64], index: 2, kind: input, shape index: {}]   ;;  %s1358_s3 = inlined_call_operand.hbm [shape: f32[2,64], index: 3, kind: output, shape index: {}]  }
   0x1   :  { %10 = vsyncpa [#allocation4 + $0x1], 0 }
   0x2   :  { %11 = vsyncpa [#allocation7], 0 }
   0x3   :  { %13 = vsyncpa [#allocation7 + $0x1], 0 }
   0x4   :  { %14 = vsyncpa [#allocation5], 0  ;;  %s1097_s12 = smov 0   ;;  %s1099_s13 = smov 0  }
   0x5   :  { %s1101_s14 = smov 0   ;;  %s1103_s15 = smov 0  }
   0x6 LB: > { %s1116_s16 = sadd.s32 4294967295, %s1067_s15   ;;  %s1119_s17 = sadd.s32 1, %s1067_s15   ;;  %s1067_s15 = sphi %s1103_s15, %s1377_s15   ;;  %s1063_s14 = sphi %s1101_s14, %s1376_s14   ;;  %s1059_s13 = sphi %s1099_s13, %s1375_s13   ;;  %s1055_s12 = sphi %s1097_s12, %s1374_s12  }
   0x7   : > { %s24_s18 = ssub.s32 %s1067_s15, %s1119_s17  ;;  %s27_s19 = sadd.s32 1, %s1063_s14 }
   0x8   : > { %p25_p0 = scmp.eq.s32.totalorder %s24_s18, 0  ;;  %p34_p1 = scmp.ne.s32.totalorder %s1063_s14, %s1059_s13 }
   0x9   : > { %p40_p2 = scmp.ne.s32.totalorder %s1059_s13, %s1055_s12  ;;  %p1359_p3 = scmp.eq.s32.totalorder %s1116_s16, 0 }
   0xa   : > { %s1129_s20 = scalar_select %p25_p0, %s1063_s14, %s27_s19  }
   0xb   : > { %p1133_p4 = por %p1359_p3, %p40_p2  ;;  %p710_p5 = scmp.ge.s32.totalorder %s1067_s15, 1 }
   0xc   : > { %p119_p6 = scmp.lt.s32.totalorder %s1067_s15, 3  ;;  %s1069_s23 = smov [#allocation8]  }
   0xd   : > { %s1362_s21 = scalar_select %p1133_p4, 1, 0 }
   0xe   : > { %p1140_p8 = pnand %p710_p5, %p119_p6  ;;  %s132_s24 = sshll.u32 %s1069_s23, 4  ;;  %s133_s24 = int_to_ptr.vmem [resolvable:$true] %s132_s24 }
   0xf   : > { %p35_p9 = scmp.eq.s32.totalorder %s1067_s15, 0  ;;  %s1156_s26 = sand.u32 1, %s1063_s14  }
  0x10   : > { %s1363_s22 = scalar_select %p1140_p8, 1, 0 }
  0x11   : > { %p821_p10 = pneg %p1140_p8  ;;  %p1151_p12 = por %p35_p9, %p34_p1 }
  0x12   : > { %s713_s28 = sshll.u32 %s1156_s26, 2  ;;  %s763_s29 = sshll.u32 %s1067_s15, 6 }
  0x13   : > { %s1364_s25 = scalar_select %p1151_p12, 1, 0 }
  0x14   : > { %p1160_p13 = pnand %p821_p10, %p1359_p3  ;;  %s907_s5 = scalar_lea.hbm %s1357_s2, 16 }
  0x15   : > { %p908_p0 = scmp.ne.s32.totalorder %s1357_s2, %s907_s5  ;;  %p914_p6 = scmp.lt.u32.totalorder %s907_s5, %s1357_s2 }
  0x16   : > { %p909_p1 = pneg %p1160_p13 }
  0x18   : > { %p910_p2 = pnand %p909_p1, %p908_p0 }
  0x1a   : > { %p911_p5 = pneg %p910_p2 }
  0x1c   : > { %p916_p9 = pnand %p914_p6, %p911_p5 }
  0x1e   : > { %919 = shalt.err (!%p916_p9)
}
  0x1f   : > { %s920_s10 = scalar_lea.vmem %s133_s24, 16  ;;  %s927_s11 = scalar_lea.vmem %s133_s24, 32 }
  0x20   : > { %p921_p10 = scmp.ne.s32.totalorder %s133_s24, %s920_s10  ;;  %p928_p11 = scmp.lt.s32.totalorder %s133_s24, %s133_s24 }
  0x21   : > { %p929_p4 = scmp.lt.s32.totalorder %s927_s11, %s920_s10 }
  0x22   : > { %p923_p7 = pnand %p921_p10, %p909_p1 }
  0x23   : > { %p930_p8 = por %p929_p4, %p928_p11 }
  0x24   : > { %p924_p3 = pneg %p923_p7 }
  0x26   : > { %p931_p12 = pnand %p930_p8, %p924_p3 }
  0x28   : > { %934 = shalt.err (!%p931_p12)
}
  0x29   : > { %824 = dma.hbm_to_vmem [thread:$0]  (!%p1160_p13), %s1357_s2, 16, %s133_s24, [#allocation7]  }
  0x2a   : > { %s1185_s30 = scalar_lea.hbm %s1355_s0, %s763_s29  ;;  %s147_s4 = scalar_lea.vmem [#allocation3], %s713_s28 }
  0x2b   : > { %s155_s27 = sshll.u32 %s147_s4, 4  ;;  %p1366_p3 = scmp.ne.s32.totalorder %s1364_s25, 0  ;;  %s1187_s27 = int_to_ptr.vmem [resolvable:$true] %s155_s27 }
  0x2c   : > { %p1367_p4 = scmp.lt.s32.totalorder %s1067_s15, 2  ;;  %s716_s24 = sshll.u32 %s1156_s26, 8 }
  0x2d   : > { %s162_s6 = sand.u32 1, %s1067_s15   ;;  %s144_s29 = scalar_lea.sflag [#allocation4], %s1156_s26 }
  0x2e   : > { %p1193_p7 = pnand %p1367_p4, %p1366_p3  ;;  %s935_s7 = scalar_lea.hbm %s1185_s30, 64 }
  0x2f   : > { %p936_p8 = scmp.ne.s32.totalorder %s1185_s30, %s935_s7  ;;  %s940_s8 = scalar_lea.hbm %s1355_s0, 128 }
  0x30   : > { %p937_p11 = pneg %p1193_p7  ;;  %p941_p0 = scmp.lt.u32.totalorder %s1185_s30, %s1355_s0 }
  0x31   : > { %p942_p1 = scmp.lt.u32.totalorder %s940_s8, %s935_s7  ;;  %p944_p5 = scmp.lt.u32.totalorder %s935_s7, %s1185_s30 }
  0x32   : > { %p938_p12 = pnand %p937_p11, %p936_p8 }
  0x33   : > { %p943_p2 = por %p942_p1, %p941_p0 }
  0x34   : > { %p939_p13 = pneg %p938_p12 }
  0x35   : > { %p945_p6 = por %p944_p5, %p943_p2 }
  0x37   : > { %p946_p9 = pnand %p945_p6, %p939_p13 }
  0x39   : > { %949 = shalt.err (!%p946_p9)
}
  0x3a   : > { %s950_s11 = scalar_lea.vmem %s1187_s27, 64  ;;  %s1070_s12 = smov [#allocation3]  }
  0x3b   : > { %p951_p10 = scmp.ne.s32.totalorder %s1187_s27, %s950_s11  ;;  %s955_s18 = sshll.u32 %s1070_s12, 4  ;;  %s956_s18 = int_to_ptr.vmem [resolvable:$false] %s955_s18 }
  0x3c   : > { %s957_s19 = scalar_lea.vmem %s956_s18, 128  ;;  %p958_p8 = scmp.lt.s32.totalorder %s1187_s27, %s956_s18 }
  0x3d   : > { %p953_p3 = pnand %p951_p10, %p937_p11  ;;  %p959_p12 = scmp.lt.s32.totalorder %s957_s19, %s950_s11 }
  0x3f   : > { %p954_p4 = pneg %p953_p3  ;;  %p960_p0 = por %p959_p12, %p958_p8 }
  0x41   : > { %p961_p1 = pnand %p960_p0, %p954_p4 }
  0x43   : > { %964 = shalt.err (!%p961_p1)
}
  0x44   : > { %828 = dma.hbm_to_vmem [thread:$0]  (!%p1193_p7), %s1185_s30, 64, %s1187_s27, %s144_s29  }
  0x45   : > { %s166_s23 = scalar_lea.vmem [#allocation6], %s716_s24  ;;  %s764_s7 = sshll.u32 %s1067_s15, 12 }
  0x46   : > { %s173_s4 = sshll.u32 %s166_s23, 4  ;;  %s1233_s8 = scalar_lea.hbm %s1356_s1, %s764_s7  ;;  %s1227_s4 = int_to_ptr.vmem [resolvable:$true] %s173_s4 }
  0x47   : > { %s1237_s9 = scalar_lea.sflag [#allocation7], %s162_s6  ;;  %s965_s10 = scalar_lea.hbm %s1233_s8, 4096 }
  0x48   : > { %p966_p13 = scmp.ne.s32.totalorder %s1233_s8, %s965_s10  ;;  %s970_s27 = scalar_lea.hbm %s1356_s1, 8192 }
  0x49   : > { %p971_p6 = scmp.lt.u32.totalorder %s1233_s8, %s1356_s1  ;;  %p972_p9 = scmp.lt.u32.totalorder %s970_s27, %s965_s10 }
  0x4a   : > { %p968_p2 = pnand %p966_p13, %p937_p11  ;;  %p974_p3 = scmp.lt.u32.totalorder %s965_s10, %s1233_s8 }
  0x4b   : > { %p973_p10 = por %p972_p9, %p971_p6 }
  0x4c   : > { %p969_p5 = pneg %p968_p2 }
  0x4d   : > { %p975_p4 = por %p974_p3, %p973_p10 }
  0x4f   : > { %p976_p8 = pnand %p975_p4, %p969_p5 }
  0x51   : > { %979 = shalt.err (!%p976_p8)
}
  0x52   : > { %s980_s15 = scalar_lea.vmem %s1227_s4, 4096  ;;  %s1071_s6 = smov [#allocation6]  }
  0x53   : > { %p981_p12 = scmp.ne.s32.totalorder %s1227_s4, %s980_s15  ;;  %s985_s11 = sshll.u32 %s1071_s6, 4  ;;  %s986_s11 = int_to_ptr.vmem [resolvable:$false] %s985_s11 }
  0x54   : > { %s987_s12 = scalar_lea.vmem %s986_s11, 8192  ;;  %p988_p13 = scmp.lt.s32.totalorder %s1227_s4, %s986_s11 }
  0x55   : > { %p983_p0 = pnand %p981_p12, %p937_p11  ;;  %p989_p2 = scmp.lt.s32.totalorder %s987_s12, %s980_s15 }
  0x57   : > { %p984_p1 = pneg %p983_p0  ;;  %p990_p6 = por %p989_p2, %p988_p13 }
  0x59   : > { %p991_p9 = pnand %p990_p6, %p984_p1 }
  0x5b   : > { %994 = shalt.err (!%p991_p9)
}
  0x5c   : > { %s1072_s18 = smov 64   ;;  %s1073_s19 = smov 4  }
  0x5d   : > { %831 = dma.hbm_to_vmem [thread:$0]  (!%p1193_p7), %s1233_s8, 4096, %s1227_s4, %s1237_s9, %s1072_s18, %s1072_s18, %s1073_s19  }
  0x5e   : > { %p1369_p11 = scmp.ne.s32.totalorder %s1363_s22, 0 }
  0x5f   : > { %s187_s23 = sand.u32 (!%p1369_p11), 1, %s1059_s13   ;;  %p1370_p5 = scmp.ne.s32.totalorder (!%p1369_p11), %s1362_s21, 0 }
  0x60   : > { %185 = sbr.rel (%p1369_p11) target bundleno = 409 (0x199), region = 32  ;;  %s720_s7 = sshll.u32 (!%p1369_p11), %s187_s23, 2 }
  0x61   : > { %s188_s28 = scalar_lea.sflag (!%p1369_p11), [#allocation4], %s187_s23  ;;  %s1266_s25 = scalar_lea.vmem (!%p1369_p11), [#allocation3], %s720_s7 }
  0x67   : > { %1038 = dma.done.wait (%p1370_p5), %s188_s28, 64  }
  0x68   : > { %1040 = vsyncadd (%p1370_p5), %s188_s28, 4294967232  ;;  %s196_s10 = sand.u32 1, %s1116_s16   ;;  %s721_s5 = sshll.u32 %s187_s23, 8 }
  0x69   : > { %s197_s4 = scalar_lea.sflag [#allocation7], %s196_s10  ;;  %s1273_s8 = scalar_lea.vmem [#allocation6], %s721_s5 }
  0x6a   : > { %1042 = dma.done.wait (%p1370_p5), %s197_s4, 4096  }
  0x6b   : > { %1044 = vsyncadd (%p1370_p5), %s197_s4, 4294963200  ;;  %p1371_p7 = scmp.eq.s32.totalorder %s1116_s16, 0 }
  0x6d   : > { %1046 = dma.done.wait (%p1371_p7), [#allocation7], 16   ;;  %p1372_p10 = pmov %p1371_p7 }
  0x6e   : > { %p1373_p3 = scmp.ne.s32.totalorder %s1116_s16, 0 }
  0x6f   : > { %1048 = vsyncadd (%p1372_p10), [#allocation7], 4294967280  ;;  %vm234_vm0 = vcmask (!%p1373_p3), 517120   ;;  %v1074_v0 = vmov (!%p1373_p3), 0.0  }
  0x70   : > { %233 = sbr.rel (%p1373_p3) target bundleno = 119 (0x77), region = 48  ;;  %235 = vst.msk [vmem:[#allocation2] sm:$0x3] (!%p1373_p3), %vm234_vm0, %v1074_v0 }
  0x77 PF: > { %v875_v1 = vld [vmem:[%s1273_s8 + $0x40] sm:$0xff]   ;;  %v879_v5 = vld [vmem:[%s1273_s8 + $0x48] sm:$0xff]   ;;  %v883_v9 = vld [vmem:[%s1273_s8 + $0x50] sm:$0xff]   ;;  %v314_v31 = vlaneseq  ;;  %v1075_v35 = vmov 1966171168   ;;  %vm604_vm1 = vcmask 517120  }
  0x78   : > { %v876_v2 = vld [vmem:[%s1273_s8 + $0xc0] sm:$0xff]   ;;  %765 = vmatprep.subr.bf16.mxu0 %v875_v1  ;;  %v880_v6 = vld [vmem:[%s1273_s8 + $0xc8] sm:$0xff]   ;;  %v884_v10 = vld [vmem:[%s1273_s8 + $0xd0] sm:$0xff]   ;;  %v312_v36 = vunpack.c.l.s4 %v1075_v35  ;;  %p757_p4 = scmp.ne.s32.totalorder %s1116_s16, 1 }
  0x79   : > { %v877_v3 = vld [vmem:[%s1273_s8] sm:$0xff]   ;;  %787 = vmatprep.subr.bf16.mxu1 %v876_v2  ;;  %v881_v7 = vld [vmem:[%s1273_s8 + $0x8] sm:$0xff]   ;;  %v885_v11 = vld [vmem:[%s1273_s8 + $0x10] sm:$0xff]   ;;  %v315_v37 = vshrl.u32 %v314_v31, 7 }
  0x7a   : > { %v878_v4 = vld [vmem:[%s1273_s8 + $0x80] sm:$0xff]   ;;  %766 = vmatpush3.bf16.msra.mxu0 %v877_v3  ;;  %v882_v8 = vld [vmem:[%s1273_s8 + $0x88] sm:$0xff]   ;;  %v886_v12 = vld [vmem:[%s1273_s8 + $0x90] sm:$0xff]   ;;  %v313_v39 = vunpack.c.0.s8 %v312_v36 }
  0x7b   : > { %788 = vmatpush3.bf16.msra.mxu1 %v878_v4  ;;  %767 = vmatprep.subr.bf16.mxu0 %v879_v5  ;;  %v887_v13 = vld [vmem:[%s1273_s8 + $0x58] sm:$0xff]   ;;  %v891_v17 = vld [vmem:[%s1273_s8 + $0x60] sm:$0xff]   ;;  %v895_v21 = vld [vmem:[%s1273_s8 + $0x68] sm:$0xff]  }
  0x7c   : > { %789 = vmatprep.subr.bf16.mxu1 %v880_v6  ;;  %v888_v14 = vld [vmem:[%s1273_s8 + $0xd8] sm:$0xff]   ;;  %v892_v18 = vld [vmem:[%s1273_s8 + $0xe0] sm:$0xff]   ;;  %v896_v22 = vld [vmem:[%s1273_s8 + $0xe8] sm:$0xff]   ;;  %v316_v40 = vsub.s32 %v313_v39, %v315_v37 }
  0x7d   : > { %v889_v15 = vld [vmem:[%s1273_s8 + $0x18] sm:$0xff]   ;;  %v893_v19 = vld [vmem:[%s1273_s8 + $0x20] sm:$0xff]   ;;  %v897_v23 = vld [vmem:[%s1273_s8 + $0x28] sm:$0xff]  }
  0x7e   : > { %768 = vmatpush3.bf16.msra.mxu0 %v881_v7  ;;  %v890_v16 = vld [vmem:[%s1273_s8 + $0x98] sm:$0xff]   ;;  %v894_v20 = vld [vmem:[%s1273_s8 + $0xa0] sm:$0xff]   ;;  %v898_v24 = vld [vmem:[%s1273_s8 + $0xa8] sm:$0xff]  }
  0x7f   : > { %790 = vmatpush3.bf16.msra.mxu1 %v882_v8  ;;  %769 = vmatprep.subr.bf16.mxu0 %v883_v9  ;;  %v899_v25 = vld [vmem:[%s1273_s8 + $0x70] sm:$0xff]   ;;  %v903_v29 = vld [vmem:[%s1273_s8 + $0x78] sm:$0xff]   ;;  %v758_v59 = vld [vmem:[#allocation8] ss:$0 sm:$0xff] (!%p757_p4) }
  0x80   : > { %791 = vmatprep.subr.bf16.mxu1 %v884_v10  ;;  %v900_v26 = vld [vmem:[%s1273_s8 + $0xf0] sm:$0xff]   ;;  %v904_v30 = vld [vmem:[%s1273_s8 + $0xf8] sm:$0xff]  }
  0x81   : > { %v901_v27 = vld [vmem:[%s1273_s8 + $0x30] sm:$0xff]   ;;  %v905_v32 = vld [vmem:[%s1273_s8 + $0x38] sm:$0xff]  }
  0x82   : > { %770 = vmatpush3.bf16.msra.mxu0 %v885_v11  ;;  %v902_v28 = vld [vmem:[%s1273_s8 + $0xb0] sm:$0xff]   ;;  %v906_v33 = vld [vmem:[%s1273_s8 + $0xb8] sm:$0xff]  }
  0x83   : > { %792 = vmatpush3.bf16.msra.mxu1 %v886_v12  ;;  %771 = vmatprep.subr.bf16.mxu0 %v887_v13  ;;  %v724_v34 = vld.sshfl [vmem:[%s1266_s25] sm:$0x33 pattern:$0x75316420]  ;;  %v236_v54 = vld [vmem:[#allocation2] sm:$0x3] }
  0x84   : > { %793 = vmatprep.subr.bf16.mxu1 %v888_v14  ;;  %v310_v38 = vcombine.high %v724_v34, %v724_v34  ;;  %v317_v42 = vrot.slane %v724_v34, %v316_v40 }
  0x86   : > { %772 = vmatpush3.bf16.msra.mxu0 %v889_v15  ;;  %v324_v41 = vrot.slane %v310_v38, %v316_v40  ;;  %v325_v44 = vcombine.high %v317_v42, %v317_v42 }
  0x87   : > { %794 = vmatpush3.bf16.msra.mxu1 %v890_v16  ;;  %773 = vmatprep.subr.bf16.mxu0 %v891_v17 }
  0x88   : > { %795 = vmatprep.subr.bf16.mxu1 %v892_v18  ;;  %555 = vmatprep.mubr.bf16.mxu0 %v324_v41  ;;  %v326_v43 = vcombine.high %v324_v41, %v324_v41 }
  0x8a   : > { %774 = vmatpush3.bf16.msra.mxu0 %v893_v19  ;;  %595 = vmatprep.mubr.bf16.mxu1 %v326_v43 }
  0x8b   : > { %796 = vmatpush3.bf16.msra.mxu1 %v894_v20  ;;  %775 = vmatprep.subr.bf16.mxu0 %v895_v21 }
  0x8c   : > { %797 = vmatprep.subr.bf16.mxu1 %v896_v22 }
  0x8e   : > { %776 = vmatpush3.bf16.msra.mxu0 %v897_v23 }
  0x8f   : > { %798 = vmatpush3.bf16.msra.mxu1 %v898_v24  ;;  %777 = vmatprep.subr.bf16.mxu0 %v899_v25 }
  0x90   : > { %799 = vmatprep.subr.bf16.mxu1 %v900_v26 }
  0x92   : > { %778 = vmatpush3.bf16.msra.mxu0 %v901_v27 }
  0x93   : > { %800 = vmatpush3.bf16.msra.mxu1 %v902_v28  ;;  %779 = vmatprep.subr.bf16.mxu0 %v903_v29 }
  0x94   : > { %801 = vmatprep.subr.bf16.mxu1 %v904_v30 }
  0x96   : > { %780 = vmatpush3.bf16.msra.mxu0 %v905_v32 }
  0x97   : > { %802 = vmatpush3.bf16.msra.mxu1 %v906_v33 }
  0x99   : > { %556 = vmatmul.mubr.bf16.vlgmr.msra.gmra.mrb[0].mxu0 %v317_v42 }
  0x9a   : > { %596 = vmatmul.mubr.bf16.vlgmr.msra.gmra.mrb[0].mxu1 %v325_v44 }
 0x16c   : > { %v781_v45 = vpop.f32.mrb[0].mxu0 }
 0x16d   : > { %v782_v46 = vpop.f32.mrb[1].mxu0  ;;  %v803_v47 = vpop.f32.mrb[0].mxu1 }
 0x16e   : > { %v783_v48 = vadd.f32 %v782_v46, %v781_v45  ;;  %v784_v49 = vpop.f32.mrb[2].mxu0  ;;  %v804_v50 = vpop.f32.mrb[1].mxu1 }
 0x16f   : > { %v785_v51 = vpop.f32.mrb[3].mxu0  ;;  %v805_v52 = vadd.f32 %v804_v50, %v803_v47  ;;  %v806_v53 = vpop.f32.mrb[2].mxu1  ;;  %609 = sbr.rel (%p757_p4) target bundleno = 384 (0x180), region = 52 }
 0x170   : > { %v807_v55 = vpop.f32.mrb[3].mxu1 }
 0x171   : > { %v598_v56 = vadd.f32 %v805_v52, %v783_v48 }
 0x173   : > { %v603_v57 = vadd.f32 %v598_v56, %v236_v54 }
 0x175   : > { %605 = vst.msk [vmem:[#allocation2] sm:$0x3] %vm604_vm1, %v603_v57 }
 0x17c   : > { %v610_v58 = vld [vmem:[#allocation2] sm:$0x3] }
 0x17d   : > { %v618_v60 = vadd.f32 %v758_v59, %v610_v58 }
 0x17f   : > { %619 = vst.msk [vmem:[#allocation9] sm:$0x3] %vm604_vm1, %v618_v60 }
 0x180 PF: > { %p835_p8 = scmp.eq.s32.totalorder %s1116_s16, 1  ;;  %s1076_s21 = smov [#allocation9]  }
 0x181   : > { %s627_s22 = sshll.u32 %s1076_s21, 4  ;;  %s628_s22 = int_to_ptr.vmem [resolvable:$true] %s627_s22 }
 0x182   : > { %s995_s9 = scalar_lea.vmem %s628_s22, 32  ;;  %p1002_p13 = scmp.lt.s32.totalorder %s628_s22, %s628_s22 }
 0x183   : > { %p996_p12 = scmp.ne.s32.totalorder %s628_s22, %s995_s9  ;;  %p1003_p2 = scmp.lt.s32.totalorder %s995_s9, %s995_s9 }
 0x185   : > { %p997_p0 = pnand %p996_p12, %p835_p8  ;;  %p1004_p6 = por %p1003_p2, %p1002_p13 }
 0x187   : > { %p998_p1 = pneg %p997_p0 }
 0x189   : > { %p1005_p9 = pnand %p1004_p6, %p998_p1 }
 0x18b   : > { %1008 = shalt.err (!%p1005_p9)
}
 0x18c   : > { %s1009_s27 = scalar_lea.hbm %s1358_s3, 32 }
 0x18d   : > { %p1010_p11 = scmp.ne.s32.totalorder %s1358_s3, %s1009_s27  ;;  %p1015_p10 = scmp.lt.u32.totalorder %s1009_s27, %s1358_s3 }
 0x18f   : > { %p1011_p5 = pnand %p1010_p11, %p835_p8 }
 0x191   : > { %p1012_p7 = pneg %p1011_p5 }
 0x193   : > { %p1017_p3 = pnand %p1015_p10, %p1012_p7 }
 0x195   : > { %1020 = shalt.err (!%p1017_p3)
}
 0x196   : > { %818 = dma.vmem_to_hbm [thread:$0]  (%p835_p8), %s628_s22, 32, %s1358_s3, [#allocation5]  }
 0x197   : > { %1050 = dma.done.wait (%p835_p8), [#allocation5], 32  }
 0x198   : > { %1052 = vsyncadd (%p835_p8), [#allocation5], 4294967264 }
 0x199 PF: > { %p17_p4 = scmp.ge.s32.totalorder %s1119_s17, 4   ;;  %s1374_s12 = smov %s1059_s13 }
 0x19a   : > { %s1375_s13 = smov %s1063_s14  ;;  %s1376_s14 = smov %s1129_s20 }
 0x19b   : > { %s1377_s15 = smov %s1119_s17  ;;  %19 = sbr.rel (!%p17_p4) target bundleno = 6 (0x6), region = 94 }
 0x1a2   :  { %640 = vsyncpa [#allocation4], 1 }
 0x1a3   :  { %642 = vsyncpa [#allocation4 + $0x1], 1 }
 0x1a4   :  { %643 = vsyncpa [#allocation7], 1 }
 0x1a5   :  { %645 = vsyncpa [#allocation7 + $0x1], 1 }
 0x1a6   :  { %646 = vsyncpa [#allocation5], 1 }
 0x1a7   :  { %648 = vsyncpa [#allocation5 + $0x1], 1 }

</bundles_post_ra>
